<compile_context>
chip_gen: v6e
topology: v6e:2x2x1
jax: 0.10.0
libtpu: 0.0.40
codegen_flags: <defaults>
</compile_context>

<pallas_src>
import functools

import jax
import jax.numpy as jnp
from jax.experimental import pallas as pl
from jax.experimental.pallas import tpu as pltpu


# ----------------------------------------------------------------------------
# helpers
# ----------------------------------------------------------------------------
def _round_up(x, m):
    return (x + m - 1) // m * m


_M_TILE_CAP = 512  # rows per matmul block; fits comfortably in VMEM on v5e/v6e/v7x


# ----------------------------------------------------------------------------
# Pallas kernels
# ----------------------------------------------------------------------------
def _mm_kernel(x_ref, w_ref, b_ref, o_ref, *, relu):
    # (TM, K) @ (K, N) + b ; bf16 MXU inputs, f32 accumulation / epilogue.
    acc = jnp.dot(x_ref[...].astype(jnp.bfloat16),
                  w_ref[...].astype(jnp.bfloat16),
                  preferred_element_type=jnp.float32) + b_ref[...]
    if relu:
        acc = jnp.maximum(acc, 0.0)
    o_ref[...] = acc.astype(o_ref.dtype)


def _mm_add_relu_kernel(x_ref, w_ref, b_ref, s_ref, o_ref):
    # Fused expand-conv + residual add + ReLU:  o = relu(x @ w + b + shortcut)
    acc = jnp.dot(x_ref[...].astype(jnp.bfloat16),
                  w_ref[...].astype(jnp.bfloat16),
                  preferred_element_type=jnp.float32) + b_ref[...]
    o_ref[...] = jnp.maximum(acc + s_ref[...], 0.0).astype(o_ref.dtype)


def _tap(x_ref, k, stride, Ho, Wo):
    # x_ref block: (stride*stride, Hh, Wh, C) — phase-split padded image of one batch.
    # Tap (ky, kx) of the 3x3 window is a *contiguous* static slice of one phase plane.
    ky, kx = k // 3, k % 3
    phase = (ky % stride) * stride + (kx % stride)
    return x_ref[phase,
                 ky // stride: ky // stride + Ho,
                 kx // stride: kx // stride + Wo, :]


def _dw3x3_kernel(x_ref, w_ref, b_ref, o_ref, *, stride, Ho, Wo):
    # Depthwise 3x3 conv (+ folded BN). w: (9, 1, C), b: (1, 1, C)
    acc = _tap(x_ref, 0, stride, Ho, Wo) * w_ref[0]
    for k in range(1, 9):
        acc = acc + _tap(x_ref, k, stride, Ho, Wo) * w_ref[k]
    o_ref[0] = (acc + b_ref[0]).astype(o_ref.dtype)


def _pool3x3_kernel(x_ref, o_ref, *, op, relu, stride, Ho, Wo):
    # 3x3 max / avg pool (avg: count_include_pad=True -> /9), optional fused ReLU.
    r = _tap(x_ref, 0, stride, Ho, Wo)
    for k in range(1, 9):
        t = _tap(x_ref, k, stride, Ho, Wo)
        r = jnp.maximum(r, t) if op == "max" else r + t
    if op == "avg":
        r = r * (1.0 / 9.0)
    if relu:
        r = jnp.maximum(r, 0.0)
    o_ref[0] = r.astype(o_ref.dtype)


# ----------------------------------------------------------------------------
# kernel wrappers
# ----------------------------------------------------------------------------
def _matmul(x, w, b, *, relu=False, residual=None, cap=_M_TILE_CAP):
    """x:(M,K) @ w:(K,N) + b, optional ReLU or fused relu(out + residual)."""
    M, K = x.shape
    Nc = w.shape[1]
    if M <= cap:
        TM, Mp = M, M                 # single full block (no 8-divisibility needed)
    else:
        TM = cap
        Mp = _round_up(M, TM)
    if Mp != M:
        x = jnp.pad(x, ((0, Mp - M), (0, 0)))
        if residual is not None:
            residual = jnp.pad(residual, ((0, Mp - M), (0, 0)))

    x_spec = pl.BlockSpec((TM, K), lambda i: (i, 0))
    w_spec = pl.BlockSpec((K, Nc), lambda i: (0, 0))
    b_spec = pl.BlockSpec((1, Nc), lambda i: (0, 0))
    o_spec = pl.BlockSpec((TM, Nc), lambda i: (i, 0))
    cp = pltpu.CompilerParams(dimension_semantics=("parallel",))

    if residual is None:
        out = pl.pallas_call(
            functools.partial(_mm_kernel, relu=relu),
            out_shape=jax.ShapeDtypeStruct((Mp, Nc), jnp.float32),
            grid=(Mp // TM,),
            in_specs=[x_spec, w_spec, b_spec],
            out_specs=o_spec,
            compiler_params=cp,
        )(x, w, b.reshape(1, Nc))
    else:
        s_spec = pl.BlockSpec((TM, Nc), lambda i: (i, 0))
        out = pl.pallas_call(
            _mm_add_relu_kernel,
            out_shape=jax.ShapeDtypeStruct((Mp, Nc), jnp.float32),
            grid=(Mp // TM,),
            in_specs=[x_spec, w_spec, b_spec, s_spec],
            out_specs=o_spec,
            compiler_params=cp,
        )(x, w, b.reshape(1, Nc), residual)
    return out[:M] if Mp != M else out


def _phase_split(x, stride, pad_val):
    """Pad (3x3, pad=1) and split the padded NHWC image into stride x stride phases so
    that every 3x3 tap becomes a contiguous (unstrided) slice inside the kernel.
    Returns (phases:(N*stride*stride, Hh, Wh, C), Ho, Wo, Hh, Wh)."""
    N, H, W, C = x.shape
    s = stride
    Ho = (H - 1) // s + 1
    Wo = (W - 1) // s + 1
    Hh = Ho + 2 // s
    Wh = Wo + 2 // s
    Hp, Wp = Hh * s, Wh * s
    xp = jnp.pad(x, ((0, 0), (1, Hp - H - 1), (1, Wp - W - 1), (0, 0)),
                 constant_values=pad_val)
    xph = xp.reshape(N, Hh, s, Wh, s, C).transpose(0, 2, 4, 1, 3, 5)
    return xph.reshape(N * s * s, Hh, Wh, C), Ho, Wo, Hh, Wh


def depthwise3x3(x, w, b, *, stride):
    """Depthwise 3x3 conv (pad 1, given stride) + folded BN. Taps formed in-kernel."""
    N, H, W, C = x.shape
    s = stride
    xph, Ho, Wo, Hh, Wh = _phase_split(x, s, 0.0)
    return pl.pallas_call(
        functools.partial(_dw3x3_kernel, stride=s, Ho=Ho, Wo=Wo),
        out_shape=jax.ShapeDtypeStruct((N, Ho, Wo, C), jnp.float32),
        grid=(N,),
        in_specs=[
            pl.BlockSpec((s * s, Hh, Wh, C), lambda n: (n, 0, 0, 0)),
            pl.BlockSpec((9, 1, C), lambda n: (0, 0, 0)),
            pl.BlockSpec((1, 1, C), lambda n: (0, 0, 0)),
        ],
        out_specs=pl.BlockSpec((1, Ho, Wo, C), lambda n: (n, 0, 0, 0)),
        compiler_params=pltpu.CompilerParams(dimension_semantics=("parallel",)),
    )(xph, w.reshape(9, 1, C), b.reshape(1, 1, C))


def pool3x3s2(x, *, op, relu):
    """3x3 stride-2 pad-1 max/avg pool (+ optional fused ReLU)."""
    N, H, W, C = x.shape
    pad_val = -jnp.inf if op == "max" else 0.0
    xph, Ho, Wo, Hh, Wh = _phase_split(x, 2, pad_val)
    return pl.pallas_call(
        functools.partial(_pool3x3_kernel, op=op, relu=relu, stride=2, Ho=Ho, Wo=Wo),
        out_shape=jax.ShapeDtypeStruct((N, Ho, Wo, C), jnp.float32),
        grid=(N,),
        in_specs=[pl.BlockSpec((4, Hh, Wh, C), lambda n: (n, 0, 0, 0))],
        out_specs=pl.BlockSpec((1, Ho, Wo, C), lambda n: (n, 0, 0, 0)),
        compiler_params=pltpu.CompilerParams(dimension_semantics=("parallel",)),
    )(xph)


def pointwise_group(x, w, b, *, relu=False, residual=None):
    """Grouped 1x1 conv + folded BN as ONE block-diagonal matmul (lane-dense output).
    If `residual` is given, relu(out + residual) is fused into the kernel epilogue."""
    N, H, W, Cin = x.shape
    xf = x.reshape(-1, Cin)
    rf = residual.reshape(-1, residual.shape[-1]) if residual is not None else None
    out = _matmul(xf, w, b, relu=relu, residual=rf)
    return out.reshape(N, H, W, -1)


def conv3x3s2_head(x, w, b):
    """Head conv: 3x3 stride-2 pad-1 conv + BN + ReLU. im2col is only on the tiny
    3-channel input (27-wide patches), then one fused Pallas matmul."""
    N, H, W, Cin = x.shape
    Ho, Wo = (H - 1) // 2 + 1, (W - 1) // 2 + 1
    xp = jnp.pad(x, ((0, 0), (1, 1), (1, 1), (0, 0)))
    taps = [xp[:, ky:ky + 2 * Ho:2, kx:kx + 2 * Wo:2, :]
            for ky in range(3) for kx in range(3)]
    patches = jnp.concatenate(taps, axis=-1).reshape(-1, 9 * Cin)
    out = _matmul(patches, w, b, relu=True)
    return out.reshape(N, Ho, Wo, -1)


# ----------------------------------------------------------------------------
# deterministic parameter init (conv + BN folded, inference-mode BN)
# ----------------------------------------------------------------------------
def _bn_fold_stats(key, cout, eps=1e-5):
    k = jax.random.split(key, 4)
    gamma = 1.0 + 0.1 * jax.random.normal(k[0], (cout,), jnp.float32)
    beta = 0.1 * jax.random.normal(k[1], (cout,), jnp.float32)
    mean = 0.1 * jax.random.normal(k[2], (cout,), jnp.float32)
    var = 1.0 + 0.1 * jnp.abs(jax.random.normal(k[3], (cout,), jnp.float32))
    scale = gamma * jax.lax.rsqrt(var + eps)
    shift = beta - mean * scale
    return scale, shift


def init_conv_bn(key, w_shape, cout):
    """w_shape has cout as its last dim; returns BN-folded (w, b)."""
    k1, k2, k3 = jax.random.split(key, 3)
    w = 0.1 * jax.random.normal(k1, w_shape, jnp.float32)
    b = 0.1 * jax.random.normal(k2, (cout,), jnp.float32)
    scale, shift = _bn_fold_stats(k3, cout)
    return w * scale, b * scale + shift


def init_group_pw(key, cin, cout, groups, *, fold_shuffle=False):
    """Grouped 1x1 conv + BN folded, packed as a dense block-diagonal (cin, cout) matrix.
    If fold_shuffle, the following ChannelShuffle(groups) is folded in by permuting the
    output columns (free at runtime)."""
    cin_g, cout_g = cin // groups, cout // groups
    k1, k2, k3 = jax.random.split(key, 3)
    wg = 0.1 * jax.random.normal(k1, (groups, cin_g, cout_g), jnp.float32)
    b = 0.1 * jax.random.normal(k2, (cout,), jnp.float32)
    scale, shift = _bn_fold_stats(k3, cout)
    wg = wg * scale.reshape(groups, 1, cout_g)
    b = b * scale + shift
    w = jnp.zeros((cin, cout), jnp.float32)
    for g in range(groups):
        w = w.at[g * cin_g:(g + 1) * cin_g, g * cout_g:(g + 1) * cout_g].set(wg[g])
    if fold_shuffle:
        perm = jnp.arange(cout).reshape(groups, cout_g).T.reshape(-1)
        w = w[:, perm]
        b = b[perm]
    return w, b


def init_unit(key, stride, in_c, out_c, groups):
    mid = out_c // 4
    cat = (stride != 1) or (in_c != out_c)
    ex_out = out_c - in_c if cat else out_c
    k1, k2, k3 = jax.random.split(key, 3)
    return {
        "stride": stride,
        "cat": cat,
        # ChannelShuffle folded into gp1's output columns:
        "gp1": init_group_pw(k1, in_c, mid, groups, fold_shuffle=True),
        "dw": init_conv_bn(k2, (9, mid), mid),
        "ex": init_group_pw(k3, mid, ex_out, groups),
    }


def init_shuffle_ssd(key, num_blocks, groups=4):
    oc_map = {1: [24, 144, 288, 567], 2: [24, 200, 400, 800],
              3: [24, 240, 480, 960], 4: [24, 272, 544, 1088],
              8: [24, 384, 768, 1536]}
    ocs = oc_map[groups]
    key, kh = jax.random.split(key)
    params = {"head": init_conv_bn(kh, (27, ocs[0]), ocs[0])}
    in_c = ocs[0]
    stages = []
    for nb, oc in zip(num_blocks, ocs[1:]):
        strides = [2] + [1] * (nb - 1)
        blocks = []
        for s in strides:
            key, kb = jax.random.split(key)
            blocks.append(init_unit(kb, s, in_c, oc, groups))
            in_c = oc
        stages.append(blocks)
    params["stages"] = stages
    return params


# ----------------------------------------------------------------------------
# forward pass
# ----------------------------------------------------------------------------
def shufflenet_unit_forward(x, p):
    y = pointwise_group(x, *p["gp1"], relu=True)      # gp1 + ReLU (+ folded shuffle)
    y = depthwise3x3(y, *p["dw"], stride=p["stride"])  # depthwise 3x3 + BN
    if p["cat"]:
        # relu(cat(a, b)) == cat(relu(a), relu(b)): fuse ReLU into each branch.
        shortcut = pool3x3s2(x, op="avg", relu=True)
        y = pointwise_group(y, *p["ex"], relu=True)
        return jnp.concatenate([shortcut, y], axis=-1)
    # stride-1 identity path: relu(expand(y) + x) fused in the expand kernel epilogue.
    return pointwise_group(y, *p["ex"], residual=x)


def shuffle_ssd_forward(params, x_nchw):
    x = jnp.transpose(x_nchw, (0, 2, 3, 1)).astype(jnp.float32)  # NCHW -> NHWC
    x = conv3x3s2_head(x, *params["head"])
    x = pool3x3s2(x, op="max", relu=False)
    for stage in params["stages"]:
        for blk in stage:
            x = shufflenet_unit_forward(x, blk)
    return jnp.transpose(x, (0, 3, 1, 2))  # NHWC -> NCHW


# ----------------------------------------------------------------------------
if __name__ == "__main__":
    key = jax.random.PRNGKey(0)
    kx, kp = jax.random.split(key)

    # small but module-consistent: NCHW input with 3 channels
    x = jax.random.normal(kx, (2, 3, 32, 32), jnp.float32)

    num_blocks = (2, 1, 1)   # stage2 has one stride-2 (cat) and one stride-1 (add) unit
    groups = 4               # -> channels [24, 272, 544, 1088]
    params = init_shuffle_ssd(kp, num_blocks=num_blocks, groups=groups)

    fwd = jax.jit(lambda inp: shuffle_ssd_forward(params, inp))
    out = jax.block_until_ready(fwd(x))

    assert out.shape == (2, 1088, 1, 1), out.shape
    assert bool(jnp.all(jnp.isfinite(out)))
    print("KERNEL_OK")
</pallas_src>

<mosaic_0001>
module attributes {stable_mosaic.version = 11 : i64} {
  func.func @_mm_kernel(%arg0: i32, %arg1: memref<512x27xf32, #tpu.memory_space<vmem>>, %arg2: memref<27x24xf32, #tpu.memory_space<vmem>>, %arg3: memref<1x24xf32, #tpu.memory_space<vmem>>, %arg4: memref<512x24xf32, #tpu.memory_space<vmem>>) attributes {dimension_semantics = [#tpu.dimension_semantics<parallel>], iteration_bounds = array<i64: 1>, scalar_prefetch = 0 : i64, scratch_operands = 0 : i64, tpu.core_type = #tpu.core_type<tc>, window_params = [{transform_indices = @transform_0, window_bounds = array<i64: 512, 27>}, {pipeline_mode = #tpu.pipeline_mode<synchronous>, transform_indices = @transform_1, window_bounds = array<i64: 27, 24>}, {pipeline_mode = #tpu.pipeline_mode<synchronous>, transform_indices = @transform_2, window_bounds = array<i64: 1, 24>}, {transform_indices = @transform_3, window_bounds = array<i64: 512, 24>}]} {
    %c0 = arith.constant 0 : index
    %c0_0 = arith.constant 0 : index
    %0 = vector.load %arg1[%c0, %c0_0] : memref<512x27xf32, #tpu.memory_space<vmem>>, vector<512x27xf32>
    %1 = arith.truncf %0 : vector<512x27xf32> to vector<512x27xbf16>
    %c0_1 = arith.constant 0 : index
    %c0_2 = arith.constant 0 : index
    %2 = vector.load %arg2[%c0_1, %c0_2] : memref<27x24xf32, #tpu.memory_space<vmem>>, vector<27x24xf32>
    %3 = arith.truncf %2 : vector<27x24xf32> to vector<27x24xbf16>
    %cst = arith.constant dense<0.000000e+00> : vector<512x24xf32>
    %4 = tpu.matmul %1, %3, %cst {dimension_numbers = #tpu.dot_dimension_numbers<[1], [0], [0], [1], [0, 0, 1, 1], [], []>} : vector<512x27xbf16>, vector<27x24xbf16>, vector<512x24xf32> -> vector<512x24xf32>
    %c0_3 = arith.constant 0 : index
    %c0_4 = arith.constant 0 : index
    %5 = vector.load %arg3[%c0_3, %c0_4] : memref<1x24xf32, #tpu.memory_space<vmem>>, vector<1x24xf32>
    %6 = vector.broadcast %5 : vector<1x24xf32> to vector<512x24xf32>
    %7 = arith.addf %4, %6 : vector<512x24xf32>
    %cst_5 = arith.constant 0.000000e+00 : f32
    %8 = vector.broadcast %cst_5 : f32 to vector<512x24xf32>
    %9 = arith.maximumf %7, %8 : vector<512x24xf32>
    %c0_6 = arith.constant 0 : index
    %c0_7 = arith.constant 0 : index
    %10 = vector.load %arg4[%c0_6, %c0_7] : memref<512x24xf32, #tpu.memory_space<vmem>>, vector<512x24xf32>
    tpu.vector_store %arg4[%c0_6, %c0_7], %9 {strides = array<i32>} : memref<512x24xf32, #tpu.memory_space<vmem>>, vector<512x24xf32>,
    return
  }
  func.func @transform_0(%arg0: i32) -> (i32, i32) {
    %c0_i32 = arith.constant 0 : i32
    %c0_i32_0 = arith.constant 0 : i32
    return %arg0, %c0_i32 : i32, i32
  }
  func.func @transform_1(%arg0: i32) -> (i32, i32) {
    %c0_i32 = arith.constant 0 : i32
    %c0_i32_0 = arith.constant 0 : i32
    %c0_i32_1 = arith.constant 0 : i32
    return %c0_i32, %c0_i32_0 : i32, i32
  }
  func.func @transform_2(%arg0: i32) -> (i32, i32) {
    %c0_i32 = arith.constant 0 : i32
    %c0_i32_0 = arith.constant 0 : i32
    %c0_i32_1 = arith.constant 0 : i32
    return %c0_i32, %c0_i32_0 : i32, i32
  }
  func.func @transform_3(%arg0: i32) -> (i32, i32) {
    %c0_i32 = arith.constant 0 : i32
    %c0_i32_0 = arith.constant 0 : i32
    return %arg0, %c0_i32 : i32, i32
  }
}

module attributes {stable_mosaic.version = 11 : i64} {
  func.func @_pool3x3_kernel(%arg0: i32, %arg1: memref<4x9x9x24xf32, #tpu.memory_space<vmem>>, %arg2: memref<1x8x8x24xf32, #tpu.memory_space<vmem>>) attributes {dimension_semantics = [#tpu.dimension_semantics<parallel>], iteration_bounds = array<i64: 2>, scalar_prefetch = 0 : i64, scratch_operands = 0 : i64, tpu.core_type = #tpu.core_type<tc>, window_params = [{transform_indices = @transform_0, window_bounds = array<i64: 4, 9, 9, 24>}, {transform_indices = @transform_1, window_bounds = array<i64: 1, 8, 8, 24>}]} {
    %c0 = arith.constant 0 : index
    %c0_0 = arith.constant 0 : index
    %c0_1 = arith.constant 0 : index
    %c0_2 = arith.constant 0 : index
    %0 = vector.load %arg1[%c0, %c0_0, %c0_1, %c0_2] : memref<4x9x9x24xf32, #tpu.memory_space<vmem>>, vector<1x8x8x24xf32>
    %1 = vector.shape_cast %0 : vector<1x8x8x24xf32> to vector<8x8x24xf32>
    %c1 = arith.constant 1 : index
    %c0_3 = arith.constant 0 : index
    %c0_4 = arith.constant 0 : index
    %c0_5 = arith.constant 0 : index
    %2 = vector.load %arg1[%c1, %c0_3, %c0_4, %c0_5] : memref<4x9x9x24xf32, #tpu.memory_space<vmem>>, vector<1x8x8x24xf32>
    %3 = vector.shape_cast %2 : vector<1x8x8x24xf32> to vector<8x8x24xf32>
    %4 = arith.maximumf %1, %3 : vector<8x8x24xf32>
    %c0_6 = arith.constant 0 : index
    %c0_7 = arith.constant 0 : index
    %c1_8 = arith.constant 1 : index
    %c0_9 = arith.constant 0 : index
    %5 = vector.load %arg1[%c0_6, %c0_7, %c1_8, %c0_9] : memref<4x9x9x24xf32, #tpu.memory_space<vmem>>, vector<1x8x8x24xf32>
    %6 = vector.shape_cast %5 : vector<1x8x8x24xf32> to vector<8x8x24xf32>
    %7 = arith.maximumf %4, %6 : vector<8x8x24xf32>
    %c2 = arith.constant 2 : index
    %c0_10 = arith.constant 0 : index
    %c0_11 = arith.constant 0 : index
    %c0_12 = arith.constant 0 : index
    %8 = vector.load %arg1[%c2, %c0_10, %c0_11, %c0_12] : memref<4x9x9x24xf32, #tpu.memory_space<vmem>>, vector<1x8x8x24xf32>
    %9 = vector.shape_cast %8 : vector<1x8x8x24xf32> to vector<8x8x24xf32>
    %10 = arith.maximumf %7, %9 : vector<8x8x24xf32>
    %c3 = arith.constant 3 : index
    %c0_13 = arith.constant 0 : index
    %c0_14 = arith.constant 0 : index
    %c0_15 = arith.constant 0 : index
    %11 = vector.load %arg1[%c3, %c0_13, %c0_14, %c0_15] : memref<4x9x9x24xf32, #tpu.memory_space<vmem>>, vector<1x8x8x24xf32>
    %12 = vector.shape_cast %11 : vector<1x8x8x24xf32> to vector<8x8x24xf32>
    %13 = arith.maximumf %10, %12 : vector<8x8x24xf32>
    %c2_16 = arith.constant 2 : index
    %c0_17 = arith.constant 0 : index
    %c1_18 = arith.constant 1 : index
    %c0_19 = arith.constant 0 : index
    %14 = vector.load %arg1[%c2_16, %c0_17, %c1_18, %c0_19] : memref<4x9x9x24xf32, #tpu.memory_space<vmem>>, vector<1x8x8x24xf32>
    %15 = vector.shape_cast %14 : vector<1x8x8x24xf32> to vector<8x8x24xf32>
    %16 = arith.maximumf %13, %15 : vector<8x8x24xf32>
    %c0_20 = arith.constant 0 : index
    %c1_21 = arith.constant 1 : index
    %c0_22 = arith.constant 0 : index
    %c0_23 = arith.constant 0 : index
    %17 = vector.load %arg1[%c0_20, %c1_21, %c0_22, %c0_23] : memref<4x9x9x24xf32, #tpu.memory_space<vmem>>, vector<1x8x8x24xf32>
    %18 = vector.shape_cast %17 : vector<1x8x8x24xf32> to vector<8x8x24xf32>
    %19 = arith.maximumf %16, %18 : vector<8x8x24xf32>
    %c1_24 = arith.constant 1 : index
    %c1_25 = arith.constant 1 : index
    %c0_26 = arith.constant 0 : index
    %c0_27 = arith.constant 0 : index
    %20 = vector.load %arg1[%c1_24, %c1_25, %c0_26, %c0_27] : memref<4x9x9x24xf32, #tpu.memory_space<vmem>>, vector<1x8x8x24xf32>
    %21 = vector.shape_cast %20 : vector<1x8x8x24xf32> to vector<8x8x24xf32>
    %22 = arith.maximumf %19, %21 : vector<8x8x24xf32>
    %c0_28 = arith.constant 0 : index
    %c1_29 = arith.constant 1 : index
    %c1_30 = arith.constant 1 : index
    %c0_31 = arith.constant 0 : index
    %23 = vector.load %arg1[%c0_28, %c1_29, %c1_30, %c0_31] : memref<4x9x9x24xf32, #tpu.memory_space<vmem>>, vector<1x8x8x24xf32>
    %24 = vector.shape_cast %23 : vector<1x8x8x24xf32> to vector<8x8x24xf32>
    %25 = arith.maximumf %22, %24 : vector<8x8x24xf32>
    %c0_32 = arith.constant 0 : index
    %c0_33 = arith.constant 0 : index
    %c0_34 = arith.constant 0 : index
    %c0_35 = arith.constant 0 : index
    %26 = vector.load %arg2[%c0_32, %c0_33, %c0_34, %c0_35] : memref<1x8x8x24xf32, #tpu.memory_space<vmem>>, vector<1x8x8x24xf32>
    %27 = vector.shape_cast %26 : vector<1x8x8x24xf32> to vector<8x8x24xf32>
    %28 = vector.shape_cast %25 : vector<8x8x24xf32> to vector<1x8x8x24xf32>
    tpu.vector_store %arg2[%c0_32, %c0_33, %c0_34, %c0_35], %28 {strides = array<i32>} : memref<1x8x8x24xf32, #tpu.memory_space<vmem>>, vector<1x8x8x24xf32>,
    return
  }
  func.func @transform_0(%arg0: i32) -> (i32, i32, i32, i32) {
    %c0_i32 = arith.constant 0 : i32
    %c0_i32_0 = arith.constant 0 : i32
    %c0_i32_1 = arith.constant 0 : i32
    %c0_i32_2 = arith.constant 0 : i32
    return %arg0, %c0_i32, %c0_i32_0, %c0_i32_1 : i32, i32, i32, i32
  }
  func.func @transform_1(%arg0: i32) -> (i32, i32, i32, i32) {
    %c0_i32 = arith.constant 0 : i32
    %c0_i32_0 = arith.constant 0 : i32
    %c0_i32_1 = arith.constant 0 : i32
    %c0_i32_2 = arith.constant 0 : i32
    return %arg0, %c0_i32, %c0_i32_0, %c0_i32_1 : i32, i32, i32, i32
  }
}

module attributes {stable_mosaic.version = 11 : i64} {
  func.func @_mm_kernel(%arg0: i32, %arg1: memref<128x24xf32, #tpu.memory_space<vmem>>, %arg2: memref<24x68xf32, #tpu.memory_space<vmem>>, %arg3: memref<1x68xf32, #tpu.memory_space<vmem>>, %arg4: memref<128x68xf32, #tpu.memory_space<vmem>>) attributes {dimension_semantics = [#tpu.dimension_semantics<parallel>], iteration_bounds = array<i64: 1>, scalar_prefetch = 0 : i64, scratch_operands = 0 : i64, tpu.core_type = #tpu.core_type<tc>, window_params = [{transform_indices = @transform_0, window_bounds = array<i64: 128, 24>}, {pipeline_mode = #tpu.pipeline_mode<synchronous>, transform_indices = @transform_1, window_bounds = array<i64: 24, 68>}, {pipeline_mode = #tpu.pipeline_mode<synchronous>, transform_indices = @transform_2, window_bounds = array<i64: 1, 68>}, {transform_indices = @transform_3, window_bounds = array<i64: 128, 68>}]} {
    %c0 = arith.constant 0 : index
    %c0_0 = arith.constant 0 : index
    %0 = vector.load %arg1[%c0, %c0_0] : memref<128x24xf32, #tpu.memory_space<vmem>>, vector<128x24xf32>
    %1 = arith.truncf %0 : vector<128x24xf32> to vector<128x24xbf16>
    %c0_1 = arith.constant 0 : index
    %c0_2 = arith.constant 0 : index
    %2 = vector.load %arg2[%c0_1, %c0_2] : memref<24x68xf32, #tpu.memory_space<vmem>>, vector<24x68xf32>
    %3 = arith.truncf %2 : vector<24x68xf32> to vector<24x68xbf16>
    %cst = arith.constant dense<0.000000e+00> : vector<128x68xf32>
    %4 = tpu.matmul %1, %3, %cst {dimension_numbers = #tpu.dot_dimension_numbers<[1], [0], [0], [1], [0, 0, 1, 1], [], []>} : vector<128x24xbf16>, vector<24x68xbf16>, vector<128x68xf32> -> vector<128x68xf32>
    %c0_3 = arith.constant 0 : index
    %c0_4 = arith.constant 0 : index
    %5 = vector.load %arg3[%c0_3, %c0_4] : memref<1x68xf32, #tpu.memory_space<vmem>>, vector<1x68xf32>
    %6 = vector.broadcast %5 : vector<1x68xf32> to vector<128x68xf32>
    %7 = arith.addf %4, %6 : vector<128x68xf32>
    %cst_5 = arith.constant 0.000000e+00 : f32
    %8 = vector.broadcast %cst_5 : f32 to vector<128x68xf32>
    %9 = arith.maximumf %7, %8 : vector<128x68xf32>
    %c0_6 = arith.constant 0 : index
    %c0_7 = arith.constant 0 : index
    %10 = vector.load %arg4[%c0_6, %c0_7] : memref<128x68xf32, #tpu.memory_space<vmem>>, vector<128x68xf32>
    tpu.vector_store %arg4[%c0_6, %c0_7], %9 {strides = array<i32>} : memref<128x68xf32, #tpu.memory_space<vmem>>, vector<128x68xf32>,
    return
  }
  func.func @transform_0(%arg0: i32) -> (i32, i32) {
    %c0_i32 = arith.constant 0 : i32
    %c0_i32_0 = arith.constant 0 : i32
    return %arg0, %c0_i32 : i32, i32
  }
  func.func @transform_1(%arg0: i32) -> (i32, i32) {
    %c0_i32 = arith.constant 0 : i32
    %c0_i32_0 = arith.constant 0 : i32
    %c0_i32_1 = arith.constant 0 : i32
    return %c0_i32, %c0_i32_0 : i32, i32
  }
  func.func @transform_2(%arg0: i32) -> (i32, i32) {
    %c0_i32 = arith.constant 0 : i32
    %c0_i32_0 = arith.constant 0 : i32
    %c0_i32_1 = arith.constant 0 : i32
    return %c0_i32, %c0_i32_0 : i32, i32
  }
  func.func @transform_3(%arg0: i32) -> (i32, i32) {
    %c0_i32 = arith.constant 0 : i32
    %c0_i32_0 = arith.constant 0 : i32
    return %arg0, %c0_i32 : i32, i32
  }
}

module attributes {stable_mosaic.version = 11 : i64} {
  func.func @_dw3x3_kernel(%arg0: i32, %arg1: memref<4x5x5x68xf32, #tpu.memory_space<vmem>>, %arg2: memref<9x1x68xf32, #tpu.memory_space<vmem>>, %arg3: memref<1x1x68xf32, #tpu.memory_space<vmem>>, %arg4: memref<1x4x4x68xf32, #tpu.memory_space<vmem>>) attributes {dimension_semantics = [#tpu.dimension_semantics<parallel>], iteration_bounds = array<i64: 2>, scalar_prefetch = 0 : i64, scratch_operands = 0 : i64, tpu.core_type = #tpu.core_type<tc>, window_params = [{transform_indices = @transform_0, window_bounds = array<i64: 4, 5, 5, 68>}, {pipeline_mode = #tpu.pipeline_mode<synchronous>, transform_indices = @transform_1, window_bounds = array<i64: 9, 1, 68>}, {pipeline_mode = #tpu.pipeline_mode<synchronous>, transform_indices = @transform_2, window_bounds = array<i64: 1, 1, 68>}, {transform_indices = @transform_3, window_bounds = array<i64: 1, 4, 4, 68>}]} {
    %c0 = arith.constant 0 : index
    %c0_0 = arith.constant 0 : index
    %c0_1 = arith.constant 0 : index
    %c0_2 = arith.constant 0 : index
    %0 = vector.load %arg1[%c0, %c0_0, %c0_1, %c0_2] : memref<4x5x5x68xf32, #tpu.memory_space<vmem>>, vector<1x4x4x68xf32>
    %1 = vector.shape_cast %0 : vector<1x4x4x68xf32> to vector<4x4x68xf32>
    %c0_3 = arith.constant 0 : index
    %c0_4 = arith.constant 0 : index
    %c0_5 = arith.constant 0 : index
    %2 = vector.load %arg2[%c0_3, %c0_4, %c0_5] : memref<9x1x68xf32, #tpu.memory_space<vmem>>, vector<1x1x68xf32>
    %3 = vector.shape_cast %2 : vector<1x1x68xf32> to vector<1x68xf32>
    %4 = vector.shape_cast %3 : vector<1x68xf32> to vector<1x1x68xf32>
    %5 = vector.broadcast %4 : vector<1x1x68xf32> to vector<4x4x68xf32>
    %6 = arith.mulf %1, %5 : vector<4x4x68xf32>
    %c1 = arith.constant 1 : index
    %c0_6 = arith.constant 0 : index
    %c0_7 = arith.constant 0 : index
    %c0_8 = arith.constant 0 : index
    %7 = vector.load %arg1[%c1, %c0_6, %c0_7, %c0_8] : memref<4x5x5x68xf32, #tpu.memory_space<vmem>>, vector<1x4x4x68xf32>
    %8 = vector.shape_cast %7 : vector<1x4x4x68xf32> to vector<4x4x68xf32>
    %c1_9 = arith.constant 1 : index
    %c0_10 = arith.constant 0 : index
    %c0_11 = arith.constant 0 : index
    %9 = vector.load %arg2[%c1_9, %c0_10, %c0_11] : memref<9x1x68xf32, #tpu.memory_space<vmem>>, vector<1x1x68xf32>
    %10 = vector.shape_cast %9 : vector<1x1x68xf32> to vector<1x68xf32>
    %11 = vector.shape_cast %10 : vector<1x68xf32> to vector<1x1x68xf32>
    %12 = vector.broadcast %11 : vector<1x1x68xf32> to vector<4x4x68xf32>
    %13 = arith.mulf %8, %12 : vector<4x4x68xf32>
    %14 = arith.addf %6, %13 : vector<4x4x68xf32>
    %c0_12 = arith.constant 0 : index
    %c0_13 = arith.constant 0 : index
    %c1_14 = arith.constant 1 : index
    %c0_15 = arith.constant 0 : index
    %15 = vector.load %arg1[%c0_12, %c0_13, %c1_14, %c0_15] : memref<4x5x5x68xf32, #tpu.memory_space<vmem>>, vector<1x4x4x68xf32>
    %16 = vector.shape_cast %15 : vector<1x4x4x68xf32> to vector<4x4x68xf32>
    %c2 = arith.constant 2 : index
    %c0_16 = arith.constant 0 : index
    %c0_17 = arith.constant 0 : index
    %17 = vector.load %arg2[%c2, %c0_16, %c0_17] : memref<9x1x68xf32, #tpu.memory_space<vmem>>, vector<1x1x68xf32>
    %18 = vector.shape_cast %17 : vector<1x1x68xf32> to vector<1x68xf32>
    %19 = vector.shape_cast %18 : vector<1x68xf32> to vector<1x1x68xf32>
    %20 = vector.broadcast %19 : vector<1x1x68xf32> to vector<4x4x68xf32>
    %21 = arith.mulf %16, %20 : vector<4x4x68xf32>
    %22 = arith.addf %14, %21 : vector<4x4x68xf32>
    %c2_18 = arith.constant 2 : index
    %c0_19 = arith.constant 0 : index
    %c0_20 = arith.constant 0 : index
    %c0_21 = arith.constant 0 : index
    %23 = vector.load %arg1[%c2_18, %c0_19, %c0_20, %c0_21] : memref<4x5x5x68xf32, #tpu.memory_space<vmem>>, vector<1x4x4x68xf32>
    %24 = vector.shape_cast %23 : vector<1x4x4x68xf32> to vector<4x4x68xf32>
    %c3 = arith.constant 3 : index
    %c0_22 = arith.constant 0 : index
    %c0_23 = arith.constant 0 : index
    %25 = vector.load %arg2[%c3, %c0_22, %c0_23] : memref<9x1x68xf32, #tpu.memory_space<vmem>>, vector<1x1x68xf32>
    %26 = vector.shape_cast %25 : vector<1x1x68xf32> to vector<1x68xf32>
    %27 = vector.shape_cast %26 : vector<1x68xf32> to vector<1x1x68xf32>
    %28 = vector.broadcast %27 : vector<1x1x68xf32> to vector<4x4x68xf32>
    %29 = arith.mulf %24, %28 : vector<4x4x68xf32>
    %30 = arith.addf %22, %29 : vector<4x4x68xf32>
    %c3_24 = arith.constant 3 : index
    %c0_25 = arith.constant 0 : index
    %c0_26 = arith.constant 0 : index
    %c0_27 = arith.constant 0 : index
    %31 = vector.load %arg1[%c3_24, %c0_25, %c0_26, %c0_27] : memref<4x5x5x68xf32, #tpu.memory_space<vmem>>, vector<1x4x4x68xf32>
    %32 = vector.shape_cast %31 : vector<1x4x4x68xf32> to vector<4x4x68xf32>
    %c4 = arith.constant 4 : index
    %c0_28 = arith.constant 0 : index
    %c0_29 = arith.constant 0 : index
    %33 = vector.load %arg2[%c4, %c0_28, %c0_29] : memref<9x1x68xf32, #tpu.memory_space<vmem>>, vector<1x1x68xf32>
    %34 = vector.shape_cast %33 : vector<1x1x68xf32> to vector<1x68xf32>
    %35 = vector.shape_cast %34 : vector<1x68xf32> to vector<1x1x68xf32>
    %36 = vector.broadcast %35 : vector<1x1x68xf32> to vector<4x4x68xf32>
    %37 = arith.mulf %32, %36 : vector<4x4x68xf32>
    %38 = arith.addf %30, %37 : vector<4x4x68xf32>
    %c2_30 = arith.constant 2 : index
    %c0_31 = arith.constant 0 : index
    %c1_32 = arith.constant 1 : index
    %c0_33 = arith.constant 0 : index
    %39 = vector.load %arg1[%c2_30, %c0_31, %c1_32, %c0_33] : memref<4x5x5x68xf32, #tpu.memory_space<vmem>>, vector<1x4x4x68xf32>
    %40 = vector.shape_cast %39 : vector<1x4x4x68xf32> to vector<4x4x68xf32>
    %c5 = arith.constant 5 : index
    %c0_34 = arith.constant 0 : index
    %c0_35 = arith.constant 0 : index
    %41 = vector.load %arg2[%c5, %c0_34, %c0_35] : memref<9x1x68xf32, #tpu.memory_space<vmem>>, vector<1x1x68xf32>
    %42 = vector.shape_cast %41 : vector<1x1x68xf32> to vector<1x68xf32>
    %43 = vector.shape_cast %42 : vector<1x68xf32> to vector<1x1x68xf32>
    %44 = vector.broadcast %43 : vector<1x1x68xf32> to vector<4x4x68xf32>
    %45 = arith.mulf %40, %44 : vector<4x4x68xf32>
    %46 = arith.addf %38, %45 : vector<4x4x68xf32>
    %c0_36 = arith.constant 0 : index
    %c1_37 = arith.constant 1 : index
    %c0_38 = arith.constant 0 : index
    %c0_39 = arith.constant 0 : index
    %47 = vector.load %arg1[%c0_36, %c1_37, %c0_38, %c0_39] : memref<4x5x5x68xf32, #tpu.memory_space<vmem>>, vector<1x4x4x68xf32>
    %48 = vector.shape_cast %47 : vector<1x4x4x68xf32> to vector<4x4x68xf32>
    %c6 = arith.constant 6 : index
    %c0_40 = arith.constant 0 : index
    %c0_41 = arith.constant 0 : index
    %49 = vector.load %arg2[%c6, %c0_40, %c0_41] : memref<9x1x68xf32, #tpu.memory_space<vmem>>, vector<1x1x68xf32>
    %50 = vector.shape_cast %49 : vector<1x1x68xf32> to vector<1x68xf32>
    %51 = vector.shape_cast %50 : vector<1x68xf32> to vector<1x1x68xf32>
    %52 = vector.broadcast %51 : vector<1x1x68xf32> to vector<4x4x68xf32>
    %53 = arith.mulf %48, %52 : vector<4x4x68xf32>
    %54 = arith.addf %46, %53 : vector<4x4x68xf32>
    %c1_42 = arith.constant 1 : index
    %c1_43 = arith.constant 1 : index
    %c0_44 = arith.constant 0 : index
    %c0_45 = arith.constant 0 : index
    %55 = vector.load %arg1[%c1_42, %c1_43, %c0_44, %c0_45] : memref<4x5x5x68xf32, #tpu.memory_space<vmem>>, vector<1x4x4x68xf32>
    %56 = vector.shape_cast %55 : vector<1x4x4x68xf32> to vector<4x4x68xf32>
    %c7 = arith.constant 7 : index
    %c0_46 = arith.constant 0 : index
    %c0_47 = arith.constant 0 : index
    %57 = vector.load %arg2[%c7, %c0_46, %c0_47] : memref<9x1x68xf32, #tpu.memory_space<vmem>>, vector<1x1x68xf32>
    %58 = vector.shape_cast %57 : vector<1x1x68xf32> to vector<1x68xf32>
    %59 = vector.shape_cast %58 : vector<1x68xf32> to vector<1x1x68xf32>
    %60 = vector.broadcast %59 : vector<1x1x68xf32> to vector<4x4x68xf32>
    %61 = arith.mulf %56, %60 : vector<4x4x68xf32>
    %62 = arith.addf %54, %61 : vector<4x4x68xf32>
    %c0_48 = arith.constant 0 : index
    %c1_49 = arith.constant 1 : index
    %c1_50 = arith.constant 1 : index
    %c0_51 = arith.constant 0 : index
    %63 = vector.load %arg1[%c0_48, %c1_49, %c1_50, %c0_51] : memref<4x5x5x68xf32, #tpu.memory_space<vmem>>, vector<1x4x4x68xf32>
    %64 = vector.shape_cast %63 : vector<1x4x4x68xf32> to vector<4x4x68xf32>
    %c8 = arith.constant 8 : index
    %c0_52 = arith.constant 0 : index
    %c0_53 = arith.constant 0 : index
    %65 = vector.load %arg2[%c8, %c0_52, %c0_53] : memref<9x1x68xf32, #tpu.memory_space<vmem>>, vector<1x1x68xf32>
    %66 = vector.shape_cast %65 : vector<1x1x68xf32> to vector<1x68xf32>
    %67 = vector.shape_cast %66 : vector<1x68xf32> to vector<1x1x68xf32>
    %68 = vector.broadcast %67 : vector<1x1x68xf32> to vector<4x4x68xf32>
    %69 = arith.mulf %64, %68 : vector<4x4x68xf32>
    %70 = arith.addf %62, %69 : vector<4x4x68xf32>
    %c0_54 = arith.constant 0 : index
    %c0_55 = arith.constant 0 : index
    %c0_56 = arith.constant 0 : index
    %71 = vector.load %arg3[%c0_54, %c0_55, %c0_56] : memref<1x1x68xf32, #tpu.memory_space<vmem>>, vector<1x1x68xf32>
    %72 = vector.shape_cast %71 : vector<1x1x68xf32> to vector<1x68xf32>
    %73 = vector.shape_cast %72 : vector<1x68xf32> to vector<1x1x68xf32>
    %74 = vector.broadcast %73 : vector<1x1x68xf32> to vector<4x4x68xf32>
    %75 = arith.addf %70, %74 : vector<4x4x68xf32>
    %c0_57 = arith.constant 0 : index
    %c0_58 = arith.constant 0 : index
    %c0_59 = arith.constant 0 : index
    %c0_60 = arith.constant 0 : index
    %76 = vector.load %arg4[%c0_57, %c0_58, %c0_59, %c0_60] : memref<1x4x4x68xf32, #tpu.memory_space<vmem>>, vector<1x4x4x68xf32>
    %77 = vector.shape_cast %76 : vector<1x4x4x68xf32> to vector<4x4x68xf32>
    %78 = vector.shape_cast %75 : vector<4x4x68xf32> to vector<1x4x4x68xf32>
    tpu.vector_store %arg4[%c0_57, %c0_58, %c0_59, %c0_60], %78 {strides = array<i32>} : memref<1x4x4x68xf32, #tpu.memory_space<vmem>>, vector<1x4x4x68xf32>,
    return
  }
  func.func @transform_0(%arg0: i32) -> (i32, i32, i32, i32) {
    %c0_i32 = arith.constant 0 : i32
    %c0_i32_0 = arith.constant 0 : i32
    %c0_i32_1 = arith.constant 0 : i32
    %c0_i32_2 = arith.constant 0 : i32
    return %arg0, %c0_i32, %c0_i32_0, %c0_i32_1 : i32, i32, i32, i32
  }
  func.func @transform_1(%arg0: i32) -> (i32, i32, i32) {
    %c0_i32 = arith.constant 0 : i32
    %c0_i32_0 = arith.constant 0 : i32
    %c0_i32_1 = arith.constant 0 : i32
    %c0_i32_2 = arith.constant 0 : i32
    return %c0_i32, %c0_i32_0, %c0_i32_1 : i32, i32, i32
  }
  func.func @transform_2(%arg0: i32) -> (i32, i32, i32) {
    %c0_i32 = arith.constant 0 : i32
    %c0_i32_0 = arith.constant 0 : i32
    %c0_i32_1 = arith.constant 0 : i32
    %c0_i32_2 = arith.constant 0 : i32
    return %c0_i32, %c0_i32_0, %c0_i32_1 : i32, i32, i32
  }
  func.func @transform_3(%arg0: i32) -> (i32, i32, i32, i32) {
    %c0_i32 = arith.constant 0 : i32
    %c0_i32_0 = arith.constant 0 : i32
    %c0_i32_1 = arith.constant 0 : i32
    %c0_i32_2 = arith.constant 0 : i32
    return %arg0, %c0_i32, %c0_i32_0, %c0_i32_1 : i32, i32, i32, i32
  }
}

module attributes {stable_mosaic.version = 11 : i64} {
  func.func @_mm_kernel(%arg0: i32, %arg1: memref<32x68xf32, #tpu.memory_space<vmem>>, %arg2: memref<68x248xf32, #tpu.memory_space<vmem>>, %arg3: memref<1x248xf32, #tpu.memory_space<vmem>>, %arg4: memref<32x248xf32, #tpu.memory_space<vmem>>) attributes {dimension_semantics = [#tpu.dimension_semantics<parallel>], iteration_bounds = array<i64: 1>, scalar_prefetch = 0 : i64, scratch_operands = 0 : i64, tpu.core_type = #tpu.core_type<tc>, window_params = [{transform_indices = @transform_0, window_bounds = array<i64: 32, 68>}, {pipeline_mode = #tpu.pipeline_mode<synchronous>, transform_indices = @transform_1, window_bounds = array<i64: 68, 248>}, {pipeline_mode = #tpu.pipeline_mode<synchronous>, transform_indices = @transform_2, window_bounds = array<i64: 1, 248>}, {transform_indices = @transform_3, window_bounds = array<i64: 32, 248>}]} {
    %c0 = arith.constant 0 : index
    %c0_0 = arith.constant 0 : index
    %0 = vector.load %arg1[%c0, %c0_0] : memref<32x68xf32, #tpu.memory_space<vmem>>, vector<32x68xf32>
    %1 = arith.truncf %0 : vector<32x68xf32> to vector<32x68xbf16>
    %c0_1 = arith.constant 0 : index
    %c0_2 = arith.constant 0 : index
    %2 = vector.load %arg2[%c0_1, %c0_2] : memref<68x248xf32, #tpu.memory_space<vmem>>, vector<68x248xf32>
    %3 = arith.truncf %2 : vector<68x248xf32> to vector<68x248xbf16>
    %cst = arith.constant dense<0.000000e+00> : vector<32x248xf32>
    %4 = tpu.matmul %1, %3, %cst {dimension_numbers = #tpu.dot_dimension_numbers<[1], [0], [0], [1], [0, 0, 1, 1], [], []>} : vector<32x68xbf16>, vector<68x248xbf16>, vector<32x248xf32> -> vector<32x248xf32>
    %c0_3 = arith.constant 0 : index
    %c0_4 = arith.constant 0 : index
    %5 = vector.load %arg3[%c0_3, %c0_4] : memref<1x248xf32, #tpu.memory_space<vmem>>, vector<1x248xf32>
    %6 = vector.broadcast %5 : vector<1x248xf32> to vector<32x248xf32>
    %7 = arith.addf %4, %6 : vector<32x248xf32>
    %cst_5 = arith.constant 0.000000e+00 : f32
    %8 = vector.broadcast %cst_5 : f32 to vector<32x248xf32>
    %9 = arith.maximumf %7, %8 : vector<32x248xf32>
    %c0_6 = arith.constant 0 : index
    %c0_7 = arith.constant 0 : index
    %10 = vector.load %arg4[%c0_6, %c0_7] : memref<32x248xf32, #tpu.memory_space<vmem>>, vector<32x248xf32>
    tpu.vector_store %arg4[%c0_6, %c0_7], %9 {strides = array<i32>} : memref<32x248xf32, #tpu.memory_space<vmem>>, vector<32x248xf32>,
    return
  }
  func.func @transform_0(%arg0: i32) -> (i32, i32) {
    %c0_i32 = arith.constant 0 : i32
    %c0_i32_0 = arith.constant 0 : i32
    return %arg0, %c0_i32 : i32, i32
  }
  func.func @transform_1(%arg0: i32) -> (i32, i32) {
    %c0_i32 = arith.constant 0 : i32
    %c0_i32_0 = arith.constant 0 : i32
    %c0_i32_1 = arith.constant 0 : i32
    return %c0_i32, %c0_i32_0 : i32, i32
  }
  func.func @transform_2(%arg0: i32) -> (i32, i32) {
    %c0_i32 = arith.constant 0 : i32
    %c0_i32_0 = arith.constant 0 : i32
    %c0_i32_1 = arith.constant 0 : i32
    return %c0_i32, %c0_i32_0 : i32, i32
  }
  func.func @transform_3(%arg0: i32) -> (i32, i32) {
    %c0_i32 = arith.constant 0 : i32
    %c0_i32_0 = arith.constant 0 : i32
    return %arg0, %c0_i32 : i32, i32
  }
}

module attributes {stable_mosaic.version = 11 : i64} {
  func.func @_pool3x3_kernel(%arg0: i32, %arg1: memref<4x5x5x24xf32, #tpu.memory_space<vmem>>, %arg2: memref<1x4x4x24xf32, #tpu.memory_space<vmem>>) attributes {dimension_semantics = [#tpu.dimension_semantics<parallel>], iteration_bounds = array<i64: 2>, scalar_prefetch = 0 : i64, scratch_operands = 0 : i64, tpu.core_type = #tpu.core_type<tc>, window_params = [{transform_indices = @transform_0, window_bounds = array<i64: 4, 5, 5, 24>}, {transform_indices = @transform_1, window_bounds = array<i64: 1, 4, 4, 24>}]} {
    %c0 = arith.constant 0 : index
    %c0_0 = arith.constant 0 : index
    %c0_1 = arith.constant 0 : index
    %c0_2 = arith.constant 0 : index
    %0 = vector.load %arg1[%c0, %c0_0, %c0_1, %c0_2] : memref<4x5x5x24xf32, #tpu.memory_space<vmem>>, vector<1x4x4x24xf32>
    %1 = vector.shape_cast %0 : vector<1x4x4x24xf32> to vector<4x4x24xf32>
    %c1 = arith.constant 1 : index
    %c0_3 = arith.constant 0 : index
    %c0_4 = arith.constant 0 : index
    %c0_5 = arith.constant 0 : index
    %2 = vector.load %arg1[%c1, %c0_3, %c0_4, %c0_5] : memref<4x5x5x24xf32, #tpu.memory_space<vmem>>, vector<1x4x4x24xf32>
    %3 = vector.shape_cast %2 : vector<1x4x4x24xf32> to vector<4x4x24xf32>
    %4 = arith.addf %1, %3 : vector<4x4x24xf32>
    %c0_6 = arith.constant 0 : index
    %c0_7 = arith.constant 0 : index
    %c1_8 = arith.constant 1 : index
    %c0_9 = arith.constant 0 : index
    %5 = vector.load %arg1[%c0_6, %c0_7, %c1_8, %c0_9] : memref<4x5x5x24xf32, #tpu.memory_space<vmem>>, vector<1x4x4x24xf32>
    %6 = vector.shape_cast %5 : vector<1x4x4x24xf32> to vector<4x4x24xf32>
    %7 = arith.addf %4, %6 : vector<4x4x24xf32>
    %c2 = arith.constant 2 : index
    %c0_10 = arith.constant 0 : index
    %c0_11 = arith.constant 0 : index
    %c0_12 = arith.constant 0 : index
    %8 = vector.load %arg1[%c2, %c0_10, %c0_11, %c0_12] : memref<4x5x5x24xf32, #tpu.memory_space<vmem>>, vector<1x4x4x24xf32>
    %9 = vector.shape_cast %8 : vector<1x4x4x24xf32> to vector<4x4x24xf32>
    %10 = arith.addf %7, %9 : vector<4x4x24xf32>
    %c3 = arith.constant 3 : index
    %c0_13 = arith.constant 0 : index
    %c0_14 = arith.constant 0 : index
    %c0_15 = arith.constant 0 : index
    %11 = vector.load %arg1[%c3, %c0_13, %c0_14, %c0_15] : memref<4x5x5x24xf32, #tpu.memory_space<vmem>>, vector<1x4x4x24xf32>
    %12 = vector.shape_cast %11 : vector<1x4x4x24xf32> to vector<4x4x24xf32>
    %13 = arith.addf %10, %12 : vector<4x4x24xf32>
    %c2_16 = arith.constant 2 : index
    %c0_17 = arith.constant 0 : index
    %c1_18 = arith.constant 1 : index
    %c0_19 = arith.constant 0 : index
    %14 = vector.load %arg1[%c2_16, %c0_17, %c1_18, %c0_19] : memref<4x5x5x24xf32, #tpu.memory_space<vmem>>, vector<1x4x4x24xf32>
    %15 = vector.shape_cast %14 : vector<1x4x4x24xf32> to vector<4x4x24xf32>
    %16 = arith.addf %13, %15 : vector<4x4x24xf32>
    %c0_20 = arith.constant 0 : index
    %c1_21 = arith.constant 1 : index
    %c0_22 = arith.constant 0 : index
    %c0_23 = arith.constant 0 : index
    %17 = vector.load %arg1[%c0_20, %c1_21, %c0_22, %c0_23] : memref<4x5x5x24xf32, #tpu.memory_space<vmem>>, vector<1x4x4x24xf32>
    %18 = vector.shape_cast %17 : vector<1x4x4x24xf32> to vector<4x4x24xf32>
    %19 = arith.addf %16, %18 : vector<4x4x24xf32>
    %c1_24 = arith.constant 1 : index
    %c1_25 = arith.constant 1 : index
    %c0_26 = arith.constant 0 : index
    %c0_27 = arith.constant 0 : index
    %20 = vector.load %arg1[%c1_24, %c1_25, %c0_26, %c0_27] : memref<4x5x5x24xf32, #tpu.memory_space<vmem>>, vector<1x4x4x24xf32>
    %21 = vector.shape_cast %20 : vector<1x4x4x24xf32> to vector<4x4x24xf32>
    %22 = arith.addf %19, %21 : vector<4x4x24xf32>
    %c0_28 = arith.constant 0 : index
    %c1_29 = arith.constant 1 : index
    %c1_30 = arith.constant 1 : index
    %c0_31 = arith.constant 0 : index
    %23 = vector.load %arg1[%c0_28, %c1_29, %c1_30, %c0_31] : memref<4x5x5x24xf32, #tpu.memory_space<vmem>>, vector<1x4x4x24xf32>
    %24 = vector.shape_cast %23 : vector<1x4x4x24xf32> to vector<4x4x24xf32>
    %25 = arith.addf %22, %24 : vector<4x4x24xf32>
    %cst = arith.constant 0.111111112 : f32
    %26 = vector.broadcast %cst : f32 to vector<4x4x24xf32>
    %27 = arith.mulf %25, %26 : vector<4x4x24xf32>
    %cst_32 = arith.constant 0.000000e+00 : f32
    %28 = vector.broadcast %cst_32 : f32 to vector<4x4x24xf32>
    %29 = arith.maximumf %27, %28 : vector<4x4x24xf32>
    %c0_33 = arith.constant 0 : index
    %c0_34 = arith.constant 0 : index
    %c0_35 = arith.constant 0 : index
    %c0_36 = arith.constant 0 : index
    %30 = vector.load %arg2[%c0_33, %c0_34, %c0_35, %c0_36] : memref<1x4x4x24xf32, #tpu.memory_space<vmem>>, vector<1x4x4x24xf32>
    %31 = vector.shape_cast %30 : vector<1x4x4x24xf32> to vector<4x4x24xf32>
    %32 = vector.shape_cast %29 : vector<4x4x24xf32> to vector<1x4x4x24xf32>
    tpu.vector_store %arg2[%c0_33, %c0_34, %c0_35, %c0_36], %32 {strides = array<i32>} : memref<1x4x4x24xf32, #tpu.memory_space<vmem>>, vector<1x4x4x24xf32>,
    return
  }
  func.func @transform_0(%arg0: i32) -> (i32, i32, i32, i32) {
    %c0_i32 = arith.constant 0 : i32
    %c0_i32_0 = arith.constant 0 : i32
    %c0_i32_1 = arith.constant 0 : i32
    %c0_i32_2 = arith.constant 0 : i32
    return %arg0, %c0_i32, %c0_i32_0, %c0_i32_1 : i32, i32, i32, i32
  }
  func.func @transform_1(%arg0: i32) -> (i32, i32, i32, i32) {
    %c0_i32 = arith.constant 0 : i32
    %c0_i32_0 = arith.constant 0 : i32
    %c0_i32_1 = arith.constant 0 : i32
    %c0_i32_2 = arith.constant 0 : i32
    return %arg0, %c0_i32, %c0_i32_0, %c0_i32_1 : i32, i32, i32, i32
  }
}

module attributes {stable_mosaic.version = 11 : i64} {
  func.func @_mm_kernel(%arg0: i32, %arg1: memref<32x272xf32, #tpu.memory_space<vmem>>, %arg2: memref<272x68xf32, #tpu.memory_space<vmem>>, %arg3: memref<1x68xf32, #tpu.memory_space<vmem>>, %arg4: memref<32x68xf32, #tpu.memory_space<vmem>>) attributes {dimension_semantics = [#tpu.dimension_semantics<parallel>], iteration_bounds = array<i64: 1>, scalar_prefetch = 0 : i64, scratch_operands = 0 : i64, tpu.core_type = #tpu.core_type<tc>, window_params = [{transform_indices = @transform_0, window_bounds = array<i64: 32, 272>}, {pipeline_mode = #tpu.pipeline_mode<synchronous>, transform_indices = @transform_1, window_bounds = array<i64: 272, 68>}, {pipeline_mode = #tpu.pipeline_mode<synchronous>, transform_indices = @transform_2, window_bounds = array<i64: 1, 68>}, {transform_indices = @transform_3, window_bounds = array<i64: 32, 68>}]} {
    %c0 = arith.constant 0 : index
    %c0_0 = arith.constant 0 : index
    %0 = vector.load %arg1[%c0, %c0_0] : memref<32x272xf32, #tpu.memory_space<vmem>>, vector<32x272xf32>
    %1 = arith.truncf %0 : vector<32x272xf32> to vector<32x272xbf16>
    %c0_1 = arith.constant 0 : index
    %c0_2 = arith.constant 0 : index
    %2 = vector.load %arg2[%c0_1, %c0_2] : memref<272x68xf32, #tpu.memory_space<vmem>>, vector<272x68xf32>
    %3 = arith.truncf %2 : vector<272x68xf32> to vector<272x68xbf16>
    %cst = arith.constant dense<0.000000e+00> : vector<32x68xf32>
    %4 = tpu.matmul %1, %3, %cst {dimension_numbers = #tpu.dot_dimension_numbers<[1], [0], [0], [1], [0, 0, 1, 1], [], []>} : vector<32x272xbf16>, vector<272x68xbf16>, vector<32x68xf32> -> vector<32x68xf32>
    %c0_3 = arith.constant 0 : index
    %c0_4 = arith.constant 0 : index
    %5 = vector.load %arg3[%c0_3, %c0_4] : memref<1x68xf32, #tpu.memory_space<vmem>>, vector<1x68xf32>
    %6 = vector.broadcast %5 : vector<1x68xf32> to vector<32x68xf32>
    %7 = arith.addf %4, %6 : vector<32x68xf32>
    %cst_5 = arith.constant 0.000000e+00 : f32
    %8 = vector.broadcast %cst_5 : f32 to vector<32x68xf32>
    %9 = arith.maximumf %7, %8 : vector<32x68xf32>
    %c0_6 = arith.constant 0 : index
    %c0_7 = arith.constant 0 : index
    %10 = vector.load %arg4[%c0_6, %c0_7] : memref<32x68xf32, #tpu.memory_space<vmem>>, vector<32x68xf32>
    tpu.vector_store %arg4[%c0_6, %c0_7], %9 {strides = array<i32>} : memref<32x68xf32, #tpu.memory_space<vmem>>, vector<32x68xf32>,
    return
  }
  func.func @transform_0(%arg0: i32) -> (i32, i32) {
    %c0_i32 = arith.constant 0 : i32
    %c0_i32_0 = arith.constant 0 : i32
    return %arg0, %c0_i32 : i32, i32
  }
  func.func @transform_1(%arg0: i32) -> (i32, i32) {
    %c0_i32 = arith.constant 0 : i32
    %c0_i32_0 = arith.constant 0 : i32
    %c0_i32_1 = arith.constant 0 : i32
    return %c0_i32, %c0_i32_0 : i32, i32
  }
  func.func @transform_2(%arg0: i32) -> (i32, i32) {
    %c0_i32 = arith.constant 0 : i32
    %c0_i32_0 = arith.constant 0 : i32
    %c0_i32_1 = arith.constant 0 : i32
    return %c0_i32, %c0_i32_0 : i32, i32
  }
  func.func @transform_3(%arg0: i32) -> (i32, i32) {
    %c0_i32 = arith.constant 0 : i32
    %c0_i32_0 = arith.constant 0 : i32
    return %arg0, %c0_i32 : i32, i32
  }
}

module attributes {stable_mosaic.version = 11 : i64} {
  func.func @_mm_add_relu_kernel(%arg0: i32, %arg1: memref<32x68xf32, #tpu.memory_space<vmem>>, %arg2: memref<68x272xf32, #tpu.memory_space<vmem>>, %arg3: memref<1x272xf32, #tpu.memory_space<vmem>>, %arg4: memref<32x272xf32, #tpu.memory_space<vmem>>, %arg5: memref<32x272xf32, #tpu.memory_space<vmem>>) attributes {dimension_semantics = [#tpu.dimension_semantics<parallel>], iteration_bounds = array<i64: 1>, scalar_prefetch = 0 : i64, scratch_operands = 0 : i64, tpu.core_type = #tpu.core_type<tc>, window_params = [{transform_indices = @transform_0, window_bounds = array<i64: 32, 68>}, {pipeline_mode = #tpu.pipeline_mode<synchronous>, transform_indices = @transform_1, window_bounds = array<i64: 68, 272>}, {pipeline_mode = #tpu.pipeline_mode<synchronous>, transform_indices = @transform_2, window_bounds = array<i64: 1, 272>}, {transform_indices = @transform_3, window_bounds = array<i64: 32, 272>}, {transform_indices = @transform_4, window_bounds = array<i64: 32, 272>}]} {
    %c0 = arith.constant 0 : index
    %c0_0 = arith.constant 0 : index
    %0 = vector.load %arg1[%c0, %c0_0] : memref<32x68xf32, #tpu.memory_space<vmem>>, vector<32x68xf32>
    %1 = arith.truncf %0 : vector<32x68xf32> to vector<32x68xbf16>
    %c0_1 = arith.constant 0 : index
    %c0_2 = arith.constant 0 : index
    %2 = vector.load %arg2[%c0_1, %c0_2] : memref<68x272xf32, #tpu.memory_space<vmem>>, vector<68x272xf32>
    %3 = arith.truncf %2 : vector<68x272xf32> to vector<68x272xbf16>
    %cst = arith.constant dense<0.000000e+00> : vector<32x272xf32>
    %4 = tpu.matmul %1, %3, %cst {dimension_numbers = #tpu.dot_dimension_numbers<[1], [0], [0], [1], [0, 0, 1, 1], [], []>} : vector<32x68xbf16>, vector<68x272xbf16>, vector<32x272xf32> -> vector<32x272xf32>
    %c0_3 = arith.constant 0 : index
    %c0_4 = arith.constant 0 : index
    %5 = vector.load %arg3[%c0_3, %c0_4] : memref<1x272xf32, #tpu.memory_space<vmem>>, vector<1x272xf32>
    %6 = vector.broadcast %5 : vector<1x272xf32> to vector<32x272xf32>
    %7 = arith.addf %4, %6 : vector<32x272xf32>
    %c0_5 = arith.constant 0 : index
    %c0_6 = arith.constant 0 : index
    %8 = vector.load %arg4[%c0_5, %c0_6] : memref<32x272xf32, #tpu.memory_space<vmem>>, vector<32x272xf32>
    %9 = arith.addf %7, %8 : vector<32x272xf32>
    %cst_7 = arith.constant 0.000000e+00 : f32
    %10 = vector.broadcast %cst_7 : f32 to vector<32x272xf32>
    %11 = arith.maximumf %9, %10 : vector<32x272xf32>
    %c0_8 = arith.constant 0 : index
    %c0_9 = arith.constant 0 : index
    %12 = vector.load %arg5[%c0_8, %c0_9] : memref<32x272xf32, #tpu.memory_space<vmem>>, vector<32x272xf32>
    tpu.vector_store %arg5[%c0_8, %c0_9], %11 {strides = array<i32>} : memref<32x272xf32, #tpu.memory_space<vmem>>, vector<32x272xf32>,
    return
  }
  func.func @transform_0(%arg0: i32) -> (i32, i32) {
    %c0_i32 = arith.constant 0 : i32
    %c0_i32_0 = arith.constant 0 : i32
    return %arg0, %c0_i32 : i32, i32
  }
  func.func @transform_1(%arg0: i32) -> (i32, i32) {
    %c0_i32 = arith.constant 0 : i32
    %c0_i32_0 = arith.constant 0 : i32
    %c0_i32_1 = arith.constant 0 : i32
    return %c0_i32, %c0_i32_0 : i32, i32
  }
  func.func @transform_2(%arg0: i32) -> (i32, i32) {
    %c0_i32 = arith.constant 0 : i32
    %c0_i32_0 = arith.constant 0 : i32
    %c0_i32_1 = arith.constant 0 : i32
    return %c0_i32, %c0_i32_0 : i32, i32
  }
  func.func @transform_3(%arg0: i32) -> (i32, i32) {
    %c0_i32 = arith.constant 0 : i32
    %c0_i32_0 = arith.constant 0 : i32
    return %arg0, %c0_i32 : i32, i32
  }
  func.func @transform_4(%arg0: i32) -> (i32, i32) {
    %c0_i32 = arith.constant 0 : i32
    %c0_i32_0 = arith.constant 0 : i32
    return %arg0, %c0_i32 : i32, i32
  }
}

module attributes {stable_mosaic.version = 11 : i64} {
  func.func @_dw3x3_kernel(%arg0: i32, %arg1: memref<1x6x6x68xf32, #tpu.memory_space<vmem>>, %arg2: memref<9x1x68xf32, #tpu.memory_space<vmem>>, %arg3: memref<1x1x68xf32, #tpu.memory_space<vmem>>, %arg4: memref<1x4x4x68xf32, #tpu.memory_space<vmem>>) attributes {dimension_semantics = [#tpu.dimension_semantics<parallel>], iteration_bounds = array<i64: 2>, scalar_prefetch = 0 : i64, scratch_operands = 0 : i64, tpu.core_type = #tpu.core_type<tc>, window_params = [{transform_indices = @transform_0, window_bounds = array<i64: 1, 6, 6, 68>}, {pipeline_mode = #tpu.pipeline_mode<synchronous>, transform_indices = @transform_1, window_bounds = array<i64: 9, 1, 68>}, {pipeline_mode = #tpu.pipeline_mode<synchronous>, transform_indices = @transform_2, window_bounds = array<i64: 1, 1, 68>}, {transform_indices = @transform_3, window_bounds = array<i64: 1, 4, 4, 68>}]} {
    %c0 = arith.constant 0 : index
    %c0_0 = arith.constant 0 : index
    %c0_1 = arith.constant 0 : index
    %c0_2 = arith.constant 0 : index
    %0 = vector.load %arg1[%c0, %c0_0, %c0_1, %c0_2] : memref<1x6x6x68xf32, #tpu.memory_space<vmem>>, vector<1x4x4x68xf32>
    %1 = vector.shape_cast %0 : vector<1x4x4x68xf32> to vector<4x4x68xf32>
    %c0_3 = arith.constant 0 : index
    %c0_4 = arith.constant 0 : index
    %c0_5 = arith.constant 0 : index
    %2 = vector.load %arg2[%c0_3, %c0_4, %c0_5] : memref<9x1x68xf32, #tpu.memory_space<vmem>>, vector<1x1x68xf32>
    %3 = vector.shape_cast %2 : vector<1x1x68xf32> to vector<1x68xf32>
    %4 = vector.shape_cast %3 : vector<1x68xf32> to vector<1x1x68xf32>
    %5 = vector.broadcast %4 : vector<1x1x68xf32> to vector<4x4x68xf32>
    %6 = arith.mulf %1, %5 : vector<4x4x68xf32>
    %c0_6 = arith.constant 0 : index
    %c0_7 = arith.constant 0 : index
    %c1 = arith.constant 1 : index
    %c0_8 = arith.constant 0 : index
    %7 = vector.load %arg1[%c0_6, %c0_7, %c1, %c0_8] : memref<1x6x6x68xf32, #tpu.memory_space<vmem>>, vector<1x4x4x68xf32>
    %8 = vector.shape_cast %7 : vector<1x4x4x68xf32> to vector<4x4x68xf32>
    %c1_9 = arith.constant 1 : index
    %c0_10 = arith.constant 0 : index
    %c0_11 = arith.constant 0 : index
    %9 = vector.load %arg2[%c1_9, %c0_10, %c0_11] : memref<9x1x68xf32, #tpu.memory_space<vmem>>, vector<1x1x68xf32>
    %10 = vector.shape_cast %9 : vector<1x1x68xf32> to vector<1x68xf32>
    %11 = vector.shape_cast %10 : vector<1x68xf32> to vector<1x1x68xf32>
    %12 = vector.broadcast %11 : vector<1x1x68xf32> to vector<4x4x68xf32>
    %13 = arith.mulf %8, %12 : vector<4x4x68xf32>
    %14 = arith.addf %6, %13 : vector<4x4x68xf32>
    %c0_12 = arith.constant 0 : index
    %c0_13 = arith.constant 0 : index
    %c2 = arith.constant 2 : index
    %c0_14 = arith.constant 0 : index
    %15 = vector.load %arg1[%c0_12, %c0_13, %c2, %c0_14] : memref<1x6x6x68xf32, #tpu.memory_space<vmem>>, vector<1x4x4x68xf32>
    %16 = vector.shape_cast %15 : vector<1x4x4x68xf32> to vector<4x4x68xf32>
    %c2_15 = arith.constant 2 : index
    %c0_16 = arith.constant 0 : index
    %c0_17 = arith.constant 0 : index
    %17 = vector.load %arg2[%c2_15, %c0_16, %c0_17] : memref<9x1x68xf32, #tpu.memory_space<vmem>>, vector<1x1x68xf32>
    %18 = vector.shape_cast %17 : vector<1x1x68xf32> to vector<1x68xf32>
    %19 = vector.shape_cast %18 : vector<1x68xf32> to vector<1x1x68xf32>
    %20 = vector.broadcast %19 : vector<1x1x68xf32> to vector<4x4x68xf32>
    %21 = arith.mulf %16, %20 : vector<4x4x68xf32>
    %22 = arith.addf %14, %21 : vector<4x4x68xf32>
    %c0_18 = arith.constant 0 : index
    %c1_19 = arith.constant 1 : index
    %c0_20 = arith.constant 0 : index
    %c0_21 = arith.constant 0 : index
    %23 = vector.load %arg1[%c0_18, %c1_19, %c0_20, %c0_21] : memref<1x6x6x68xf32, #tpu.memory_space<vmem>>, vector<1x4x4x68xf32>
    %24 = vector.shape_cast %23 : vector<1x4x4x68xf32> to vector<4x4x68xf32>
    %c3 = arith.constant 3 : index
    %c0_22 = arith.constant 0 : index
    %c0_23 = arith.constant 0 : index
    %25 = vector.load %arg2[%c3, %c0_22, %c0_23] : memref<9x1x68xf32, #tpu.memory_space<vmem>>, vector<1x1x68xf32>
    %26 = vector.shape_cast %25 : vector<1x1x68xf32> to vector<1x68xf32>
    %27 = vector.shape_cast %26 : vector<1x68xf32> to vector<1x1x68xf32>
    %28 = vector.broadcast %27 : vector<1x1x68xf32> to vector<4x4x68xf32>
    %29 = arith.mulf %24, %28 : vector<4x4x68xf32>
    %30 = arith.addf %22, %29 : vector<4x4x68xf32>
    %c0_24 = arith.constant 0 : index
    %c1_25 = arith.constant 1 : index
    %c1_26 = arith.constant 1 : index
    %c0_27 = arith.constant 0 : index
    %31 = vector.load %arg1[%c0_24, %c1_25, %c1_26, %c0_27] : memref<1x6x6x68xf32, #tpu.memory_space<vmem>>, vector<1x4x4x68xf32>
    %32 = vector.shape_cast %31 : vector<1x4x4x68xf32> to vector<4x4x68xf32>
    %c4 = arith.constant 4 : index
    %c0_28 = arith.constant 0 : index
    %c0_29 = arith.constant 0 : index
    %33 = vector.load %arg2[%c4, %c0_28, %c0_29] : memref<9x1x68xf32, #tpu.memory_space<vmem>>, vector<1x1x68xf32>
    %34 = vector.shape_cast %33 : vector<1x1x68xf32> to vector<1x68xf32>
    %35 = vector.shape_cast %34 : vector<1x68xf32> to vector<1x1x68xf32>
    %36 = vector.broadcast %35 : vector<1x1x68xf32> to vector<4x4x68xf32>
    %37 = arith.mulf %32, %36 : vector<4x4x68xf32>
    %38 = arith.addf %30, %37 : vector<4x4x68xf32>
    %c0_30 = arith.constant 0 : index
    %c1_31 = arith.constant 1 : index
    %c2_32 = arith.constant 2 : index
    %c0_33 = arith.constant 0 : index
    %39 = vector.load %arg1[%c0_30, %c1_31, %c2_32, %c0_33] : memref<1x6x6x68xf32, #tpu.memory_space<vmem>>, vector<1x4x4x68xf32>
    %40 = vector.shape_cast %39 : vector<1x4x4x68xf32> to vector<4x4x68xf32>
    %c5 = arith.constant 5 : index
    %c0_34 = arith.constant 0 : index
    %c0_35 = arith.constant 0 : index
    %41 = vector.load %arg2[%c5, %c0_34, %c0_35] : memref<9x1x68xf32, #tpu.memory_space<vmem>>, vector<1x1x68xf32>
    %42 = vector.shape_cast %41 : vector<1x1x68xf32> to vector<1x68xf32>
    %43 = vector.shape_cast %42 : vector<1x68xf32> to vector<1x1x68xf32>
    %44 = vector.broadcast %43 : vector<1x1x68xf32> to vector<4x4x68xf32>
    %45 = arith.mulf %40, %44 : vector<4x4x68xf32>
    %46 = arith.addf %38, %45 : vector<4x4x68xf32>
    %c0_36 = arith.constant 0 : index
    %c2_37 = arith.constant 2 : index
    %c0_38 = arith.constant 0 : index
    %c0_39 = arith.constant 0 : index
    %47 = vector.load %arg1[%c0_36, %c2_37, %c0_38, %c0_39] : memref<1x6x6x68xf32, #tpu.memory_space<vmem>>, vector<1x4x4x68xf32>
    %48 = vector.shape_cast %47 : vector<1x4x4x68xf32> to vector<4x4x68xf32>
    %c6 = arith.constant 6 : index
    %c0_40 = arith.constant 0 : index
    %c0_41 = arith.constant 0 : index
    %49 = vector.load %arg2[%c6, %c0_40, %c0_41] : memref<9x1x68xf32, #tpu.memory_space<vmem>>, vector<1x1x68xf32>
    %50 = vector.shape_cast %49 : vector<1x1x68xf32> to vector<1x68xf32>
    %51 = vector.shape_cast %50 : vector<1x68xf32> to vector<1x1x68xf32>
    %52 = vector.broadcast %51 : vector<1x1x68xf32> to vector<4x4x68xf32>
    %53 = arith.mulf %48, %52 : vector<4x4x68xf32>
    %54 = arith.addf %46, %53 : vector<4x4x68xf32>
    %c0_42 = arith.constant 0 : index
    %c2_43 = arith.constant 2 : index
    %c1_44 = arith.constant 1 : index
    %c0_45 = arith.constant 0 : index
    %55 = vector.load %arg1[%c0_42, %c2_43, %c1_44, %c0_45] : memref<1x6x6x68xf32, #tpu.memory_space<vmem>>, vector<1x4x4x68xf32>
    %56 = vector.shape_cast %55 : vector<1x4x4x68xf32> to vector<4x4x68xf32>
    %c7 = arith.constant 7 : index
    %c0_46 = arith.constant 0 : index
    %c0_47 = arith.constant 0 : index
    %57 = vector.load %arg2[%c7, %c0_46, %c0_47] : memref<9x1x68xf32, #tpu.memory_space<vmem>>, vector<1x1x68xf32>
    %58 = vector.shape_cast %57 : vector<1x1x68xf32> to vector<1x68xf32>
    %59 = vector.shape_cast %58 : vector<1x68xf32> to vector<1x1x68xf32>
    %60 = vector.broadcast %59 : vector<1x1x68xf32> to vector<4x4x68xf32>
    %61 = arith.mulf %56, %60 : vector<4x4x68xf32>
    %62 = arith.addf %54, %61 : vector<4x4x68xf32>
    %c0_48 = arith.constant 0 : index
    %c2_49 = arith.constant 2 : index
    %c2_50 = arith.constant 2 : index
    %c0_51 = arith.constant 0 : index
    %63 = vector.load %arg1[%c0_48, %c2_49, %c2_50, %c0_51] : memref<1x6x6x68xf32, #tpu.memory_space<vmem>>, vector<1x4x4x68xf32>
    %64 = vector.shape_cast %63 : vector<1x4x4x68xf32> to vector<4x4x68xf32>
    %c8 = arith.constant 8 : index
    %c0_52 = arith.constant 0 : index
    %c0_53 = arith.constant 0 : index
    %65 = vector.load %arg2[%c8, %c0_52, %c0_53] : memref<9x1x68xf32, #tpu.memory_space<vmem>>, vector<1x1x68xf32>
    %66 = vector.shape_cast %65 : vector<1x1x68xf32> to vector<1x68xf32>
    %67 = vector.shape_cast %66 : vector<1x68xf32> to vector<1x1x68xf32>
    %68 = vector.broadcast %67 : vector<1x1x68xf32> to vector<4x4x68xf32>
    %69 = arith.mulf %64, %68 : vector<4x4x68xf32>
    %70 = arith.addf %62, %69 : vector<4x4x68xf32>
    %c0_54 = arith.constant 0 : index
    %c0_55 = arith.constant 0 : index
    %c0_56 = arith.constant 0 : index
    %71 = vector.load %arg3[%c0_54, %c0_55, %c0_56] : memref<1x1x68xf32, #tpu.memory_space<vmem>>, vector<1x1x68xf32>
    %72 = vector.shape_cast %71 : vector<1x1x68xf32> to vector<1x68xf32>
    %73 = vector.shape_cast %72 : vector<1x68xf32> to vector<1x1x68xf32>
    %74 = vector.broadcast %73 : vector<1x1x68xf32> to vector<4x4x68xf32>
    %75 = arith.addf %70, %74 : vector<4x4x68xf32>
    %c0_57 = arith.constant 0 : index
    %c0_58 = arith.constant 0 : index
    %c0_59 = arith.constant 0 : index
    %c0_60 = arith.constant 0 : index
    %76 = vector.load %arg4[%c0_57, %c0_58, %c0_59, %c0_60] : memref<1x4x4x68xf32, #tpu.memory_space<vmem>>, vector<1x4x4x68xf32>
    %77 = vector.shape_cast %76 : vector<1x4x4x68xf32> to vector<4x4x68xf32>
    %78 = vector.shape_cast %75 : vector<4x4x68xf32> to vector<1x4x4x68xf32>
    tpu.vector_store %arg4[%c0_57, %c0_58, %c0_59, %c0_60], %78 {strides = array<i32>} : memref<1x4x4x68xf32, #tpu.memory_space<vmem>>, vector<1x4x4x68xf32>,
    return
  }
  func.func @transform_0(%arg0: i32) -> (i32, i32, i32, i32) {
    %c0_i32 = arith.constant 0 : i32
    %c0_i32_0 = arith.constant 0 : i32
    %c0_i32_1 = arith.constant 0 : i32
    %c0_i32_2 = arith.constant 0 : i32
    return %arg0, %c0_i32, %c0_i32_0, %c0_i32_1 : i32, i32, i32, i32
  }
  func.func @transform_1(%arg0: i32) -> (i32, i32, i32) {
    %c0_i32 = arith.constant 0 : i32
    %c0_i32_0 = arith.constant 0 : i32
    %c0_i32_1 = arith.constant 0 : i32
    %c0_i32_2 = arith.constant 0 : i32
    return %c0_i32, %c0_i32_0, %c0_i32_1 : i32, i32, i32
  }
  func.func @transform_2(%arg0: i32) -> (i32, i32, i32) {
    %c0_i32 = arith.constant 0 : i32
    %c0_i32_0 = arith.constant 0 : i32
    %c0_i32_1 = arith.constant 0 : i32
    %c0_i32_2 = arith.constant 0 : i32
    return %c0_i32, %c0_i32_0, %c0_i32_1 : i32, i32, i32
  }
  func.func @transform_3(%arg0: i32) -> (i32, i32, i32, i32) {
    %c0_i32 = arith.constant 0 : i32
    %c0_i32_0 = arith.constant 0 : i32
    %c0_i32_1 = arith.constant 0 : i32
    %c0_i32_2 = arith.constant 0 : i32
    return %arg0, %c0_i32, %c0_i32_0, %c0_i32_1 : i32, i32, i32, i32
  }
}

module attributes {stable_mosaic.version = 11 : i64} {
  func.func @_mm_kernel(%arg0: i32, %arg1: memref<32x272xf32, #tpu.memory_space<vmem>>, %arg2: memref<272x136xf32, #tpu.memory_space<vmem>>, %arg3: memref<1x136xf32, #tpu.memory_space<vmem>>, %arg4: memref<32x136xf32, #tpu.memory_space<vmem>>) attributes {dimension_semantics = [#tpu.dimension_semantics<parallel>], iteration_bounds = array<i64: 1>, scalar_prefetch = 0 : i64, scratch_operands = 0 : i64, tpu.core_type = #tpu.core_type<tc>, window_params = [{transform_indices = @transform_0, window_bounds = array<i64: 32, 272>}, {pipeline_mode = #tpu.pipeline_mode<synchronous>, transform_indices = @transform_1, window_bounds = array<i64: 272, 136>}, {pipeline_mode = #tpu.pipeline_mode<synchronous>, transform_indices = @transform_2, window_bounds = array<i64: 1, 136>}, {transform_indices = @transform_3, window_bounds = array<i64: 32, 136>}]} {
    %c0 = arith.constant 0 : index
    %c0_0 = arith.constant 0 : index
    %0 = vector.load %arg1[%c0, %c0_0] : memref<32x272xf32, #tpu.memory_space<vmem>>, vector<32x272xf32>
    %1 = arith.truncf %0 : vector<32x272xf32> to vector<32x272xbf16>
    %c0_1 = arith.constant 0 : index
    %c0_2 = arith.constant 0 : index
    %2 = vector.load %arg2[%c0_1, %c0_2] : memref<272x136xf32, #tpu.memory_space<vmem>>, vector<272x136xf32>
    %3 = arith.truncf %2 : vector<272x136xf32> to vector<272x136xbf16>
    %cst = arith.constant dense<0.000000e+00> : vector<32x136xf32>
    %4 = tpu.matmul %1, %3, %cst {dimension_numbers = #tpu.dot_dimension_numbers<[1], [0], [0], [1], [0, 0, 1, 1], [], []>} : vector<32x272xbf16>, vector<272x136xbf16>, vector<32x136xf32> -> vector<32x136xf32>
    %c0_3 = arith.constant 0 : index
    %c0_4 = arith.constant 0 : index
    %5 = vector.load %arg3[%c0_3, %c0_4] : memref<1x136xf32, #tpu.memory_space<vmem>>, vector<1x136xf32>
    %6 = vector.broadcast %5 : vector<1x136xf32> to vector<32x136xf32>
    %7 = arith.addf %4, %6 : vector<32x136xf32>
    %cst_5 = arith.constant 0.000000e+00 : f32
    %8 = vector.broadcast %cst_5 : f32 to vector<32x136xf32>
    %9 = arith.maximumf %7, %8 : vector<32x136xf32>
    %c0_6 = arith.constant 0 : index
    %c0_7 = arith.constant 0 : index
    %10 = vector.load %arg4[%c0_6, %c0_7] : memref<32x136xf32, #tpu.memory_space<vmem>>, vector<32x136xf32>
    tpu.vector_store %arg4[%c0_6, %c0_7], %9 {strides = array<i32>} : memref<32x136xf32, #tpu.memory_space<vmem>>, vector<32x136xf32>,
    return
  }
  func.func @transform_0(%arg0: i32) -> (i32, i32) {
    %c0_i32 = arith.constant 0 : i32
    %c0_i32_0 = arith.constant 0 : i32
    return %arg0, %c0_i32 : i32, i32
  }
  func.func @transform_1(%arg0: i32) -> (i32, i32) {
    %c0_i32 = arith.constant 0 : i32
    %c0_i32_0 = arith.constant 0 : i32
    %c0_i32_1 = arith.constant 0 : i32
    return %c0_i32, %c0_i32_0 : i32, i32
  }
  func.func @transform_2(%arg0: i32) -> (i32, i32) {
    %c0_i32 = arith.constant 0 : i32
    %c0_i32_0 = arith.constant 0 : i32
    %c0_i32_1 = arith.constant 0 : i32
    return %c0_i32, %c0_i32_0 : i32, i32
  }
  func.func @transform_3(%arg0: i32) -> (i32, i32) {
    %c0_i32 = arith.constant 0 : i32
    %c0_i32_0 = arith.constant 0 : i32
    return %arg0, %c0_i32 : i32, i32
  }
}

module attributes {stable_mosaic.version = 11 : i64} {
  func.func @_pool3x3_kernel(%arg0: i32, %arg1: memref<4x3x3x272xf32, #tpu.memory_space<vmem>>, %arg2: memref<1x2x2x272xf32, #tpu.memory_space<vmem>>) attributes {dimension_semantics = [#tpu.dimension_semantics<parallel>], iteration_bounds = array<i64: 2>, scalar_prefetch = 0 : i64, scratch_operands = 0 : i64, tpu.core_type = #tpu.core_type<tc>, window_params = [{transform_indices = @transform_0, window_bounds = array<i64: 4, 3, 3, 272>}, {transform_indices = @transform_1, window_bounds = array<i64: 1, 2, 2, 272>}]} {
    %c0 = arith.constant 0 : index
    %c0_0 = arith.constant 0 : index
    %c0_1 = arith.constant 0 : index
    %c0_2 = arith.constant 0 : index
    %0 = vector.load %arg1[%c0, %c0_0, %c0_1, %c0_2] : memref<4x3x3x272xf32, #tpu.memory_space<vmem>>, vector<1x2x2x272xf32>
    %1 = vector.shape_cast %0 : vector<1x2x2x272xf32> to vector<2x2x272xf32>
    %c1 = arith.constant 1 : index
    %c0_3 = arith.constant 0 : index
    %c0_4 = arith.constant 0 : index
    %c0_5 = arith.constant 0 : index
    %2 = vector.load %arg1[%c1, %c0_3, %c0_4, %c0_5] : memref<4x3x3x272xf32, #tpu.memory_space<vmem>>, vector<1x2x2x272xf32>
    %3 = vector.shape_cast %2 : vector<1x2x2x272xf32> to vector<2x2x272xf32>
    %4 = arith.addf %1, %3 : vector<2x2x272xf32>
    %c0_6 = arith.constant 0 : index
    %c0_7 = arith.constant 0 : index
    %c1_8 = arith.constant 1 : index
    %c0_9 = arith.constant 0 : index
    %5 = vector.load %arg1[%c0_6, %c0_7, %c1_8, %c0_9] : memref<4x3x3x272xf32, #tpu.memory_space<vmem>>, vector<1x2x2x272xf32>
    %6 = vector.shape_cast %5 : vector<1x2x2x272xf32> to vector<2x2x272xf32>
    %7 = arith.addf %4, %6 : vector<2x2x272xf32>
    %c2 = arith.constant 2 : index
    %c0_10 = arith.constant 0 : index
    %c0_11 = arith.constant 0 : index
    %c0_12 = arith.constant 0 : index
    %8 = vector.load %arg1[%c2, %c0_10, %c0_11, %c0_12] : memref<4x3x3x272xf32, #tpu.memory_space<vmem>>, vector<1x2x2x272xf32>
    %9 = vector.shape_cast %8 : vector<1x2x2x272xf32> to vector<2x2x272xf32>
    %10 = arith.addf %7, %9 : vector<2x2x272xf32>
    %c3 = arith.constant 3 : index
    %c0_13 = arith.constant 0 : index
    %c0_14 = arith.constant 0 : index
    %c0_15 = arith.constant 0 : index
    %11 = vector.load %arg1[%c3, %c0_13, %c0_14, %c0_15] : memref<4x3x3x272xf32, #tpu.memory_space<vmem>>, vector<1x2x2x272xf32>
    %12 = vector.shape_cast %11 : vector<1x2x2x272xf32> to vector<2x2x272xf32>
    %13 = arith.addf %10, %12 : vector<2x2x272xf32>
    %c2_16 = arith.constant 2 : index
    %c0_17 = arith.constant 0 : index
    %c1_18 = arith.constant 1 : index
    %c0_19 = arith.constant 0 : index
    %14 = vector.load %arg1[%c2_16, %c0_17, %c1_18, %c0_19] : memref<4x3x3x272xf32, #tpu.memory_space<vmem>>, vector<1x2x2x272xf32>
    %15 = vector.shape_cast %14 : vector<1x2x2x272xf32> to vector<2x2x272xf32>
    %16 = arith.addf %13, %15 : vector<2x2x272xf32>
    %c0_20 = arith.constant 0 : index
    %c1_21 = arith.constant 1 : index
    %c0_22 = arith.constant 0 : index
    %c0_23 = arith.constant 0 : index
    %17 = vector.load %arg1[%c0_20, %c1_21, %c0_22, %c0_23] : memref<4x3x3x272xf32, #tpu.memory_space<vmem>>, vector<1x2x2x272xf32>
    %18 = vector.shape_cast %17 : vector<1x2x2x272xf32> to vector<2x2x272xf32>
    %19 = arith.addf %16, %18 : vector<2x2x272xf32>
    %c1_24 = arith.constant 1 : index
    %c1_25 = arith.constant 1 : index
    %c0_26 = arith.constant 0 : index
    %c0_27 = arith.constant 0 : index
    %20 = vector.load %arg1[%c1_24, %c1_25, %c0_26, %c0_27] : memref<4x3x3x272xf32, #tpu.memory_space<vmem>>, vector<1x2x2x272xf32>
    %21 = vector.shape_cast %20 : vector<1x2x2x272xf32> to vector<2x2x272xf32>
    %22 = arith.addf %19, %21 : vector<2x2x272xf32>
    %c0_28 = arith.constant 0 : index
    %c1_29 = arith.constant 1 : index
    %c1_30 = arith.constant 1 : index
    %c0_31 = arith.constant 0 : index
    %23 = vector.load %arg1[%c0_28, %c1_29, %c1_30, %c0_31] : memref<4x3x3x272xf32, #tpu.memory_space<vmem>>, vector<1x2x2x272xf32>
    %24 = vector.shape_cast %23 : vector<1x2x2x272xf32> to vector<2x2x272xf32>
    %25 = arith.addf %22, %24 : vector<2x2x272xf32>
    %cst = arith.constant 0.111111112 : f32
    %26 = vector.broadcast %cst : f32 to vector<2x2x272xf32>
    %27 = arith.mulf %25, %26 : vector<2x2x272xf32>
    %cst_32 = arith.constant 0.000000e+00 : f32
    %28 = vector.broadcast %cst_32 : f32 to vector<2x2x272xf32>
    %29 = arith.maximumf %27, %28 : vector<2x2x272xf32>
    %c0_33 = arith.constant 0 : index
    %c0_34 = arith.constant 0 : index
    %c0_35 = arith.constant 0 : index
    %c0_36 = arith.constant 0 : index
    %30 = vector.load %arg2[%c0_33, %c0_34, %c0_35, %c0_36] : memref<1x2x2x272xf32, #tpu.memory_space<vmem>>, vector<1x2x2x272xf32>
    %31 = vector.shape_cast %30 : vector<1x2x2x272xf32> to vector<2x2x272xf32>
    %32 = vector.shape_cast %29 : vector<2x2x272xf32> to vector<1x2x2x272xf32>
    tpu.vector_store %arg2[%c0_33, %c0_34, %c0_35, %c0_36], %32 {strides = array<i32>} : memref<1x2x2x272xf32, #tpu.memory_space<vmem>>, vector<1x2x2x272xf32>,
    return
  }
  func.func @transform_0(%arg0: i32) -> (i32, i32, i32, i32) {
    %c0_i32 = arith.constant 0 : i32
    %c0_i32_0 = arith.constant 0 : i32
    %c0_i32_1 = arith.constant 0 : i32
    %c0_i32_2 = arith.constant 0 : i32
    return %arg0, %c0_i32, %c0_i32_0, %c0_i32_1 : i32, i32, i32, i32
  }
  func.func @transform_1(%arg0: i32) -> (i32, i32, i32, i32) {
    %c0_i32 = arith.constant 0 : i32
    %c0_i32_0 = arith.constant 0 : i32
    %c0_i32_1 = arith.constant 0 : i32
    %c0_i32_2 = arith.constant 0 : i32
    return %arg0, %c0_i32, %c0_i32_0, %c0_i32_1 : i32, i32, i32, i32
  }
}

module attributes {stable_mosaic.version = 11 : i64} {
  func.func @_dw3x3_kernel(%arg0: i32, %arg1: memref<4x3x3x136xf32, #tpu.memory_space<vmem>>, %arg2: memref<9x1x136xf32, #tpu.memory_space<vmem>>, %arg3: memref<1x1x136xf32, #tpu.memory_space<vmem>>, %arg4: memref<1x2x2x136xf32, #tpu.memory_space<vmem>>) attributes {dimension_semantics = [#tpu.dimension_semantics<parallel>], iteration_bounds = array<i64: 2>, scalar_prefetch = 0 : i64, scratch_operands = 0 : i64, tpu.core_type = #tpu.core_type<tc>, window_params = [{transform_indices = @transform_0, window_bounds = array<i64: 4, 3, 3, 136>}, {pipeline_mode = #tpu.pipeline_mode<synchronous>, transform_indices = @transform_1, window_bounds = array<i64: 9, 1, 136>}, {pipeline_mode = #tpu.pipeline_mode<synchronous>, transform_indices = @transform_2, window_bounds = array<i64: 1, 1, 136>}, {transform_indices = @transform_3, window_bounds = array<i64: 1, 2, 2, 136>}]} {
    %c0 = arith.constant 0 : index
    %c0_0 = arith.constant 0 : index
    %c0_1 = arith.constant 0 : index
    %c0_2 = arith.constant 0 : index
    %0 = vector.load %arg1[%c0, %c0_0, %c0_1, %c0_2] : memref<4x3x3x136xf32, #tpu.memory_space<vmem>>, vector<1x2x2x136xf32>
    %1 = vector.shape_cast %0 : vector<1x2x2x136xf32> to vector<2x2x136xf32>
    %c0_3 = arith.constant 0 : index
    %c0_4 = arith.constant 0 : index
    %c0_5 = arith.constant 0 : index
    %2 = vector.load %arg2[%c0_3, %c0_4, %c0_5] : memref<9x1x136xf32, #tpu.memory_space<vmem>>, vector<1x1x136xf32>
    %3 = vector.shape_cast %2 : vector<1x1x136xf32> to vector<1x136xf32>
    %4 = vector.shape_cast %3 : vector<1x136xf32> to vector<1x1x136xf32>
    %5 = vector.broadcast %4 : vector<1x1x136xf32> to vector<2x2x136xf32>
    %6 = arith.mulf %1, %5 : vector<2x2x136xf32>
    %c1 = arith.constant 1 : index
    %c0_6 = arith.constant 0 : index
    %c0_7 = arith.constant 0 : index
    %c0_8 = arith.constant 0 : index
    %7 = vector.load %arg1[%c1, %c0_6, %c0_7, %c0_8] : memref<4x3x3x136xf32, #tpu.memory_space<vmem>>, vector<1x2x2x136xf32>
    %8 = vector.shape_cast %7 : vector<1x2x2x136xf32> to vector<2x2x136xf32>
    %c1_9 = arith.constant 1 : index
    %c0_10 = arith.constant 0 : index
    %c0_11 = arith.constant 0 : index
    %9 = vector.load %arg2[%c1_9, %c0_10, %c0_11] : memref<9x1x136xf32, #tpu.memory_space<vmem>>, vector<1x1x136xf32>
    %10 = vector.shape_cast %9 : vector<1x1x136xf32> to vector<1x136xf32>
    %11 = vector.shape_cast %10 : vector<1x136xf32> to vector<1x1x136xf32>
    %12 = vector.broadcast %11 : vector<1x1x136xf32> to vector<2x2x136xf32>
    %13 = arith.mulf %8, %12 : vector<2x2x136xf32>
    %14 = arith.addf %6, %13 : vector<2x2x136xf32>
    %c0_12 = arith.constant 0 : index
    %c0_13 = arith.constant 0 : index
    %c1_14 = arith.constant 1 : index
    %c0_15 = arith.constant 0 : index
    %15 = vector.load %arg1[%c0_12, %c0_13, %c1_14, %c0_15] : memref<4x3x3x136xf32, #tpu.memory_space<vmem>>, vector<1x2x2x136xf32>
    %16 = vector.shape_cast %15 : vector<1x2x2x136xf32> to vector<2x2x136xf32>
    %c2 = arith.constant 2 : index
    %c0_16 = arith.constant 0 : index
    %c0_17 = arith.constant 0 : index
    %17 = vector.load %arg2[%c2, %c0_16, %c0_17] : memref<9x1x136xf32, #tpu.memory_space<vmem>>, vector<1x1x136xf32>
    %18 = vector.shape_cast %17 : vector<1x1x136xf32> to vector<1x136xf32>
    %19 = vector.shape_cast %18 : vector<1x136xf32> to vector<1x1x136xf32>
    %20 = vector.broadcast %19 : vector<1x1x136xf32> to vector<2x2x136xf32>
    %21 = arith.mulf %16, %20 : vector<2x2x136xf32>
    %22 = arith.addf %14, %21 : vector<2x2x136xf32>
    %c2_18 = arith.constant 2 : index
    %c0_19 = arith.constant 0 : index
    %c0_20 = arith.constant 0 : index
    %c0_21 = arith.constant 0 : index
    %23 = vector.load %arg1[%c2_18, %c0_19, %c0_20, %c0_21] : memref<4x3x3x136xf32, #tpu.memory_space<vmem>>, vector<1x2x2x136xf32>
    %24 = vector.shape_cast %23 : vector<1x2x2x136xf32> to vector<2x2x136xf32>
    %c3 = arith.constant 3 : index
    %c0_22 = arith.constant 0 : index
    %c0_23 = arith.constant 0 : index
    %25 = vector.load %arg2[%c3, %c0_22, %c0_23] : memref<9x1x136xf32, #tpu.memory_space<vmem>>, vector<1x1x136xf32>
    %26 = vector.shape_cast %25 : vector<1x1x136xf32> to vector<1x136xf32>
    %27 = vector.shape_cast %26 : vector<1x136xf32> to vector<1x1x136xf32>
    %28 = vector.broadcast %27 : vector<1x1x136xf32> to vector<2x2x136xf32>
    %29 = arith.mulf %24, %28 : vector<2x2x136xf32>
    %30 = arith.addf %22, %29 : vector<2x2x136xf32>
    %c3_24 = arith.constant 3 : index
    %c0_25 = arith.constant 0 : index
    %c0_26 = arith.constant 0 : index
    %c0_27 = arith.constant 0 : index
    %31 = vector.load %arg1[%c3_24, %c0_25, %c0_26, %c0_27] : memref<4x3x3x136xf32, #tpu.memory_space<vmem>>, vector<1x2x2x136xf32>
    %32 = vector.shape_cast %31 : vector<1x2x2x136xf32> to vector<2x2x136xf32>
    %c4 = arith.constant 4 : index
    %c0_28 = arith.constant 0 : index
    %c0_29 = arith.constant 0 : index
    %33 = vector.load %arg2[%c4, %c0_28, %c0_29] : memref<9x1x136xf32, #tpu.memory_space<vmem>>, vector<1x1x136xf32>
    %34 = vector.shape_cast %33 : vector<1x1x136xf32> to vector<1x136xf32>
    %35 = vector.shape_cast %34 : vector<1x136xf32> to vector<1x1x136xf32>
    %36 = vector.broadcast %35 : vector<1x1x136xf32> to vector<2x2x136xf32>
    %37 = arith.mulf %32, %36 : vector<2x2x136xf32>
    %38 = arith.addf %30, %37 : vector<2x2x136xf32>
    %c2_30 = arith.constant 2 : index
    %c0_31 = arith.constant 0 : index
    %c1_32 = arith.constant 1 : index
    %c0_33 = arith.constant 0 : index
    %39 = vector.load %arg1[%c2_30, %c0_31, %c1_32, %c0_33] : memref<4x3x3x136xf32, #tpu.memory_space<vmem>>, vector<1x2x2x136xf32>
    %40 = vector.shape_cast %39 : vector<1x2x2x136xf32> to vector<2x2x136xf32>
    %c5 = arith.constant 5 : index
    %c0_34 = arith.constant 0 : index
    %c0_35 = arith.constant 0 : index
    %41 = vector.load %arg2[%c5, %c0_34, %c0_35] : memref<9x1x136xf32, #tpu.memory_space<vmem>>, vector<1x1x136xf32>
    %42 = vector.shape_cast %41 : vector<1x1x136xf32> to vector<1x136xf32>
    %43 = vector.shape_cast %42 : vector<1x136xf32> to vector<1x1x136xf32>
    %44 = vector.broadcast %43 : vector<1x1x136xf32> to vector<2x2x136xf32>
    %45 = arith.mulf %40, %44 : vector<2x2x136xf32>
    %46 = arith.addf %38, %45 : vector<2x2x136xf32>
    %c0_36 = arith.constant 0 : index
    %c1_37 = arith.constant 1 : index
    %c0_38 = arith.constant 0 : index
    %c0_39 = arith.constant 0 : index
    %47 = vector.load %arg1[%c0_36, %c1_37, %c0_38, %c0_39] : memref<4x3x3x136xf32, #tpu.memory_space<vmem>>, vector<1x2x2x136xf32>
    %48 = vector.shape_cast %47 : vector<1x2x2x136xf32> to vector<2x2x136xf32>
    %c6 = arith.constant 6 : index
    %c0_40 = arith.constant 0 : index
    %c0_41 = arith.constant 0 : index
    %49 = vector.load %arg2[%c6, %c0_40, %c0_41] : memref<9x1x136xf32, #tpu.memory_space<vmem>>, vector<1x1x136xf32>
    %50 = vector.shape_cast %49 : vector<1x1x136xf32> to vector<1x136xf32>
    %51 = vector.shape_cast %50 : vector<1x136xf32> to vector<1x1x136xf32>
    %52 = vector.broadcast %51 : vector<1x1x136xf32> to vector<2x2x136xf32>
    %53 = arith.mulf %48, %52 : vector<2x2x136xf32>
    %54 = arith.addf %46, %53 : vector<2x2x136xf32>
    %c1_42 = arith.constant 1 : index
    %c1_43 = arith.constant 1 : index
    %c0_44 = arith.constant 0 : index
    %c0_45 = arith.constant 0 : index
    %55 = vector.load %arg1[%c1_42, %c1_43, %c0_44, %c0_45] : memref<4x3x3x136xf32, #tpu.memory_space<vmem>>, vector<1x2x2x136xf32>
    %56 = vector.shape_cast %55 : vector<1x2x2x136xf32> to vector<2x2x136xf32>
    %c7 = arith.constant 7 : index
    %c0_46 = arith.constant 0 : index
    %c0_47 = arith.constant 0 : index
    %57 = vector.load %arg2[%c7, %c0_46, %c0_47] : memref<9x1x136xf32, #tpu.memory_space<vmem>>, vector<1x1x136xf32>
    %58 = vector.shape_cast %57 : vector<1x1x136xf32> to vector<1x136xf32>
    %59 = vector.shape_cast %58 : vector<1x136xf32> to vector<1x1x136xf32>
    %60 = vector.broadcast %59 : vector<1x1x136xf32> to vector<2x2x136xf32>
    %61 = arith.mulf %56, %60 : vector<2x2x136xf32>
    %62 = arith.addf %54, %61 : vector<2x2x136xf32>
    %c0_48 = arith.constant 0 : index
    %c1_49 = arith.constant 1 : index
    %c1_50 = arith.constant 1 : index
    %c0_51 = arith.constant 0 : index
    %63 = vector.load %arg1[%c0_48, %c1_49, %c1_50, %c0_51] : memref<4x3x3x136xf32, #tpu.memory_space<vmem>>, vector<1x2x2x136xf32>
    %64 = vector.shape_cast %63 : vector<1x2x2x136xf32> to vector<2x2x136xf32>
    %c8 = arith.constant 8 : index
    %c0_52 = arith.constant 0 : index
    %c0_53 = arith.constant 0 : index
    %65 = vector.load %arg2[%c8, %c0_52, %c0_53] : memref<9x1x136xf32, #tpu.memory_space<vmem>>, vector<1x1x136xf32>
    %66 = vector.shape_cast %65 : vector<1x1x136xf32> to vector<1x136xf32>
    %67 = vector.shape_cast %66 : vector<1x136xf32> to vector<1x1x136xf32>
    %68 = vector.broadcast %67 : vector<1x1x136xf32> to vector<2x2x136xf32>
    %69 = arith.mulf %64, %68 : vector<2x2x136xf32>
    %70 = arith.addf %62, %69 : vector<2x2x136xf32>
    %c0_54 = arith.constant 0 : index
    %c0_55 = arith.constant 0 : index
    %c0_56 = arith.constant 0 : index
    %71 = vector.load %arg3[%c0_54, %c0_55, %c0_56] : memref<1x1x136xf32, #tpu.memory_space<vmem>>, vector<1x1x136xf32>
    %72 = vector.shape_cast %71 : vector<1x1x136xf32> to vector<1x136xf32>
    %73 = vector.shape_cast %72 : vector<1x136xf32> to vector<1x1x136xf32>
    %74 = vector.broadcast %73 : vector<1x1x136xf32> to vector<2x2x136xf32>
    %75 = arith.addf %70, %74 : vector<2x2x136xf32>
    %c0_57 = arith.constant 0 : index
    %c0_58 = arith.constant 0 : index
    %c0_59 = arith.constant 0 : index
    %c0_60 = arith.constant 0 : index
    %76 = vector.load %arg4[%c0_57, %c0_58, %c0_59, %c0_60] : memref<1x2x2x136xf32, #tpu.memory_space<vmem>>, vector<1x2x2x136xf32>
    %77 = vector.shape_cast %76 : vector<1x2x2x136xf32> to vector<2x2x136xf32>
    %78 = vector.shape_cast %75 : vector<2x2x136xf32> to vector<1x2x2x136xf32>
    tpu.vector_store %arg4[%c0_57, %c0_58, %c0_59, %c0_60], %78 {strides = array<i32>} : memref<1x2x2x136xf32, #tpu.memory_space<vmem>>, vector<1x2x2x136xf32>,
    return
  }
  func.func @transform_0(%arg0: i32) -> (i32, i32, i32, i32) {
    %c0_i32 = arith.constant 0 : i32
    %c0_i32_0 = arith.constant 0 : i32
    %c0_i32_1 = arith.constant 0 : i32
    %c0_i32_2 = arith.constant 0 : i32
    return %arg0, %c0_i32, %c0_i32_0, %c0_i32_1 : i32, i32, i32, i32
  }
  func.func @transform_1(%arg0: i32) -> (i32, i32, i32) {
    %c0_i32 = arith.constant 0 : i32
    %c0_i32_0 = arith.constant 0 : i32
    %c0_i32_1 = arith.constant 0 : i32
    %c0_i32_2 = arith.constant 0 : i32
    return %c0_i32, %c0_i32_0, %c0_i32_1 : i32, i32, i32
  }
  func.func @transform_2(%arg0: i32) -> (i32, i32, i32) {
    %c0_i32 = arith.constant 0 : i32
    %c0_i32_0 = arith.constant 0 : i32
    %c0_i32_1 = arith.constant 0 : i32
    %c0_i32_2 = arith.constant 0 : i32
    return %c0_i32, %c0_i32_0, %c0_i32_1 : i32, i32, i32
  }
  func.func @transform_3(%arg0: i32) -> (i32, i32, i32, i32) {
    %c0_i32 = arith.constant 0 : i32
    %c0_i32_0 = arith.constant 0 : i32
    %c0_i32_1 = arith.constant 0 : i32
    %c0_i32_2 = arith.constant 0 : i32
    return %arg0, %c0_i32, %c0_i32_0, %c0_i32_1 : i32, i32, i32, i32
  }
}

module attributes {stable_mosaic.version = 11 : i64} {
  func.func @_mm_kernel(%arg0: i32, %arg1: memref<8x136xf32, #tpu.memory_space<vmem>>, %arg2: memref<136x272xf32, #tpu.memory_space<vmem>>, %arg3: memref<1x272xf32, #tpu.memory_space<vmem>>, %arg4: memref<8x272xf32, #tpu.memory_space<vmem>>) attributes {dimension_semantics = [#tpu.dimension_semantics<parallel>], iteration_bounds = array<i64: 1>, scalar_prefetch = 0 : i64, scratch_operands = 0 : i64, tpu.core_type = #tpu.core_type<tc>, window_params = [{transform_indices = @transform_0, window_bounds = array<i64: 8, 136>}, {pipeline_mode = #tpu.pipeline_mode<synchronous>, transform_indices = @transform_1, window_bounds = array<i64: 136, 272>}, {pipeline_mode = #tpu.pipeline_mode<synchronous>, transform_indices = @transform_2, window_bounds = array<i64: 1, 272>}, {transform_indices = @transform_3, window_bounds = array<i64: 8, 272>}]} {
    %c0 = arith.constant 0 : index
    %c0_0 = arith.constant 0 : index
    %0 = vector.load %arg1[%c0, %c0_0] : memref<8x136xf32, #tpu.memory_space<vmem>>, vector<8x136xf32>
    %1 = arith.truncf %0 : vector<8x136xf32> to vector<8x136xbf16>
    %c0_1 = arith.constant 0 : index
    %c0_2 = arith.constant 0 : index
    %2 = vector.load %arg2[%c0_1, %c0_2] : memref<136x272xf32, #tpu.memory_space<vmem>>, vector<136x272xf32>
    %3 = arith.truncf %2 : vector<136x272xf32> to vector<136x272xbf16>
    %cst = arith.constant dense<0.000000e+00> : vector<8x272xf32>
    %4 = tpu.matmul %1, %3, %cst {dimension_numbers = #tpu.dot_dimension_numbers<[1], [0], [0], [1], [0, 0, 1, 1], [], []>} : vector<8x136xbf16>, vector<136x272xbf16>, vector<8x272xf32> -> vector<8x272xf32>
    %c0_3 = arith.constant 0 : index
    %c0_4 = arith.constant 0 : index
    %5 = vector.load %arg3[%c0_3, %c0_4] : memref<1x272xf32, #tpu.memory_space<vmem>>, vector<1x272xf32>
    %6 = vector.broadcast %5 : vector<1x272xf32> to vector<8x272xf32>
    %7 = arith.addf %4, %6 : vector<8x272xf32>
    %cst_5 = arith.constant 0.000000e+00 : f32
    %8 = vector.broadcast %cst_5 : f32 to vector<8x272xf32>
    %9 = arith.maximumf %7, %8 : vector<8x272xf32>
    %c0_6 = arith.constant 0 : index
    %c0_7 = arith.constant 0 : index
    %10 = vector.load %arg4[%c0_6, %c0_7] : memref<8x272xf32, #tpu.memory_space<vmem>>, vector<8x272xf32>
    tpu.vector_store %arg4[%c0_6, %c0_7], %9 {strides = array<i32>} : memref<8x272xf32, #tpu.memory_space<vmem>>, vector<8x272xf32>,
    return
  }
  func.func @transform_0(%arg0: i32) -> (i32, i32) {
    %c0_i32 = arith.constant 0 : i32
    %c0_i32_0 = arith.constant 0 : i32
    return %arg0, %c0_i32 : i32, i32
  }
  func.func @transform_1(%arg0: i32) -> (i32, i32) {
    %c0_i32 = arith.constant 0 : i32
    %c0_i32_0 = arith.constant 0 : i32
    %c0_i32_1 = arith.constant 0 : i32
    return %c0_i32, %c0_i32_0 : i32, i32
  }
  func.func @transform_2(%arg0: i32) -> (i32, i32) {
    %c0_i32 = arith.constant 0 : i32
    %c0_i32_0 = arith.constant 0 : i32
    %c0_i32_1 = arith.constant 0 : i32
    return %c0_i32, %c0_i32_0 : i32, i32
  }
  func.func @transform_3(%arg0: i32) -> (i32, i32) {
    %c0_i32 = arith.constant 0 : i32
    %c0_i32_0 = arith.constant 0 : i32
    return %arg0, %c0_i32 : i32, i32
  }
}

module attributes {stable_mosaic.version = 11 : i64} {
  func.func @_pool3x3_kernel(%arg0: i32, %arg1: memref<4x2x2x544xf32, #tpu.memory_space<vmem>>, %arg2: memref<1x1x1x544xf32, #tpu.memory_space<vmem>>) attributes {dimension_semantics = [#tpu.dimension_semantics<parallel>], iteration_bounds = array<i64: 2>, scalar_prefetch = 0 : i64, scratch_operands = 0 : i64, tpu.core_type = #tpu.core_type<tc>, window_params = [{transform_indices = @transform_0, window_bounds = array<i64: 4, 2, 2, 544>}, {transform_indices = @transform_1, window_bounds = array<i64: 1, 1, 1, 544>}]} {
    %c0 = arith.constant 0 : index
    %c0_0 = arith.constant 0 : index
    %c0_1 = arith.constant 0 : index
    %c0_2 = arith.constant 0 : index
    %0 = vector.load %arg1[%c0, %c0_0, %c0_1, %c0_2] : memref<4x2x2x544xf32, #tpu.memory_space<vmem>>, vector<1x1x1x544xf32>
    %1 = vector.shape_cast %0 : vector<1x1x1x544xf32> to vector<1x1x544xf32>
    %c1 = arith.constant 1 : index
    %c0_3 = arith.constant 0 : index
    %c0_4 = arith.constant 0 : index
    %c0_5 = arith.constant 0 : index
    %2 = vector.load %arg1[%c1, %c0_3, %c0_4, %c0_5] : memref<4x2x2x544xf32, #tpu.memory_space<vmem>>, vector<1x1x1x544xf32>
    %3 = vector.shape_cast %2 : vector<1x1x1x544xf32> to vector<1x1x544xf32>
    %4 = arith.addf %1, %3 : vector<1x1x544xf32>
    %c0_6 = arith.constant 0 : index
    %c0_7 = arith.constant 0 : index
    %c1_8 = arith.constant 1 : index
    %c0_9 = arith.constant 0 : index
    %5 = vector.load %arg1[%c0_6, %c0_7, %c1_8, %c0_9] : memref<4x2x2x544xf32, #tpu.memory_space<vmem>>, vector<1x1x1x544xf32>
    %6 = vector.shape_cast %5 : vector<1x1x1x544xf32> to vector<1x1x544xf32>
    %7 = arith.addf %4, %6 : vector<1x1x544xf32>
    %c2 = arith.constant 2 : index
    %c0_10 = arith.constant 0 : index
    %c0_11 = arith.constant 0 : index
    %c0_12 = arith.constant 0 : index
    %8 = vector.load %arg1[%c2, %c0_10, %c0_11, %c0_12] : memref<4x2x2x544xf32, #tpu.memory_space<vmem>>, vector<1x1x1x544xf32>
    %9 = vector.shape_cast %8 : vector<1x1x1x544xf32> to vector<1x1x544xf32>
    %10 = arith.addf %7, %9 : vector<1x1x544xf32>
    %c3 = arith.constant 3 : index
    %c0_13 = arith.constant 0 : index
    %c0_14 = arith.constant 0 : index
    %c0_15 = arith.constant 0 : index
    %11 = vector.load %arg1[%c3, %c0_13, %c0_14, %c0_15] : memref<4x2x2x544xf32, #tpu.memory_space<vmem>>, vector<1x1x1x544xf32>
    %12 = vector.shape_cast %11 : vector<1x1x1x544xf32> to vector<1x1x544xf32>
    %13 = arith.addf %10, %12 : vector<1x1x544xf32>
    %c2_16 = arith.constant 2 : index
    %c0_17 = arith.constant 0 : index
    %c1_18 = arith.constant 1 : index
    %c0_19 = arith.constant 0 : index
    %14 = vector.load %arg1[%c2_16, %c0_17, %c1_18, %c0_19] : memref<4x2x2x544xf32, #tpu.memory_space<vmem>>, vector<1x1x1x544xf32>
    %15 = vector.shape_cast %14 : vector<1x1x1x544xf32> to vector<1x1x544xf32>
    %16 = arith.addf %13, %15 : vector<1x1x544xf32>
    %c0_20 = arith.constant 0 : index
    %c1_21 = arith.constant 1 : index
    %c0_22 = arith.constant 0 : index
    %c0_23 = arith.constant 0 : index
    %17 = vector.load %arg1[%c0_20, %c1_21, %c0_22, %c0_23] : memref<4x2x2x544xf32, #tpu.memory_space<vmem>>, vector<1x1x1x544xf32>
    %18 = vector.shape_cast %17 : vector<1x1x1x544xf32> to vector<1x1x544xf32>
    %19 = arith.addf %16, %18 : vector<1x1x544xf32>
    %c1_24 = arith.constant 1 : index
    %c1_25 = arith.constant 1 : index
    %c0_26 = arith.constant 0 : index
    %c0_27 = arith.constant 0 : index
    %20 = vector.load %arg1[%c1_24, %c1_25, %c0_26, %c0_27] : memref<4x2x2x544xf32, #tpu.memory_space<vmem>>, vector<1x1x1x544xf32>
    %21 = vector.shape_cast %20 : vector<1x1x1x544xf32> to vector<1x1x544xf32>
    %22 = arith.addf %19, %21 : vector<1x1x544xf32>
    %c0_28 = arith.constant 0 : index
    %c1_29 = arith.constant 1 : index
    %c1_30 = arith.constant 1 : index
    %c0_31 = arith.constant 0 : index
    %23 = vector.load %arg1[%c0_28, %c1_29, %c1_30, %c0_31] : memref<4x2x2x544xf32, #tpu.memory_space<vmem>>, vector<1x1x1x544xf32>
    %24 = vector.shape_cast %23 : vector<1x1x1x544xf32> to vector<1x1x544xf32>
    %25 = arith.addf %22, %24 : vector<1x1x544xf32>
    %cst = arith.constant 0.111111112 : f32
    %26 = vector.broadcast %cst : f32 to vector<1x1x544xf32>
    %27 = arith.mulf %25, %26 : vector<1x1x544xf32>
    %cst_32 = arith.constant 0.000000e+00 : f32
    %28 = vector.broadcast %cst_32 : f32 to vector<1x1x544xf32>
    %29 = arith.maximumf %27, %28 : vector<1x1x544xf32>
    %c0_33 = arith.constant 0 : index
    %c0_34 = arith.constant 0 : index
    %c0_35 = arith.constant 0 : index
    %c0_36 = arith.constant 0 : index
    %30 = vector.load %arg2[%c0_33, %c0_34, %c0_35, %c0_36] : memref<1x1x1x544xf32, #tpu.memory_space<vmem>>, vector<1x1x1x544xf32>
    %31 = vector.shape_cast %30 : vector<1x1x1x544xf32> to vector<1x1x544xf32>
    %32 = vector.shape_cast %29 : vector<1x1x544xf32> to vector<1x1x1x544xf32>
    tpu.vector_store %arg2[%c0_33, %c0_34, %c0_35, %c0_36], %32 {strides = array<i32>} : memref<1x1x1x544xf32, #tpu.memory_space<vmem>>, vector<1x1x1x544xf32>,
    return
  }
  func.func @transform_0(%arg0: i32) -> (i32, i32, i32, i32) {
    %c0_i32 = arith.constant 0 : i32
    %c0_i32_0 = arith.constant 0 : i32
    %c0_i32_1 = arith.constant 0 : i32
    %c0_i32_2 = arith.constant 0 : i32
    return %arg0, %c0_i32, %c0_i32_0, %c0_i32_1 : i32, i32, i32, i32
  }
  func.func @transform_1(%arg0: i32) -> (i32, i32, i32, i32) {
    %c0_i32 = arith.constant 0 : i32
    %c0_i32_0 = arith.constant 0 : i32
    %c0_i32_1 = arith.constant 0 : i32
    %c0_i32_2 = arith.constant 0 : i32
    return %arg0, %c0_i32, %c0_i32_0, %c0_i32_1 : i32, i32, i32, i32
  }
}

module attributes {stable_mosaic.version = 11 : i64} {
  func.func @_mm_kernel(%arg0: i32, %arg1: memref<8x544xf32, #tpu.memory_space<vmem>>, %arg2: memref<544x272xf32, #tpu.memory_space<vmem>>, %arg3: memref<1x272xf32, #tpu.memory_space<vmem>>, %arg4: memref<8x272xf32, #tpu.memory_space<vmem>>) attributes {dimension_semantics = [#tpu.dimension_semantics<parallel>], iteration_bounds = array<i64: 1>, scalar_prefetch = 0 : i64, scratch_operands = 0 : i64, tpu.core_type = #tpu.core_type<tc>, window_params = [{transform_indices = @transform_0, window_bounds = array<i64: 8, 544>}, {pipeline_mode = #tpu.pipeline_mode<synchronous>, transform_indices = @transform_1, window_bounds = array<i64: 544, 272>}, {pipeline_mode = #tpu.pipeline_mode<synchronous>, transform_indices = @transform_2, window_bounds = array<i64: 1, 272>}, {transform_indices = @transform_3, window_bounds = array<i64: 8, 272>}]} {
    %c0 = arith.constant 0 : index
    %c0_0 = arith.constant 0 : index
    %0 = vector.load %arg1[%c0, %c0_0] : memref<8x544xf32, #tpu.memory_space<vmem>>, vector<8x544xf32>
    %1 = arith.truncf %0 : vector<8x544xf32> to vector<8x544xbf16>
    %c0_1 = arith.constant 0 : index
    %c0_2 = arith.constant 0 : index
    %2 = vector.load %arg2[%c0_1, %c0_2] : memref<544x272xf32, #tpu.memory_space<vmem>>, vector<544x272xf32>
    %3 = arith.truncf %2 : vector<544x272xf32> to vector<544x272xbf16>
    %cst = arith.constant dense<0.000000e+00> : vector<8x272xf32>
    %4 = tpu.matmul %1, %3, %cst {dimension_numbers = #tpu.dot_dimension_numbers<[1], [0], [0], [1], [0, 0, 1, 1], [], []>} : vector<8x544xbf16>, vector<544x272xbf16>, vector<8x272xf32> -> vector<8x272xf32>
    %c0_3 = arith.constant 0 : index
    %c0_4 = arith.constant 0 : index
    %5 = vector.load %arg3[%c0_3, %c0_4] : memref<1x272xf32, #tpu.memory_space<vmem>>, vector<1x272xf32>
    %6 = vector.broadcast %5 : vector<1x272xf32> to vector<8x272xf32>
    %7 = arith.addf %4, %6 : vector<8x272xf32>
    %cst_5 = arith.constant 0.000000e+00 : f32
    %8 = vector.broadcast %cst_5 : f32 to vector<8x272xf32>
    %9 = arith.maximumf %7, %8 : vector<8x272xf32>
    %c0_6 = arith.constant 0 : index
    %c0_7 = arith.constant 0 : index
    %10 = vector.load %arg4[%c0_6, %c0_7] : memref<8x272xf32, #tpu.memory_space<vmem>>, vector<8x272xf32>
    tpu.vector_store %arg4[%c0_6, %c0_7], %9 {strides = array<i32>} : memref<8x272xf32, #tpu.memory_space<vmem>>, vector<8x272xf32>,
    return
  }
  func.func @transform_0(%arg0: i32) -> (i32, i32) {
    %c0_i32 = arith.constant 0 : i32
    %c0_i32_0 = arith.constant 0 : i32
    return %arg0, %c0_i32 : i32, i32
  }
  func.func @transform_1(%arg0: i32) -> (i32, i32) {
    %c0_i32 = arith.constant 0 : i32
    %c0_i32_0 = arith.constant 0 : i32
    %c0_i32_1 = arith.constant 0 : i32
    return %c0_i32, %c0_i32_0 : i32, i32
  }
  func.func @transform_2(%arg0: i32) -> (i32, i32) {
    %c0_i32 = arith.constant 0 : i32
    %c0_i32_0 = arith.constant 0 : i32
    %c0_i32_1 = arith.constant 0 : i32
    return %c0_i32, %c0_i32_0 : i32, i32
  }
  func.func @transform_3(%arg0: i32) -> (i32, i32) {
    %c0_i32 = arith.constant 0 : i32
    %c0_i32_0 = arith.constant 0 : i32
    return %arg0, %c0_i32 : i32, i32
  }
}

module attributes {stable_mosaic.version = 11 : i64} {
  func.func @_dw3x3_kernel(%arg0: i32, %arg1: memref<4x2x2x272xf32, #tpu.memory_space<vmem>>, %arg2: memref<9x1x272xf32, #tpu.memory_space<vmem>>, %arg3: memref<1x1x272xf32, #tpu.memory_space<vmem>>, %arg4: memref<1x1x1x272xf32, #tpu.memory_space<vmem>>) attributes {dimension_semantics = [#tpu.dimension_semantics<parallel>], iteration_bounds = array<i64: 2>, scalar_prefetch = 0 : i64, scratch_operands = 0 : i64, tpu.core_type = #tpu.core_type<tc>, window_params = [{transform_indices = @transform_0, window_bounds = array<i64: 4, 2, 2, 272>}, {pipeline_mode = #tpu.pipeline_mode<synchronous>, transform_indices = @transform_1, window_bounds = array<i64: 9, 1, 272>}, {pipeline_mode = #tpu.pipeline_mode<synchronous>, transform_indices = @transform_2, window_bounds = array<i64: 1, 1, 272>}, {transform_indices = @transform_3, window_bounds = array<i64: 1, 1, 1, 272>}]} {
    %c0 = arith.constant 0 : index
    %c0_0 = arith.constant 0 : index
    %c0_1 = arith.constant 0 : index
    %c0_2 = arith.constant 0 : index
    %0 = vector.load %arg1[%c0, %c0_0, %c0_1, %c0_2] : memref<4x2x2x272xf32, #tpu.memory_space<vmem>>, vector<1x1x1x272xf32>
    %1 = vector.shape_cast %0 : vector<1x1x1x272xf32> to vector<1x1x272xf32>
    %c0_3 = arith.constant 0 : index
    %c0_4 = arith.constant 0 : index
    %c0_5 = arith.constant 0 : index
    %2 = vector.load %arg2[%c0_3, %c0_4, %c0_5] : memref<9x1x272xf32, #tpu.memory_space<vmem>>, vector<1x1x272xf32>
    %3 = vector.shape_cast %2 : vector<1x1x272xf32> to vector<1x272xf32>
    %4 = vector.shape_cast %3 : vector<1x272xf32> to vector<1x1x272xf32>
    %5 = arith.mulf %1, %4 : vector<1x1x272xf32>
    %c1 = arith.constant 1 : index
    %c0_6 = arith.constant 0 : index
    %c0_7 = arith.constant 0 : index
    %c0_8 = arith.constant 0 : index
    %6 = vector.load %arg1[%c1, %c0_6, %c0_7, %c0_8] : memref<4x2x2x272xf32, #tpu.memory_space<vmem>>, vector<1x1x1x272xf32>
    %7 = vector.shape_cast %6 : vector<1x1x1x272xf32> to vector<1x1x272xf32>
    %c1_9 = arith.constant 1 : index
    %c0_10 = arith.constant 0 : index
    %c0_11 = arith.constant 0 : index
    %8 = vector.load %arg2[%c1_9, %c0_10, %c0_11] : memref<9x1x272xf32, #tpu.memory_space<vmem>>, vector<1x1x272xf32>
    %9 = vector.shape_cast %8 : vector<1x1x272xf32> to vector<1x272xf32>
    %10 = vector.shape_cast %9 : vector<1x272xf32> to vector<1x1x272xf32>
    %11 = arith.mulf %7, %10 : vector<1x1x272xf32>
    %12 = arith.addf %5, %11 : vector<1x1x272xf32>
    %c0_12 = arith.constant 0 : index
    %c0_13 = arith.constant 0 : index
    %c1_14 = arith.constant 1 : index
    %c0_15 = arith.constant 0 : index
    %13 = vector.load %arg1[%c0_12, %c0_13, %c1_14, %c0_15] : memref<4x2x2x272xf32, #tpu.memory_space<vmem>>, vector<1x1x1x272xf32>
    %14 = vector.shape_cast %13 : vector<1x1x1x272xf32> to vector<1x1x272xf32>
    %c2 = arith.constant 2 : index
    %c0_16 = arith.constant 0 : index
    %c0_17 = arith.constant 0 : index
    %15 = vector.load %arg2[%c2, %c0_16, %c0_17] : memref<9x1x272xf32, #tpu.memory_space<vmem>>, vector<1x1x272xf32>
    %16 = vector.shape_cast %15 : vector<1x1x272xf32> to vector<1x272xf32>
    %17 = vector.shape_cast %16 : vector<1x272xf32> to vector<1x1x272xf32>
    %18 = arith.mulf %14, %17 : vector<1x1x272xf32>
    %19 = arith.addf %12, %18 : vector<1x1x272xf32>
    %c2_18 = arith.constant 2 : index
    %c0_19 = arith.constant 0 : index
    %c0_20 = arith.constant 0 : index
    %c0_21 = arith.constant 0 : index
    %20 = vector.load %arg1[%c2_18, %c0_19, %c0_20, %c0_21] : memref<4x2x2x272xf32, #tpu.memory_space<vmem>>, vector<1x1x1x272xf32>
    %21 = vector.shape_cast %20 : vector<1x1x1x272xf32> to vector<1x1x272xf32>
    %c3 = arith.constant 3 : index
    %c0_22 = arith.constant 0 : index
    %c0_23 = arith.constant 0 : index
    %22 = vector.load %arg2[%c3, %c0_22, %c0_23] : memref<9x1x272xf32, #tpu.memory_space<vmem>>, vector<1x1x272xf32>
    %23 = vector.shape_cast %22 : vector<1x1x272xf32> to vector<1x272xf32>
    %24 = vector.shape_cast %23 : vector<1x272xf32> to vector<1x1x272xf32>
    %25 = arith.mulf %21, %24 : vector<1x1x272xf32>
    %26 = arith.addf %19, %25 : vector<1x1x272xf32>
    %c3_24 = arith.constant 3 : index
    %c0_25 = arith.constant 0 : index
    %c0_26 = arith.constant 0 : index
    %c0_27 = arith.constant 0 : index
    %27 = vector.load %arg1[%c3_24, %c0_25, %c0_26, %c0_27] : memref<4x2x2x272xf32, #tpu.memory_space<vmem>>, vector<1x1x1x272xf32>
    %28 = vector.shape_cast %27 : vector<1x1x1x272xf32> to vector<1x1x272xf32>
    %c4 = arith.constant 4 : index
    %c0_28 = arith.constant 0 : index
    %c0_29 = arith.constant 0 : index
    %29 = vector.load %arg2[%c4, %c0_28, %c0_29] : memref<9x1x272xf32, #tpu.memory_space<vmem>>, vector<1x1x272xf32>
    %30 = vector.shape_cast %29 : vector<1x1x272xf32> to vector<1x272xf32>
    %31 = vector.shape_cast %30 : vector<1x272xf32> to vector<1x1x272xf32>
    %32 = arith.mulf %28, %31 : vector<1x1x272xf32>
    %33 = arith.addf %26, %32 : vector<1x1x272xf32>
    %c2_30 = arith.constant 2 : index
    %c0_31 = arith.constant 0 : index
    %c1_32 = arith.constant 1 : index
    %c0_33 = arith.constant 0 : index
    %34 = vector.load %arg1[%c2_30, %c0_31, %c1_32, %c0_33] : memref<4x2x2x272xf32, #tpu.memory_space<vmem>>, vector<1x1x1x272xf32>
    %35 = vector.shape_cast %34 : vector<1x1x1x272xf32> to vector<1x1x272xf32>
    %c5 = arith.constant 5 : index
    %c0_34 = arith.constant 0 : index
    %c0_35 = arith.constant 0 : index
    %36 = vector.load %arg2[%c5, %c0_34, %c0_35] : memref<9x1x272xf32, #tpu.memory_space<vmem>>, vector<1x1x272xf32>
    %37 = vector.shape_cast %36 : vector<1x1x272xf32> to vector<1x272xf32>
    %38 = vector.shape_cast %37 : vector<1x272xf32> to vector<1x1x272xf32>
    %39 = arith.mulf %35, %38 : vector<1x1x272xf32>
    %40 = arith.addf %33, %39 : vector<1x1x272xf32>
    %c0_36 = arith.constant 0 : index
    %c1_37 = arith.constant 1 : index
    %c0_38 = arith.constant 0 : index
    %c0_39 = arith.constant 0 : index
    %41 = vector.load %arg1[%c0_36, %c1_37, %c0_38, %c0_39] : memref<4x2x2x272xf32, #tpu.memory_space<vmem>>, vector<1x1x1x272xf32>
    %42 = vector.shape_cast %41 : vector<1x1x1x272xf32> to vector<1x1x272xf32>
    %c6 = arith.constant 6 : index
    %c0_40 = arith.constant 0 : index
    %c0_41 = arith.constant 0 : index
    %43 = vector.load %arg2[%c6, %c0_40, %c0_41] : memref<9x1x272xf32, #tpu.memory_space<vmem>>, vector<1x1x272xf32>
    %44 = vector.shape_cast %43 : vector<1x1x272xf32> to vector<1x272xf32>
    %45 = vector.shape_cast %44 : vector<1x272xf32> to vector<1x1x272xf32>
    %46 = arith.mulf %42, %45 : vector<1x1x272xf32>
    %47 = arith.addf %40, %46 : vector<1x1x272xf32>
    %c1_42 = arith.constant 1 : index
    %c1_43 = arith.constant 1 : index
    %c0_44 = arith.constant 0 : index
    %c0_45 = arith.constant 0 : index
    %48 = vector.load %arg1[%c1_42, %c1_43, %c0_44, %c0_45] : memref<4x2x2x272xf32, #tpu.memory_space<vmem>>, vector<1x1x1x272xf32>
    %49 = vector.shape_cast %48 : vector<1x1x1x272xf32> to vector<1x1x272xf32>
    %c7 = arith.constant 7 : index
    %c0_46 = arith.constant 0 : index
    %c0_47 = arith.constant 0 : index
    %50 = vector.load %arg2[%c7, %c0_46, %c0_47] : memref<9x1x272xf32, #tpu.memory_space<vmem>>, vector<1x1x272xf32>
    %51 = vector.shape_cast %50 : vector<1x1x272xf32> to vector<1x272xf32>
    %52 = vector.shape_cast %51 : vector<1x272xf32> to vector<1x1x272xf32>
    %53 = arith.mulf %49, %52 : vector<1x1x272xf32>
    %54 = arith.addf %47, %53 : vector<1x1x272xf32>
    %c0_48 = arith.constant 0 : index
    %c1_49 = arith.constant 1 : index
    %c1_50 = arith.constant 1 : index
    %c0_51 = arith.constant 0 : index
    %55 = vector.load %arg1[%c0_48, %c1_49, %c1_50, %c0_51] : memref<4x2x2x272xf32, #tpu.memory_space<vmem>>, vector<1x1x1x272xf32>
    %56 = vector.shape_cast %55 : vector<1x1x1x272xf32> to vector<1x1x272xf32>
    %c8 = arith.constant 8 : index
    %c0_52 = arith.constant 0 : index
    %c0_53 = arith.constant 0 : index
    %57 = vector.load %arg2[%c8, %c0_52, %c0_53] : memref<9x1x272xf32, #tpu.memory_space<vmem>>, vector<1x1x272xf32>
    %58 = vector.shape_cast %57 : vector<1x1x272xf32> to vector<1x272xf32>
    %59 = vector.shape_cast %58 : vector<1x272xf32> to vector<1x1x272xf32>
    %60 = arith.mulf %56, %59 : vector<1x1x272xf32>
    %61 = arith.addf %54, %60 : vector<1x1x272xf32>
    %c0_54 = arith.constant 0 : index
    %c0_55 = arith.constant 0 : index
    %c0_56 = arith.constant 0 : index
    %62 = vector.load %arg3[%c0_54, %c0_55, %c0_56] : memref<1x1x272xf32, #tpu.memory_space<vmem>>, vector<1x1x272xf32>
    %63 = vector.shape_cast %62 : vector<1x1x272xf32> to vector<1x272xf32>
    %64 = vector.shape_cast %63 : vector<1x272xf32> to vector<1x1x272xf32>
    %65 = arith.addf %61, %64 : vector<1x1x272xf32>
    %c0_57 = arith.constant 0 : index
    %c0_58 = arith.constant 0 : index
    %c0_59 = arith.constant 0 : index
    %c0_60 = arith.constant 0 : index
    %66 = vector.load %arg4[%c0_57, %c0_58, %c0_59, %c0_60] : memref<1x1x1x272xf32, #tpu.memory_space<vmem>>, vector<1x1x1x272xf32>
    %67 = vector.shape_cast %66 : vector<1x1x1x272xf32> to vector<1x1x272xf32>
    %68 = vector.shape_cast %65 : vector<1x1x272xf32> to vector<1x1x1x272xf32>
    tpu.vector_store %arg4[%c0_57, %c0_58, %c0_59, %c0_60], %68 {strides = array<i32>} : memref<1x1x1x272xf32, #tpu.memory_space<vmem>>, vector<1x1x1x272xf32>,
    return
  }
  func.func @transform_0(%arg0: i32) -> (i32, i32, i32, i32) {
    %c0_i32 = arith.constant 0 : i32
    %c0_i32_0 = arith.constant 0 : i32
    %c0_i32_1 = arith.constant 0 : i32
    %c0_i32_2 = arith.constant 0 : i32
    return %arg0, %c0_i32, %c0_i32_0, %c0_i32_1 : i32, i32, i32, i32
  }
  func.func @transform_1(%arg0: i32) -> (i32, i32, i32) {
    %c0_i32 = arith.constant 0 : i32
    %c0_i32_0 = arith.constant 0 : i32
    %c0_i32_1 = arith.constant 0 : i32
    %c0_i32_2 = arith.constant 0 : i32
    return %c0_i32, %c0_i32_0, %c0_i32_1 : i32, i32, i32
  }
  func.func @transform_2(%arg0: i32) -> (i32, i32, i32) {
    %c0_i32 = arith.constant 0 : i32
    %c0_i32_0 = arith.constant 0 : i32
    %c0_i32_1 = arith.constant 0 : i32
    %c0_i32_2 = arith.constant 0 : i32
    return %c0_i32, %c0_i32_0, %c0_i32_1 : i32, i32, i32
  }
  func.func @transform_3(%arg0: i32) -> (i32, i32, i32, i32) {
    %c0_i32 = arith.constant 0 : i32
    %c0_i32_0 = arith.constant 0 : i32
    %c0_i32_1 = arith.constant 0 : i32
    %c0_i32_2 = arith.constant 0 : i32
    return %arg0, %c0_i32, %c0_i32_0, %c0_i32_1 : i32, i32, i32, i32
  }
}

module attributes {stable_mosaic.version = 11 : i64} {
  func.func @_mm_kernel(%arg0: i32, %arg1: memref<2x272xf32, #tpu.memory_space<vmem>>, %arg2: memref<272x544xf32, #tpu.memory_space<vmem>>, %arg3: memref<1x544xf32, #tpu.memory_space<vmem>>, %arg4: memref<2x544xf32, #tpu.memory_space<vmem>>) attributes {dimension_semantics = [#tpu.dimension_semantics<parallel>], iteration_bounds = array<i64: 1>, scalar_prefetch = 0 : i64, scratch_operands = 0 : i64, tpu.core_type = #tpu.core_type<tc>, window_params = [{transform_indices = @transform_0, window_bounds = array<i64: 2, 272>}, {pipeline_mode = #tpu.pipeline_mode<synchronous>, transform_indices = @transform_1, window_bounds = array<i64: 272, 544>}, {pipeline_mode = #tpu.pipeline_mode<synchronous>, transform_indices = @transform_2, window_bounds = array<i64: 1, 544>}, {transform_indices = @transform_3, window_bounds = array<i64: 2, 544>}]} {
    %c0 = arith.constant 0 : index
    %c0_0 = arith.constant 0 : index
    %0 = vector.load %arg1[%c0, %c0_0] : memref<2x272xf32, #tpu.memory_space<vmem>>, vector<2x272xf32>
    %1 = arith.truncf %0 : vector<2x272xf32> to vector<2x272xbf16>
    %c0_1 = arith.constant 0 : index
    %c0_2 = arith.constant 0 : index
    %2 = vector.load %arg2[%c0_1, %c0_2] : memref<272x544xf32, #tpu.memory_space<vmem>>, vector<272x544xf32>
    %3 = arith.truncf %2 : vector<272x544xf32> to vector<272x544xbf16>
    %cst = arith.constant dense<0.000000e+00> : vector<2x544xf32>
    %4 = tpu.matmul %1, %3, %cst {dimension_numbers = #tpu.dot_dimension_numbers<[1], [0], [0], [1], [0, 0, 1, 1], [], []>} : vector<2x272xbf16>, vector<272x544xbf16>, vector<2x544xf32> -> vector<2x544xf32>
    %c0_3 = arith.constant 0 : index
    %c0_4 = arith.constant 0 : index
    %5 = vector.load %arg3[%c0_3, %c0_4] : memref<1x544xf32, #tpu.memory_space<vmem>>, vector<1x544xf32>
    %6 = vector.broadcast %5 : vector<1x544xf32> to vector<2x544xf32>
    %7 = arith.addf %4, %6 : vector<2x544xf32>
    %cst_5 = arith.constant 0.000000e+00 : f32
    %8 = vector.broadcast %cst_5 : f32 to vector<2x544xf32>
    %9 = arith.maximumf %7, %8 : vector<2x544xf32>
    %c0_6 = arith.constant 0 : index
    %c0_7 = arith.constant 0 : index
    %10 = vector.load %arg4[%c0_6, %c0_7] : memref<2x544xf32, #tpu.memory_space<vmem>>, vector<2x544xf32>
    tpu.vector_store %arg4[%c0_6, %c0_7], %9 {strides = array<i32>} : memref<2x544xf32, #tpu.memory_space<vmem>>, vector<2x544xf32>,
    return
  }
  func.func @transform_0(%arg0: i32) -> (i32, i32) {
    %c0_i32 = arith.constant 0 : i32
    %c0_i32_0 = arith.constant 0 : i32
    return %arg0, %c0_i32 : i32, i32
  }
  func.func @transform_1(%arg0: i32) -> (i32, i32) {
    %c0_i32 = arith.constant 0 : i32
    %c0_i32_0 = arith.constant 0 : i32
    %c0_i32_1 = arith.constant 0 : i32
    return %c0_i32, %c0_i32_0 : i32, i32
  }
  func.func @transform_2(%arg0: i32) -> (i32, i32) {
    %c0_i32 = arith.constant 0 : i32
    %c0_i32_0 = arith.constant 0 : i32
    %c0_i32_1 = arith.constant 0 : i32
    return %c0_i32, %c0_i32_0 : i32, i32
  }
  func.func @transform_3(%arg0: i32) -> (i32, i32) {
    %c0_i32 = arith.constant 0 : i32
    %c0_i32_0 = arith.constant 0 : i32
    return %arg0, %c0_i32 : i32, i32
  }
}

</mosaic_0001>

<bundles_post_ra>
// kernel: _lambda_.17
= control target key start
LH: loop header
LB: loop body
LE: loop exit
PB: predicated region body
PF: predicated region fallthrough
CT: control target
= control target key end

     0   :  { %vm221_vm0 = vcmask 1044480   ;;  %vm222_vm1 = vcmask 1045504   ;;  %v790_v2 = vmov 65535   ;;  %vm124_vm2 = vcmask 220160   ;;  %s1372_s1 = inlined_call_operand.vmem [shape: f32[27,24], index: 1, kind: input, shape index: {}]   ;;  %s1373_s0 = inlined_call_operand.vmem [shape: f32[512,27], index: 0, kind: input, shape index: {}]   ;;  %s1374_s2 = inlined_call_operand.vmem [shape: f32[1,24], index: 2, kind: input, shape index: {}]   ;;  %s1375_s3 = inlined_call_operand.vmem [shape: f32[512,24], index: 3, kind: output, shape index: {}]  }
   0x1   :  { %v113_v0 = vld [vmem:[%s1372_s1 + $0x10] sm:$0xff]  ;;  %v114_v1 = vld [vmem:[%s1372_s1 + $0x18] sm:$0x7]  ;;  %v223_v3 = vsel %vm221_vm0, 4294967295, %v790_v2  ;;  %v111_v4 = vld [vmem:[%s1372_s1] sm:$0xff]  ;;  %vm581_vm3 = vcmask 195584  }
   0x2   :  { %v116_v5 = vpack.c.bf16 %v114_v1, %v113_v0  ;;  %v224_v6 = vsel %vm222_vm1, %v223_v3, 0  ;;  %v112_v7 = vld [vmem:[%s1372_s1 + $0x8] sm:$0xff]  ;;  %v15_v8 = vld [vmem:[%s1373_s0] sm:$0xff]  ;;  %v17_v16 = vld [vmem:[%s1373_s0 + $0x10] sm:$0xff] }
   0x3   :  { %v16_v9 = vld [vmem:[%s1373_s0 + $0x8] sm:$0xff]  ;;  %v47_v11 = vld [vmem:[%s1373_s0 + $0x100] sm:$0xff]  ;;  %v115_v14 = vpack.c.bf16 %v112_v7, %v111_v4  ;;  %v18_v17 = vld [vmem:[%s1373_s0 + $0x18] sm:$0xff] }
   0x4   :  { %v79_v10 = vpack.c.bf16 %v16_v9, %v15_v8  ;;  %v48_v12 = vld [vmem:[%s1373_s0 + $0x108] sm:$0xff]  ;;  %v226_v13 = vand.u32 %v224_v6, %v116_v5  ;;  %v49_v18 = vld [vmem:[%s1373_s0 + $0x110] sm:$0xff]  ;;  %v50_v19 = vld [vmem:[%s1373_s0 + $0x118] sm:$0xff]  ;;  %v80_v24 = vpack.c.bf16 %v18_v17, %v17_v16 }
   0x5   :  { %v95_v15 = vpack.c.bf16 %v48_v12, %v47_v11  ;;  %v19_v20 = vld [vmem:[%s1373_s0 + $0x20] sm:$0xff]  ;;  %v20_v21 = vld [vmem:[%s1373_s0 + $0x28] sm:$0xff]  ;;  %v96_v25 = vpack.c.bf16 %v50_v19, %v49_v18  ;;  %v21_v28 = vld [vmem:[%s1373_s0 + $0x30] sm:$0xff] }
   0x6   :  { %721 = vmatprep.mubr.msk.bf16.mxu0 %vm124_vm2, %v79_v10  ;;  %717 = vmatprep.subr.bf16.mxu0 %v226_v13  ;;  %v51_v22 = vld [vmem:[%s1373_s0 + $0x120] sm:$0xff]  ;;  %v52_v23 = vld [vmem:[%s1373_s0 + $0x128] sm:$0xff]  ;;  %v81_v26 = vpack.c.bf16 %v20_v21, %v19_v20  ;;  %v22_v29 = vld [vmem:[%s1373_s0 + $0x38] sm:$0xff] }
   0x7   :  { %785 = vmatprep.subr.bf16.mxu1 %v226_v13  ;;  %718 = vmatpush3.bf16.msra.mxu0 %v226_v13  ;;  %v97_v27 = vpack.c.bf16 %v52_v23, %v51_v22  ;;  %v53_v30 = vld [vmem:[%s1373_s0 + $0x130] sm:$0xff]  ;;  %v54_v31 = vld [vmem:[%s1373_s0 + $0x138] sm:$0xff]  ;;  %v23_v32 = vld [vmem:[%s1373_s0 + $0x40] sm:$0xff]  ;;  %v82_v36 = vpack.c.bf16 %v22_v29, %v21_v28 }
   0x8   :  { %787 = vmatpush3.bf16.msra.mxu1 %v226_v13  ;;  %719 = vmatprep.subr.bf16.mxu0 %v115_v14  ;;  %v24_v33 = vld [vmem:[%s1373_s0 + $0x48] sm:$0xff]  ;;  %v55_v34 = vld [vmem:[%s1373_s0 + $0x140] sm:$0xff]  ;;  %v98_v37 = vpack.c.bf16 %v54_v31, %v53_v30  ;;  %v25_v40 = vld [vmem:[%s1373_s0 + $0x50] sm:$0xff] }
   0x9   :  { %786 = vmatprep.subr.bf16.mxu1 %v115_v14  ;;  %753 = vmatprep.mubr.msk.bf16.mxu1 %vm124_vm2, %v95_v15  ;;  %v56_v35 = vld [vmem:[%s1373_s0 + $0x148] sm:$0xff]  ;;  %v83_v38 = vpack.c.bf16 %v24_v33, %v23_v32  ;;  %v26_v41 = vld [vmem:[%s1373_s0 + $0x58] sm:$0xff]  ;;  %v57_v42 = vld [vmem:[%s1373_s0 + $0x150] sm:$0xff] }
   0xa   :  { %v99_v39 = vpack.c.bf16 %v56_v35, %v55_v34  ;;  %v58_v43 = vld [vmem:[%s1373_s0 + $0x158] sm:$0xff]  ;;  %v27_v44 = vld [vmem:[%s1373_s0 + $0x60] sm:$0xff]  ;;  %v28_v45 = vld [vmem:[%s1373_s0 + $0x68] sm:$0xff]  ;;  %v84_v48 = vpack.c.bf16 %v26_v41, %v25_v40 }
   0xb   :  { %720 = vmatpush3.bf16.msra.mxu0 %v115_v14  ;;  %v59_v46 = vld [vmem:[%s1373_s0 + $0x160] sm:$0xff]  ;;  %v60_v47 = vld [vmem:[%s1373_s0 + $0x168] sm:$0xff]  ;;  %v100_v49 = vpack.c.bf16 %v58_v43, %v57_v42  ;;  %v85_v50 = vpack.c.bf16 %v28_v45, %v27_v44  ;;  %v29_v52 = vld [vmem:[%s1373_s0 + $0x70] sm:$0xff] }
   0xc   :  { %788 = vmatpush3.bf16.msra.mxu1 %v115_v14  ;;  %v101_v51 = vpack.c.bf16 %v60_v47, %v59_v46  ;;  %v30_v53 = vld [vmem:[%s1373_s0 + $0x78] sm:$0xff]  ;;  %v61_v54 = vld [vmem:[%s1373_s0 + $0x170] sm:$0xff]  ;;  %v31_v56 = vld [vmem:[%s1373_s0 + $0x80] sm:$0xff] }
   0xd   :  { %v62_v55 = vld [vmem:[%s1373_s0 + $0x178] sm:$0xff]  ;;  %v32_v57 = vld [vmem:[%s1373_s0 + $0x88] sm:$0xff]  ;;  %v63_v58 = vld [vmem:[%s1373_s0 + $0x180] sm:$0xff]  ;;  %v86_v60 = vpack.c.bf16 %v30_v53, %v29_v52 }
   0xe   :  { %722 = vmatmul.mubr.msk.bf16.vlgmr.msra.gmra.mxu0 %vm124_vm2, %v80_v24  ;;  %v64_v59 = vld [vmem:[%s1373_s0 + $0x188] sm:$0xff]  ;;  %v102_v61 = vpack.c.bf16 %v62_v55, %v61_v54  ;;  %v87_v62 = vpack.c.bf16 %v32_v57, %v31_v56  ;;  %v33_v0 = vld [vmem:[%s1373_s0 + $0x90] sm:$0xff]  ;;  %v34_v1 = vld [vmem:[%s1373_s0 + $0x98] sm:$0xff] }
   0xf   :  { %754 = vmatmul.mubr.msk.bf16.vlgmr.msra.gmra.mxu1 %vm124_vm2, %v96_v25  ;;  %725 = vmatprep.mubr.msk.bf16.mxu0 %vm124_vm2, %v81_v26  ;;  %v103_v63 = vpack.c.bf16 %v64_v59, %v63_v58  ;;  %v65_v2 = vld [vmem:[%s1373_s0 + $0x190] sm:$0xff]  ;;  %v66_v3 = vld [vmem:[%s1373_s0 + $0x198] sm:$0xff]  ;;  %v35_v4 = vld [vmem:[%s1373_s0 + $0xa0] sm:$0xff]  ;;  %v88_v8 = vpack.c.bf16 %v34_v1, %v33_v0 }
  0x10   :  { %757 = vmatprep.mubr.msk.bf16.mxu1 %vm124_vm2, %v97_v27  ;;  %v36_v5 = vld [vmem:[%s1373_s0 + $0xa8] sm:$0xff]  ;;  %v67_v6 = vld [vmem:[%s1373_s0 + $0x1a0] sm:$0xff]  ;;  %v104_v9 = vpack.c.bf16 %v66_v3, %v65_v2  ;;  %v37_v12 = vld [vmem:[%s1373_s0 + $0xb0] sm:$0xff] }
  0x11   :  { %v68_v7 = vld [vmem:[%s1373_s0 + $0x1a8] sm:$0xff]  ;;  %v89_v10 = vpack.c.bf16 %v36_v5, %v35_v4  ;;  %v38_v13 = vld [vmem:[%s1373_s0 + $0xb8] sm:$0xff]  ;;  %v69_v14 = vld [vmem:[%s1373_s0 + $0x1b0] sm:$0xff] }
  0x12   :  { %v105_v11 = vpack.c.bf16 %v68_v7, %v67_v6  ;;  %v70_v15 = vld [vmem:[%s1373_s0 + $0x1b8] sm:$0xff]  ;;  %v39_v16 = vld [vmem:[%s1373_s0 + $0xc0] sm:$0xff]  ;;  %v40_v17 = vld [vmem:[%s1373_s0 + $0xc8] sm:$0xff]  ;;  %v90_v20 = vpack.c.bf16 %v38_v13, %v37_v12 }
  0x13   :  { %v71_v18 = vld [vmem:[%s1373_s0 + $0x1c0] sm:$0xff]  ;;  %v72_v19 = vld [vmem:[%s1373_s0 + $0x1c8] sm:$0xff]  ;;  %v106_v21 = vpack.c.bf16 %v70_v15, %v69_v14  ;;  %v91_v22 = vpack.c.bf16 %v40_v17, %v39_v16  ;;  %v41_v24 = vld [vmem:[%s1373_s0 + $0xd0] sm:$0xff] }
  0x14   :  { %v107_v23 = vpack.c.bf16 %v72_v19, %v71_v18  ;;  %v42_v25 = vld [vmem:[%s1373_s0 + $0xd8] sm:$0xff]  ;;  %v73_v26 = vld [vmem:[%s1373_s0 + $0x1d0] sm:$0xff]  ;;  %v43_v28 = vld [vmem:[%s1373_s0 + $0xe0] sm:$0xff] }
  0x15   :  { %v74_v27 = vld [vmem:[%s1373_s0 + $0x1d8] sm:$0xff]  ;;  %v44_v29 = vld [vmem:[%s1373_s0 + $0xe8] sm:$0xff]  ;;  %v75_v30 = vld [vmem:[%s1373_s0 + $0x1e0] sm:$0xff]  ;;  %v92_v32 = vpack.c.bf16 %v42_v25, %v41_v24 }
  0x16   :  { %726 = vmatmul.mubr.msk.bf16.gmra.mxu0 %vm124_vm2, %v82_v36  ;;  %v76_v31 = vld [vmem:[%s1373_s0 + $0x1e8] sm:$0xff]  ;;  %v108_v33 = vpack.c.bf16 %v74_v27, %v73_v26  ;;  %v93_v34 = vpack.c.bf16 %v44_v29, %v43_v28  ;;  %v45_v36 = vld [vmem:[%s1373_s0 + $0xf0] sm:$0xff]  ;;  %v1050_v42 = vld [vmem:[%s1374_s2] ss:$0 sm:$0xff] }
  0x17   :  { %758 = vmatmul.mubr.msk.bf16.gmra.mxu1 %vm124_vm2, %v98_v37  ;;  %729 = vmatprep.mubr.msk.bf16.mxu0 %vm124_vm2, %v83_v38  ;;  %v109_v35 = vpack.c.bf16 %v76_v31, %v75_v30  ;;  %v46_v37 = vld [vmem:[%s1373_s0 + $0xf8] sm:$0xff]  ;;  %v77_v38 = vld [vmem:[%s1373_s0 + $0x1f0] sm:$0xff] }
  0x18   :  { %761 = vmatprep.mubr.msk.bf16.mxu1 %vm124_vm2, %v99_v39  ;;  %v78_v39 = vld [vmem:[%s1373_s0 + $0x1f8] sm:$0xff]  ;;  %v94_v40 = vpack.c.bf16 %v46_v37, %v45_v36 }
  0x19   :  { %v110_v41 = vpack.c.bf16 %v78_v39, %v77_v38 }
  0x1e   :  { %730 = vmatmul.mubr.msk.bf16.gmra.mxu0 %vm124_vm2, %v84_v48 }
  0x1f   :  { %762 = vmatmul.mubr.msk.bf16.gmra.mxu1 %vm124_vm2, %v100_v49  ;;  %733 = vmatprep.mubr.msk.bf16.mxu0 %vm124_vm2, %v85_v50 }
  0x20   :  { %765 = vmatprep.mubr.msk.bf16.mxu1 %vm124_vm2, %v101_v51 }
  0x26   :  { %734 = vmatmul.mubr.msk.bf16.gmra.mxu0 %vm124_vm2, %v86_v60 }
  0x27   :  { %766 = vmatmul.mubr.msk.bf16.gmra.mxu1 %vm124_vm2, %v102_v61  ;;  %737 = vmatprep.mubr.msk.bf16.mxu0 %vm124_vm2, %v87_v62 }
  0x28   :  { %769 = vmatprep.mubr.msk.bf16.mxu1 %vm124_vm2, %v103_v63 }
  0x2e   :  { %738 = vmatmul.mubr.msk.bf16.gmra.mxu0 %vm124_vm2, %v88_v8 }
  0x2f   :  { %770 = vmatmul.mubr.msk.bf16.gmra.mxu1 %vm124_vm2, %v104_v9  ;;  %741 = vmatprep.mubr.msk.bf16.mxu0 %vm124_vm2, %v89_v10 }
  0x30   :  { %773 = vmatprep.mubr.msk.bf16.mxu1 %vm124_vm2, %v105_v11 }
  0x36   :  { %742 = vmatmul.mubr.msk.bf16.gmra.mxu0 %vm124_vm2, %v90_v20 }
  0x37   :  { %774 = vmatmul.mubr.msk.bf16.gmra.mxu1 %vm124_vm2, %v106_v21  ;;  %745 = vmatprep.mubr.msk.bf16.mxu0 %vm124_vm2, %v91_v22 }
  0x38   :  { %777 = vmatprep.mubr.msk.bf16.mxu1 %vm124_vm2, %v107_v23 }
  0x3e   :  { %746 = vmatmul.mubr.msk.bf16.gmra.mxu0 %vm124_vm2, %v92_v32 }
  0x3f   :  { %778 = vmatmul.mubr.msk.bf16.gmra.mxu1 %vm124_vm2, %v108_v33  ;;  %749 = vmatprep.mubr.msk.bf16.mxu0 %vm124_vm2, %v93_v34 }
  0x40   :  { %781 = vmatprep.mubr.msk.bf16.mxu1 %vm124_vm2, %v109_v35 }
  0x46   :  { %750 = vmatmul.mubr.msk.bf16.gmra.mxu0 %vm124_vm2, %v94_v40 }
  0x47   :  { %782 = vmatmul.mubr.msk.bf16.gmra.mxu1 %vm124_vm2, %v110_v41 }
  0xce   :  { %v723_v43 = vpop.f32.mrf.mxu0 }
  0xcf   :  { %v755_v44 = vpop.f32.mrf.mxu1  ;;  %v271_v45 = vadd.f32 %v723_v43, %v1050_v42 }
  0xd0   :  { %v399_v46 = vadd.f32 %v755_v44, %v1050_v42  ;;  %v262_v47 = vpop.f32.mrf.mxu0 }
  0xd1   :  { %v390_v48 = vpop.f32.mrf.mxu1  ;;  %v519_v49 = vmax.f32 %v271_v45, 0.0  ;;  %v263_v51 = vadd.f32 %v1050_v42, %v262_v47 }
  0xd2   :  { %v551_v50 = vmax.f32 %v399_v46, 0.0  ;;  %v391_v52 = vadd.f32 %v1050_v42, %v390_v48  ;;  %v724_v53 = vpop.f32.mrf.mxu0 }
  0xd3   :  { %v756_v54 = vpop.f32.mrf.mxu1  ;;  %584 = vst.msk [vmem:[%s1375_s3 + $0x10] sm:$0xff] %vm581_vm3, %v519_v49  ;;  %v517_v55 = vmax.f32 %v263_v51, 0.0  ;;  %v274_v57 = vadd.f32 %v724_v53, %v1050_v42 }
  0xd4   :  { %616 = vst.msk [vmem:[%s1375_s3 + $0x110] sm:$0xff] %vm581_vm3, %v551_v50  ;;  %v549_v56 = vmax.f32 %v391_v52, 0.0  ;;  %v402_v58 = vadd.f32 %v756_v54, %v1050_v42  ;;  %v265_v59 = vpop.f32.mrf.mxu0 }
  0xd5   :  { %v393_v60 = vpop.f32.mrf.mxu1  ;;  %582 = vst.msk [vmem:[%s1375_s3] sm:$0xff] %vm581_vm3, %v517_v55  ;;  %v520_v61 = vmax.f32 %v274_v57, 0.0  ;;  %v266_v63 = vadd.f32 %v1050_v42, %v265_v59 }
  0xd6   :  { %614 = vst.msk [vmem:[%s1375_s3 + $0x100] sm:$0xff] %vm581_vm3, %v549_v56  ;;  %v552_v62 = vmax.f32 %v402_v58, 0.0  ;;  %v394_v0 = vadd.f32 %v1050_v42, %v393_v60  ;;  %v727_v1 = vpop.f32.mrf.mxu0 }
  0xd7   :  { %v759_v2 = vpop.f32.mrf.mxu1  ;;  %585 = vst.msk [vmem:[%s1375_s3 + $0x18] sm:$0xff] %vm581_vm3, %v520_v61  ;;  %v518_v3 = vmax.f32 %v266_v63, 0.0  ;;  %v287_v5 = vadd.f32 %v727_v1, %v1050_v42 }
  0xd8   :  { %617 = vst.msk [vmem:[%s1375_s3 + $0x118] sm:$0xff] %vm581_vm3, %v552_v62  ;;  %v550_v4 = vmax.f32 %v394_v0, 0.0  ;;  %v415_v6 = vadd.f32 %v759_v2, %v1050_v42  ;;  %v278_v7 = vpop.f32.mrf.mxu0 }
  0xd9   :  { %v406_v8 = vpop.f32.mrf.mxu1  ;;  %583 = vst.msk [vmem:[%s1375_s3 + $0x8] sm:$0xff] %vm581_vm3, %v518_v3  ;;  %v523_v9 = vmax.f32 %v287_v5, 0.0  ;;  %v279_v11 = vadd.f32 %v1050_v42, %v278_v7 }
  0xda   :  { %615 = vst.msk [vmem:[%s1375_s3 + $0x108] sm:$0xff] %vm581_vm3, %v550_v4  ;;  %v555_v10 = vmax.f32 %v415_v6, 0.0  ;;  %v407_v12 = vadd.f32 %v1050_v42, %v406_v8  ;;  %v728_v13 = vpop.f32.mrf.mxu0 }
  0xdb   :  { %v760_v14 = vpop.f32.mrf.mxu1  ;;  %588 = vst.msk [vmem:[%s1375_s3 + $0x30] sm:$0xff] %vm581_vm3, %v523_v9  ;;  %v521_v15 = vmax.f32 %v279_v11, 0.0  ;;  %v290_v17 = vadd.f32 %v728_v13, %v1050_v42 }
  0xdc   :  { %620 = vst.msk [vmem:[%s1375_s3 + $0x130] sm:$0xff] %vm581_vm3, %v555_v10  ;;  %v553_v16 = vmax.f32 %v407_v12, 0.0  ;;  %v418_v18 = vadd.f32 %v760_v14, %v1050_v42  ;;  %v281_v19 = vpop.f32.mrf.mxu0 }
  0xdd   :  { %v409_v20 = vpop.f32.mrf.mxu1  ;;  %586 = vst.msk [vmem:[%s1375_s3 + $0x20] sm:$0xff] %vm581_vm3, %v521_v15  ;;  %v524_v21 = vmax.f32 %v290_v17, 0.0  ;;  %v282_v23 = vadd.f32 %v1050_v42, %v281_v19 }
  0xde   :  { %618 = vst.msk [vmem:[%s1375_s3 + $0x120] sm:$0xff] %vm581_vm3, %v553_v16  ;;  %v556_v22 = vmax.f32 %v418_v18, 0.0  ;;  %v410_v24 = vadd.f32 %v1050_v42, %v409_v20  ;;  %v731_v25 = vpop.f32.mrf.mxu0 }
  0xdf   :  { %v763_v26 = vpop.f32.mrf.mxu1  ;;  %589 = vst.msk [vmem:[%s1375_s3 + $0x38] sm:$0xff] %vm581_vm3, %v524_v21  ;;  %v522_v27 = vmax.f32 %v282_v23, 0.0  ;;  %v303_v29 = vadd.f32 %v731_v25, %v1050_v42 }
  0xe0   :  { %621 = vst.msk [vmem:[%s1375_s3 + $0x138] sm:$0xff] %vm581_vm3, %v556_v22  ;;  %v554_v28 = vmax.f32 %v410_v24, 0.0  ;;  %v431_v30 = vadd.f32 %v763_v26, %v1050_v42  ;;  %v294_v31 = vpop.f32.mrf.mxu0 }
  0xe1   :  { %v422_v32 = vpop.f32.mrf.mxu1  ;;  %587 = vst.msk [vmem:[%s1375_s3 + $0x28] sm:$0xff] %vm581_vm3, %v522_v27  ;;  %v527_v33 = vmax.f32 %v303_v29, 0.0  ;;  %v295_v35 = vadd.f32 %v1050_v42, %v294_v31 }
  0xe2   :  { %619 = vst.msk [vmem:[%s1375_s3 + $0x128] sm:$0xff] %vm581_vm3, %v554_v28  ;;  %v559_v34 = vmax.f32 %v431_v30, 0.0  ;;  %v423_v36 = vadd.f32 %v1050_v42, %v422_v32  ;;  %v732_v37 = vpop.f32.mrf.mxu0 }
  0xe3   :  { %v764_v38 = vpop.f32.mrf.mxu1  ;;  %592 = vst.msk [vmem:[%s1375_s3 + $0x50] sm:$0xff] %vm581_vm3, %v527_v33  ;;  %v525_v39 = vmax.f32 %v295_v35, 0.0  ;;  %v306_v41 = vadd.f32 %v732_v37, %v1050_v42 }
  0xe4   :  { %624 = vst.msk [vmem:[%s1375_s3 + $0x150] sm:$0xff] %vm581_vm3, %v559_v34  ;;  %v557_v40 = vmax.f32 %v423_v36, 0.0  ;;  %v434_v43 = vadd.f32 %v764_v38, %v1050_v42  ;;  %v297_v44 = vpop.f32.mrf.mxu0 }
  0xe5   :  { %v425_v45 = vpop.f32.mrf.mxu1  ;;  %590 = vst.msk [vmem:[%s1375_s3 + $0x40] sm:$0xff] %vm581_vm3, %v525_v39  ;;  %v528_v46 = vmax.f32 %v306_v41, 0.0  ;;  %v298_v48 = vadd.f32 %v1050_v42, %v297_v44 }
  0xe6   :  { %622 = vst.msk [vmem:[%s1375_s3 + $0x140] sm:$0xff] %vm581_vm3, %v557_v40  ;;  %v560_v47 = vmax.f32 %v434_v43, 0.0  ;;  %v426_v49 = vadd.f32 %v1050_v42, %v425_v45  ;;  %v735_v50 = vpop.f32.mrf.mxu0 }
  0xe7   :  { %v767_v51 = vpop.f32.mrf.mxu1  ;;  %593 = vst.msk [vmem:[%s1375_s3 + $0x58] sm:$0xff] %vm581_vm3, %v528_v46  ;;  %v526_v52 = vmax.f32 %v298_v48, 0.0  ;;  %v319_v54 = vadd.f32 %v735_v50, %v1050_v42 }
  0xe8   :  { %625 = vst.msk [vmem:[%s1375_s3 + $0x158] sm:$0xff] %vm581_vm3, %v560_v47  ;;  %v558_v53 = vmax.f32 %v426_v49, 0.0  ;;  %v447_v55 = vadd.f32 %v767_v51, %v1050_v42  ;;  %v310_v56 = vpop.f32.mrf.mxu0 }
  0xe9   :  { %v438_v57 = vpop.f32.mrf.mxu1  ;;  %591 = vst.msk [vmem:[%s1375_s3 + $0x48] sm:$0xff] %vm581_vm3, %v526_v52  ;;  %v531_v58 = vmax.f32 %v319_v54, 0.0  ;;  %v311_v60 = vadd.f32 %v1050_v42, %v310_v56 }
  0xea   :  { %623 = vst.msk [vmem:[%s1375_s3 + $0x148] sm:$0xff] %vm581_vm3, %v558_v53  ;;  %v563_v59 = vmax.f32 %v447_v55, 0.0  ;;  %v439_v61 = vadd.f32 %v1050_v42, %v438_v57  ;;  %v736_v62 = vpop.f32.mrf.mxu0 }
  0xeb   :  { %v768_v63 = vpop.f32.mrf.mxu1  ;;  %596 = vst.msk [vmem:[%s1375_s3 + $0x70] sm:$0xff] %vm581_vm3, %v531_v58  ;;  %v529_v0 = vmax.f32 %v311_v60, 0.0  ;;  %v322_v2 = vadd.f32 %v736_v62, %v1050_v42 }
  0xec   :  { %628 = vst.msk [vmem:[%s1375_s3 + $0x170] sm:$0xff] %vm581_vm3, %v563_v59  ;;  %v561_v1 = vmax.f32 %v439_v61, 0.0  ;;  %v450_v3 = vadd.f32 %v768_v63, %v1050_v42  ;;  %v313_v4 = vpop.f32.mrf.mxu0 }
  0xed   :  { %v441_v5 = vpop.f32.mrf.mxu1  ;;  %594 = vst.msk [vmem:[%s1375_s3 + $0x60] sm:$0xff] %vm581_vm3, %v529_v0  ;;  %v532_v6 = vmax.f32 %v322_v2, 0.0  ;;  %v314_v8 = vadd.f32 %v1050_v42, %v313_v4 }
  0xee   :  { %626 = vst.msk [vmem:[%s1375_s3 + $0x160] sm:$0xff] %vm581_vm3, %v561_v1  ;;  %v564_v7 = vmax.f32 %v450_v3, 0.0  ;;  %v442_v9 = vadd.f32 %v1050_v42, %v441_v5  ;;  %v739_v10 = vpop.f32.mrf.mxu0 }
  0xef   :  { %v771_v11 = vpop.f32.mrf.mxu1  ;;  %597 = vst.msk [vmem:[%s1375_s3 + $0x78] sm:$0xff] %vm581_vm3, %v532_v6  ;;  %v530_v12 = vmax.f32 %v314_v8, 0.0  ;;  %v335_v14 = vadd.f32 %v739_v10, %v1050_v42 }
  0xf0   :  { %629 = vst.msk [vmem:[%s1375_s3 + $0x178] sm:$0xff] %vm581_vm3, %v564_v7  ;;  %v562_v13 = vmax.f32 %v442_v9, 0.0  ;;  %v463_v15 = vadd.f32 %v771_v11, %v1050_v42  ;;  %v326_v16 = vpop.f32.mrf.mxu0 }
  0xf1   :  { %v454_v17 = vpop.f32.mrf.mxu1  ;;  %595 = vst.msk [vmem:[%s1375_s3 + $0x68] sm:$0xff] %vm581_vm3, %v530_v12  ;;  %v535_v18 = vmax.f32 %v335_v14, 0.0  ;;  %v327_v20 = vadd.f32 %v1050_v42, %v326_v16 }
  0xf2   :  { %627 = vst.msk [vmem:[%s1375_s3 + $0x168] sm:$0xff] %vm581_vm3, %v562_v13  ;;  %v567_v19 = vmax.f32 %v463_v15, 0.0  ;;  %v455_v21 = vadd.f32 %v1050_v42, %v454_v17  ;;  %v740_v22 = vpop.f32.mrf.mxu0 }
  0xf3   :  { %v772_v23 = vpop.f32.mrf.mxu1  ;;  %600 = vst.msk [vmem:[%s1375_s3 + $0x90] sm:$0xff] %vm581_vm3, %v535_v18  ;;  %v533_v24 = vmax.f32 %v327_v20, 0.0  ;;  %v338_v26 = vadd.f32 %v740_v22, %v1050_v42 }
  0xf4   :  { %632 = vst.msk [vmem:[%s1375_s3 + $0x190] sm:$0xff] %vm581_vm3, %v567_v19  ;;  %v565_v25 = vmax.f32 %v455_v21, 0.0  ;;  %v466_v27 = vadd.f32 %v772_v23, %v1050_v42  ;;  %v329_v28 = vpop.f32.mrf.mxu0 }
  0xf5   :  { %v457_v29 = vpop.f32.mrf.mxu1  ;;  %598 = vst.msk [vmem:[%s1375_s3 + $0x80] sm:$0xff] %vm581_vm3, %v533_v24  ;;  %v536_v30 = vmax.f32 %v338_v26, 0.0  ;;  %v330_v32 = vadd.f32 %v1050_v42, %v329_v28 }
  0xf6   :  { %630 = vst.msk [vmem:[%s1375_s3 + $0x180] sm:$0xff] %vm581_vm3, %v565_v25  ;;  %v568_v31 = vmax.f32 %v466_v27, 0.0  ;;  %v458_v33 = vadd.f32 %v1050_v42, %v457_v29  ;;  %v743_v34 = vpop.f32.mrf.mxu0 }
  0xf7   :  { %v775_v35 = vpop.f32.mrf.mxu1  ;;  %601 = vst.msk [vmem:[%s1375_s3 + $0x98] sm:$0xff] %vm581_vm3, %v536_v30  ;;  %v534_v36 = vmax.f32 %v330_v32, 0.0  ;;  %v351_v38 = vadd.f32 %v743_v34, %v1050_v42 }
  0xf8   :  { %633 = vst.msk [vmem:[%s1375_s3 + $0x198] sm:$0xff] %vm581_vm3, %v568_v31  ;;  %v566_v37 = vmax.f32 %v458_v33, 0.0  ;;  %v479_v39 = vadd.f32 %v775_v35, %v1050_v42  ;;  %v342_v40 = vpop.f32.mrf.mxu0 }
  0xf9   :  { %v470_v41 = vpop.f32.mrf.mxu1  ;;  %599 = vst.msk [vmem:[%s1375_s3 + $0x88] sm:$0xff] %vm581_vm3, %v534_v36  ;;  %v539_v43 = vmax.f32 %v351_v38, 0.0  ;;  %v343_v45 = vadd.f32 %v1050_v42, %v342_v40 }
  0xfa   :  { %631 = vst.msk [vmem:[%s1375_s3 + $0x188] sm:$0xff] %vm581_vm3, %v566_v37  ;;  %v571_v44 = vmax.f32 %v479_v39, 0.0  ;;  %v471_v46 = vadd.f32 %v1050_v42, %v470_v41  ;;  %v744_v47 = vpop.f32.mrf.mxu0 }
  0xfb   :  { %v776_v48 = vpop.f32.mrf.mxu1  ;;  %604 = vst.msk [vmem:[%s1375_s3 + $0xb0] sm:$0xff] %vm581_vm3, %v539_v43  ;;  %v537_v49 = vmax.f32 %v343_v45, 0.0  ;;  %v354_v51 = vadd.f32 %v744_v47, %v1050_v42 }
  0xfc   :  { %636 = vst.msk [vmem:[%s1375_s3 + $0x1b0] sm:$0xff] %vm581_vm3, %v571_v44  ;;  %v569_v50 = vmax.f32 %v471_v46, 0.0  ;;  %v482_v52 = vadd.f32 %v776_v48, %v1050_v42  ;;  %v345_v53 = vpop.f32.mrf.mxu0 }
  0xfd   :  { %v473_v54 = vpop.f32.mrf.mxu1  ;;  %602 = vst.msk [vmem:[%s1375_s3 + $0xa0] sm:$0xff] %vm581_vm3, %v537_v49  ;;  %v540_v55 = vmax.f32 %v354_v51, 0.0  ;;  %v346_v57 = vadd.f32 %v1050_v42, %v345_v53 }
  0xfe   :  { %634 = vst.msk [vmem:[%s1375_s3 + $0x1a0] sm:$0xff] %vm581_vm3, %v569_v50  ;;  %v572_v56 = vmax.f32 %v482_v52, 0.0  ;;  %v474_v58 = vadd.f32 %v1050_v42, %v473_v54  ;;  %v747_v59 = vpop.f32.mrf.mxu0 }
  0xff   :  { %v779_v60 = vpop.f32.mrf.mxu1  ;;  %605 = vst.msk [vmem:[%s1375_s3 + $0xb8] sm:$0xff] %vm581_vm3, %v540_v55  ;;  %v538_v61 = vmax.f32 %v346_v57, 0.0  ;;  %v367_v63 = vadd.f32 %v747_v59, %v1050_v42 }
 0x100   :  { %637 = vst.msk [vmem:[%s1375_s3 + $0x1b8] sm:$0xff] %vm581_vm3, %v572_v56  ;;  %v570_v62 = vmax.f32 %v474_v58, 0.0  ;;  %v495_v0 = vadd.f32 %v779_v60, %v1050_v42  ;;  %v358_v1 = vpop.f32.mrf.mxu0 }
 0x101   :  { %v486_v2 = vpop.f32.mrf.mxu1  ;;  %603 = vst.msk [vmem:[%s1375_s3 + $0xa8] sm:$0xff] %vm581_vm3, %v538_v61  ;;  %v543_v3 = vmax.f32 %v367_v63, 0.0  ;;  %v359_v5 = vadd.f32 %v1050_v42, %v358_v1 }
 0x102   :  { %635 = vst.msk [vmem:[%s1375_s3 + $0x1a8] sm:$0xff] %vm581_vm3, %v570_v62  ;;  %v575_v4 = vmax.f32 %v495_v0, 0.0  ;;  %v487_v6 = vadd.f32 %v1050_v42, %v486_v2  ;;  %v748_v7 = vpop.f32.mrf.mxu0 }
 0x103   :  { %v780_v8 = vpop.f32.mrf.mxu1  ;;  %608 = vst.msk [vmem:[%s1375_s3 + $0xd0] sm:$0xff] %vm581_vm3, %v543_v3  ;;  %v541_v9 = vmax.f32 %v359_v5, 0.0  ;;  %v370_v11 = vadd.f32 %v748_v7, %v1050_v42 }
 0x104   :  { %640 = vst.msk [vmem:[%s1375_s3 + $0x1d0] sm:$0xff] %vm581_vm3, %v575_v4  ;;  %v573_v10 = vmax.f32 %v487_v6, 0.0  ;;  %v498_v12 = vadd.f32 %v780_v8, %v1050_v42  ;;  %v361_v13 = vpop.f32.mrf.mxu0 }
 0x105   :  { %v489_v14 = vpop.f32.mrf.mxu1  ;;  %606 = vst.msk [vmem:[%s1375_s3 + $0xc0] sm:$0xff] %vm581_vm3, %v541_v9  ;;  %v544_v15 = vmax.f32 %v370_v11, 0.0  ;;  %v362_v17 = vadd.f32 %v1050_v42, %v361_v13 }
 0x106   :  { %638 = vst.msk [vmem:[%s1375_s3 + $0x1c0] sm:$0xff] %vm581_vm3, %v573_v10  ;;  %v576_v16 = vmax.f32 %v498_v12, 0.0  ;;  %v490_v18 = vadd.f32 %v1050_v42, %v489_v14  ;;  %v751_v19 = vpop.f32.mrf.mxu0 }
 0x107   :  { %v783_v20 = vpop.f32.mrf.mxu1  ;;  %609 = vst.msk [vmem:[%s1375_s3 + $0xd8] sm:$0xff] %vm581_vm3, %v544_v15  ;;  %v542_v21 = vmax.f32 %v362_v17, 0.0  ;;  %v383_v23 = vadd.f32 %v751_v19, %v1050_v42 }
 0x108   :  { %641 = vst.msk [vmem:[%s1375_s3 + $0x1d8] sm:$0xff] %vm581_vm3, %v576_v16  ;;  %v574_v22 = vmax.f32 %v490_v18, 0.0  ;;  %v511_v24 = vadd.f32 %v783_v20, %v1050_v42  ;;  %v374_v25 = vpop.f32.mrf.mxu0 }
 0x109   :  { %v502_v26 = vpop.f32.mrf.mxu1  ;;  %607 = vst.msk [vmem:[%s1375_s3 + $0xc8] sm:$0xff] %vm581_vm3, %v542_v21  ;;  %v547_v27 = vmax.f32 %v383_v23, 0.0  ;;  %v375_v29 = vadd.f32 %v1050_v42, %v374_v25 }
 0x10a   :  { %639 = vst.msk [vmem:[%s1375_s3 + $0x1c8] sm:$0xff] %vm581_vm3, %v574_v22  ;;  %v579_v28 = vmax.f32 %v511_v24, 0.0  ;;  %v503_v30 = vadd.f32 %v1050_v42, %v502_v26  ;;  %v752_v31 = vpop.f32.mrf.mxu0 }
 0x10b   :  { %v784_v32 = vpop.f32.mrf.mxu1  ;;  %612 = vst.msk [vmem:[%s1375_s3 + $0xf0] sm:$0xff] %vm581_vm3, %v547_v27  ;;  %v545_v33 = vmax.f32 %v375_v29, 0.0  ;;  %v386_v35 = vadd.f32 %v752_v31, %v1050_v42 }
 0x10c   :  { %644 = vst.msk [vmem:[%s1375_s3 + $0x1f0] sm:$0xff] %vm581_vm3, %v579_v28  ;;  %v577_v34 = vmax.f32 %v503_v30, 0.0  ;;  %v514_v36 = vadd.f32 %v784_v32, %v1050_v42  ;;  %v377_v37 = vpop.f32.mrf.mxu0 }
 0x10d   :  { %v505_v38 = vpop.f32.mrf.mxu1  ;;  %610 = vst.msk [vmem:[%s1375_s3 + $0xe0] sm:$0xff] %vm581_vm3, %v545_v33  ;;  %v548_v39 = vmax.f32 %v386_v35, 0.0  ;;  %v378_v41 = vadd.f32 %v1050_v42, %v377_v37 }
 0x10e   :  { %642 = vst.msk [vmem:[%s1375_s3 + $0x1e0] sm:$0xff] %vm581_vm3, %v577_v34  ;;  %v580_v40 = vmax.f32 %v514_v36, 0.0  ;;  %v506_v43 = vadd.f32 %v1050_v42, %v505_v38 }
 0x10f   :  { %613 = vst.msk [vmem:[%s1375_s3 + $0xf8] sm:$0xff] %vm581_vm3, %v548_v39  ;;  %v546_v44 = vmax.f32 %v378_v41, 0.0 }
 0x110   :  { %645 = vst.msk [vmem:[%s1375_s3 + $0x1f8] sm:$0xff] %vm581_vm3, %v580_v40  ;;  %v578_v45 = vmax.f32 %v506_v43, 0.0 }
 0x111   :  { %611 = vst.msk [vmem:[%s1375_s3 + $0xe8] sm:$0xff] %vm581_vm3, %v546_v44 }
 0x112   :  { %643 = vst.msk [vmem:[%s1375_s3 + $0x1e8] sm:$0xff] %vm581_vm3, %v578_v45 }

// kernel: _lambda_.18
= control target key start
LH: loop header
LB: loop body
LE: loop exit
PB: predicated region body
PF: predicated region fallthrough
CT: control target
= control target key end

     0   :  { %s422_s6 = smov 0   ;;  %s560_s0 = inlined_call_operand.vmem [shape: f32[8,9,9,24], index: 0, kind: input, shape index: {}]   ;;  %s561_s1 = inlined_call_operand.vmem [shape: f32[2,8,8,24], index: 1, kind: output, shape index: {}]  }
   0x1 LB: > { %s428_s7 = sadd.s32 4294967295, %s410_s6   ;;  %p331_p0 = scmp.ge.s32.totalorder %s410_s6, 1  ;;  %s410_s6 = sphi %s422_s6, %s11_s6  }
   0x2   : > { %p89_p1 = scmp.lt.s32.totalorder %s410_s6, 3 }
   0x4   : > { %p90_p2 = pnand %p331_p0, %p89_p1 }
   0x5   : > { %s332_s8 = sshll.u32 (!%p90_p2), %s428_s7, 2  ;;  %p117_p4 = scmp.lt.s32.totalorder (!%p90_p2), %s428_s7, 1 }
   0x6   : > { %93 = sbr.rel (%p90_p2) target bundleno = 52 (0x34), region = 24  ;;  %p111_p3 = scmp.lt.s32.totalorder (!%p90_p2), %s332_s8, 7 }
   0xb   : > { %s563_s8 = smov (!%p111_p3, %s332_s8), 7  ;;  %s565_s7 = smov (!%p117_p4, %s428_s7), 1  ;;  %vm263_vm0 = vcmask 195584  }
   0xc   : > { %s395_s9 = smul.u32 144, %s563_s8  ;;  %s394_s13 = sshll.u32 %s565_s7, 6 }
   0xd   : > { %s514_s16 = scalar_lea.vmem %s561_s1, %s394_s13 }
   0xe   : > { %s436_s12 = scalar_lea.vmem %s560_s0, %s395_s9 }
   0xf   : > { %v122_v0 = vld [vmem:[%s436_s12] sm:$0xff]  ;;  %v336_v1 = vld [vmem:[%s436_s12 + $0x90] sm:$0xff] }
  0x10   : > { %v147_v2 = vld [vmem:[%s436_s12 + $0x1] sm:$0xff]  ;;  %v139_v3 = vmax.f32 %v122_v0, %v336_v1  ;;  %v368_v5 = vld [vmem:[%s436_s12 + $0x10] sm:$0xff] }
  0x11   : > { %v344_v4 = vld [vmem:[%s436_s12 + $0x120] sm:$0xff]  ;;  %v447_v7 = vld [vmem:[%s436_s12 + $0x11] sm:$0xff] }
  0x12   : > { %v444_v6 = vld [vmem:[%s436_s12 + $0xa0] sm:$0xff]  ;;  %v155_v8 = vmax.f32 %v139_v3, %v147_v2  ;;  %v352_v9 = vld [vmem:[%s436_s12 + $0x1b0] sm:$0xff] }
  0x13   : > { %v140_v10 = vmax.f32 %v368_v5, %v444_v6  ;;  %v345_v11 = vld [vmem:[%s436_s12 + $0x130] sm:$0xff]  ;;  %v369_v12 = vld [vmem:[%s436_s12 + $0x20] sm:$0xff] }
  0x14   : > { %v455_v13 = vld [vmem:[%s436_s12 + $0xb0] sm:$0xff]  ;;  %v458_v14 = vld [vmem:[%s436_s12 + $0x21] sm:$0xff]  ;;  %v172_v15 = vmax.f32 %v155_v8, %v344_v4 }
  0x15   : > { %v360_v16 = vld [vmem:[%s436_s12 + $0x121] sm:$0xff]  ;;  %v156_v17 = vmax.f32 %v140_v10, %v447_v7  ;;  %v141_v19 = vmax.f32 %v369_v12, %v455_v13  ;;  %v370_v21 = vld [vmem:[%s436_s12 + $0x30] sm:$0xff] }
  0x16   : > { %v353_v18 = vld [vmem:[%s436_s12 + $0x1c0] sm:$0xff]  ;;  %v470_v23 = vld [vmem:[%s436_s12 + $0x31] sm:$0xff]  ;;  %v189_v24 = vmax.f32 %v172_v15, %v352_v9 }
  0x17   : > { %v346_v20 = vld [vmem:[%s436_s12 + $0x140] sm:$0xff]  ;;  %v173_v25 = vmax.f32 %v156_v17, %v345_v11  ;;  %v361_v26 = vld [vmem:[%s436_s12 + $0x131] sm:$0xff]  ;;  %v157_v27 = vmax.f32 %v141_v19, %v458_v14 }
  0x18   : > { %v467_v22 = vld [vmem:[%s436_s12 + $0xc0] sm:$0xff]  ;;  %v354_v28 = vld [vmem:[%s436_s12 + $0x1d0] sm:$0xff]  ;;  %v205_v33 = vmax.f32 %v189_v24, %v360_v16 }
  0x19   : > { %v142_v29 = vmax.f32 %v370_v21, %v467_v22  ;;  %v347_v30 = vld [vmem:[%s436_s12 + $0x150] sm:$0xff]  ;;  %v371_v31 = vld [vmem:[%s436_s12 + $0x40] sm:$0xff]  ;;  %v190_v34 = vmax.f32 %v173_v25, %v353_v18  ;;  %v174_v35 = vmax.f32 %v157_v27, %v346_v20 }
  0x1a   : > { %v484_v32 = vld [vmem:[%s436_s12 + $0xd0] sm:$0xff]  ;;  %v362_v36 = vld [vmem:[%s436_s12 + $0x141] sm:$0xff]  ;;  %v222_v43 = vmax.f32 %v205_v33, %v368_v5 }
  0x1b   : > { %v158_v37 = vmax.f32 %v142_v29, %v470_v23  ;;  %v489_v38 = vld [vmem:[%s436_s12 + $0x41] sm:$0xff]  ;;  %v143_v40 = vmax.f32 %v371_v31, %v484_v32  ;;  %v372_v41 = vld [vmem:[%s436_s12 + $0x50] sm:$0xff]  ;;  %v206_v44 = vmax.f32 %v190_v34, %v361_v26  ;;  %v191_v45 = vmax.f32 %v174_v35, %v354_v28 }
  0x1c   : > { %v355_v39 = vld [vmem:[%s436_s12 + $0x1e0] sm:$0xff]  ;;  %v388_v48 = vld [vmem:[%s436_s12 + $0x51] sm:$0xff]  ;;  %v239_v54 = vmax.f32 %v222_v43, %v444_v6 }
  0x1d   : > { %v495_v42 = vld [vmem:[%s436_s12 + $0xe0] sm:$0xff]  ;;  %v175_v46 = vmax.f32 %v158_v37, %v347_v30  ;;  %v363_v49 = vld [vmem:[%s436_s12 + $0x151] sm:$0xff]  ;;  %v159_v50 = vmax.f32 %v143_v40, %v489_v38  ;;  %v223_v55 = vmax.f32 %v206_v44, %v369_v12  ;;  %v207_v56 = vmax.f32 %v191_v45, %v362_v36 }
  0x1e   : > { %v348_v47 = vld [vmem:[%s436_s12 + $0x160] sm:$0xff]  ;;  %v144_v51 = vmax.f32 %v372_v41, %v495_v42  ;;  %v505_v53 = vld [vmem:[%s436_s12 + $0xf0] sm:$0xff]  ;;  %v255_v3 = vmax.f32 %v239_v54, %v447_v7 }
  0x1f   : > { %v373_v52 = vld [vmem:[%s436_s12 + $0x60] sm:$0xff]  ;;  %v192_v57 = vmax.f32 %v175_v46, %v355_v39  ;;  %v356_v58 = vld [vmem:[%s436_s12 + $0x1f0] sm:$0xff]  ;;  %v176_v61 = vmax.f32 %v159_v50, %v348_v47  ;;  %v240_v4 = vmax.f32 %v223_v55, %v455_v13  ;;  %v224_v5 = vmax.f32 %v207_v56, %v370_v21 }
  0x20   : > { %v349_v59 = vld [vmem:[%s436_s12 + $0x170] sm:$0xff]  ;;  %v389_v60 = vld [vmem:[%s436_s12 + $0x61] sm:$0xff]  ;;  %v160_v63 = vmax.f32 %v144_v51, %v388_v48  ;;  %v145_v0 = vmax.f32 %v373_v52, %v505_v53  ;;  %264 = vst.msk [vmem:[%s514_s16] sm:$0xff] %vm263_vm0, %v255_v3 }
  0x21   : > { %v364_v62 = vld [vmem:[%s436_s12 + $0x161] sm:$0xff]  ;;  %v374_v1 = vld [vmem:[%s436_s12 + $0x70] sm:$0xff]  ;;  %v208_v6 = vmax.f32 %v192_v57, %v363_v49  ;;  %v193_v11 = vmax.f32 %v176_v61, %v356_v58  ;;  %v256_v7 = vmax.f32 %v240_v4, %v458_v14  ;;  %v241_v17 = vmax.f32 %v224_v5, %v467_v22 }
  0x22   : > { %v382_v2 = vld [vmem:[%s436_s12 + $0x100] sm:$0xff]  ;;  %v390_v10 = vld [vmem:[%s436_s12 + $0x71] sm:$0xff]  ;;  %v177_v12 = vmax.f32 %v160_v63, %v349_v59  ;;  %v161_v15 = vmax.f32 %v145_v0, %v389_v60 }
  0x23   : > { %v357_v8 = vld [vmem:[%s436_s12 + $0x200] sm:$0xff]  ;;  %v146_v16 = vmax.f32 %v374_v1, %v382_v2  ;;  %v225_v13 = vmax.f32 %v208_v6, %v371_v31  ;;  %v365_v18 = vld [vmem:[%s436_s12 + $0x171] sm:$0xff]  ;;  %v209_v21 = vmax.f32 %v193_v11, %v364_v62  ;;  %265 = vst.msk [vmem:[%s514_s16 + $0x8] sm:$0xff] %vm263_vm0, %v256_v7  ;;  %v257_v27 = vmax.f32 %v241_v17, %v470_v23 }
  0x24   : > { %v350_v9 = vld [vmem:[%s436_s12 + $0x180] sm:$0xff]  ;;  %v358_v19 = vld [vmem:[%s436_s12 + $0x210] sm:$0xff]  ;;  %v194_v24 = vmax.f32 %v177_v12, %v357_v8 }
  0x25   : > { %v351_v20 = vld [vmem:[%s436_s12 + $0x190] sm:$0xff]  ;;  %v178_v25 = vmax.f32 %v161_v15, %v350_v9  ;;  %v162_v26 = vmax.f32 %v146_v16, %v390_v10  ;;  %v242_v14 = vmax.f32 %v225_v13, %v484_v32  ;;  %v366_v28 = vld [vmem:[%s436_s12 + $0x181] sm:$0xff]  ;;  %v226_v29 = vmax.f32 %v209_v21, %v372_v41  ;;  %266 = vst.msk [vmem:[%s514_s16 + $0x10] sm:$0xff] %vm263_vm0, %v257_v27 }
  0x26   : > { %v359_v22 = vld [vmem:[%s436_s12 + $0x220] sm:$0xff]  ;;  %v210_v30 = vmax.f32 %v194_v24, %v365_v18  ;;  %v367_v35 = vld [vmem:[%s436_s12 + $0x191] sm:$0xff] }
  0x27   : > { %v195_v31 = vmax.f32 %v178_v25, %v358_v19  ;;  %v179_v33 = vmax.f32 %v162_v26, %v351_v20  ;;  %v258_v34 = vmax.f32 %v242_v14, %v489_v38  ;;  %v243_v36 = vmax.f32 %v226_v29, %v495_v42  ;;  %v375_v39 = vld [vmem:[%s436_s12 + $0x80] sm:$0xff]  ;;  %v383_v45 = vld [vmem:[%s436_s12 + $0x110] sm:$0xff] }
  0x28   : > { %v227_v23 = vmax.f32 %v210_v30, %v373_v52  ;;  %v391_v47 = vld [vmem:[%s436_s12 + $0x81] sm:$0xff] }
  0x29   : > { %v211_v37 = vmax.f32 %v195_v31, %v366_v28  ;;  %v196_v32 = vmax.f32 %v179_v33, %v359_v22  ;;  %267 = vst.msk [vmem:[%s514_s16 + $0x18] sm:$0xff] %vm263_vm0, %v258_v34  ;;  %v259_v40 = vmax.f32 %v243_v36, %v388_v48 }
  0x2a   : > { %v244_v41 = vmax.f32 %v227_v23, %v505_v53 }
  0x2b   : > { %v228_v43 = vmax.f32 %v211_v37, %v374_v1  ;;  %v212_v44 = vmax.f32 %v196_v32, %v367_v35  ;;  %268 = vst.msk [vmem:[%s514_s16 + $0x20] sm:$0xff] %vm263_vm0, %v259_v40 }
  0x2c   : > { %v260_v38 = vmax.f32 %v244_v41, %v389_v60 }
  0x2d   : > { %v245_v46 = vmax.f32 %v228_v43, %v382_v2  ;;  %v229_v42 = vmax.f32 %v212_v44, %v375_v39 }
  0x2e   : > { %269 = vst.msk [vmem:[%s514_s16 + $0x28] sm:$0xff] %vm263_vm0, %v260_v38 }
  0x2f   : > { %v261_v49 = vmax.f32 %v245_v46, %v390_v10  ;;  %v246_v50 = vmax.f32 %v229_v42, %v383_v45 }
  0x31   : > { %270 = vst.msk [vmem:[%s514_s16 + $0x30] sm:$0xff] %vm263_vm0, %v261_v49  ;;  %v262_v51 = vmax.f32 %v246_v50, %v391_v47 }
  0x33   : > { %271 = vst.msk [vmem:[%s514_s16 + $0x38] sm:$0xff] %vm263_vm0, %v262_v51 }
  0x34 PF: > { %s11_s6 = sadd.s32 1, %s410_s6  }
  0x35   : > { %p8_p5 = scmp.ge.s32.totalorder %s11_s6, 4  }
  0x37   :  { %10 = sbr.rel (!%p8_p5) target bundleno = 1 (0x1), region = 59 }

// kernel: _lambda_.19
= control target key start
LH: loop header
LB: loop body
LE: loop exit
PB: predicated region body
PF: predicated region fallthrough
CT: control target
= control target key end

     0   :  { %vm76_vm0 = vcmask 1043456   ;;  %vm51_vm1 = vcmask 195584   ;;  %vm193_vm2 = vcmask 556032   ;;  %s411_s1 = inlined_call_operand.vmem [shape: f32[24,68], index: 1, kind: input, shape index: {}]   ;;  %s412_s0 = inlined_call_operand.vmem [shape: f32[128,24], index: 0, kind: input, shape index: {}]   ;;  %s413_s2 = inlined_call_operand.vmem [shape: f32[1,68], index: 2, kind: input, shape index: {}]   ;;  %s414_s3 = inlined_call_operand.vmem [shape: f32[128,68], index: 3, kind: output, shape index: {}]  }
   0x1   :  { %v41_v0 = vld [vmem:[%s411_s1 + $0x10] sm:$0xff]  ;;  %v39_v1 = vld [vmem:[%s411_s1] sm:$0xff]  ;;  %v40_v2 = vld [vmem:[%s411_s1 + $0x8] sm:$0xff] }
   0x2   :  { %v43_v3 = vpack.c.bf16 %v41_v0, %v41_v0  ;;  %v42_v4 = vpack.c.bf16 %v40_v2, %v39_v1  ;;  %v15_v5 = vld [vmem:[%s412_s0] sm:$0xff]  ;;  %v16_v6 = vld [vmem:[%s412_s0 + $0x8] sm:$0xff]  ;;  %v17_v12 = vld [vmem:[%s412_s0 + $0x10] sm:$0xff] }
   0x3   :  { %v23_v7 = vld [vmem:[%s412_s0 + $0x40] sm:$0xff]  ;;  %v31_v8 = vpack.c.bf16 %v16_v6, %v15_v5  ;;  %v24_v9 = vld [vmem:[%s412_s0 + $0x48] sm:$0xff]  ;;  %v18_v13 = vld [vmem:[%s412_s0 + $0x18] sm:$0xff] }
   0x4   :  { %257 = vmatprep.subr.msk.bf16.mxu0 %vm76_vm0, %v43_v3  ;;  %258 = vmatprep.subr.msk.bf16.mxu1 %vm76_vm0, %v43_v3  ;;  %v78_v10 = vsel %vm76_vm0, %v43_v3, 0  ;;  %v35_v11 = vpack.c.bf16 %v24_v9, %v23_v7  ;;  %v25_v14 = vld [vmem:[%s412_s0 + $0x50] sm:$0xff]  ;;  %v26_v15 = vld [vmem:[%s412_s0 + $0x58] sm:$0xff]  ;;  %v19_v16 = vld [vmem:[%s412_s0 + $0x20] sm:$0xff]  ;;  %v32_v20 = vpack.c.bf16 %v18_v13, %v17_v12 }
   0x5   :  { %234 = vmatpush3.bf16.msra.mxu0 %v78_v10  ;;  %255 = vmatpush3.bf16.msra.mxu1 %v78_v10  ;;  %v20_v17 = vld [vmem:[%s412_s0 + $0x28] sm:$0xff]  ;;  %v27_v18 = vld [vmem:[%s412_s0 + $0x60] sm:$0xff]  ;;  %v36_v21 = vpack.c.bf16 %v26_v15, %v25_v14  ;;  %v21_v24 = vld [vmem:[%s412_s0 + $0x30] sm:$0xff] }
   0x6   :  { %235 = vmatprep.subr.bf16.mxu0 %v42_v4  ;;  %254 = vmatprep.subr.bf16.mxu1 %v42_v4  ;;  %v28_v19 = vld [vmem:[%s412_s0 + $0x68] sm:$0xff]  ;;  %v33_v22 = vpack.c.bf16 %v20_v17, %v19_v16  ;;  %v22_v25 = vld [vmem:[%s412_s0 + $0x38] sm:$0xff]  ;;  %v29_v26 = vld [vmem:[%s412_s0 + $0x70] sm:$0xff] }
   0x7   :  { %237 = vmatprep.mubr.msk.bf16.mxu0 %vm51_vm1, %v31_v8  ;;  %245 = vmatprep.mubr.msk.bf16.mxu1 %vm51_vm1, %v35_v11  ;;  %v37_v23 = vpack.c.bf16 %v28_v19, %v27_v18  ;;  %v30_v27 = vld [vmem:[%s412_s0 + $0x78] sm:$0xff]  ;;  %v34_v28 = vpack.c.bf16 %v22_v25, %v21_v24  ;;  %v214_v30 = vld [vmem:[%s413_s2] ss:$0 sm:$0xff] }
   0x8   :  { %v38_v29 = vpack.c.bf16 %v30_v27, %v29_v26 }
   0x9   :  { %236 = vmatpush3.bf16.msra.mxu0 %v42_v4  ;;  %256 = vmatpush3.bf16.msra.mxu1 %v42_v4 }
   0xc   :  { %238 = vmatmul.mubr.msk.bf16.vlgmr.msra.gmra.mxu0 %vm51_vm1, %v32_v20  ;;  %246 = vmatmul.mubr.msk.bf16.vlgmr.msra.gmra.mxu1 %vm51_vm1, %v36_v21 }
   0xd   :  { %241 = vmatprep.mubr.msk.bf16.mxu0 %vm51_vm1, %v33_v22  ;;  %249 = vmatprep.mubr.msk.bf16.mxu1 %vm51_vm1, %v37_v23 }
  0x14   :  { %242 = vmatmul.mubr.msk.bf16.gmra.mxu0 %vm51_vm1, %v34_v28  ;;  %250 = vmatmul.mubr.msk.bf16.gmra.mxu1 %vm51_vm1, %v38_v29 }
  0xcc   :  { %v239_v31 = vpop.f32.mrf.mxu0  ;;  %v247_v32 = vpop.f32.mrf.mxu1 }
  0xcd   :  { %v123_v33 = vadd.f32 %v239_v31, %v214_v30  ;;  %v155_v34 = vadd.f32 %v247_v32, %v214_v30 }
  0xce   :  { %v114_v35 = vpop.f32.mrf.mxu0  ;;  %v146_v36 = vpop.f32.mrf.mxu1 }
  0xcf   :  { %v179_v37 = vmax.f32 %v123_v33, 0.0  ;;  %v187_v38 = vmax.f32 %v155_v34, 0.0  ;;  %v115_v39 = vadd.f32 %v214_v30, %v114_v35  ;;  %v147_v40 = vadd.f32 %v214_v30, %v146_v36 }
  0xd0   :  { %v240_v41 = vpop.f32.mrf.mxu0  ;;  %v248_v42 = vpop.f32.mrf.mxu1 }
  0xd1   :  { %196 = vst.msk [vmem:[%s414_s3 + $0x10] sm:$0xff] %vm193_vm2, %v179_v37  ;;  %204 = vst.msk [vmem:[%s414_s3 + $0x50] sm:$0xff] %vm193_vm2, %v187_v38  ;;  %v177_v43 = vmax.f32 %v115_v39, 0.0  ;;  %v185_v44 = vmax.f32 %v147_v40, 0.0  ;;  %v126_v45 = vadd.f32 %v240_v41, %v214_v30  ;;  %v158_v46 = vadd.f32 %v248_v42, %v214_v30 }
  0xd2   :  { %v117_v47 = vpop.f32.mrf.mxu0  ;;  %v149_v48 = vpop.f32.mrf.mxu1 }
  0xd3   :  { %194 = vst.msk [vmem:[%s414_s3] sm:$0xff] %vm193_vm2, %v177_v43  ;;  %202 = vst.msk [vmem:[%s414_s3 + $0x40] sm:$0xff] %vm193_vm2, %v185_v44  ;;  %v180_v49 = vmax.f32 %v126_v45, 0.0  ;;  %v188_v50 = vmax.f32 %v158_v46, 0.0  ;;  %v118_v51 = vadd.f32 %v214_v30, %v117_v47  ;;  %v150_v52 = vadd.f32 %v214_v30, %v149_v48 }
  0xd4   :  { %v243_v53 = vpop.f32.mrf.mxu0  ;;  %v251_v54 = vpop.f32.mrf.mxu1 }
  0xd5   :  { %197 = vst.msk [vmem:[%s414_s3 + $0x18] sm:$0xff] %vm193_vm2, %v180_v49  ;;  %205 = vst.msk [vmem:[%s414_s3 + $0x58] sm:$0xff] %vm193_vm2, %v188_v50  ;;  %v178_v55 = vmax.f32 %v118_v51, 0.0  ;;  %v186_v56 = vmax.f32 %v150_v52, 0.0  ;;  %v139_v57 = vadd.f32 %v243_v53, %v214_v30  ;;  %v171_v58 = vadd.f32 %v251_v54, %v214_v30 }
  0xd6   :  { %v130_v59 = vpop.f32.mrf.mxu0  ;;  %v162_v60 = vpop.f32.mrf.mxu1 }
  0xd7   :  { %195 = vst.msk [vmem:[%s414_s3 + $0x8] sm:$0xff] %vm193_vm2, %v178_v55  ;;  %203 = vst.msk [vmem:[%s414_s3 + $0x48] sm:$0xff] %vm193_vm2, %v186_v56  ;;  %v183_v61 = vmax.f32 %v139_v57, 0.0  ;;  %v191_v62 = vmax.f32 %v171_v58, 0.0  ;;  %v131_v63 = vadd.f32 %v214_v30, %v130_v59  ;;  %v163_v0 = vadd.f32 %v214_v30, %v162_v60 }
  0xd8   :  { %v244_v1 = vpop.f32.mrf.mxu0  ;;  %v252_v2 = vpop.f32.mrf.mxu1 }
  0xd9   :  { %200 = vst.msk [vmem:[%s414_s3 + $0x30] sm:$0xff] %vm193_vm2, %v183_v61  ;;  %208 = vst.msk [vmem:[%s414_s3 + $0x70] sm:$0xff] %vm193_vm2, %v191_v62  ;;  %v181_v3 = vmax.f32 %v131_v63, 0.0  ;;  %v189_v4 = vmax.f32 %v163_v0, 0.0  ;;  %v142_v5 = vadd.f32 %v244_v1, %v214_v30  ;;  %v174_v6 = vadd.f32 %v252_v2, %v214_v30 }
  0xda   :  { %v133_v7 = vpop.f32.mrf.mxu0  ;;  %v165_v8 = vpop.f32.mrf.mxu1 }
  0xdb   :  { %198 = vst.msk [vmem:[%s414_s3 + $0x20] sm:$0xff] %vm193_vm2, %v181_v3  ;;  %206 = vst.msk [vmem:[%s414_s3 + $0x60] sm:$0xff] %vm193_vm2, %v189_v4  ;;  %v184_v9 = vmax.f32 %v142_v5, 0.0  ;;  %v192_v10 = vmax.f32 %v174_v6, 0.0  ;;  %v134_v11 = vadd.f32 %v214_v30, %v133_v7  ;;  %v166_v12 = vadd.f32 %v214_v30, %v165_v8 }
  0xdd   :  { %201 = vst.msk [vmem:[%s414_s3 + $0x38] sm:$0xff] %vm193_vm2, %v184_v9  ;;  %209 = vst.msk [vmem:[%s414_s3 + $0x78] sm:$0xff] %vm193_vm2, %v192_v10  ;;  %v182_v13 = vmax.f32 %v134_v11, 0.0  ;;  %v190_v14 = vmax.f32 %v166_v12, 0.0 }
  0xdf   :  { %199 = vst.msk [vmem:[%s414_s3 + $0x28] sm:$0xff] %vm193_vm2, %v182_v13  ;;  %207 = vst.msk [vmem:[%s414_s3 + $0x68] sm:$0xff] %vm193_vm2, %v190_v14 }

// kernel: _lambda_.22
= control target key start
LH: loop header
LB: loop body
LE: loop exit
PB: predicated region body
PF: predicated region fallthrough
CT: control target
= control target key end

     0   :  { %vm68_vm0 = vcmask 1041408   ;;  %v163_v3 = vmov 0   ;;  %vm61_vm1 = vcmask 556032   ;;  %v51_v36 = vlaneseq  ;;  %s284_s1 = inlined_call_operand.vmem [shape: f32[68,248], index: 1, kind: input, shape index: {}]   ;;  %s285_s0 = inlined_call_operand.vmem [shape: f32[32,68], index: 0, kind: input, shape index: {}]   ;;  %s286_s2 = inlined_call_operand.vmem [shape: f32[1,248], index: 2, kind: input, shape index: {}]   ;;  %s287_s3 = inlined_call_operand.vmem [shape: f32[32,248], index: 3, kind: output, shape index: {}]  }
   0x1   :  { %v38_v0 = vld [vmem:[%s284_s1 + $0x88] sm:$0xf]  ;;  %v37_v1 = vld [vmem:[%s284_s1 + $0x80] sm:$0xf]  ;;  %107 = vmatprep.mubr.bf16.mxu0 %v163_v3  ;;  %117 = vmatprep.mubr.bf16.mxu1 %v163_v3  ;;  %v36_v6 = vld [vmem:[%s284_s1 + $0x78] sm:$0xff]  ;;  %vm137_vm2 = vcmask 982016  }
   0x2   :  { %v34_v2 = vld [vmem:[%s284_s1 + $0x68] sm:$0xff]  ;;  %v48_v4 = vpack.c.bf16 %v38_v0, %v38_v0  ;;  %v47_v5 = vpack.c.bf16 %v37_v1, %v37_v1  ;;  %v33_v7 = vld [vmem:[%s284_s1 + $0x60] sm:$0xff]  ;;  %v35_v8 = vld [vmem:[%s284_s1 + $0x70] sm:$0xff]  ;;  %v52_v37 = vshrl.u32 %v51_v36, 7 }
   0x3   :  { %v46_v9 = vpack.c.bf16 %v36_v6, %v34_v2  ;;  %v30_v10 = vld [vmem:[%s284_s1 + $0x48] sm:$0xff]  ;;  %v32_v11 = vld [vmem:[%s284_s1 + $0x58] sm:$0xff]  ;;  %v45_v13 = vpack.c.bf16 %v35_v8, %v33_v7  ;;  %v29_v15 = vld [vmem:[%s284_s1 + $0x40] sm:$0xff] }
   0x4   :  { %149 = vmatprep.subr.msk.bf16.mxu0 %vm68_vm0, %v48_v4  ;;  %152 = vmatprep.subr.msk.bf16.mxu1 %vm68_vm0, %v48_v4  ;;  %v70_v12 = vsel %vm68_vm0, %v47_v5, 0  ;;  %v44_v14 = vpack.c.bf16 %v32_v11, %v30_v10  ;;  %v31_v16 = vld [vmem:[%s284_s1 + $0x50] sm:$0xff]  ;;  %v26_v17 = vld [vmem:[%s284_s1 + $0x28] sm:$0xff]  ;;  %v28_v18 = vld [vmem:[%s284_s1 + $0x38] sm:$0xff]  ;;  %v53_v38 = vsub.s32 0, %v52_v37  ;;  %v57_v40 = vsub.s32 1, %v52_v37 }
   0x5   :  { %82 = vmatpush1.bf16.msra.mxu0 %v70_v12  ;;  %157 = vmatpush1.bf16.msra.mxu1 %v70_v12  ;;  %v43_v19 = vpack.c.bf16 %v31_v16, %v29_v15  ;;  %v42_v20 = vpack.c.bf16 %v28_v18, %v26_v17  ;;  %v25_v21 = vld [vmem:[%s284_s1 + $0x20] sm:$0xff]  ;;  %v27_v22 = vld [vmem:[%s284_s1 + $0x30] sm:$0xff]  ;;  %v22_v23 = vld [vmem:[%s284_s1 + $0x8] sm:$0xff] }
   0x6   :  { %83 = vmatprep.subr.bf16.mxu0 %v46_v9  ;;  %153 = vmatprep.subr.bf16.mxu1 %v46_v9  ;;  %v24_v24 = vld [vmem:[%s284_s1 + $0x18] sm:$0xff]  ;;  %v41_v25 = vpack.c.bf16 %v27_v22, %v25_v21  ;;  %v21_v27 = vld [vmem:[%s284_s1] sm:$0xff]  ;;  %v23_v28 = vld [vmem:[%s284_s1 + $0x10] sm:$0xff] }
   0x7   :  { %v40_v26 = vpack.c.bf16 %v24_v24, %v22_v23  ;;  %v15_v29 = vld [vmem:[%s285_s0] sm:$0xff]  ;;  %v39_v30 = vpack.c.bf16 %v23_v28, %v21_v27  ;;  %v16_v31 = vld [vmem:[%s285_s0 + $0x8] sm:$0xff]  ;;  %v17_v32 = vld [vmem:[%s285_s0 + $0x10] sm:$0xff] }
   0x8   :  { %v18_v33 = vld [vmem:[%s285_s0 + $0x18] sm:$0xff]  ;;  %v19_v34 = vpack.c.bf16 %v16_v31, %v15_v29  ;;  %v49_v39 = vld [vmem:[%s286_s2] sm:$0x3] }
   0x9   :  { %84 = vmatpush1.bf16.msra.mxu0 %v45_v13  ;;  %158 = vmatpush1.bf16.msra.mxu1 %v45_v13  ;;  %v20_v35 = vpack.c.bf16 %v18_v33, %v17_v32  ;;  %v54_v41 = vrot.slane %v49_v39, %v53_v38  ;;  %v58_v42 = vrot.slane %v49_v39, %v57_v40 }
   0xa   :  { %85 = vmatprep.subr.bf16.mxu0 %v44_v14  ;;  %154 = vmatprep.subr.bf16.mxu1 %v44_v14 }
   0xd   :  { %86 = vmatpush1.bf16.msra.mxu0 %v43_v19  ;;  %159 = vmatpush1.bf16.msra.mxu1 %v43_v19 }
   0xe   :  { %87 = vmatprep.subr.bf16.mxu0 %v42_v20  ;;  %155 = vmatprep.subr.bf16.mxu1 %v42_v20 }
  0x11   :  { %88 = vmatpush1.bf16.msra.mxu0 %v41_v25  ;;  %160 = vmatpush1.bf16.msra.mxu1 %v41_v25 }
  0x12   :  { %89 = vmatprep.subr.bf16.mxu0 %v40_v26  ;;  %156 = vmatprep.subr.bf16.mxu1 %v40_v26 }
  0x15   :  { %90 = vmatpush1.bf16.msra.mxu0 %v39_v30  ;;  %161 = vmatpush1.bf16.msra.mxu1 %v39_v30 }
  0x18   :  { %150 = vmatmul.mubr.msk.bf16.vlgmr.msra.gmra.mxu0 %vm61_vm1, %v19_v34  ;;  %151 = vmatmul.mubr.msk.bf16.vlgmr.msra.gmra.mxu1 %vm61_vm1, %v20_v35 }
  0xd8   :  { %v109_v43 = vpop.f32.mrf.mxu0  ;;  %v119_v44 = vpop.f32.mrf.mxu1 }
  0xd9   :  { %v110_v45 = vadd.f32 %v109_v43, %v54_v41  ;;  %v120_v46 = vadd.f32 %v119_v44, %v54_v41 }
  0xda   :  { %v111_v47 = vpop.f32.mrf.mxu0  ;;  %v121_v48 = vpop.f32.mrf.mxu1 }
  0xdb   :  { %v128_v49 = vmax.f32 %v110_v45, 0.0  ;;  %v132_v50 = vmax.f32 %v120_v46, 0.0  ;;  %v112_v51 = vadd.f32 %v111_v47, %v58_v42  ;;  %v122_v52 = vadd.f32 %v121_v48, %v58_v42 }
  0xdc   :  { %v113_v53 = vpop.f32.mrf.mxu0  ;;  %v123_v54 = vpop.f32.mrf.mxu1 }
  0xdd   :  { %136 = vst [vmem:[%s287_s3] sm:$0xff] %v128_v49  ;;  %141 = vst [vmem:[%s287_s3 + $0x20] sm:$0xff] %v132_v50  ;;  %v129_v55 = vmax.f32 %v112_v51, 0.0  ;;  %v133_v56 = vmax.f32 %v122_v52, 0.0  ;;  %v114_v57 = vadd.f32 %v113_v53, %v54_v41  ;;  %v124_v58 = vadd.f32 %v123_v54, %v54_v41 }
  0xde   :  { %v115_v59 = vpop.f32.mrf.mxu0  ;;  %v125_v60 = vpop.f32.mrf.mxu1 }
  0xdf   :  { %138 = vst.msk [vmem:[%s287_s3 + $0x8] sm:$0xff] %vm137_vm2, %v129_v55  ;;  %142 = vst.msk [vmem:[%s287_s3 + $0x28] sm:$0xff] %vm137_vm2, %v133_v56  ;;  %v130_v61 = vmax.f32 %v114_v57, 0.0  ;;  %v134_v62 = vmax.f32 %v124_v58, 0.0  ;;  %v116_v63 = vadd.f32 %v115_v59, %v58_v42  ;;  %v126_v0 = vadd.f32 %v125_v60, %v58_v42 }
  0xe1   :  { %139 = vst [vmem:[%s287_s3 + $0x10] sm:$0xff] %v130_v61  ;;  %143 = vst [vmem:[%s287_s3 + $0x30] sm:$0xff] %v134_v62  ;;  %v131_v1 = vmax.f32 %v116_v63, 0.0  ;;  %v135_v2 = vmax.f32 %v126_v0, 0.0 }
  0xe3   :  { %140 = vst.msk [vmem:[%s287_s3 + $0x18] sm:$0xff] %vm137_vm2, %v131_v1  ;;  %144 = vst.msk [vmem:[%s287_s3 + $0x38] sm:$0xff] %vm137_vm2, %v135_v2 }

// kernel: _lambda_.20
= control target key start
LH: loop header
LB: loop body
LE: loop exit
PB: predicated region body
PF: predicated region fallthrough
CT: control target
= control target key end

     0   :  { %s522_s12 = smov 0   ;;  %s663_s0 = inlined_call_operand.vmem [shape: f32[8,5,5,68], index: 0, kind: input, shape index: {}]   ;;  %s664_s1 = inlined_call_operand.vmem [shape: f32[9,1,68], index: 1, kind: input, shape index: {}]   ;;  %s665_s2 = inlined_call_operand.vmem [shape: f32[1,1,68], index: 2, kind: input, shape index: {}]   ;;  %s666_s3 = inlined_call_operand.vmem [shape: f32[2,4,4,68], index: 3, kind: output, shape index: {}]  }
   0x1 LB: > { %s528_s13 = sadd.s32 4294967295, %s500_s12   ;;  %p431_p0 = scmp.ge.s32.totalorder %s500_s12, 1  ;;  %s500_s12 = sphi %s522_s12, %s13_s12  }
   0x2   : > { %p139_p1 = scmp.lt.s32.totalorder %s500_s12, 3 }
   0x4   : > { %p140_p2 = pnand %p431_p0, %p139_p1 }
   0x5   : > { %s432_s14 = sshll.u32 (!%p140_p2), %s528_s13, 2  ;;  %p171_p4 = scmp.lt.s32.totalorder (!%p140_p2), %s528_s13, 1 }
   0x6   : > { %143 = sbr.rel (%p140_p2) target bundleno = 44 (0x2c), region = 32  ;;  %p165_p3 = scmp.lt.s32.totalorder (!%p140_p2), %s432_s14, 7 }
   0xb   : > { %s668_s14 = smov (!%p165_p3, %s432_s14), 7  ;;  %v436_v0 = vld [vmem:[%s664_s1] ss:$0 sm:$0xff]  ;;  %v442_v1 = vld [vmem:[%s664_s1 + $0x1] ss:$0 sm:$0xff]  ;;  %s670_s13 = smov (!%p171_p4, %s528_s13), 1 }
   0xc   : > { %s485_s15 = smul.u32 40, %s668_s14  ;;  %v542_v2 = vld [vmem:[%s664_s1 + $0x2] ss:$0 sm:$0xff]  ;;  %v552_v3 = vld [vmem:[%s664_s1 + $0x3] ss:$0 sm:$0xff]  ;;  %s484_s10 = sshll.u32 %s670_s13, 4 }
   0xd   : > { %v562_v11 = vld [vmem:[%s664_s1 + $0x4] ss:$0 sm:$0xff]  ;;  %v569_v14 = vld [vmem:[%s664_s1 + $0x5] ss:$0 sm:$0xff]  ;;  %v578_v20 = vld [vmem:[%s664_s1 + $0x6] ss:$0 sm:$0xff]  ;;  %s175_s16 = scalar_lea.vmem %s666_s3, %s484_s10 }
   0xe   : > { %s547_s24 = scalar_lea.vmem %s663_s0, %s485_s15  ;;  %v583_v21 = vld [vmem:[%s664_s1 + $0x7] ss:$0 sm:$0xff]  ;;  %v604_v44 = vld [vmem:[%s664_s1 + $0x8] ss:$0 sm:$0xff]  ;;  %vm367_vm0 = vcmask 551936  }
   0xf   : > { %v176_v4 = vld [vmem:[%s547_s24] sm:$0xf]  ;;  %v437_v5 = vld [vmem:[%s547_s24 + $0x28] sm:$0xf]  ;;  %v445_v10 = vld [vmem:[%s547_s24 + $0x50] sm:$0xf] }
  0x10   : > { %v212_v6 = vld [vmem:[%s547_s24 + $0x1] sm:$0xf]  ;;  %v187_v7 = vmul.f32 %v436_v0, %v176_v4  ;;  %v204_v8 = vmul.f32 %v442_v1, %v437_v5  ;;  %v451_v12 = vld [vmem:[%s547_s24 + $0x78] sm:$0xf]  ;;  %v457_v13 = vld [vmem:[%s547_s24 + $0x51] sm:$0xf]  ;;  %v245_v16 = vmul.f32 %v552_v3, %v445_v10 }
  0x11   : > { %v224_v9 = vmul.f32 %v542_v2, %v212_v6  ;;  %v177_v17 = vld [vmem:[%s547_s24 + $0x8] sm:$0xf]  ;;  %v438_v18 = vld [vmem:[%s547_s24 + $0x30] sm:$0xf]  ;;  %v446_v25 = vld [vmem:[%s547_s24 + $0x58] sm:$0xf]  ;;  %v266_v27 = vmul.f32 %v562_v11, %v451_v12  ;;  %v286_v31 = vmul.f32 %v569_v14, %v457_v13 }
  0x12   : > { %v208_v15 = vadd.f32 %v204_v8, %v187_v7  ;;  %v213_v19 = vld [vmem:[%s547_s24 + $0x9] sm:$0xf]  ;;  %v188_v22 = vmul.f32 %v436_v0, %v177_v17  ;;  %v205_v23 = vmul.f32 %v442_v1, %v438_v18  ;;  %v469_v29 = vld [vmem:[%s547_s24 + $0x30] sm:$0xf]  ;;  %v452_v30 = vld [vmem:[%s547_s24 + $0x80] sm:$0xf]  ;;  %v246_v33 = vmul.f32 %v552_v3, %v446_v25 }
  0x13   : > { %v225_v24 = vmul.f32 %v542_v2, %v213_v19  ;;  %v463_v28 = vld [vmem:[%s547_s24 + $0x8] sm:$0xf]  ;;  %v178_v34 = vld [vmem:[%s547_s24 + $0x10] sm:$0xf]  ;;  %v439_v35 = vld [vmem:[%s547_s24 + $0x38] sm:$0xf]  ;;  %v267_v46 = vmul.f32 %v562_v11, %v452_v30  ;;  %v328_v50 = vmul.f32 %v583_v21, %v469_v29 }
  0x14   : > { %v228_v26 = vadd.f32 %v224_v9, %v208_v15  ;;  %v209_v32 = vadd.f32 %v205_v23, %v188_v22  ;;  %v214_v36 = vld [vmem:[%s547_s24 + $0x11] sm:$0xf]  ;;  %v458_v38 = vld [vmem:[%s547_s24 + $0x59] sm:$0xf]  ;;  %v189_v39 = vmul.f32 %v436_v0, %v178_v34  ;;  %v206_v40 = vmul.f32 %v442_v1, %v439_v35  ;;  %v447_v42 = vld [vmem:[%s547_s24 + $0x60] sm:$0xf] }
  0x15   : > { %v226_v41 = vmul.f32 %v542_v2, %v214_v36  ;;  %v307_v43 = vmul.f32 %v578_v20, %v463_v28  ;;  %v464_v47 = vld [vmem:[%s547_s24 + $0x10] sm:$0xf]  ;;  %v453_v48 = vld [vmem:[%s547_s24 + $0x88] sm:$0xf]  ;;  %v247_v52 = vmul.f32 %v552_v3, %v447_v42  ;;  %v179_v53 = vld [vmem:[%s547_s24 + $0x18] sm:$0xf]  ;;  %v287_v58 = vmul.f32 %v569_v14, %v458_v38 }
  0x16   : > { %v249_v37 = vadd.f32 %v245_v16, %v228_v26  ;;  %v229_v45 = vadd.f32 %v225_v24, %v209_v32  ;;  %v210_v51 = vadd.f32 %v206_v40, %v189_v39  ;;  %v440_v54 = vld [vmem:[%s547_s24 + $0x40] sm:$0xf]  ;;  %v215_v55 = vld [vmem:[%s547_s24 + $0x19] sm:$0xf]  ;;  %v475_v56 = vld [vmem:[%s547_s24 + $0x9] sm:$0xf]  ;;  %v190_v60 = vmul.f32 %v436_v0, %v179_v53 }
  0x17   : > { %v459_v59 = vld [vmem:[%s547_s24 + $0x61] sm:$0xf]  ;;  %v207_v61 = vmul.f32 %v442_v1, %v440_v54  ;;  %v448_v62 = vld [vmem:[%s547_s24 + $0x68] sm:$0xf]  ;;  %v470_v4 = vld [vmem:[%s547_s24 + $0x38] sm:$0xf]  ;;  %v268_v6 = vmul.f32 %v562_v11, %v453_v48  ;;  %v227_v7 = vmul.f32 %v542_v2, %v215_v55  ;;  %v308_v0 = vmul.f32 %v578_v20, %v464_v47 }
  0x18   : > { %v270_v49 = vadd.f32 %v266_v27, %v249_v37  ;;  %v250_v57 = vadd.f32 %v246_v33, %v229_v45  ;;  %v230_v5 = vadd.f32 %v226_v41, %v210_v51  ;;  %v454_v8 = vld [vmem:[%s547_s24 + $0x90] sm:$0xf]  ;;  %v465_v1 = vld [vmem:[%s547_s24 + $0x18] sm:$0xf]  ;;  %v248_v12 = vmul.f32 %v552_v3, %v448_v62  ;;  %v460_v19 = vld [vmem:[%s547_s24 + $0x69] sm:$0xf] }
  0x19   : > { %v211_v10 = vadd.f32 %v207_v61, %v190_v60  ;;  %v348_v15 = vmul.f32 %v604_v44, %v475_v56  ;;  %v476_v16 = vld [vmem:[%s547_s24 + $0x11] sm:$0xf]  ;;  %v288_v18 = vmul.f32 %v569_v14, %v459_v59  ;;  %v329_v22 = vmul.f32 %v583_v21, %v470_v4  ;;  %v471_v23 = vld [vmem:[%s547_s24 + $0x40] sm:$0xf]  ;;  %v477_v32 = vld [vmem:[%s547_s24 + $0x19] sm:$0xf] }
  0x1a   : > { %v290_v63 = vadd.f32 %v286_v31, %v270_v49  ;;  %v271_v9 = vadd.f32 %v267_v46, %v250_v57  ;;  %v251_v17 = vadd.f32 %v247_v52, %v230_v5  ;;  %v269_v25 = vmul.f32 %v562_v11, %v454_v8  ;;  %v466_v28 = vld [vmem:[%s547_s24 + $0x20] sm:$0xf]  ;;  %v472_v37 = vld [vmem:[%s547_s24 + $0x48] sm:$0xf] }
  0x1b   : > { %v231_v24 = vadd.f32 %v227_v7, %v211_v10  ;;  %v309_v27 = vmul.f32 %v578_v20, %v465_v1  ;;  %v481_v29 = vld [vmem:[%s665_s2] ss:$0 sm:$0xff]  ;;  %v349_v31 = vmul.f32 %v604_v44, %v476_v16  ;;  %v289_v34 = vmul.f32 %v569_v14, %v460_v19  ;;  %v478_v45 = vld [vmem:[%s547_s24 + $0x21] sm:$0xf] }
  0x1c   : > { %v311_v13 = vadd.f32 %v307_v43, %v290_v63  ;;  %v291_v2 = vadd.f32 %v287_v58, %v271_v9  ;;  %v272_v26 = vadd.f32 %v268_v6, %v251_v17  ;;  %v330_v36 = vmul.f32 %v583_v21, %v471_v23 }
  0x1d   : > { %v252_v33 = vadd.f32 %v248_v12, %v231_v24  ;;  %v310_v40 = vmul.f32 %v578_v20, %v466_v28  ;;  %v350_v43 = vmul.f32 %v604_v44, %v477_v32  ;;  %v331_v47 = vmul.f32 %v583_v21, %v472_v37 }
  0x1e   : > { %v332_v3 = vadd.f32 %v328_v50, %v311_v13  ;;  %v312_v30 = vadd.f32 %v308_v0, %v291_v2  ;;  %v292_v11 = vadd.f32 %v288_v18, %v272_v26  ;;  %v351_v51 = vmul.f32 %v604_v44, %v478_v45 }
  0x1f   : > { %v273_v39 = vadd.f32 %v269_v25, %v252_v33 }
  0x20   : > { %v352_v35 = vadd.f32 %v348_v15, %v332_v3  ;;  %v333_v38 = vadd.f32 %v329_v22, %v312_v30  ;;  %v313_v42 = vadd.f32 %v309_v27, %v292_v11 }
  0x21   : > { %v293_v46 = vadd.f32 %v289_v34, %v273_v39 }
  0x22   : > { %v363_v41 = vadd.f32 %v481_v29, %v352_v35  ;;  %v353_v14 = vadd.f32 %v349_v31, %v333_v38  ;;  %v334_v48 = vadd.f32 %v330_v36, %v313_v42 }
  0x23   : > { %v314_v50 = vadd.f32 %v310_v40, %v293_v46 }
  0x24   : > { %368 = vst.msk [vmem:[%s175_s16] sm:$0xf] %vm367_vm0, %v363_v41  ;;  %v364_v49 = vadd.f32 %v481_v29, %v353_v14  ;;  %v354_v52 = vadd.f32 %v350_v43, %v334_v48 }
  0x25   : > { %v335_v20 = vadd.f32 %v331_v47, %v314_v50 }
  0x26   : > { %369 = vst.msk [vmem:[%s175_s16 + $0x4] sm:$0xf] %vm367_vm0, %v364_v49  ;;  %v365_v53 = vadd.f32 %v481_v29, %v354_v52 }
  0x27   : > { %v355_v54 = vadd.f32 %v351_v51, %v335_v20 }
  0x28   : > { %370 = vst.msk [vmem:[%s175_s16 + $0x8] sm:$0xf] %vm367_vm0, %v365_v53 }
  0x29   : > { %v366_v55 = vadd.f32 %v481_v29, %v355_v54 }
  0x2b   : > { %371 = vst.msk [vmem:[%s175_s16 + $0xc] sm:$0xf] %vm367_vm0, %v366_v55 }
  0x2c PF: > { %s13_s12 = sadd.s32 1, %s500_s12  }
  0x2d   : > { %p10_p5 = scmp.ge.s32.totalorder %s13_s12, 4  }
  0x2f   :  { %12 = sbr.rel (!%p10_p5) target bundleno = 1 (0x1), region = 75 }

// kernel: _lambda_.21
= control target key start
LH: loop header
LB: loop body
LE: loop exit
PB: predicated region body
PF: predicated region fallthrough
CT: control target
= control target key end

     0   :  { %s330_s6 = smov 0   ;;  %s396_s0 = inlined_call_operand.vmem [shape: f32[8,5,5,24], index: 0, kind: input, shape index: {}]   ;;  %s397_s1 = inlined_call_operand.vmem [shape: f32[2,4,4,24], index: 1, kind: output, shape index: {}]  }
   0x1 LB: > { %s336_s7 = sadd.s32 4294967295, %s318_s6   ;;  %p267_p0 = scmp.ge.s32.totalorder %s318_s6, 1  ;;  %s318_s6 = sphi %s330_s6, %s11_s6  }
   0x2   : > { %p89_p1 = scmp.lt.s32.totalorder %s318_s6, 3 }
   0x4   : > { %p90_p2 = pnand %p267_p0, %p89_p1 }
   0x5   : > { %s268_s8 = sshll.u32 (!%p90_p2), %s336_s7, 2  ;;  %p117_p4 = scmp.lt.s32.totalorder (!%p90_p2), %s336_s7, 1 }
   0x6   : > { %93 = sbr.rel (%p90_p2) target bundleno = 43 (0x2b), region = 24  ;;  %p111_p3 = scmp.lt.s32.totalorder (!%p90_p2), %s268_s8, 7 }
   0xb   : > { %s399_s8 = smov (!%p111_p3, %s268_s8), 7  ;;  %s401_s7 = smov (!%p117_p4, %s336_s7), 1  ;;  %vm203_vm0 = vcmask 191488  }
   0xc   : > { %s303_s9 = smul.u32 40, %s399_s8  ;;  %s302_s13 = sshll.u32 %s401_s7, 4 }
   0xd   : > { %s121_s16 = scalar_lea.vmem %s397_s1, %s302_s13 }
   0xe   : > { %s344_s12 = scalar_lea.vmem %s396_s0, %s303_s9 }
   0xf   : > { %v122_v0 = vld [vmem:[%s344_s12] sm:$0xf]  ;;  %v272_v1 = vld [vmem:[%s344_s12 + $0x28] sm:$0xf]  ;;  %v276_v4 = vld [vmem:[%s344_s12 + $0x50] sm:$0xf] }
  0x10   : > { %v135_v2 = vld [vmem:[%s344_s12 + $0x1] sm:$0xf]  ;;  %v131_v3 = vadd.f32 %v272_v1, %v122_v0  ;;  %v123_v6 = vld [vmem:[%s344_s12 + $0x8] sm:$0xf]  ;;  %v273_v7 = vld [vmem:[%s344_s12 + $0x30] sm:$0xf] }
  0x11   : > { %v136_v8 = vld [vmem:[%s344_s12 + $0x9] sm:$0xf]  ;;  %v280_v9 = vld [vmem:[%s344_s12 + $0x78] sm:$0xf]  ;;  %v132_v10 = vadd.f32 %v273_v7, %v123_v6  ;;  %v284_v12 = vld [vmem:[%s344_s12 + $0x51] sm:$0xf] }
  0x12   : > { %v139_v5 = vadd.f32 %v135_v2, %v131_v3  ;;  %v277_v13 = vld [vmem:[%s344_s12 + $0x58] sm:$0xf]  ;;  %v124_v15 = vld [vmem:[%s344_s12 + $0x10] sm:$0xf]  ;;  %v281_v19 = vld [vmem:[%s344_s12 + $0x80] sm:$0xf] }
  0x13   : > { %v140_v14 = vadd.f32 %v136_v8, %v132_v10  ;;  %v274_v16 = vld [vmem:[%s344_s12 + $0x38] sm:$0xf]  ;;  %v137_v17 = vld [vmem:[%s344_s12 + $0x11] sm:$0xf]  ;;  %v288_v21 = vld [vmem:[%s344_s12 + $0x8] sm:$0xf] }
  0x14   : > { %v148_v11 = vadd.f32 %v276_v4, %v139_v5  ;;  %v133_v20 = vadd.f32 %v274_v16, %v124_v15  ;;  %v285_v23 = vld [vmem:[%s344_s12 + $0x59] sm:$0xf]  ;;  %v278_v24 = vld [vmem:[%s344_s12 + $0x60] sm:$0xf]  ;;  %v292_v30 = vld [vmem:[%s344_s12 + $0x30] sm:$0xf] }
  0x15   : > { %v149_v22 = vadd.f32 %v277_v13, %v140_v14  ;;  %v125_v27 = vld [vmem:[%s344_s12 + $0x18] sm:$0xf]  ;;  %v275_v28 = vld [vmem:[%s344_s12 + $0x40] sm:$0xf]  ;;  %v282_v32 = vld [vmem:[%s344_s12 + $0x88] sm:$0xf] }
  0x16   : > { %v157_v18 = vadd.f32 %v280_v9, %v148_v11  ;;  %v141_v26 = vadd.f32 %v137_v17, %v133_v20  ;;  %v138_v29 = vld [vmem:[%s344_s12 + $0x19] sm:$0xf]  ;;  %v134_v33 = vadd.f32 %v275_v28, %v125_v27  ;;  %v289_v35 = vld [vmem:[%s344_s12 + $0x10] sm:$0xf]  ;;  %v279_v37 = vld [vmem:[%s344_s12 + $0x68] sm:$0xf] }
  0x17   : > { %v158_v31 = vadd.f32 %v281_v19, %v149_v22  ;;  %v296_v38 = vld [vmem:[%s344_s12 + $0x9] sm:$0xf]  ;;  %v286_v40 = vld [vmem:[%s344_s12 + $0x61] sm:$0xf]  ;;  %v293_v43 = vld [vmem:[%s344_s12 + $0x38] sm:$0xf] }
  0x18   : > { %v165_v25 = vadd.f32 %v284_v12, %v157_v18  ;;  %v150_v36 = vadd.f32 %v278_v24, %v141_v26  ;;  %v142_v41 = vadd.f32 %v138_v29, %v134_v33  ;;  %v283_v45 = vld [vmem:[%s344_s12 + $0x90] sm:$0xf]  ;;  %v290_v47 = vld [vmem:[%s344_s12 + $0x18] sm:$0xf]  ;;  %v287_v52 = vld [vmem:[%s344_s12 + $0x69] sm:$0xf] }
  0x19   : > { %v166_v39 = vadd.f32 %v285_v23, %v158_v31  ;;  %v297_v50 = vld [vmem:[%s344_s12 + $0x11] sm:$0xf]  ;;  %v294_v54 = vld [vmem:[%s344_s12 + $0x40] sm:$0xf]  ;;  %v298_v60 = vld [vmem:[%s344_s12 + $0x19] sm:$0xf] }
  0x1a   : > { %v174_v34 = vadd.f32 %v288_v21, %v165_v25  ;;  %v159_v44 = vadd.f32 %v282_v32, %v150_v36  ;;  %v151_v48 = vadd.f32 %v279_v37, %v142_v41  ;;  %v291_v58 = vld [vmem:[%s344_s12 + $0x20] sm:$0xf]  ;;  %v295_v0 = vld [vmem:[%s344_s12 + $0x48] sm:$0xf] }
  0x1b   : > { %v175_v46 = vadd.f32 %v289_v35, %v166_v39  ;;  %v299_v4 = vld [vmem:[%s344_s12 + $0x21] sm:$0xf] }
  0x1c   : > { %v183_v42 = vadd.f32 %v292_v30, %v174_v34  ;;  %v167_v51 = vadd.f32 %v286_v40, %v159_v44  ;;  %v160_v55 = vadd.f32 %v283_v45, %v151_v48 }
  0x1d   : > { %v184_v53 = vadd.f32 %v293_v43, %v175_v46 }
  0x1e   : > { %v191_v49 = vadd.f32 %v296_v38, %v183_v42  ;;  %v176_v57 = vadd.f32 %v290_v47, %v167_v51  ;;  %v168_v61 = vadd.f32 %v287_v52, %v160_v55 }
  0x1f   : > { %v192_v59 = vadd.f32 %v297_v50, %v184_v53 }
  0x20   : > { %v195_v56 = vmul.f32 0.11111111, %v191_v49  ;;  %v185_v63 = vadd.f32 %v294_v54, %v176_v57  ;;  %v177_v2 = vadd.f32 %v291_v58, %v168_v61 }
  0x21   : > { %v196_v1 = vmul.f32 0.11111111, %v192_v59 }
  0x22   : > { %v199_v62 = vmax.f32 %v195_v56, 0.0  ;;  %v193_v3 = vadd.f32 %v298_v60, %v185_v63  ;;  %v186_v6 = vadd.f32 %v295_v0, %v177_v2 }
  0x23   : > { %v200_v5 = vmax.f32 %v196_v1, 0.0 }
  0x24   : > { %204 = vst.msk [vmem:[%s121_s16] sm:$0xf] %vm203_vm0, %v199_v62  ;;  %v197_v7 = vmul.f32 0.11111111, %v193_v3  ;;  %v194_v8 = vadd.f32 %v299_v4, %v186_v6 }
  0x25   : > { %205 = vst.msk [vmem:[%s121_s16 + $0x4] sm:$0xf] %vm203_vm0, %v200_v5 }
  0x26   : > { %v201_v9 = vmax.f32 %v197_v7, 0.0  ;;  %v198_v10 = vmul.f32 0.11111111, %v194_v8 }
  0x28   : > { %206 = vst.msk [vmem:[%s121_s16 + $0x8] sm:$0xf] %vm203_vm0, %v201_v9  ;;  %v202_v11 = vmax.f32 %v198_v10, 0.0 }
  0x2a   : > { %207 = vst.msk [vmem:[%s121_s16 + $0xc] sm:$0xf] %vm203_vm0, %v202_v11 }
  0x2b PF: > { %s11_s6 = sadd.s32 1, %s318_s6  }
  0x2c   : > { %p8_p5 = scmp.ge.s32.totalorder %s11_s6, 4  }
  0x2e   :  { %10 = sbr.rel (!%p8_p5) target bundleno = 1 (0x1), region = 59 }

// kernel: _lambda_.24
= control target key start
LH: loop header
LB: loop body
LE: loop exit
PB: predicated region body
PF: predicated region fallthrough
CT: control target
= control target key end

     0   :  { %s509_s12 = smov 0   ;;  %s644_s0 = inlined_call_operand.vmem [shape: f32[2,6,6,68], index: 0, kind: input, shape index: {}]   ;;  %s645_s1 = inlined_call_operand.vmem [shape: f32[9,1,68], index: 1, kind: input, shape index: {}]   ;;  %s646_s2 = inlined_call_operand.vmem [shape: f32[1,1,68], index: 2, kind: input, shape index: {}]   ;;  %s647_s3 = inlined_call_operand.vmem [shape: f32[2,4,4,68], index: 3, kind: output, shape index: {}]  }
   0x1 LB: > { %s419_s13 = sadd.s32 4294967295, %s487_s12   ;;  %p423_p0 = scmp.ge.s32.totalorder %s487_s12, 1  ;;  %s487_s12 = sphi %s509_s12, %s13_s12  }
   0x2   : > { %p137_p1 = scmp.lt.s32.totalorder %s487_s12, 3 }
   0x4   : > { %p138_p2 = pnand %p423_p0, %p137_p1 }
   0x5   : > { %p161_p3 = scmp.lt.s32.totalorder (!%p138_p2), %s419_s13, 1 }
   0x6   : > { %141 = sbr.rel (%p138_p2) target bundleno = 44 (0x2c), region = 32 }
   0xb   : > { %s649_s13 = smov (!%p161_p3, %s419_s13), 1  ;;  %v427_v0 = vld [vmem:[%s645_s1] ss:$0 sm:$0xff]  ;;  %v429_v1 = vld [vmem:[%s645_s1 + $0x1] ss:$0 sm:$0xff]  ;;  %vm359_vm0 = vcmask 551936  }
   0xc   : > { %s472_s14 = smul.u32 48, %s649_s13  ;;  %v529_v2 = vld [vmem:[%s645_s1 + $0x2] ss:$0 sm:$0xff]  ;;  %v539_v3 = vld [vmem:[%s645_s1 + $0x3] ss:$0 sm:$0xff]  ;;  %s471_s9 = sshll.u32 %s649_s13, 4 }
   0xd   : > { %v549_v11 = vld [vmem:[%s645_s1 + $0x4] ss:$0 sm:$0xff]  ;;  %v556_v14 = vld [vmem:[%s645_s1 + $0x5] ss:$0 sm:$0xff]  ;;  %v565_v20 = vld [vmem:[%s645_s1 + $0x6] ss:$0 sm:$0xff]  ;;  %s170_s15 = scalar_lea.vmem %s647_s3, %s471_s9 }
   0xe   : > { %s534_s23 = scalar_lea.vmem %s644_s0, %s472_s14  ;;  %v570_v21 = vld [vmem:[%s645_s1 + $0x7] ss:$0 sm:$0xff]  ;;  %v590_v44 = vld [vmem:[%s645_s1 + $0x8] ss:$0 sm:$0xff] }
   0xf   : > { %v171_v4 = vld [vmem:[%s534_s23] sm:$0xf]  ;;  %v432_v10 = vld [vmem:[%s534_s23 + $0x8] sm:$0xf]  ;;  %v433_v25 = vld [vmem:[%s534_s23 + $0x10] sm:$0xf] }
  0x10   : > { %v186_v5 = vld [vmem:[%s534_s23 + $0x1] sm:$0xf]  ;;  %v182_v7 = vmul.f32 %v427_v0, %v171_v4  ;;  %v438_v12 = vld [vmem:[%s534_s23 + $0x9] sm:$0xf]  ;;  %v239_v16 = vmul.f32 %v539_v3, %v432_v10  ;;  %v450_v28 = vld [vmem:[%s534_s23 + $0x10] sm:$0xf]  ;;  %v240_v33 = vmul.f32 %v539_v3, %v433_v25 }
  0x11   : > { %v206_v6 = vld [vmem:[%s534_s23 + $0x2] sm:$0xf]  ;;  %v198_v8 = vmul.f32 %v429_v1, %v186_v5  ;;  %v444_v13 = vld [vmem:[%s534_s23 + $0xa] sm:$0xf]  ;;  %v259_v27 = vmul.f32 %v549_v11, %v438_v12  ;;  %v456_v29 = vld [vmem:[%s534_s23 + $0x11] sm:$0xf]  ;;  %v300_v43 = vmul.f32 %v565_v20, %v450_v28 }
  0x12   : > { %v218_v9 = vmul.f32 %v529_v2, %v206_v6  ;;  %v172_v17 = vld [vmem:[%s534_s23 + $0x8] sm:$0xf]  ;;  %v439_v30 = vld [vmem:[%s534_s23 + $0x11] sm:$0xf]  ;;  %v279_v31 = vmul.f32 %v556_v14, %v444_v13  ;;  %v434_v42 = vld [vmem:[%s534_s23 + $0x18] sm:$0xf]  ;;  %v320_v50 = vmul.f32 %v570_v21, %v456_v29 }
  0x13   : > { %v202_v15 = vadd.f32 %v198_v8, %v182_v7  ;;  %v187_v18 = vld [vmem:[%s534_s23 + $0x9] sm:$0xf]  ;;  %v183_v22 = vmul.f32 %v427_v0, %v172_v17  ;;  %v173_v34 = vld [vmem:[%s534_s23 + $0x10] sm:$0xf]  ;;  %v260_v46 = vmul.f32 %v549_v11, %v439_v30  ;;  %v451_v47 = vld [vmem:[%s534_s23 + $0x18] sm:$0xf]  ;;  %v241_v52 = vmul.f32 %v539_v3, %v434_v42 }
  0x14   : > { %v207_v19 = vld [vmem:[%s534_s23 + $0xa] sm:$0xf]  ;;  %v199_v23 = vmul.f32 %v429_v1, %v187_v18  ;;  %v188_v35 = vld [vmem:[%s534_s23 + $0x11] sm:$0xf]  ;;  %v184_v39 = vmul.f32 %v427_v0, %v173_v34  ;;  %v440_v48 = vld [vmem:[%s534_s23 + $0x19] sm:$0xf]  ;;  %v301_v10 = vmul.f32 %v565_v20, %v451_v47 }
  0x15   : > { %v219_v24 = vmul.f32 %v529_v2, %v207_v19  ;;  %v222_v26 = vadd.f32 %v218_v9, %v202_v15  ;;  %v208_v36 = vld [vmem:[%s534_s23 + $0x12] sm:$0xf]  ;;  %v200_v40 = vmul.f32 %v429_v1, %v188_v35  ;;  %v174_v53 = vld [vmem:[%s534_s23 + $0x18] sm:$0xf]  ;;  %v435_v62 = vld [vmem:[%s534_s23 + $0x20] sm:$0xf]  ;;  %v261_v6 = vmul.f32 %v549_v11, %v440_v48 }
  0x16   : > { %v203_v32 = vadd.f32 %v199_v23, %v183_v22  ;;  %v445_v38 = vld [vmem:[%s534_s23 + $0x12] sm:$0xf]  ;;  %v220_v41 = vmul.f32 %v529_v2, %v208_v36  ;;  %v189_v54 = vld [vmem:[%s534_s23 + $0x19] sm:$0xf]  ;;  %v185_v60 = vmul.f32 %v427_v0, %v174_v53  ;;  %v441_v8 = vld [vmem:[%s534_s23 + $0x21] sm:$0xf]  ;;  %v242_v0 = vmul.f32 %v539_v3, %v435_v62 }
  0x17   : > { %v243_v37 = vadd.f32 %v239_v16, %v222_v26  ;;  %v204_v51 = vadd.f32 %v200_v40, %v184_v39  ;;  %v209_v55 = vld [vmem:[%s534_s23 + $0x1a] sm:$0xf]  ;;  %v462_v56 = vld [vmem:[%s534_s23 + $0x12] sm:$0xf]  ;;  %v280_v58 = vmul.f32 %v556_v14, %v445_v38  ;;  %v201_v61 = vmul.f32 %v429_v1, %v189_v54  ;;  %v452_v12 = vld [vmem:[%s534_s23 + $0x20] sm:$0xf] }
  0x18   : > { %v223_v45 = vadd.f32 %v219_v24, %v203_v32  ;;  %v446_v59 = vld [vmem:[%s534_s23 + $0x1a] sm:$0xf]  ;;  %v221_v7 = vmul.f32 %v529_v2, %v209_v55  ;;  %v340_v15 = vmul.f32 %v590_v44, %v462_v56  ;;  %v447_v19 = vld [vmem:[%s534_s23 + $0x22] sm:$0xf]  ;;  %v262_v25 = vmul.f32 %v549_v11, %v441_v8  ;;  %v453_v28 = vld [vmem:[%s534_s23 + $0x28] sm:$0xf] }
  0x19   : > { %v263_v49 = vadd.f32 %v259_v27, %v243_v37  ;;  %v457_v4 = vld [vmem:[%s534_s23 + $0x19] sm:$0xf]  ;;  %v224_v5 = vadd.f32 %v220_v41, %v204_v51  ;;  %v205_v13 = vadd.f32 %v201_v61, %v185_v60  ;;  %v281_v18 = vmul.f32 %v556_v14, %v446_v59  ;;  %v458_v23 = vld [vmem:[%s534_s23 + $0x21] sm:$0xf]  ;;  %v468_v29 = vld [vmem:[%s646_s2] ss:$0 sm:$0xff] }
  0x1a   : > { %v244_v57 = vadd.f32 %v240_v33, %v223_v45  ;;  %v463_v16 = vld [vmem:[%s534_s23 + $0x1a] sm:$0xf]  ;;  %v321_v22 = vmul.f32 %v570_v21, %v457_v4  ;;  %v302_v27 = vmul.f32 %v565_v20, %v452_v12  ;;  %v464_v32 = vld [vmem:[%s534_s23 + $0x22] sm:$0xf]  ;;  %v282_v34 = vmul.f32 %v556_v14, %v447_v19  ;;  %v459_v37 = vld [vmem:[%s534_s23 + $0x29] sm:$0xf] }
  0x1b   : > { %v283_v63 = vadd.f32 %v279_v31, %v263_v49  ;;  %v245_v17 = vadd.f32 %v241_v52, %v224_v5  ;;  %v225_v24 = vadd.f32 %v221_v7, %v205_v13  ;;  %v341_v31 = vmul.f32 %v590_v44, %v463_v16  ;;  %v465_v45 = vld [vmem:[%s534_s23 + $0x2a] sm:$0xf] }
  0x1c   : > { %v264_v9 = vadd.f32 %v260_v46, %v244_v57  ;;  %v322_v36 = vmul.f32 %v570_v21, %v458_v23  ;;  %v303_v40 = vmul.f32 %v565_v20, %v453_v28  ;;  %v323_v47 = vmul.f32 %v570_v21, %v459_v37 }
  0x1d   : > { %v304_v1 = vadd.f32 %v300_v43, %v283_v63  ;;  %v265_v26 = vadd.f32 %v261_v6, %v245_v17  ;;  %v246_v33 = vadd.f32 %v242_v0, %v225_v24  ;;  %v342_v43 = vmul.f32 %v590_v44, %v464_v32 }
  0x1e   : > { %v284_v2 = vadd.f32 %v280_v58, %v264_v9  ;;  %v343_v51 = vmul.f32 %v590_v44, %v465_v45 }
  0x1f   : > { %v324_v3 = vadd.f32 %v320_v50, %v304_v1  ;;  %v285_v11 = vadd.f32 %v281_v18, %v265_v26  ;;  %v266_v39 = vadd.f32 %v262_v25, %v246_v33 }
  0x20   : > { %v305_v30 = vadd.f32 %v301_v10, %v284_v2 }
  0x21   : > { %v344_v35 = vadd.f32 %v340_v15, %v324_v3  ;;  %v306_v42 = vadd.f32 %v302_v27, %v285_v11  ;;  %v286_v46 = vadd.f32 %v282_v34, %v266_v39 }
  0x22   : > { %v325_v38 = vadd.f32 %v321_v22, %v305_v30 }
  0x23   : > { %v355_v41 = vadd.f32 %v468_v29, %v344_v35  ;;  %v326_v48 = vadd.f32 %v322_v36, %v306_v42  ;;  %v307_v50 = vadd.f32 %v303_v40, %v286_v46 }
  0x24   : > { %v345_v14 = vadd.f32 %v341_v31, %v325_v38 }
  0x25   : > { %360 = vst.msk [vmem:[%s170_s15] sm:$0xf] %vm359_vm0, %v355_v41  ;;  %v346_v52 = vadd.f32 %v342_v43, %v326_v48  ;;  %v327_v20 = vadd.f32 %v323_v47, %v307_v50 }
  0x26   : > { %v356_v49 = vadd.f32 %v468_v29, %v345_v14 }
  0x27   : > { %v357_v53 = vadd.f32 %v468_v29, %v346_v52  ;;  %v347_v54 = vadd.f32 %v343_v51, %v327_v20 }
  0x28   : > { %361 = vst.msk [vmem:[%s170_s15 + $0x4] sm:$0xf] %vm359_vm0, %v356_v49 }
  0x29   : > { %362 = vst.msk [vmem:[%s170_s15 + $0x8] sm:$0xf] %vm359_vm0, %v357_v53  ;;  %v358_v55 = vadd.f32 %v468_v29, %v347_v54 }
  0x2b   : > { %363 = vst.msk [vmem:[%s170_s15 + $0xc] sm:$0xf] %vm359_vm0, %v358_v55 }
  0x2c PF: > { %s13_s12 = sadd.s32 1, %s487_s12  }
  0x2d   : > { %p10_p4 = scmp.ge.s32.totalorder %s13_s12, 4  }
  0x2f   :  { %12 = sbr.rel (!%p10_p4) target bundleno = 1 (0x1), region = 72 }

// kernel: _lambda_.23
= control target key start
LH: loop header
LB: loop body
LE: loop exit
PB: predicated region body
PF: predicated region fallthrough
CT: control target
= control target key end

     0   :  { %vm91_vm0 = vcmask 130048   ;;  %vm200_vm1 = vcmask 556032   ;;  %s426_s1 = inlined_call_operand.vmem [shape: f32[272,68], index: 1, kind: input, shape index: {}]   ;;  %s427_s0 = inlined_call_operand.vmem [shape: f32[32,272], index: 0, kind: input, shape index: {}]   ;;  %s428_s2 = inlined_call_operand.vmem [shape: f32[1,68], index: 2, kind: input, shape index: {}]   ;;  %s429_s3 = inlined_call_operand.vmem [shape: f32[32,68], index: 3, kind: output, shape index: {}]  }
   0x1   :  { %v63_v0 = vld [vmem:[%s426_s1 + $0xf0] sm:$0xff]  ;;  %v64_v1 = vld [vmem:[%s426_s1 + $0xf8] sm:$0xff]  ;;  %v61_v5 = vld [vmem:[%s426_s1 + $0xe0] sm:$0xff] }
   0x2   :  { %v47_v2 = vld [vmem:[%s426_s1 + $0x70] sm:$0xff]  ;;  %v82_v3 = vpack.c.bf16 %v64_v1, %v63_v0  ;;  %v48_v4 = vld [vmem:[%s426_s1 + $0x78] sm:$0xff]  ;;  %v62_v6 = vld [vmem:[%s426_s1 + $0xe8] sm:$0xff] }
   0x3   :  { %v74_v7 = vpack.c.bf16 %v48_v4, %v47_v2  ;;  %v81_v8 = vpack.c.bf16 %v62_v6, %v61_v5  ;;  %v45_v9 = vld [vmem:[%s426_s1 + $0x60] sm:$0xff]  ;;  %v46_v10 = vld [vmem:[%s426_s1 + $0x68] sm:$0xff]  ;;  %v59_v11 = vld [vmem:[%s426_s1 + $0xd0] sm:$0xff] }
   0x4   :  { %212 = vmatprep.subr.bf16.mxu0 %v82_v3  ;;  %v60_v12 = vld [vmem:[%s426_s1 + $0xd8] sm:$0xff]  ;;  %v73_v13 = vpack.c.bf16 %v46_v10, %v45_v9  ;;  %v43_v15 = vld [vmem:[%s426_s1 + $0x50] sm:$0xff]  ;;  %v57_v17 = vld [vmem:[%s426_s1 + $0xc0] sm:$0xff] }
   0x5   :  { %213 = vmatpush3.bf16.msra.mxu0 %v74_v7  ;;  %v80_v14 = vpack.c.bf16 %v60_v12, %v59_v11  ;;  %v44_v16 = vld [vmem:[%s426_s1 + $0x58] sm:$0xff]  ;;  %v58_v18 = vld [vmem:[%s426_s1 + $0xc8] sm:$0xff]  ;;  %v41_v21 = vld [vmem:[%s426_s1 + $0x40] sm:$0xff] }
   0x6   :  { %214 = vmatprep.subr.bf16.mxu0 %v81_v8  ;;  %v72_v19 = vpack.c.bf16 %v44_v16, %v43_v15  ;;  %v79_v20 = vpack.c.bf16 %v58_v18, %v57_v17  ;;  %v42_v22 = vld [vmem:[%s426_s1 + $0x48] sm:$0xff]  ;;  %v55_v23 = vld [vmem:[%s426_s1 + $0xb0] sm:$0xff]  ;;  %v56_v24 = vld [vmem:[%s426_s1 + $0xb8] sm:$0xff] }
   0x7   :  { %v16_v25 = vld [vmem:[%s427_s0 + $0x8] sm:$0xff]  ;;  %v39_v26 = vld [vmem:[%s426_s1 + $0x30] sm:$0xff]  ;;  %v40_v27 = vld [vmem:[%s426_s1 + $0x38] sm:$0xff]  ;;  %v71_v29 = vpack.c.bf16 %v42_v22, %v41_v21  ;;  %v78_v34 = vpack.c.bf16 %v56_v24, %v55_v23 }
   0x8   :  { %v19_v28 = vld [vmem:[%s427_s0 + $0x20] sm:$0xff]  ;;  %v66_v32 = vld [vmem:[%s426_s1 + $0x108] sm:$0xff]  ;;  %v17_v33 = vld [vmem:[%s427_s0 + $0x10] sm:$0xff]  ;;  %v70_v43 = vpack.c.bf16 %v40_v27, %v39_v26 }
   0x9   :  { %215 = vmatpush3.bf16.msra.mxu0 %v73_v13  ;;  %v28_v30 = vpack.c.bf16 %v19_v28, %v16_v25  ;;  %v65_v31 = vld [vmem:[%s426_s1 + $0x100] sm:$0xff]  ;;  %v20_v36 = vld [vmem:[%s427_s0 + $0x28] sm:$0xff]  ;;  %v26_v38 = vld [vmem:[%s427_s0 + $0x58] sm:$0xff] }
   0xa   :  { %216 = vmatprep.subr.bf16.mxu0 %v80_v14  ;;  %v83_v35 = vpack.c.bf16 %v66_v32, %v65_v31  ;;  %v23_v37 = vld [vmem:[%s427_s0 + $0x40] sm:$0xff]  ;;  %v54_v40 = vld [vmem:[%s426_s1 + $0xa8] sm:$0xff]  ;;  %v29_v41 = vpack.c.bf16 %v20_v36, %v17_v33  ;;  %v51_v47 = vld [vmem:[%s426_s1 + $0x90] sm:$0xff] }
   0xb   :  { %v53_v39 = vld [vmem:[%s426_s1 + $0xa0] sm:$0xff]  ;;  %130 = vmatprep.mubr.bf16.mxu0 %v28_v30  ;;  %v32_v42 = vpack.c.bf16 %v26_v38, %v23_v37  ;;  %v38_v46 = vld [vmem:[%s426_s1 + $0x28] sm:$0xff]  ;;  %v52_v48 = vld [vmem:[%s426_s1 + $0x98] sm:$0xff] }
   0xc   :  { %243 = vmatprep.subr.bf16.mxu1 %v83_v35  ;;  %v77_v44 = vpack.c.bf16 %v54_v40, %v53_v39  ;;  %v37_v45 = vld [vmem:[%s426_s1 + $0x20] sm:$0xff]  ;;  %245 = vmatprep.mubr.msk.bf16.mxu1 %vm91_vm0, %v29_v41  ;;  %v76_v50 = vpack.c.bf16 %v52_v48, %v51_v47  ;;  %v35_v51 = vld [vmem:[%s426_s1 + $0x10] sm:$0xff]  ;;  %v36_v52 = vld [vmem:[%s426_s1 + $0x18] sm:$0xff] }
   0xd   :  { %217 = vmatpush3.bf16.msra.mxu0 %v72_v19  ;;  %244 = vmatpush3.bf16.msra.mxu1 %v83_v35  ;;  %v69_v49 = vpack.c.bf16 %v38_v46, %v37_v45  ;;  %v49_v53 = vld [vmem:[%s426_s1 + $0x80] sm:$0xff]  ;;  %v50_v54 = vld [vmem:[%s426_s1 + $0x88] sm:$0xff]  ;;  %v68_v55 = vpack.c.bf16 %v36_v52, %v35_v51  ;;  %v18_v61 = vld [vmem:[%s427_s0 + $0x18] sm:$0xff] }
   0xe   :  { %218 = vmatprep.subr.bf16.mxu0 %v79_v20  ;;  %v75_v56 = vpack.c.bf16 %v50_v54, %v49_v53  ;;  %v33_v57 = vld [vmem:[%s426_s1] sm:$0xff]  ;;  %v34_v58 = vld [vmem:[%s426_s1 + $0x8] sm:$0xff]  ;;  %v22_v62 = vld [vmem:[%s427_s0 + $0x38] sm:$0xff] }
   0xf   :  { %v67_v59 = vpack.c.bf16 %v34_v58, %v33_v57  ;;  %v15_v60 = vld [vmem:[%s427_s0] sm:$0xff]  ;;  %v25_v63 = vld [vmem:[%s427_s0 + $0x50] sm:$0xff]  ;;  %v24_v3 = vld [vmem:[%s427_s0 + $0x48] sm:$0xff] }
  0x10   :  { %246 = vmatmul.mubr.msk.bf16.vlgmr.msra.gmra.mxu1 %vm91_vm0, %v32_v42  ;;  %v27_v0 = vpack.c.bf16 %v18_v61, %v15_v60  ;;  %v31_v1 = vpack.c.bf16 %v25_v63, %v22_v62  ;;  %v21_v2 = vld [vmem:[%s427_s0 + $0x30] sm:$0xff]  ;;  %v209_v9 = vld [vmem:[%s428_s2] ss:$0 sm:$0xff] }
  0x11   :  { %219 = vmatpush3.bf16.msra.mxu0 %v71_v29  ;;  %v30_v4 = vpack.c.bf16 %v24_v3, %v21_v2 }
  0x12   :  { %220 = vmatprep.subr.bf16.mxu0 %v78_v34 }
  0x15   :  { %221 = vmatpush3.bf16.msra.mxu0 %v70_v43 }
  0x16   :  { %222 = vmatprep.subr.bf16.mxu0 %v77_v44 }
  0x19   :  { %223 = vmatpush3.bf16.msra.mxu0 %v69_v49 }
  0x1a   :  { %224 = vmatprep.subr.bf16.mxu0 %v76_v50 }
  0x1d   :  { %225 = vmatpush3.bf16.msra.mxu0 %v68_v55 }
  0x1e   :  { %226 = vmatprep.subr.bf16.mxu0 %v75_v56 }
  0x21   :  { %227 = vmatpush3.bf16.msra.mxu0 %v67_v59 }
  0x24   :  { %131 = vmatmul.mubr.bf16.vlgmr.msra.gmra.mxu0 %v27_v0 }
  0x25   :  { %138 = vmatprep.mubr.bf16.mxu0 %v31_v1 }
  0x2c   :  { %139 = vmatmul.mubr.bf16.gmra.mxu0 %v30_v4 }
  0xd0   :  { %v247_v5 = vpop.f32.mrf.mxu1 }
  0xd2   :  { %v181_v7 = vpop.f32.mrf.mxu1 }
  0xd4   :  { %v248_v12 = vpop.f32.mrf.mxu1 }
  0xd6   :  { %v184_v18 = vpop.f32.mrf.mxu1 }
  0xe4   :  { %v228_v6 = vpop.f32.mrf.mxu0 }
  0xe6   :  { %v229_v8 = vpop.f32.mrf.mxu0 }
  0xe7   :  { %v230_v10 = vadd.f32 %v229_v8, %v228_v6 }
  0xe8   :  { %v231_v11 = vpop.f32.mrf.mxu0 }
  0xe9   :  { %v133_v13 = vadd.f32 %v230_v10, %v209_v9 }
  0xea   :  { %v232_v14 = vpop.f32.mrf.mxu0 }
  0xeb   :  { %v233_v15 = vadd.f32 %v232_v14, %v231_v11  ;;  %v182_v16 = vadd.f32 %v181_v7, %v133_v13 }
  0xec   :  { %v234_v17 = vpop.f32.mrf.mxu0 }
  0xed   :  { %v196_v19 = vmax.f32 %v182_v16, 0.0  ;;  %v136_v20 = vadd.f32 %v233_v15, %v209_v9 }
  0xee   :  { %v235_v21 = vpop.f32.mrf.mxu0 }
  0xef   :  { %201 = vst.msk [vmem:[%s429_s3] sm:$0xff] %vm200_vm1, %v196_v19  ;;  %v236_v22 = vadd.f32 %v235_v21, %v234_v17  ;;  %v185_v23 = vadd.f32 %v184_v18, %v136_v20 }
  0xf0   :  { %v237_v24 = vpop.f32.mrf.mxu0 }
  0xf1   :  { %v141_v25 = vadd.f32 %v236_v22, %v209_v9  ;;  %v197_v26 = vmax.f32 %v185_v23, 0.0 }
  0xf2   :  { %v238_v27 = vpop.f32.mrf.mxu0 }
  0xf3   :  { %v190_v28 = vadd.f32 %v247_v5, %v141_v25  ;;  %202 = vst.msk [vmem:[%s429_s3 + $0x8] sm:$0xff] %vm200_vm1, %v197_v26  ;;  %v239_v29 = vadd.f32 %v238_v27, %v237_v24 }
  0xf5   :  { %v198_v30 = vmax.f32 %v190_v28, 0.0  ;;  %v144_v31 = vadd.f32 %v239_v29, %v209_v9 }
  0xf7   :  { %203 = vst.msk [vmem:[%s429_s3 + $0x10] sm:$0xff] %vm200_vm1, %v198_v30  ;;  %v193_v32 = vadd.f32 %v248_v12, %v144_v31 }
  0xf9   :  { %v199_v33 = vmax.f32 %v193_v32, 0.0 }
  0xfb   :  { %204 = vst.msk [vmem:[%s429_s3 + $0x18] sm:$0xff] %vm200_vm1, %v199_v33 }

// kernel: _lambda_.25
= control target key start
LH: loop header
LB: loop body
LE: loop exit
PB: predicated region body
PF: predicated region fallthrough
CT: control target
= control target key end

     0   :  { %vm90_vm0 = vcmask 1041408   ;;  %v283_v3 = vmov 0   ;;  %vm83_vm1 = vcmask 556032   ;;  %v68_v51 = vlaneseq  ;;  %s503_s1 = inlined_call_operand.vmem [shape: f32[68,272], index: 1, kind: input, shape index: {}]   ;;  %s504_s0 = inlined_call_operand.vmem [shape: f32[32,68], index: 0, kind: input, shape index: {}]   ;;  %s505_s2 = inlined_call_operand.vmem [shape: f32[1,272], index: 2, kind: input, shape index: {}]   ;;  %s506_s3 = inlined_call_operand.vmem [shape: f32[32,272], index: 3, kind: input, shape index: {}]   ;;  %s507_s4 = inlined_call_operand.vmem [shape: f32[32,272], index: 4, kind: output, shape index: {}]  }
   0x1   :  { %v49_v0 = vld [vmem:[%s503_s1 + $0xc8] sm:$0xf]  ;;  %v48_v1 = vld [vmem:[%s503_s1 + $0xc0] sm:$0xf]  ;;  %v50_v2 = vld [vmem:[%s503_s1 + $0xd0] sm:$0xf]  ;;  %132 = vmatprep.mubr.bf16.mxu0 %v283_v3 }
   0x2   :  { %v64_v4 = vpack.c.bf16 %v49_v0, %v49_v0  ;;  %v63_v5 = vpack.c.bf16 %v48_v1, %v48_v1  ;;  %v65_v6 = vpack.c.bf16 %v50_v2, %v50_v2  ;;  %v43_v7 = vld [vmem:[%s503_s1 + $0x98] sm:$0xff]  ;;  %v46_v8 = vld [vmem:[%s503_s1 + $0xb0] sm:$0xff]  ;;  %v45_v11 = vld [vmem:[%s503_s1 + $0xa8] sm:$0xff]  ;;  %v69_v52 = vshrl.u32 %v68_v51, 7 }
   0x3   :  { %v42_v9 = vld [vmem:[%s503_s1 + $0x90] sm:$0xff]  ;;  %v61_v10 = vpack.c.bf16 %v46_v8, %v43_v7  ;;  %v44_v12 = vld [vmem:[%s503_s1 + $0xa0] sm:$0xff]  ;;  %v47_v13 = vld [vmem:[%s503_s1 + $0xb8] sm:$0xff]  ;;  %vm240_vm2 = vcmask 130048  }
   0x4   :  { %255 = vmatprep.subr.msk.bf16.mxu0 %vm90_vm0, %v64_v4  ;;  %v92_v14 = vsel %vm90_vm0, %v63_v5, 0  ;;  %281 = vmatprep.subr.msk.bf16.mxu1 %vm90_vm0, %v65_v6  ;;  %v98_v15 = vsel %vm90_vm0, %v65_v6, 0  ;;  %v62_v16 = vpack.c.bf16 %v47_v13, %v44_v12  ;;  %v37_v17 = vld [vmem:[%s503_s1 + $0x68] sm:$0xff]  ;;  %v40_v18 = vld [vmem:[%s503_s1 + $0x80] sm:$0xff]  ;;  %v60_v19 = vpack.c.bf16 %v45_v11, %v42_v9  ;;  %v38_v20 = vld [vmem:[%s503_s1 + $0x70] sm:$0xff] }
   0x5   :  { %107 = vmatpush1.bf16.msra.mxu0 %v92_v14  ;;  %268 = vmatpush3.bf16.msra.mxu1 %v98_v15  ;;  %v41_v21 = vld [vmem:[%s503_s1 + $0x88] sm:$0xff]  ;;  %v58_v22 = vpack.c.bf16 %v40_v18, %v37_v17  ;;  %v36_v23 = vld [vmem:[%s503_s1 + $0x60] sm:$0xff]  ;;  %v39_v24 = vld [vmem:[%s503_s1 + $0x78] sm:$0xff]  ;;  %v70_v53 = vsub.s32 0, %v69_v52  ;;  %v78_v54 = vsub.s32 2, %v69_v52  ;;  %v74_v56 = vsub.s32 1, %v69_v52 }
   0x6   :  { %108 = vmatprep.subr.bf16.mxu0 %v61_v10  ;;  %269 = vmatprep.subr.bf16.mxu1 %v62_v16  ;;  %v59_v25 = vpack.c.bf16 %v41_v21, %v38_v20  ;;  %v31_v26 = vld [vmem:[%s503_s1 + $0x38] sm:$0xff]  ;;  %v34_v27 = vld [vmem:[%s503_s1 + $0x50] sm:$0xff]  ;;  %v32_v28 = vld [vmem:[%s503_s1 + $0x40] sm:$0xff]  ;;  %v57_v30 = vpack.c.bf16 %v39_v24, %v36_v23 }
   0x7   :  { %v35_v29 = vld [vmem:[%s503_s1 + $0x58] sm:$0xff]  ;;  %v30_v31 = vld [vmem:[%s503_s1 + $0x30] sm:$0xff]  ;;  %v33_v32 = vld [vmem:[%s503_s1 + $0x48] sm:$0xff]  ;;  %v55_v33 = vpack.c.bf16 %v34_v27, %v31_v26 }
   0x8   :  { %v56_v34 = vpack.c.bf16 %v35_v29, %v32_v28  ;;  %v25_v35 = vld [vmem:[%s503_s1 + $0x8] sm:$0xff]  ;;  %v18_v36 = vld [vmem:[%s504_s0] sm:$0xff]  ;;  %v26_v39 = vld [vmem:[%s503_s1 + $0x10] sm:$0xff]  ;;  %v54_v42 = vpack.c.bf16 %v33_v32, %v30_v31 }
   0x9   :  { %109 = vmatpush1.bf16.msra.mxu0 %v60_v19  ;;  %270 = vmatpush3.bf16.msra.mxu1 %v62_v16  ;;  %v19_v37 = vld [vmem:[%s504_s0 + $0x8] sm:$0xff]  ;;  %v28_v38 = vld [vmem:[%s503_s1 + $0x20] sm:$0xff]  ;;  %v27_v45 = vld [vmem:[%s503_s1 + $0x18] sm:$0xff] }
   0xa   :  { %110 = vmatprep.subr.bf16.mxu0 %v58_v22  ;;  %271 = vmatprep.subr.bf16.mxu1 %v59_v25  ;;  %v29_v40 = vld [vmem:[%s503_s1 + $0x28] sm:$0xff]  ;;  %v22_v41 = vpack.c.bf16 %v19_v37, %v18_v36  ;;  %v52_v43 = vpack.c.bf16 %v28_v38, %v25_v35  ;;  %v24_v44 = vld [vmem:[%s503_s1] sm:$0xff]  ;;  %v20_v48 = vld [vmem:[%s504_s0 + $0x10] sm:$0xff] }
   0xb   :  { %v53_v46 = vpack.c.bf16 %v29_v40, %v26_v39  ;;  %v51_v47 = vpack.c.bf16 %v27_v45, %v24_v44  ;;  %v21_v49 = vld [vmem:[%s504_s0 + $0x18] sm:$0xff]  ;;  %v66_v55 = vld [vmem:[%s505_s2] sm:$0x7]  ;;  %v204_v9 = vld [vmem:[%s506_s3 + $0x10] sm:$0xff] }
   0xc   :  { %277 = vmatprep.mubr.msk.bf16.mxu1 %vm83_vm1, %v22_v41  ;;  %v23_v50 = vpack.c.bf16 %v21_v49, %v20_v48  ;;  %v415_v57 = vrot.slane %v66_v55, %v70_v53  ;;  %v79_v58 = vrot.slane %v66_v55, %v78_v54  ;;  %v417_v59 = vrot.slane %v66_v55, %v74_v56  ;;  %v202_v61 = vld [vmem:[%s506_s3] sm:$0xff]  ;;  %v205_v11 = vld [vmem:[%s506_s3 + $0x18] sm:$0xff]  ;;  %v207_v23 = vld [vmem:[%s506_s3 + $0x28] sm:$0xff] }
   0xd   :  { %111 = vmatpush1.bf16.msra.mxu0 %v57_v30  ;;  %272 = vmatpush3.bf16.msra.mxu1 %v59_v25  ;;  %v210_v63 = vld [vmem:[%s506_s3 + $0x40] sm:$0xff]  ;;  %v213_v17 = vld [vmem:[%s506_s3 + $0x58] sm:$0xff]  ;;  %v208_v31 = vld [vmem:[%s506_s3 + $0x30] sm:$0xff] }
   0xe   :  { %112 = vmatprep.subr.bf16.mxu0 %v55_v33  ;;  %273 = vmatprep.subr.bf16.mxu1 %v56_v34  ;;  %v206_v20 = vld [vmem:[%s506_s3 + $0x20] sm:$0xff]  ;;  %v209_v38 = vld [vmem:[%s506_s3 + $0x38] sm:$0xff]  ;;  %v211_v44 = vld [vmem:[%s506_s3 + $0x48] sm:$0xff] }
   0xf   :  { %v212_v49 = vld [vmem:[%s506_s3 + $0x50] sm:$0xff] }
  0x11   :  { %113 = vmatpush1.bf16.msra.mxu0 %v54_v42  ;;  %274 = vmatpush3.bf16.msra.mxu1 %v56_v34 }
  0x12   :  { %114 = vmatprep.subr.bf16.mxu0 %v52_v43  ;;  %275 = vmatprep.subr.bf16.mxu1 %v53_v46 }
  0x15   :  { %115 = vmatpush1.bf16.msra.mxu0 %v51_v47  ;;  %276 = vmatpush3.bf16.msra.mxu1 %v53_v46 }
  0x18   :  { %256 = vmatmul.mubr.msk.bf16.vlgmr.msra.gmra.mxu0 %vm83_vm1, %v22_v41  ;;  %278 = vmatmul.mubr.msk.bf16.vlgmr.msra.gmra.mxu1 %vm83_vm1, %v23_v50 }
  0x19   :  { %142 = vmatprep.mubr.bf16.mxu0 %v283_v3  ;;  %v203_v3 = vld [vmem:[%s506_s3 + $0x8] sm:$0xff] }
  0x20   :  { %257 = vmatmul.mubr.msk.bf16.gmra.mxu0 %vm83_vm1, %v23_v50 }
  0xd8   :  { %v134_v60 = vpop.f32.mrf.mxu0  ;;  %v279_v62 = vpop.f32.mrf.mxu1 }
  0xd9   :  { %v135_v0 = vadd.f32 %v134_v60, %v415_v57  ;;  %v196_v1 = vadd.f32 %v279_v62, %v79_v58 }
  0xda   :  { %v136_v2 = vpop.f32.mrf.mxu0  ;;  %v187_v4 = vpop.f32.mrf.mxu1 }
  0xdb   :  { %v214_v5 = vadd.f32 %v202_v61, %v135_v0  ;;  %v137_v6 = vadd.f32 %v136_v2, %v417_v59  ;;  %v222_v7 = vadd.f32 %v210_v63, %v196_v1  ;;  %v188_v8 = vadd.f32 %v187_v4, %v79_v58 }
  0xdc   :  { %v138_v10 = vpop.f32.mrf.mxu0  ;;  %v280_v12 = vpop.f32.mrf.mxu1 }
  0xdd   :  { %v226_v13 = vmax.f32 %v214_v5, 0.0  ;;  %v215_v14 = vadd.f32 %v203_v3, %v137_v6  ;;  %v234_v15 = vmax.f32 %v222_v7, 0.0  ;;  %v139_v16 = vadd.f32 %v138_v10, %v415_v57 }
  0xde   :  { %v216_v18 = vadd.f32 %v204_v9, %v188_v8  ;;  %v140_v19 = vpop.f32.mrf.mxu0  ;;  %v199_v21 = vadd.f32 %v280_v12, %v79_v58  ;;  %v190_v22 = vpop.f32.mrf.mxu1 }
  0xdf   :  { %238 = vst [vmem:[%s507_s4] sm:$0xff] %v226_v13  ;;  %v227_v24 = vmax.f32 %v215_v14, 0.0  ;;  %247 = vst.msk [vmem:[%s507_s4 + $0x40] sm:$0xff] %vm240_vm2, %v234_v15  ;;  %v217_v25 = vadd.f32 %v205_v11, %v139_v16  ;;  %v141_v26 = vadd.f32 %v140_v19, %v417_v59  ;;  %v191_v27 = vadd.f32 %v190_v22, %v79_v58 }
  0xe0   :  { %v228_v28 = vmax.f32 %v216_v18, 0.0  ;;  %v225_v29 = vadd.f32 %v213_v17, %v199_v21  ;;  %v144_v30 = vpop.f32.mrf.mxu0 }
  0xe1   :  { %239 = vst [vmem:[%s507_s4 + $0x8] sm:$0xff] %v227_v24  ;;  %v229_v32 = vmax.f32 %v217_v25, 0.0  ;;  %v218_v33 = vadd.f32 %v206_v20, %v141_v26  ;;  %v145_v34 = vadd.f32 %v144_v30, %v415_v57  ;;  %v219_v35 = vadd.f32 %v207_v23, %v191_v27 }
  0xe2   :  { %241 = vst.msk [vmem:[%s507_s4 + $0x10] sm:$0xff] %vm240_vm2, %v228_v28  ;;  %v237_v36 = vmax.f32 %v225_v29, 0.0  ;;  %v146_v37 = vpop.f32.mrf.mxu0 }
  0xe3   :  { %242 = vst [vmem:[%s507_s4 + $0x18] sm:$0xff] %v229_v32  ;;  %v230_v39 = vmax.f32 %v218_v33, 0.0  ;;  %v220_v40 = vadd.f32 %v208_v31, %v145_v34  ;;  %v231_v41 = vmax.f32 %v219_v35, 0.0  ;;  %v147_v42 = vadd.f32 %v146_v37, %v417_v59 }
  0xe4   :  { %250 = vst.msk [vmem:[%s507_s4 + $0x58] sm:$0xff] %vm240_vm2, %v237_v36  ;;  %v148_v43 = vpop.f32.mrf.mxu0 }
  0xe5   :  { %243 = vst [vmem:[%s507_s4 + $0x20] sm:$0xff] %v230_v39  ;;  %v232_v45 = vmax.f32 %v220_v40, 0.0  ;;  %244 = vst.msk [vmem:[%s507_s4 + $0x28] sm:$0xff] %vm240_vm2, %v231_v41  ;;  %v221_v46 = vadd.f32 %v209_v38, %v147_v42  ;;  %v149_v47 = vadd.f32 %v148_v43, %v415_v57 }
  0xe6   :  { %v150_v48 = vpop.f32.mrf.mxu0 }
  0xe7   :  { %245 = vst [vmem:[%s507_s4 + $0x30] sm:$0xff] %v232_v45  ;;  %v233_v50 = vmax.f32 %v221_v46, 0.0  ;;  %v223_v51 = vadd.f32 %v211_v44, %v149_v47  ;;  %v151_v52 = vadd.f32 %v150_v48, %v417_v59 }
  0xe9   :  { %246 = vst [vmem:[%s507_s4 + $0x38] sm:$0xff] %v233_v50  ;;  %v235_v53 = vmax.f32 %v223_v51, 0.0  ;;  %v224_v54 = vadd.f32 %v212_v49, %v151_v52 }
  0xeb   :  { %248 = vst [vmem:[%s507_s4 + $0x48] sm:$0xff] %v235_v53  ;;  %v236_v55 = vmax.f32 %v224_v54, 0.0 }
  0xed   :  { %249 = vst [vmem:[%s507_s4 + $0x50] sm:$0xff] %v236_v55 }

// kernel: _lambda_.28
= control target key start
LH: loop header
LB: loop body
LE: loop exit
PB: predicated region body
PF: predicated region fallthrough
CT: control target
= control target key end

     0   :  { %s429_s6 = smov 0   ;;  %s496_s0 = inlined_call_operand.vmem [shape: f32[8,3,3,272], index: 0, kind: input, shape index: {}]   ;;  %s497_s1 = inlined_call_operand.vmem [shape: f32[2,2,2,272], index: 1, kind: output, shape index: {}]  }
   0x1 LB: > { %s435_s7 = sadd.s32 4294967295, %s416_s6   ;;  %p353_p0 = scmp.ge.s32.totalorder %s416_s6, 1  ;;  %s416_s6 = sphi %s429_s6, %s11_s6  }
   0x2   : > { %p89_p1 = scmp.lt.s32.totalorder %s416_s6, 3 }
   0x4   : > { %p90_p2 = pnand %p353_p0, %p89_p1 }
   0x5   : > { %s354_s8 = sshll.u32 (!%p90_p2), %s435_s7, 2  ;;  %p117_p4 = scmp.lt.s32.totalorder (!%p90_p2), %s435_s7, 1 }
   0x6   : > { %93 = sbr.rel (%p90_p2) target bundleno = 51 (0x33), region = 24  ;;  %p111_p3 = scmp.lt.s32.totalorder (!%p90_p2), %s354_s8, 7 }
   0xb   : > { %s499_s8 = smov (!%p111_p3, %s354_s8), 7  ;;  %v258_v29 = vlaneseq  ;;  %v418_v35 = vmov 1983009808   ;;  %s501_s7 = smov (!%p117_p4, %s435_s7), 1  ;;  %vm287_vm0 = vcmask 1041408   ;;  %vm288_vm1 = vcmask 1043458  }
   0xc   : > { %s399_s9 = smul.u32 36, %s499_s8  ;;  %v256_v36 = vunpack.c.l.s4 %v418_v35  ;;  %vm290_vm2 = vcmask 128004   ;;  %vm289_vm3 = vmor %vm288_vm1, %vm287_vm0 }
   0xd   : > { %v259_v57 = vshrl.u32 %v258_v29, 7  ;;  %s400_s13 = smul.u32 12, %s501_s7  ;;  %vm291_vm4 = vmor %vm290_vm2, %vm289_vm3 }
   0xe   : > { %s443_s12 = scalar_lea.vmem %s496_s0, %s399_s9  ;;  %v257_v56 = vunpack.c.0.s8 %v256_v36 }
   0xf   : > { %v122_v0 = vld [vmem:[%s443_s12] sm:$0x33]  ;;  %v123_v1 = vld [vmem:[%s443_s12 + $0x8] sm:$0x3]  ;;  %v358_v3 = vld [vmem:[%s443_s12 + $0x2c] sm:$0x3]  ;;  %s121_s16 = scalar_lea.vmem %s497_s1, %s400_s13 }
  0x10   : > { %v357_v2 = vld [vmem:[%s443_s12 + $0x24] sm:$0x33]  ;;  %v132_v7 = vadd.f32 %v358_v3, %v123_v1  ;;  %v366_v11 = vld [vmem:[%s443_s12 + $0x50] sm:$0x3]  ;;  %v370_v17 = vld [vmem:[%s443_s12 + $0x74] sm:$0x3] }
  0x11   : > { %v131_v4 = vadd.f32 %v357_v2, %v122_v0  ;;  %v135_v5 = vld [vmem:[%s443_s12] sm:$0x66]  ;;  %v136_v6 = vld [vmem:[%s443_s12 + $0x8] sm:$0x6]  ;;  %v374_v15 = vld [vmem:[%s443_s12 + $0x50] sm:$0x6] }
  0x12   : > { %v361_v8 = vrot.slane %v135_v5, 9  ;;  %v362_v9 = vrot.slane %v136_v6, 9  ;;  %v365_v10 = vld [vmem:[%s443_s12 + $0x48] sm:$0x33]  ;;  %v378_v21 = vrot.slane %v374_v15, 9 }
  0x13   : > { %v373_v12 = vld [vmem:[%s443_s12 + $0x48] sm:$0x66]  ;;  %v382_v23 = vld [vmem:[%s443_s12 + $0x14] sm:$0x3]  ;;  %v360_v31 = vld [vmem:[%s443_s12 + $0x38] sm:$0x3] }
  0x14   : > { %v155_v13 = vadd.f32 %v361_v8, %v131_v4  ;;  %v156_v14 = vadd.f32 %v362_v9, %v132_v7  ;;  %v369_v16 = vld [vmem:[%s443_s12 + $0x6c] sm:$0x33]  ;;  %v377_v20 = vrot.slane %v373_v12, 9  ;;  %v125_v26 = vld [vmem:[%s443_s12 + $0x14] sm:$0x3]  ;;  %v260_v12 = vsub.s32 %v257_v56, %v259_v57 }
  0x15   : > { %v381_v22 = vld [vmem:[%s443_s12 + $0xc] sm:$0x33]  ;;  %v390_v34 = vld [vmem:[%s443_s12 + $0x14] sm:$0x6]  ;;  %v134_v38 = vadd.f32 %v360_v31, %v125_v26  ;;  %v386_v43 = vld [vmem:[%s443_s12 + $0x38] sm:$0x3] }
  0x16   : > { %v164_v18 = vadd.f32 %v365_v10, %v155_v13  ;;  %v165_v19 = vadd.f32 %v366_v11, %v156_v14  ;;  %v389_v24 = vld [vmem:[%s443_s12 + $0xc] sm:$0x66]  ;;  %v138_v39 = vld [vmem:[%s443_s12 + $0x14] sm:$0x6]  ;;  %v368_v48 = vld [vmem:[%s443_s12 + $0x5c] sm:$0x3] }
  0x17   : > { %v124_v25 = vld [vmem:[%s443_s12 + $0xc] sm:$0x33]  ;;  %v393_v44 = vrot.slane %v389_v24, 9  ;;  %v364_v45 = vrot.slane %v138_v39, 9  ;;  %v367_v46 = vld [vmem:[%s443_s12 + $0x54] sm:$0x33] }
  0x18   : > { %v173_v27 = vadd.f32 %v369_v16, %v164_v18  ;;  %v174_v28 = vadd.f32 %v370_v17, %v165_v19  ;;  %v359_v30 = vld [vmem:[%s443_s12 + $0x30] sm:$0x33]  ;;  %v376_v50 = vld [vmem:[%s443_s12 + $0x5c] sm:$0x6]  ;;  %v394_v53 = vrot.slane %v390_v34, 9 }
  0x19   : > { %v137_v32 = vld [vmem:[%s443_s12 + $0xc] sm:$0x66]  ;;  %v133_v37 = vadd.f32 %v359_v30, %v124_v25  ;;  %v375_v49 = vld [vmem:[%s443_s12 + $0x54] sm:$0x66]  ;;  %v158_v54 = vadd.f32 %v364_v45, %v134_v38  ;;  %v372_v59 = vld [vmem:[%s443_s12 + $0x80] sm:$0x3] }
  0x1a   : > { %v385_v33 = vld [vmem:[%s443_s12 + $0x30] sm:$0x33]  ;;  %v363_v40 = vrot.slane %v137_v32, 9  ;;  %v197_v41 = vadd.f32 %v377_v20, %v173_v27  ;;  %v198_v42 = vadd.f32 %v378_v21, %v174_v28  ;;  %v371_v55 = vld [vmem:[%s443_s12 + $0x78] sm:$0x33]  ;;  %v379_v60 = vrot.slane %v375_v49, 9 }
  0x1b   : > { %v167_v63 = vadd.f32 %v368_v48, %v158_v54  ;;  %v380_v0 = vrot.slane %v376_v50, 9  ;;  %v383_v5 = vld [vmem:[%s443_s12 + $0x18] sm:$0x33]  ;;  %v384_v8 = vld [vmem:[%s443_s12 + $0x20] sm:$0x3] }
  0x1c   : > { %v157_v47 = vadd.f32 %v363_v40, %v133_v37  ;;  %v206_v51 = vadd.f32 %v381_v22, %v197_v41  ;;  %v207_v52 = vadd.f32 %v382_v23, %v198_v42  ;;  %v391_v6 = vld [vmem:[%s443_s12 + $0x18] sm:$0x66]  ;;  %v392_v9 = vld [vmem:[%s443_s12 + $0x20] sm:$0x6]  ;;  %v388_v16 = vld [vmem:[%s443_s12 + $0x44] sm:$0x3] }
  0x1d   : > { %v176_v4 = vadd.f32 %v372_v59, %v167_v63  ;;  %v387_v14 = vld [vmem:[%s443_s12 + $0x3c] sm:$0x33]  ;;  %v395_v17 = vrot.slane %v391_v6, 9  ;;  %v396_v21 = vrot.slane %v392_v9, 9 }
  0x1e   : > { %v166_v58 = vadd.f32 %v367_v46, %v157_v47  ;;  %v215_v61 = vadd.f32 %v385_v33, %v206_v51  ;;  %v216_v62 = vadd.f32 %v386_v43, %v207_v52 }
  0x1f   : > { %v200_v13 = vadd.f32 %v380_v0, %v176_v4 }
  0x20   : > { %v175_v1 = vadd.f32 %v371_v55, %v166_v58  ;;  %v239_v2 = vadd.f32 %v393_v44, %v215_v61  ;;  %v240_v3 = vadd.f32 %v394_v53, %v216_v62 }
  0x21   : > { %v209_v20 = vadd.f32 %v384_v8, %v200_v13 }
  0x22   : > { %v199_v7 = vadd.f32 %v379_v60, %v175_v1  ;;  %v243_v10 = vmul.f32 0.11111111, %v239_v2  ;;  %v244_v11 = vmul.f32 0.11111111, %v240_v3 }
  0x23   : > { %v218_v25 = vadd.f32 %v388_v16, %v209_v20 }
  0x24   : > { %v208_v15 = vadd.f32 %v383_v5, %v199_v7  ;;  %v247_v18 = vmax.f32 %v243_v10, 0.0  ;;  %v248_v19 = vmax.f32 %v244_v11, 0.0 }
  0x25   : > { %v242_v28 = vadd.f32 %v396_v21, %v218_v25 }
  0x26   : > { %v217_v22 = vadd.f32 %v387_v14, %v208_v15  ;;  %v261_v23 = vrot.slane %v247_v18, %v260_v12  ;;  %v268_v24 = vrot.slane %v248_v19, %v260_v12 }
  0x27   : > { %v246_v30 = vmul.f32 0.11111111, %v242_v28 }
  0x28   : > { %v241_v26 = vadd.f32 %v395_v17, %v217_v22  ;;  %v269_v27 = vcombine.low %v261_v23, %v268_v24 }
  0x29   : > { %v250_v32 = vmax.f32 %v246_v30, 0.0 }
  0x2a   : > { %v245_v29 = vmul.f32 0.11111111, %v241_v26  ;;  %292 = vst.msk [vmem:[%s121_s16] sm:$0x3f] %vm291_vm4, %v269_v27 }
  0x2b   : > { %v283_v34 = vrot.slane %v250_v32, %v260_v12 }
  0x2c   : > { %v249_v31 = vmax.f32 %v245_v29, 0.0 }
  0x2e   : > { %v276_v33 = vrot.slane %v249_v31, %v260_v12 }
  0x30   : > { %v284_v35 = vcombine.low %v276_v33, %v283_v34 }
  0x32   : > { %293 = vst.msk [vmem:[%s121_s16 + $0x6] sm:$0x3f] %vm291_vm4, %v284_v35 }
  0x33 PF: > { %s11_s6 = sadd.s32 1, %s416_s6  }
  0x34   : > { %p8_p5 = scmp.ge.s32.totalorder %s11_s6, 4  }
  0x36   :  { %10 = sbr.rel (!%p8_p5) target bundleno = 1 (0x1), region = 59 }

// kernel: _lambda_.27
= control target key start
LH: loop header
LB: loop body
LE: loop exit
PB: predicated region body
PF: predicated region fallthrough
CT: control target
= control target key end

     0   :  { %s547_s12 = smov 0   ;;  %s650_s0 = inlined_call_operand.vmem [shape: f32[8,3,3,136], index: 0, kind: input, shape index: {}]   ;;  %s651_s1 = inlined_call_operand.vmem [shape: f32[9,1,136], index: 1, kind: input, shape index: {}]   ;;  %s652_s2 = inlined_call_operand.vmem [shape: f32[1,1,136], index: 2, kind: input, shape index: {}]   ;;  %s653_s3 = inlined_call_operand.vmem [shape: f32[2,2,2,136], index: 3, kind: output, shape index: {}]  }
   0x1 LB: > { %s553_s13 = sadd.s32 4294967295, %s524_s12   ;;  %p472_p0 = scmp.ge.s32.totalorder %s524_s12, 1  ;;  %s524_s12 = sphi %s547_s12, %s13_s12  }
   0x2   : > { %p139_p1 = scmp.lt.s32.totalorder %s524_s12, 3 }
   0x4   : > { %p140_p2 = pnand %p472_p0, %p139_p1 }
   0x5   : > { %s473_s14 = sshll.u32 (!%p140_p2), %s553_s13, 2  ;;  %p171_p4 = scmp.lt.s32.totalorder (!%p140_p2), %s553_s13, 1 }
   0x6   : > { %143 = sbr.rel (%p140_p2) target bundleno = 49 (0x31), region = 32  ;;  %p165_p3 = scmp.lt.s32.totalorder (!%p140_p2), %s473_s14, 7 }
   0xb   : > { %v180_v0 = vlaneseq  ;;  %s655_s14 = smov (!%p165_p3, %s473_s14), 7  ;;  %v178_v2 = vld [vmem:[%s651_s1] sm:$0x3]  ;;  %v479_v3 = vld [vmem:[%s651_s1 + $0x2] sm:$0x3]  ;;  %s657_s13 = smov (!%p171_p4, %s553_s13), 1 }
   0xc   : > { %v480_v6 = vld [vmem:[%s651_s1 + $0x4] sm:$0x3]  ;;  %v485_v7 = vld [vmem:[%s651_s1 + $0x6] sm:$0x3]  ;;  %s508_s23 = smul.u32 24, %s655_s14  ;;  %s507_s14 = sshll.u32 %s657_s13, 3 }
   0xd   : > { %v558_v1 = vshrl.u32 %v180_v0, 7  ;;  %v488_v8 = vld [vmem:[%s651_s1 + $0x8] sm:$0x3]  ;;  %v491_v13 = vld [vmem:[%s651_s1 + $0xa] sm:$0x3]  ;;  %vm408_vm0 = vcmask 1041408   ;;  %s175_s17 = scalar_lea.vmem %s653_s3, %s507_s14 }
   0xe   : > { %s591_s30 = scalar_lea.vmem %s650_s0, %s508_s23  ;;  %v496_v27 = vld [vmem:[%s651_s1 + $0xc] sm:$0x3]  ;;  %v502_v32 = vld [vmem:[%s651_s1 + $0x10] sm:$0x3]  ;;  %v499_v40 = vld [vmem:[%s651_s1 + $0xe] sm:$0x3] }
   0xf   : > { %v567_v4 = vsub.s32 0, %v558_v1  ;;  %v570_v5 = vsub.s32 1, %v558_v1  ;;  %v176_v18 = vld [vmem:[%s591_s30] sm:$0x33]  ;;  %v477_v20 = vld [vmem:[%s591_s30 + $0x18] sm:$0x33] }
  0x10   : > { %v212_v30 = vld [vmem:[%s591_s30] sm:$0x66]  ;;  %v483_v34 = vld [vmem:[%s591_s30 + $0x30] sm:$0x33]  ;;  %v177_v45 = vld [vmem:[%s591_s30 + $0x8] sm:$0x33] }
  0x11   : > { %v183_v9 = vrot.slane %v178_v2, %v567_v4  ;;  %v187_v10 = vrot.slane %v178_v2, %v570_v5  ;;  %v201_v11 = vrot.slane %v479_v3, %v567_v4  ;;  %v205_v12 = vrot.slane %v479_v3, %v570_v5  ;;  %v489_v37 = vld [vmem:[%s591_s30 + $0x30] sm:$0x66]  ;;  %v486_v47 = vld [vmem:[%s591_s30 + $0x48] sm:$0x33]  ;;  %v478_v49 = vld [vmem:[%s591_s30 + $0x20] sm:$0x33] }
  0x12   : > { %v220_v14 = vrot.slane %v480_v6, %v567_v4  ;;  %v224_v15 = vrot.slane %v480_v6, %v570_v5  ;;  %v249_v16 = vrot.slane %v485_v7, %v567_v4  ;;  %v253_v17 = vrot.slane %v485_v7, %v570_v5  ;;  %v213_v54 = vld [vmem:[%s591_s30 + $0x8] sm:$0x66]  ;;  %v484_v61 = vld [vmem:[%s591_s30 + $0x38] sm:$0x33] }
  0x13   : > { %v188_v19 = vcombine.low %v183_v9, %v187_v10  ;;  %v206_v21 = vcombine.low %v201_v11, %v205_v12  ;;  %v269_v22 = vrot.slane %v488_v8, %v567_v4  ;;  %v273_v23 = vrot.slane %v488_v8, %v570_v5  ;;  %v490_v62 = vld [vmem:[%s591_s30 + $0x38] sm:$0x66]  ;;  %v494_v63 = vld [vmem:[%s591_s30 + $0x8] sm:$0x33]  ;;  %v487_v10 = vld [vmem:[%s591_s30 + $0x50] sm:$0x33] }
  0x14   : > { %v225_v24 = vcombine.low %v220_v14, %v224_v15  ;;  %v288_v25 = vrot.slane %v491_v13, %v567_v4  ;;  %v292_v26 = vrot.slane %v491_v13, %v570_v5  ;;  %v254_v31 = vcombine.low %v249_v16, %v253_v17  ;;  %v500_v0 = vld [vmem:[%s591_s30 + $0x8] sm:$0x66]  ;;  %v497_v11 = vld [vmem:[%s591_s30 + $0x20] sm:$0x33] }
  0x15   : > { %v190_v28 = vmul.f32 %v188_v19, %v176_v18  ;;  %v208_v29 = vmul.f32 %v477_v20, %v206_v21  ;;  %v274_v36 = vcombine.low %v269_v22, %v273_v23  ;;  %v317_v38 = vrot.slane %v496_v27, %v567_v4  ;;  %v376_v12 = vld [vmem:[%s652_s2] sm:$0x3] }
  0x16   : > { %v226_v33 = vrot.slane %v225_v24, 7  ;;  %v293_v35 = vcombine.low %v288_v25, %v292_v26  ;;  %v321_v39 = vrot.slane %v496_v27, %v570_v5  ;;  %v356_v44 = vrot.slane %v502_v32, %v567_v4  ;;  %v495_v27 = vld [vmem:[%s591_s30 + $0x10] sm:$0x33] }
  0x17   : > { %v210_v41 = vadd.f32 %v208_v29, %v190_v28  ;;  %v256_v46 = vmul.f32 %v483_v34, %v254_v31  ;;  %v360_v48 = vrot.slane %v502_v32, %v570_v5  ;;  %v337_v52 = vrot.slane %v499_v40, %v567_v4  ;;  %v501_v28 = vld [vmem:[%s591_s30 + $0x10] sm:$0x66]  ;;  %v498_v34 = vld [vmem:[%s591_s30 + $0x28] sm:$0x33] }
  0x18   : > { %v228_v42 = vmul.f32 %v226_v33, %v212_v30  ;;  %v294_v43 = vrot.slane %v293_v35, 7  ;;  %v341_v53 = vrot.slane %v499_v40, %v570_v5  ;;  %v191_v56 = vmul.f32 %v188_v19, %v177_v45 }
  0x19   : > { %v361_v55 = vcombine.low %v356_v44, %v360_v48  ;;  %v276_v58 = vmul.f32 %v486_v47, %v274_v36  ;;  %v322_v59 = vcombine.low %v317_v38, %v321_v39  ;;  %v209_v60 = vmul.f32 %v478_v49, %v206_v21 }
  0x1a   : > { %v481_v50 = vrot.slane %v228_v42, 9  ;;  %v296_v51 = vmul.f32 %v489_v37, %v294_v43  ;;  %v229_v3 = vmul.f32 %v226_v33, %v213_v54  ;;  %v342_v8 = vcombine.low %v337_v52, %v341_v53 }
  0x1b   : > { %v362_v2 = vrot.slane %v361_v55, 7  ;;  %v211_v9 = vadd.f32 %v209_v60, %v191_v56  ;;  %v257_v14 = vmul.f32 %v484_v61, %v254_v31  ;;  %v297_v15 = vmul.f32 %v490_v62, %v294_v43 }
  0x1c   : > { %v238_v57 = vadd.f32 %v481_v50, %v210_v41  ;;  %v492_v7 = vrot.slane %v296_v51, 9  ;;  %v482_v13 = vrot.slane %v229_v3, 9  ;;  %v324_v17 = vmul.f32 %v494_v63, %v322_v59 }
  0x1d   : > { %v364_v18 = vmul.f32 %v500_v0, %v362_v2  ;;  %v526_v19 = vmov 1983009808   ;;  %v277_v22 = vmul.f32 %v487_v10, %v274_v36  ;;  %v344_v24 = vmul.f32 %v497_v11, %v342_v8 }
  0x1e   : > { %v258_v6 = vadd.f32 %v256_v46, %v238_v57  ;;  %v393_v20 = vunpack.c.l.s4 %v526_v19  ;;  %v239_v21 = vadd.f32 %v482_v13, %v211_v9  ;;  %v381_v25 = vrot.slane %v376_v12, %v567_v4 }
  0x1f   : > { %v385_v26 = vrot.slane %v376_v12, %v570_v5  ;;  %v493_v30 = vrot.slane %v297_v15, 9  ;;  %v503_v32 = vrot.slane %v364_v18, 9  ;;  %v325_v37 = vmul.f32 %v495_v27, %v322_v59 }
  0x20   : > { %v278_v16 = vadd.f32 %v276_v58, %v258_v6  ;;  %v259_v29 = vadd.f32 %v257_v14, %v239_v21  ;;  %v394_v33 = vunpack.c.0.s8 %v393_v20  ;;  %v365_v38 = vmul.f32 %v501_v28, %v362_v2 }
  0x21   : > { %v386_v39 = vcombine.low %v381_v25, %v385_v26  ;;  %v345_v41 = vmul.f32 %v498_v34, %v342_v8  ;;  %vm409_vm1 = vcmask 60418  }
  0x22   : > { %v306_v23 = vadd.f32 %v492_v7, %v278_v16  ;;  %v279_v35 = vadd.f32 %v277_v22, %v259_v29  ;;  %v397_v5 = vsub.s32 %v394_v33, %v558_v1  ;;  %v504_v43 = vrot.slane %v365_v38, 9  ;;  %vm410_vm2 = vmor %vm409_vm1, %vm408_vm0 }
  0x24   : > { %v326_v31 = vadd.f32 %v324_v17, %v306_v23  ;;  %v307_v40 = vadd.f32 %v493_v30, %v279_v35 }
  0x26   : > { %v346_v36 = vadd.f32 %v344_v24, %v326_v31  ;;  %v327_v42 = vadd.f32 %v325_v37, %v307_v40 }
  0x28   : > { %v374_v4 = vadd.f32 %v503_v32, %v346_v36  ;;  %v347_v45 = vadd.f32 %v345_v41, %v327_v42 }
  0x2a   : > { %v388_v44 = vadd.f32 %v386_v39, %v374_v4  ;;  %v375_v47 = vadd.f32 %v504_v43, %v347_v45 }
  0x2c   : > { %v398_v46 = vrot.slane %v388_v44, %v397_v5  ;;  %v389_v48 = vadd.f32 %v386_v39, %v375_v47 }
  0x2e   : > { %411 = vst.msk [vmem:[%s175_s17] sm:$0xf] %vm410_vm2, %v398_v46  ;;  %v405_v49 = vrot.slane %v389_v48, %v397_v5 }
  0x30   : > { %412 = vst.msk [vmem:[%s175_s17 + $0x4] sm:$0xf] %vm410_vm2, %v405_v49 }
  0x31 PF: > { %s13_s12 = sadd.s32 1, %s524_s12  }
  0x32   : > { %p10_p5 = scmp.ge.s32.totalorder %s13_s12, 4  }
  0x34   :  { %12 = sbr.rel (!%p10_p5) target bundleno = 1 (0x1), region = 75 }

// kernel: _lambda_.26
= control target key start
LH: loop header
LB: loop body
LE: loop exit
PB: predicated region body
PF: predicated region fallthrough
CT: control target
= control target key end

     0   :  { %v284_v3 = vmov 0   ;;  %vm147_vm0 = vcmask 130048   ;;  %vm269_vm1 = vcmask 64512   ;;  %s580_s1 = inlined_call_operand.vmem [shape: f32[272,136], index: 1, kind: input, shape index: {}]   ;;  %s581_s0 = inlined_call_operand.vmem [shape: f32[32,272], index: 0, kind: input, shape index: {}]   ;;  %s582_s2 = inlined_call_operand.vmem [shape: f32[1,136], index: 2, kind: input, shape index: {}]   ;;  %s583_s3 = inlined_call_operand.vmem [shape: f32[32,136], index: 3, kind: output, shape index: {}]  }
   0x1   :  { %v62_v0 = vld [vmem:[%s580_s1 + $0xe8] sm:$0xff]  ;;  %v64_v1 = vld [vmem:[%s580_s1 + $0xf8] sm:$0xff]  ;;  %v61_v2 = vld [vmem:[%s580_s1 + $0xe0] sm:$0xff]  ;;  %239 = vmatprep.mubr.bf16.mxu1 %v284_v3 }
   0x2   :  { %v116_v4 = vpack.c.bf16 %v64_v1, %v62_v0  ;;  %v63_v5 = vld [vmem:[%s580_s1 + $0xf0] sm:$0xff]  ;;  %v58_v6 = vld [vmem:[%s580_s1 + $0xc8] sm:$0xff]  ;;  %v60_v7 = vld [vmem:[%s580_s1 + $0xd8] sm:$0xff] }
   0x3   :  { %v115_v8 = vpack.c.bf16 %v63_v5, %v61_v2  ;;  %v114_v9 = vpack.c.bf16 %v60_v7, %v58_v6  ;;  %v57_v10 = vld [vmem:[%s580_s1 + $0xc0] sm:$0xff]  ;;  %v59_v11 = vld [vmem:[%s580_s1 + $0xd0] sm:$0xff]  ;;  %v54_v12 = vld [vmem:[%s580_s1 + $0xa8] sm:$0xff] }
   0x4   :  { %154 = vmatprep.subr.bf16.mxu0 %v116_v4  ;;  %v56_v13 = vld [vmem:[%s580_s1 + $0xb8] sm:$0xff]  ;;  %v113_v14 = vpack.c.bf16 %v59_v11, %v57_v10  ;;  %v53_v16 = vld [vmem:[%s580_s1 + $0xa0] sm:$0xff]  ;;  %v55_v17 = vld [vmem:[%s580_s1 + $0xb0] sm:$0xff] }
   0x5   :  { %155 = vmatpush1.bf16.msra.mxu0 %v115_v8  ;;  %v112_v15 = vpack.c.bf16 %v56_v13, %v54_v12  ;;  %v50_v18 = vld [vmem:[%s580_s1 + $0x88] sm:$0xff]  ;;  %v52_v19 = vld [vmem:[%s580_s1 + $0x98] sm:$0xff]  ;;  %v111_v20 = vpack.c.bf16 %v55_v17, %v53_v16  ;;  %v49_v22 = vld [vmem:[%s580_s1 + $0x80] sm:$0xff] }
   0x6   :  { %156 = vmatprep.subr.bf16.mxu0 %v114_v9  ;;  %v110_v21 = vpack.c.bf16 %v52_v19, %v50_v18  ;;  %v51_v23 = vld [vmem:[%s580_s1 + $0x90] sm:$0xff]  ;;  %v46_v24 = vld [vmem:[%s580_s1 + $0x68] sm:$0xff]  ;;  %v48_v25 = vld [vmem:[%s580_s1 + $0x78] sm:$0xff] }
   0x7   :  { %v109_v26 = vpack.c.bf16 %v51_v23, %v49_v22  ;;  %v108_v27 = vpack.c.bf16 %v48_v25, %v46_v24  ;;  %v45_v28 = vld [vmem:[%s580_s1 + $0x60] sm:$0xff]  ;;  %v47_v29 = vld [vmem:[%s580_s1 + $0x70] sm:$0xff]  ;;  %v42_v30 = vld [vmem:[%s580_s1 + $0x48] sm:$0xff] }
   0x8   :  { %v44_v31 = vld [vmem:[%s580_s1 + $0x58] sm:$0xff]  ;;  %v107_v32 = vpack.c.bf16 %v47_v29, %v45_v28  ;;  %v41_v34 = vld [vmem:[%s580_s1 + $0x40] sm:$0xff]  ;;  %v43_v35 = vld [vmem:[%s580_s1 + $0x50] sm:$0xff] }
   0x9   :  { %157 = vmatpush1.bf16.msra.mxu0 %v113_v14  ;;  %v106_v33 = vpack.c.bf16 %v44_v31, %v42_v30  ;;  %v38_v36 = vld [vmem:[%s580_s1 + $0x28] sm:$0xff]  ;;  %v40_v37 = vld [vmem:[%s580_s1 + $0x38] sm:$0xff]  ;;  %v105_v40 = vpack.c.bf16 %v43_v35, %v41_v34  ;;  %v37_v41 = vld [vmem:[%s580_s1 + $0x20] sm:$0xff] }
   0xa   :  { %158 = vmatprep.subr.bf16.mxu0 %v112_v15  ;;  %v98_v38 = vld [vmem:[%s580_s1 + $0x208] sm:$0xff]  ;;  %v100_v39 = vld [vmem:[%s580_s1 + $0x218] sm:$0xff]  ;;  %v97_v43 = vld [vmem:[%s580_s1 + $0x200] sm:$0xff]  ;;  %v104_v44 = vpack.c.bf16 %v40_v37, %v38_v36 }
   0xb   :  { %v134_v42 = vpack.c.bf16 %v100_v39, %v98_v38  ;;  %v39_v45 = vld [vmem:[%s580_s1 + $0x30] sm:$0xff]  ;;  %v34_v46 = vld [vmem:[%s580_s1 + $0x8] sm:$0xff]  ;;  %v36_v48 = vld [vmem:[%s580_s1 + $0x18] sm:$0xff] }
   0xc   :  { %v99_v47 = vld [vmem:[%s580_s1 + $0x210] sm:$0xff]  ;;  %v20_v51 = vld [vmem:[%s581_s0 + $0x28] sm:$0xff]  ;;  %v19_v54 = vld [vmem:[%s581_s0 + $0x20] sm:$0xff]  ;;  %v103_v55 = vpack.c.bf16 %v39_v45, %v37_v41  ;;  %v102_v57 = vpack.c.bf16 %v36_v48, %v34_v46 }
   0xd   :  { %159 = vmatpush1.bf16.msra.mxu0 %v111_v20  ;;  %221 = vmatprep.subr.bf16.mxu1 %v134_v42  ;;  %v133_v49 = vpack.c.bf16 %v99_v47, %v97_v43  ;;  %v17_v50 = vld [vmem:[%s581_s0 + $0x10] sm:$0xff]  ;;  %v16_v53 = vld [vmem:[%s581_s0 + $0x8] sm:$0xff]  ;;  %v33_v58 = vld [vmem:[%s580_s1] sm:$0xff] }
   0xe   :  { %160 = vmatprep.subr.bf16.mxu0 %v110_v21  ;;  %v29_v52 = vpack.c.bf16 %v20_v51, %v17_v50  ;;  %v28_v56 = vpack.c.bf16 %v19_v54, %v16_v53  ;;  %v35_v59 = vld [vmem:[%s580_s1 + $0x10] sm:$0xff]  ;;  %v94_v60 = vld [vmem:[%s580_s1 + $0x1e8] sm:$0xff]  ;;  %v96_v61 = vld [vmem:[%s580_s1 + $0x1f8] sm:$0xff] }
   0xf   :  { %222 = vmatpush1.bf16.msra.mxu1 %v133_v49  ;;  %v101_v62 = vpack.c.bf16 %v35_v59, %v33_v58  ;;  %v23_v63 = vld [vmem:[%s581_s0 + $0x40] sm:$0xff]  ;;  %v26_v0 = vld [vmem:[%s581_s0 + $0x58] sm:$0xff]  ;;  %v132_v1 = vpack.c.bf16 %v96_v61, %v94_v60  ;;  %v95_v4 = vld [vmem:[%s580_s1 + $0x1f0] sm:$0xff] }
  0x10   :  { %186 = vmatprep.mubr.bf16.mxu0 %v28_v56  ;;  %v93_v2 = vld [vmem:[%s580_s1 + $0x1e0] sm:$0xff]  ;;  %v92_v5 = vld [vmem:[%s580_s1 + $0x1d8] sm:$0xff]  ;;  %v32_v6 = vpack.c.bf16 %v26_v0, %v23_v63  ;;  %v91_v10 = vld [vmem:[%s580_s1 + $0x1d0] sm:$0xff] }
  0x11   :  { %161 = vmatpush1.bf16.msra.mxu0 %v109_v26  ;;  %v131_v7 = vpack.c.bf16 %v95_v4, %v93_v2  ;;  %v89_v9 = vld [vmem:[%s580_s1 + $0x1c0] sm:$0xff]  ;;  %v86_v11 = vld [vmem:[%s580_s1 + $0x1a8] sm:$0xff]  ;;  %v88_v12 = vld [vmem:[%s580_s1 + $0x1b8] sm:$0xff] }
  0x12   :  { %162 = vmatprep.subr.bf16.mxu0 %v108_v27  ;;  %281 = vmatmul.mubr.msk.bf16.vlgmr.msra.gmra.mxu1 %vm147_vm0, %v29_v52  ;;  %v129_v13 = vpack.c.bf16 %v91_v10, %v89_v9  ;;  %v128_v14 = vpack.c.bf16 %v88_v12, %v86_v11  ;;  %v85_v15 = vld [vmem:[%s580_s1 + $0x1a0] sm:$0xff]  ;;  %v87_v16 = vld [vmem:[%s580_s1 + $0x1b0] sm:$0xff]  ;;  %v82_v17 = vld [vmem:[%s580_s1 + $0x188] sm:$0xff] }
  0x13   :  { %249 = vmatprep.mubr.bf16.mxu1 %v284_v3  ;;  %v90_v3 = vld [vmem:[%s580_s1 + $0x1c8] sm:$0xff]  ;;  %v84_v18 = vld [vmem:[%s580_s1 + $0x198] sm:$0xff]  ;;  %v127_v19 = vpack.c.bf16 %v87_v16, %v85_v15  ;;  %v81_v21 = vld [vmem:[%s580_s1 + $0x180] sm:$0xff] }
  0x14   :  { %v130_v8 = vpack.c.bf16 %v92_v5, %v90_v3  ;;  %v126_v20 = vpack.c.bf16 %v84_v18, %v82_v17  ;;  %v83_v22 = vld [vmem:[%s580_s1 + $0x190] sm:$0xff]  ;;  %v78_v23 = vld [vmem:[%s580_s1 + $0x168] sm:$0xff]  ;;  %v80_v24 = vld [vmem:[%s580_s1 + $0x178] sm:$0xff] }
  0x15   :  { %163 = vmatpush1.bf16.msra.mxu0 %v107_v32  ;;  %v125_v25 = vpack.c.bf16 %v83_v22, %v81_v21  ;;  %v124_v26 = vpack.c.bf16 %v80_v24, %v78_v23  ;;  %v77_v27 = vld [vmem:[%s580_s1 + $0x160] sm:$0xff]  ;;  %v79_v28 = vld [vmem:[%s580_s1 + $0x170] sm:$0xff]  ;;  %v74_v29 = vld [vmem:[%s580_s1 + $0x148] sm:$0xff] }
  0x16   :  { %164 = vmatprep.subr.bf16.mxu0 %v106_v33  ;;  %v76_v30 = vld [vmem:[%s580_s1 + $0x158] sm:$0xff]  ;;  %v123_v31 = vpack.c.bf16 %v79_v28, %v77_v27  ;;  %v73_v33 = vld [vmem:[%s580_s1 + $0x140] sm:$0xff]  ;;  %v75_v34 = vld [vmem:[%s580_s1 + $0x150] sm:$0xff] }
  0x17   :  { %v122_v32 = vpack.c.bf16 %v76_v30, %v74_v29  ;;  %v70_v35 = vld [vmem:[%s580_s1 + $0x128] sm:$0xff]  ;;  %v72_v36 = vld [vmem:[%s580_s1 + $0x138] sm:$0xff]  ;;  %v121_v37 = vpack.c.bf16 %v75_v34, %v73_v33  ;;  %v69_v39 = vld [vmem:[%s580_s1 + $0x120] sm:$0xff] }
  0x18   :  { %v120_v38 = vpack.c.bf16 %v72_v36, %v70_v35  ;;  %v66_v41 = vld [vmem:[%s580_s1 + $0x108] sm:$0xff]  ;;  %v68_v42 = vld [vmem:[%s580_s1 + $0x118] sm:$0xff]  ;;  %v65_v45 = vld [vmem:[%s580_s1 + $0x100] sm:$0xff] }
  0x19   :  { %165 = vmatpush1.bf16.msra.mxu0 %v105_v40  ;;  %v71_v40 = vld [vmem:[%s580_s1 + $0x130] sm:$0xff]  ;;  %v15_v48 = vld [vmem:[%s581_s0] sm:$0xff]  ;;  %v18_v49 = vld [vmem:[%s581_s0 + $0x18] sm:$0xff] }
  0x1a   :  { %166 = vmatprep.subr.bf16.mxu0 %v104_v44  ;;  %282 = vmatmul.mubr.msk.bf16.gmra.mxu1 %vm147_vm0, %v32_v6  ;;  %v119_v43 = vpack.c.bf16 %v71_v40, %v69_v39  ;;  %v118_v44 = vpack.c.bf16 %v68_v42, %v66_v41  ;;  %v67_v46 = vld [vmem:[%s580_s1 + $0x110] sm:$0xff]  ;;  %v22_v50 = vld [vmem:[%s581_s0 + $0x38] sm:$0xff]  ;;  %v27_v52 = vpack.c.bf16 %v18_v49, %v15_v48 }
  0x1b   :  { %v117_v47 = vpack.c.bf16 %v67_v46, %v65_v45  ;;  %v25_v51 = vld [vmem:[%s581_s0 + $0x50] sm:$0xff] }
  0x1c   :  { %v31_v53 = vpack.c.bf16 %v25_v51, %v22_v50  ;;  %v21_v54 = vld [vmem:[%s581_s0 + $0x30] sm:$0xff] }
  0x1d   :  { %167 = vmatpush1.bf16.msra.mxu0 %v103_v55  ;;  %v24_v55 = vld [vmem:[%s581_s0 + $0x48] sm:$0xff] }
  0x1e   :  { %168 = vmatprep.subr.bf16.mxu0 %v102_v57  ;;  %v30_v56 = vpack.c.bf16 %v24_v55, %v21_v54  ;;  %v137_v57 = vlaneseq }
  0x20   :  { %v138_v59 = vshrl.u32 %v137_v57, 7 }
  0x21   :  { %169 = vmatpush1.bf16.msra.mxu0 %v101_v62  ;;  %v135_v62 = vld [vmem:[%s582_s2] sm:$0x3] }
  0x22   :  { %170 = vmatprep.subr.bf16.mxu0 %v132_v1  ;;  %v139_v61 = vsub.s32 0, %v138_v59  ;;  %v143_v63 = vsub.s32 1, %v138_v59 }
  0x24   :  { %v140_v1 = vrot.slane %v135_v62, %v139_v61  ;;  %v144_v2 = vrot.slane %v135_v62, %v143_v63 }
  0x25   :  { %171 = vmatpush2.bf16.msra.mxu0 %v131_v7 }
  0x26   :  { %172 = vmatprep.subr.bf16.mxu0 %v130_v8 }
  0x29   :  { %173 = vmatpush2.bf16.msra.mxu0 %v129_v13 }
  0x2a   :  { %174 = vmatprep.subr.bf16.mxu0 %v128_v14 }
  0x2d   :  { %175 = vmatpush2.bf16.msra.mxu0 %v127_v19 }
  0x2e   :  { %176 = vmatprep.subr.bf16.mxu0 %v126_v20 }
  0x31   :  { %177 = vmatpush2.bf16.msra.mxu0 %v125_v25 }
  0x32   :  { %178 = vmatprep.subr.bf16.mxu0 %v124_v26 }
  0x35   :  { %179 = vmatpush2.bf16.msra.mxu0 %v123_v31 }
  0x36   :  { %180 = vmatprep.subr.bf16.mxu0 %v122_v32 }
  0x39   :  { %181 = vmatpush2.bf16.msra.mxu0 %v121_v37 }
  0x3a   :  { %182 = vmatprep.subr.bf16.mxu0 %v120_v38 }
  0x3d   :  { %183 = vmatpush2.bf16.msra.mxu0 %v119_v43 }
  0x3e   :  { %184 = vmatprep.subr.bf16.mxu0 %v118_v44 }
  0x41   :  { %185 = vmatpush2.bf16.msra.mxu0 %v117_v47 }
  0x44   :  { %187 = vmatmul.mubr.bf16.vlgmr.msra.gmra.mxu0 %v27_v52 }
  0x45   :  { %196 = vmatprep.mubr.bf16.mxu0 %v31_v53 }
  0x4c   :  { %197 = vmatmul.mubr.bf16.gmra.mxu0 %v30_v56 }
  0xd2   :  { %v241_v58 = vpop.f32.mrf.mxu1 }
  0xd4   :  { %v243_v60 = vpop.f32.mrf.mxu1 }
  0xd6   :  { %v245_v0 = vpop.f32.mrf.mxu1 }
  0xd8   :  { %v247_v3 = vpop.f32.mrf.mxu1 }
  0xda   :  { %v251_v10 = vpop.f32.mrf.mxu1 }
  0xdc   :  { %v253_v18 = vpop.f32.mrf.mxu1 }
  0xde   :  { %v255_v27 = vpop.f32.mrf.mxu1 }
  0xe0   :  { %v257_v36 = vpop.f32.mrf.mxu1 }
 0x104   :  { %v188_v4 = vpop.f32.mrf.mxu0 }
 0x105   :  { %v189_v5 = vadd.f32 %v188_v4, %v140_v1 }
 0x106   :  { %v190_v6 = vpop.f32.mrf.mxu0 }
 0x107   :  { %v242_v7 = vadd.f32 %v241_v58, %v189_v5  ;;  %v191_v8 = vadd.f32 %v190_v6, %v144_v2 }
 0x108   :  { %v192_v9 = vpop.f32.mrf.mxu0 }
 0x109   :  { %v260_v11 = vmax.f32 %v242_v7, 0.0  ;;  %v244_v12 = vadd.f32 %v243_v60, %v191_v8  ;;  %v193_v13 = vadd.f32 %v192_v9, %v140_v1 }
 0x10a   :  { %v194_v14 = vpop.f32.mrf.mxu0 }
 0x10b   :  { %268 = vst [vmem:[%s583_s3] sm:$0xff] %v260_v11  ;;  %v261_v15 = vmax.f32 %v244_v12, 0.0  ;;  %v246_v16 = vadd.f32 %v245_v0, %v193_v13  ;;  %v195_v17 = vadd.f32 %v194_v14, %v144_v2 }
 0x10c   :  { %v198_v19 = vpop.f32.mrf.mxu0 }
 0x10d   :  { %270 = vst.msk [vmem:[%s583_s3 + $0x8] sm:$0xff] %vm269_vm1, %v261_v15  ;;  %v262_v20 = vmax.f32 %v246_v16, 0.0  ;;  %v248_v21 = vadd.f32 %v247_v3, %v195_v17  ;;  %v199_v22 = vadd.f32 %v198_v19, %v140_v1 }
 0x10e   :  { %v200_v23 = vpop.f32.mrf.mxu0 }
 0x10f   :  { %271 = vst [vmem:[%s583_s3 + $0x10] sm:$0xff] %v262_v20  ;;  %v263_v24 = vmax.f32 %v248_v21, 0.0  ;;  %v252_v25 = vadd.f32 %v251_v10, %v199_v22  ;;  %v201_v26 = vadd.f32 %v200_v23, %v144_v2 }
 0x110   :  { %v202_v28 = vpop.f32.mrf.mxu0 }
 0x111   :  { %272 = vst.msk [vmem:[%s583_s3 + $0x18] sm:$0xff] %vm269_vm1, %v263_v24  ;;  %v264_v29 = vmax.f32 %v252_v25, 0.0  ;;  %v254_v30 = vadd.f32 %v253_v18, %v201_v26  ;;  %v203_v31 = vadd.f32 %v202_v28, %v140_v1 }
 0x112   :  { %v204_v32 = vpop.f32.mrf.mxu0 }
 0x113   :  { %273 = vst [vmem:[%s583_s3 + $0x20] sm:$0xff] %v264_v29  ;;  %v265_v33 = vmax.f32 %v254_v30, 0.0  ;;  %v256_v34 = vadd.f32 %v255_v27, %v203_v31  ;;  %v205_v35 = vadd.f32 %v204_v32, %v144_v2 }
 0x115   :  { %274 = vst.msk [vmem:[%s583_s3 + $0x28] sm:$0xff] %vm269_vm1, %v265_v33  ;;  %v266_v37 = vmax.f32 %v256_v34, 0.0  ;;  %v258_v38 = vadd.f32 %v257_v36, %v205_v35 }
 0x117   :  { %275 = vst [vmem:[%s583_s3 + $0x30] sm:$0xff] %v266_v37  ;;  %v267_v39 = vmax.f32 %v258_v38, 0.0 }
 0x119   :  { %276 = vst.msk [vmem:[%s583_s3 + $0x38] sm:$0xff] %vm269_vm1, %v267_v39 }

// kernel: _lambda_.29
= control target key start
LH: loop header
LB: loop body
LE: loop exit
PB: predicated region body
PF: predicated region fallthrough
CT: control target
= control target key end

     0   :  { %v224_v0 = vmov 0   ;;  %vm114_vm0 = vcmask 64512   ;;  %vm118_vm1 = vcmask 1043456   ;;  %vm214_vm2 = vcmask 130048   ;;  %s425_s1 = inlined_call_operand.vmem [shape: f32[136,272], index: 1, kind: input, shape index: {}]   ;;  %s426_s0 = inlined_call_operand.vmem [shape: f32[8,136], index: 0, kind: input, shape index: {}]   ;;  %s427_s2 = inlined_call_operand.vmem [shape: f32[1,272], index: 2, kind: input, shape index: {}]   ;;  %s428_s3 = inlined_call_operand.vmem [shape: f32[8,272], index: 3, kind: output, shape index: {}]  }
   0x1   :  { %169 = vmatprep.subr.bf16.mxu1 %v224_v0  ;;  %v62_v1 = vld [vmem:[%s425_s1 + $0x158] sm:$0xff]  ;;  %v65_v2 = vld [vmem:[%s425_s1 + $0x170] sm:$0xff]  ;;  %v63_v3 = vld [vmem:[%s425_s1 + $0x160] sm:$0xff] }
   0x2   :  { %v92_v4 = vpack.c.bf16 %v65_v2, %v62_v1  ;;  %v66_v5 = vld [vmem:[%s425_s1 + $0x178] sm:$0xff]  ;;  %v61_v6 = vld [vmem:[%s425_s1 + $0x150] sm:$0xff]  ;;  %v64_v7 = vld [vmem:[%s425_s1 + $0x168] sm:$0xff] }
   0x3   :  { %v93_v8 = vpack.c.bf16 %v66_v5, %v63_v3  ;;  %v91_v9 = vpack.c.bf16 %v64_v7, %v61_v6  ;;  %v56_v10 = vld [vmem:[%s425_s1 + $0x128] sm:$0xff]  ;;  %v59_v11 = vld [vmem:[%s425_s1 + $0x140] sm:$0xff]  ;;  %v57_v12 = vld [vmem:[%s425_s1 + $0x130] sm:$0xff] }
   0x4   :  { %128 = vmatprep.subr.bf16.mxu0 %v92_v4  ;;  %v89_v13 = vpack.c.bf16 %v59_v11, %v56_v10  ;;  %v60_v14 = vld [vmem:[%s425_s1 + $0x148] sm:$0xff]  ;;  %v55_v15 = vld [vmem:[%s425_s1 + $0x120] sm:$0xff]  ;;  %v58_v16 = vld [vmem:[%s425_s1 + $0x138] sm:$0xff] }
   0x5   :  { %170 = vmatpush1.bf16.msra.mxu1 %v93_v8  ;;  %129 = vmatpush1.bf16.msra.mxu0 %v91_v9  ;;  %v90_v17 = vpack.c.bf16 %v60_v14, %v57_v12  ;;  %v88_v18 = vpack.c.bf16 %v58_v16, %v55_v15  ;;  %v50_v19 = vld [vmem:[%s425_s1 + $0xf8] sm:$0xff]  ;;  %v53_v20 = vld [vmem:[%s425_s1 + $0x110] sm:$0xff]  ;;  %v51_v21 = vld [vmem:[%s425_s1 + $0x100] sm:$0xff] }
   0x6   :  { %171 = vmatprep.subr.bf16.mxu1 %v224_v0  ;;  %130 = vmatprep.subr.bf16.mxu0 %v89_v13  ;;  %v86_v22 = vpack.c.bf16 %v53_v20, %v50_v19  ;;  %v54_v23 = vld [vmem:[%s425_s1 + $0x118] sm:$0xff]  ;;  %v49_v24 = vld [vmem:[%s425_s1 + $0xf0] sm:$0xff]  ;;  %v52_v25 = vld [vmem:[%s425_s1 + $0x108] sm:$0xff] }
   0x7   :  { %v44_v26 = vld [vmem:[%s425_s1 + $0xc8] sm:$0xff]  ;;  %v47_v27 = vld [vmem:[%s425_s1 + $0xe0] sm:$0xff]  ;;  %v87_v28 = vpack.c.bf16 %v54_v23, %v51_v21  ;;  %v85_v29 = vpack.c.bf16 %v52_v25, %v49_v24  ;;  %v45_v30 = vld [vmem:[%s425_s1 + $0xd0] sm:$0xff] }
   0x8   :  { %v83_v31 = vpack.c.bf16 %v47_v27, %v44_v26  ;;  %v48_v32 = vld [vmem:[%s425_s1 + $0xe8] sm:$0xff]  ;;  %v43_v33 = vld [vmem:[%s425_s1 + $0xc0] sm:$0xff]  ;;  %v46_v34 = vld [vmem:[%s425_s1 + $0xd8] sm:$0xff] }
   0x9   :  { %172 = vmatpush1.bf16.msra.mxu1 %v90_v17  ;;  %131 = vmatpush1.bf16.msra.mxu0 %v88_v18  ;;  %v38_v35 = vld [vmem:[%s425_s1 + $0x98] sm:$0xff]  ;;  %v41_v36 = vld [vmem:[%s425_s1 + $0xb0] sm:$0xff]  ;;  %v84_v37 = vpack.c.bf16 %v48_v32, %v45_v30  ;;  %v82_v38 = vpack.c.bf16 %v46_v34, %v43_v33  ;;  %v39_v39 = vld [vmem:[%s425_s1 + $0xa0] sm:$0xff] }
   0xa   :  { %173 = vmatprep.subr.bf16.mxu1 %v224_v0  ;;  %132 = vmatprep.subr.bf16.mxu0 %v86_v22  ;;  %v80_v40 = vpack.c.bf16 %v41_v36, %v38_v35  ;;  %v42_v41 = vld [vmem:[%s425_s1 + $0xb8] sm:$0xff]  ;;  %v37_v42 = vld [vmem:[%s425_s1 + $0x90] sm:$0xff]  ;;  %v40_v43 = vld [vmem:[%s425_s1 + $0xa8] sm:$0xff]  ;;  %v99_v22 = vlaneseq }
   0xb   :  { %v32_v44 = vld [vmem:[%s425_s1 + $0x68] sm:$0xff]  ;;  %v35_v45 = vld [vmem:[%s425_s1 + $0x80] sm:$0xff]  ;;  %v81_v46 = vpack.c.bf16 %v42_v41, %v39_v39  ;;  %v79_v47 = vpack.c.bf16 %v40_v43, %v37_v42  ;;  %v33_v48 = vld [vmem:[%s425_s1 + $0x70] sm:$0xff] }
   0xc   :  { %v36_v49 = vld [vmem:[%s425_s1 + $0x88] sm:$0xff]  ;;  %v77_v50 = vpack.c.bf16 %v35_v45, %v32_v44  ;;  %v31_v51 = vld [vmem:[%s425_s1 + $0x60] sm:$0xff]  ;;  %v34_v52 = vld [vmem:[%s425_s1 + $0x78] sm:$0xff]  ;;  %v100_v23 = vshrl.u32 %v99_v22, 7 }
   0xd   :  { %174 = vmatpush1.bf16.msra.mxu1 %v87_v28  ;;  %133 = vmatpush1.bf16.msra.mxu0 %v85_v29  ;;  %v16_v53 = vld [vmem:[%s426_s0 + $0x8] sm:$0xff]  ;;  %v26_v54 = vld [vmem:[%s425_s1 + $0x38] sm:$0xff]  ;;  %v29_v55 = vld [vmem:[%s425_s1 + $0x50] sm:$0xff]  ;;  %v78_v57 = vpack.c.bf16 %v36_v49, %v33_v48  ;;  %v76_v58 = vpack.c.bf16 %v34_v52, %v31_v51 }
   0xe   :  { %175 = vmatprep.subr.bf16.mxu1 %v224_v0  ;;  %134 = vmatprep.subr.bf16.mxu0 %v83_v31  ;;  %v18_v56 = vpack.c.bf16 %v16_v53, %v16_v53  ;;  %v27_v59 = vld [vmem:[%s425_s1 + $0x40] sm:$0xff]  ;;  %v74_v60 = vpack.c.bf16 %v29_v55, %v26_v54  ;;  %v30_v61 = vld [vmem:[%s425_s1 + $0x58] sm:$0xff]  ;;  %v25_v62 = vld [vmem:[%s425_s1 + $0x30] sm:$0xff]  ;;  %v109_v24 = vsub.s32 2, %v100_v23  ;;  %v101_v25 = vsub.s32 0, %v100_v23 }
   0xf   :  { %v28_v63 = vld [vmem:[%s425_s1 + $0x48] sm:$0xff]  ;;  %v23_v2 = vld [vmem:[%s425_s1 + $0x20] sm:$0xff]  ;;  %v75_v3 = vpack.c.bf16 %v30_v61, %v27_v59  ;;  %v21_v5 = vld [vmem:[%s425_s1 + $0x10] sm:$0xff]  ;;  %v105_v27 = vsub.s32 1, %v100_v23 }
  0x10   :  { %v20_v1 = vld [vmem:[%s425_s1 + $0x8] sm:$0xff]  ;;  %222 = vmatprep.mubr.msk.bf16.mxu1 %vm114_vm0, %v18_v56  ;;  %221 = vmatprep.mubr.msk.bf16.mxu0 %vm114_vm0, %v18_v56  ;;  %v73_v4 = vpack.c.bf16 %v28_v63, %v25_v62  ;;  %v19_v8 = vld [vmem:[%s425_s1] sm:$0xff]  ;;  %v22_v9 = vld [vmem:[%s425_s1 + $0x18] sm:$0xff] }
  0x11   :  { %176 = vmatpush1.bf16.msra.mxu1 %v84_v37  ;;  %135 = vmatpush1.bf16.msra.mxu0 %v82_v38  ;;  %v71_v6 = vpack.c.bf16 %v23_v2, %v20_v1  ;;  %v24_v7 = vld [vmem:[%s425_s1 + $0x28] sm:$0xff]  ;;  %v69_v11 = vld [vmem:[%s425_s1 + $0x190] sm:$0xff]  ;;  %v67_v12 = vld [vmem:[%s425_s1 + $0x180] sm:$0xff]  ;;  %v70_v14 = vpack.c.bf16 %v22_v9, %v19_v8 }
  0x12   :  { %177 = vmatprep.subr.bf16.mxu1 %v224_v0  ;;  %136 = vmatprep.subr.bf16.mxu0 %v80_v40  ;;  %v68_v10 = vld [vmem:[%s425_s1 + $0x188] sm:$0xff]  ;;  %v72_v13 = vpack.c.bf16 %v24_v7, %v21_v5  ;;  %v96_v16 = vpack.c.bf16 %v69_v11, %v69_v11  ;;  %v94_v17 = vpack.c.bf16 %v67_v12, %v67_v12  ;;  %v15_v18 = vld [vmem:[%s426_s0] sm:$0xff] }
  0x13   :  { %v95_v15 = vpack.c.bf16 %v68_v10, %v68_v10  ;;  %v17_v21 = vpack.c.bf16 %v15_v18, %v15_v18  ;;  %v97_v26 = vld [vmem:[%s427_s2] sm:$0x7] }
  0x14   :  { %v126_v19 = vsel %vm118_vm1, %v96_v16, 0  ;;  %v120_v20 = vsel %vm118_vm1, %v94_v17, 0  ;;  %v110_v28 = vrot.slane %v97_v26, %v109_v24  ;;  %v102_v29 = vrot.slane %v97_v26, %v101_v25 }
  0x15   :  { %178 = vmatpush1.bf16.msra.mxu1 %v81_v46  ;;  %137 = vmatpush1.bf16.msra.mxu0 %v79_v47 }
  0x16   :  { %179 = vmatprep.subr.bf16.mxu1 %v224_v0  ;;  %138 = vmatprep.subr.bf16.mxu0 %v77_v50 }
  0x19   :  { %180 = vmatpush1.bf16.msra.mxu1 %v78_v57  ;;  %139 = vmatpush1.bf16.msra.mxu0 %v76_v58 }
  0x1a   :  { %181 = vmatprep.subr.bf16.mxu1 %v224_v0  ;;  %140 = vmatprep.subr.bf16.mxu0 %v74_v60 }
  0x1d   :  { %182 = vmatpush1.bf16.msra.mxu1 %v75_v3  ;;  %141 = vmatpush1.bf16.msra.mxu0 %v73_v4 }
  0x1e   :  { %183 = vmatprep.subr.bf16.mxu1 %v224_v0  ;;  %142 = vmatprep.subr.bf16.mxu0 %v71_v6 }
  0x21   :  { %184 = vmatpush1.bf16.msra.mxu1 %v72_v13  ;;  %143 = vmatpush1.bf16.msra.mxu0 %v70_v14 }
  0x22   :  { %199 = vmatprep.subr.bf16.mxu1 %v224_v0  ;;  %220 = vmatprep.subr.msk.bf16.mxu0 %vm118_vm1, %v95_v15  ;;  %v106_v0 = vrot.slane %v97_v26, %v105_v27 }
  0x25   :  { %200 = vmatpush2.bf16.msra.mxu1 %v126_v19  ;;  %159 = vmatpush2.bf16.msra.mxu0 %v120_v20 }
  0x28   :  { %202 = vmatmul.mubr.bf16.vlgmr.msra.gmra.mxu1 %v17_v21  ;;  %161 = vmatmul.mubr.bf16.vlgmr.msra.gmra.mxu0 %v17_v21 }
  0xe8   :  { %v203_v30 = vpop.f32.mrf.mxu1  ;;  %v162_v31 = vpop.f32.mrf.mxu0 }
  0xe9   :  { %v204_v32 = vadd.f32 %v203_v30, %v110_v28  ;;  %v163_v33 = vadd.f32 %v162_v31, %v102_v29 }
  0xea   :  { %v205_v34 = vpop.f32.mrf.mxu1  ;;  %v164_v35 = vpop.f32.mrf.mxu0 }
  0xeb   :  { %v211_v36 = vmax.f32 %v204_v32, 0.0  ;;  %v209_v37 = vmax.f32 %v163_v33, 0.0  ;;  %v165_v38 = vadd.f32 %v164_v35, %v106_v0 }
  0xec   :  { %v206_v39 = vpop.f32.mrf.mxu1  ;;  %v166_v40 = vpop.f32.mrf.mxu0 }
  0xed   :  { %212 = vst [vmem:[%s428_s3] sm:$0xff] %v209_v37  ;;  %215 = vst.msk [vmem:[%s428_s3 + $0x10] sm:$0xff] %vm214_vm2, %v211_v36  ;;  %v210_v41 = vmax.f32 %v165_v38, 0.0 }
  0xee   :  { %v207_v42 = vpop.f32.mrf.mxu1  ;;  %v167_v43 = vpop.f32.mrf.mxu0 }
  0xef   :  { %213 = vst [vmem:[%s428_s3 + $0x8] sm:$0xff] %v210_v41 }

// kernel: _lambda_.32
= control target key start
LH: loop header
LB: loop body
LE: loop exit
PB: predicated region body
PF: predicated region fallthrough
CT: control target
= control target key end

     0   :  { %s252_s6 = smov 0   ;;  %s269_s0 = inlined_call_operand.vmem [shape: f32[8,2,2,544], index: 0, kind: input, shape index: {}]   ;;  %s270_s1 = inlined_call_operand.vmem [shape: f32[2,1,1,544], index: 1, kind: output, shape index: {}]  }
   0x1 LB: > { %s207_s7 = sadd.s32 4294967295, %s240_s6   ;;  %p211_p0 = scmp.ge.s32.totalorder %s240_s6, 1  ;;  %s240_s6 = sphi %s252_s6, %s11_s6  }
   0x2   : > { %p89_p1 = scmp.lt.s32.totalorder %s240_s6, 3 }
   0x4   : > { %p90_p2 = pnand %p211_p0, %p89_p1 }
   0x5   : > { %s212_s8 = sshll.u32 (!%p90_p2), %s207_s7, 2  ;;  %p116_p4 = scmp.lt.s32.totalorder (!%p90_p2), %s207_s7, 1 }
   0x6   : > { %93 = sbr.rel (%p90_p2) target bundleno = 37 (0x25), region = 24  ;;  %p110_p3 = scmp.lt.s32.totalorder (!%p90_p2), %s212_s8, 7 }
   0xb   : > { %s272_s8 = smov (!%p110_p3, %s212_s8), 7  ;;  %s274_s7 = smov (!%p116_p4, %s207_s7), 1  ;;  %v147_v16 = vlaneseq }
   0xc   : > { %s224_s9 = smul.u32 20, %s272_s8 }
   0xd   : > { %s225_s13 = smul.u32 5, %s274_s7  ;;  %vm149_vm0 = vcmp.lt.s32.totalorder %v147_v16, 544 }
   0xe   : > { %s114_s12 = scalar_lea.vmem %s269_s0, %s224_s9 }
   0xf   : > { %v120_v0 = vld [vmem:[%s114_s12] ss:$2 sm:$0x1f]  ;;  %v214_v1 = vld [vmem:[%s114_s12 + $0x14] ss:$2 sm:$0x1f]  ;;  %s119_s16 = scalar_lea.vmem %s270_s1, %s225_s13 }
  0x10   : > { %v123_v2 = vadd.f32 %v214_v1, %v120_v0  ;;  %v215_v3 = vld [vmem:[%s114_s12 + $0x1] ss:$2 sm:$0x1f]  ;;  %v216_v4 = vld [vmem:[%s114_s12 + $0x28] ss:$2 sm:$0x1f] }
  0x11   : > { %v217_v6 = vld [vmem:[%s114_s12 + $0x3c] ss:$2 sm:$0x1f]  ;;  %v218_v8 = vld [vmem:[%s114_s12 + $0x29] ss:$2 sm:$0x1f] }
  0x12   : > { %v126_v5 = vadd.f32 %v215_v3, %v123_v2  ;;  %v219_v10 = vld [vmem:[%s114_s12 + $0xa] ss:$2 sm:$0x1f]  ;;  %v220_v12 = vld [vmem:[%s114_s12 + $0x1e] ss:$2 sm:$0x1f] }
  0x13   : > { %v221_v14 = vld [vmem:[%s114_s12 + $0xb] ss:$2 sm:$0x1f] }
  0x14   : > { %v129_v7 = vadd.f32 %v216_v4, %v126_v5 }
  0x16   : > { %v132_v9 = vadd.f32 %v217_v6, %v129_v7 }
  0x18   : > { %v135_v11 = vadd.f32 %v218_v8, %v132_v9 }
  0x1a   : > { %v138_v13 = vadd.f32 %v219_v10, %v135_v11 }
  0x1c   : > { %v141_v15 = vadd.f32 %v220_v12, %v138_v13 }
  0x1e   : > { %v144_v17 = vadd.f32 %v221_v14, %v141_v15 }
  0x20   : > { %v145_v18 = vmul.f32 0.11111111, %v144_v17 }
  0x22   : > { %v146_v19 = vmax.f32 %v145_v18, 0.0 }
  0x24   : > { %151 = vst.msk [vmem:[%s119_s16] sm:$0x1f] %vm149_vm0, %v146_v19 }
  0x25 PF: > { %s11_s6 = sadd.s32 1, %s240_s6  }
  0x26   : > { %p8_p5 = scmp.ge.s32.totalorder %s11_s6, 4  }
  0x28   :  { %10 = sbr.rel (!%p8_p5) target bundleno = 1 (0x1), region = 62 }

// kernel: _lambda_.31
= control target key start
LH: loop header
LB: loop body
LE: loop exit
PB: predicated region body
PF: predicated region fallthrough
CT: control target
= control target key end

     0   :  { %s350_s12 = smov 0   ;;  %s402_s0 = inlined_call_operand.vmem [shape: f32[8,2,2,272], index: 0, kind: input, shape index: {}]   ;;  %s403_s1 = inlined_call_operand.vmem [shape: f32[9,1,272], index: 1, kind: input, shape index: {}]   ;;  %s404_s2 = inlined_call_operand.vmem [shape: f32[1,1,272], index: 2, kind: input, shape index: {}]   ;;  %s405_s3 = inlined_call_operand.vmem [shape: f32[2,1,1,272], index: 3, kind: output, shape index: {}]  }
   0x1 LB: > { %s356_s13 = sadd.s32 4294967295, %s328_s12   ;;  %p291_p0 = scmp.ge.s32.totalorder %s328_s12, 1  ;;  %s328_s12 = sphi %s350_s12, %s13_s12  }
   0x2   : > { %p139_p1 = scmp.lt.s32.totalorder %s328_s12, 3 }
   0x4   : > { %p140_p2 = pnand %p291_p0, %p139_p1 }
   0x5   : > { %s292_s14 = sshll.u32 (!%p140_p2), %s356_s13, 2  ;;  %p170_p4 = scmp.lt.s32.totalorder (!%p140_p2), %s356_s13, 1 }
   0x6   : > { %143 = sbr.rel (%p140_p2) target bundleno = 37 (0x25), region = 32  ;;  %p164_p3 = scmp.lt.s32.totalorder (!%p140_p2), %s292_s14, 7 }
   0xb   : > { %s407_s14 = smov (!%p164_p3, %s292_s14), 7  ;;  %v175_v0 = vld [vmem:[%s403_s1] sm:$0x7]  ;;  %v295_v1 = vld [vmem:[%s403_s1 + $0x3] sm:$0x7]  ;;  %s409_s13 = smov (!%p170_p4, %s356_s13), 1  ;;  %v227_v33 = vlaneseq }
   0xc   : > { %s312_s15 = smul.u32 12, %s407_s14  ;;  %v297_v2 = vld [vmem:[%s403_s1 + $0x6] sm:$0x7]  ;;  %v299_v3 = vld [vmem:[%s403_s1 + $0x9] sm:$0x7] }
   0xd   : > { %v301_v12 = vld [vmem:[%s403_s1 + $0xc] sm:$0x7]  ;;  %v303_v16 = vld [vmem:[%s403_s1 + $0xf] sm:$0x7]  ;;  %v305_v20 = vld [vmem:[%s403_s1 + $0x12] sm:$0x7] }
   0xe   : > { %s168_s22 = scalar_lea.vmem %s402_s0, %s312_s15  ;;  %v307_v24 = vld [vmem:[%s403_s1 + $0x15] sm:$0x7]  ;;  %v309_v28 = vld [vmem:[%s403_s1 + $0x18] sm:$0x7]  ;;  %s313_s10 = smul.u32 3, %s409_s13  ;;  %vm229_vm0 = vcmp.lt.s32.totalorder %v227_v33, 272 }
   0xf   : > { %v174_v4 = vld [vmem:[%s168_s22] ss:$2 sm:$0x7]  ;;  %v294_v5 = vld [vmem:[%s168_s22 + $0xc] ss:$2 sm:$0x7] }
  0x10   : > { %v176_v6 = vmul.f32 %v175_v0, %v174_v4  ;;  %v181_v7 = vmul.f32 %v295_v1, %v294_v5  ;;  %v296_v8 = vld [vmem:[%s168_s22 + $0x1] ss:$2 sm:$0x7]  ;;  %v298_v9 = vld [vmem:[%s168_s22 + $0x18] ss:$2 sm:$0x7]  ;;  %s173_s17 = scalar_lea.vmem %s405_s3, %s313_s10 }
  0x11   : > { %v187_v10 = vmul.f32 %v297_v2, %v296_v8  ;;  %v300_v11 = vld [vmem:[%s168_s22 + $0x24] ss:$2 sm:$0x7]  ;;  %v193_v14 = vmul.f32 %v299_v3, %v298_v9  ;;  %v302_v15 = vld [vmem:[%s168_s22 + $0x19] ss:$2 sm:$0x7] }
  0x12   : > { %v182_v13 = vadd.f32 %v181_v7, %v176_v6  ;;  %v199_v18 = vmul.f32 %v301_v12, %v300_v11  ;;  %v304_v19 = vld [vmem:[%s168_s22 + $0x6] ss:$2 sm:$0x7]  ;;  %v205_v22 = vmul.f32 %v303_v16, %v302_v15  ;;  %v306_v23 = vld [vmem:[%s168_s22 + $0x12] ss:$2 sm:$0x7] }
  0x13   : > { %v211_v26 = vmul.f32 %v305_v20, %v304_v19  ;;  %v308_v27 = vld [vmem:[%s168_s22 + $0x7] ss:$2 sm:$0x7]  ;;  %v217_v30 = vmul.f32 %v307_v24, %v306_v23  ;;  %v225_v35 = vld [vmem:[%s404_s2] sm:$0x7] }
  0x14   : > { %v188_v17 = vadd.f32 %v187_v10, %v182_v13  ;;  %v223_v32 = vmul.f32 %v309_v28, %v308_v27 }
  0x16   : > { %v194_v21 = vadd.f32 %v193_v14, %v188_v17 }
  0x18   : > { %v200_v25 = vadd.f32 %v199_v18, %v194_v21 }
  0x1a   : > { %v206_v29 = vadd.f32 %v205_v22, %v200_v25 }
  0x1c   : > { %v212_v31 = vadd.f32 %v211_v26, %v206_v29 }
  0x1e   : > { %v218_v34 = vadd.f32 %v217_v30, %v212_v31 }
  0x20   : > { %v224_v36 = vadd.f32 %v223_v32, %v218_v34 }
  0x22   : > { %v226_v37 = vadd.f32 %v225_v35, %v224_v36 }
  0x24   : > { %231 = vst.msk [vmem:[%s173_s17] sm:$0x7] %vm229_vm0, %v226_v37 }
  0x25 PF: > { %s13_s12 = sadd.s32 1, %s328_s12  }
  0x26   : > { %p10_p5 = scmp.ge.s32.totalorder %s13_s12, 4  }
  0x28   :  { %12 = sbr.rel (!%p10_p5) target bundleno = 1 (0x1), region = 78 }

// kernel: _lambda_.30
= control target key start
LH: loop header
LB: loop body
LE: loop exit
PB: predicated region body
PF: predicated region fallthrough
CT: control target
= control target key end

     0   :  { %vm348_vm0 = vcmask 261120   ;;  %vm668_vm1 = vmmov 0   ;;  %vm600_vm2 = vcmask 130048   ;;  %s1350_s1 = inlined_call_operand.vmem [shape: f32[544,272], index: 1, kind: input, shape index: {}]   ;;  %s1351_s0 = inlined_call_operand.vmem [shape: f32[8,544], index: 0, kind: input, shape index: {}]   ;;  %s1352_s2 = inlined_call_operand.vmem [shape: f32[1,272], index: 2, kind: input, shape index: {}]   ;;  %s1353_s3 = inlined_call_operand.vmem [shape: f32[8,272], index: 3, kind: output, shape index: {}]  }
   0x1   :  { %v68_v0 = vld [vmem:[%s1350_s1 + $0x158] sm:$0xff]  ;;  %v71_v1 = vld [vmem:[%s1350_s1 + $0x170] sm:$0xff]  ;;  %v70_v6 = vld [vmem:[%s1350_s1 + $0x168] sm:$0xff] }
   0x2   :  { %v164_v2 = vld [vmem:[%s1350_s1 + $0x458] sm:$0xff]  ;;  %v251_v3 = vpack.c.bf16 %v71_v1, %v68_v0  ;;  %v167_v4 = vld [vmem:[%s1350_s1 + $0x470] sm:$0xff]  ;;  %v166_v10 = vld [vmem:[%s1350_s1 + $0x468] sm:$0xff] }
   0x3   :  { %v67_v5 = vld [vmem:[%s1350_s1 + $0x150] sm:$0xff]  ;;  %v299_v7 = vpack.c.bf16 %v167_v4, %v164_v2  ;;  %v62_v11 = vld [vmem:[%s1350_s1 + $0x128] sm:$0xff]  ;;  %v65_v13 = vld [vmem:[%s1350_s1 + $0x140] sm:$0xff] }
   0x4   :  { %v250_v8 = vpack.c.bf16 %v70_v6, %v67_v5  ;;  %v163_v9 = vld [vmem:[%s1350_s1 + $0x450] sm:$0xff]  ;;  %352 = vmatprep.subr.bf16.mxu0 %v251_v3  ;;  %v158_v14 = vld [vmem:[%s1350_s1 + $0x428] sm:$0xff]  ;;  %v161_v15 = vld [vmem:[%s1350_s1 + $0x440] sm:$0xff]  ;;  %v248_v16 = vpack.c.bf16 %v65_v13, %v62_v11 }
   0x5   :  { %v298_v12 = vpack.c.bf16 %v166_v10, %v163_v9  ;;  %393 = vmatprep.subr.bf16.mxu1 %v299_v7  ;;  %v296_v17 = vpack.c.bf16 %v161_v15, %v158_v14  ;;  %v61_v18 = vld [vmem:[%s1350_s1 + $0x120] sm:$0xff]  ;;  %v64_v19 = vld [vmem:[%s1350_s1 + $0x138] sm:$0xff]  ;;  %v59_v24 = vld [vmem:[%s1350_s1 + $0x110] sm:$0xff] }
   0x6   :  { %353 = vmatpush1.bf16.msra.mxu0 %v250_v8  ;;  %v157_v20 = vld [vmem:[%s1350_s1 + $0x420] sm:$0xff]  ;;  %v247_v21 = vpack.c.bf16 %v64_v19, %v61_v18  ;;  %v160_v22 = vld [vmem:[%s1350_s1 + $0x438] sm:$0xff]  ;;  %v155_v28 = vld [vmem:[%s1350_s1 + $0x410] sm:$0xff] }
   0x7   :  { %394 = vmatpush1.bf16.msra.mxu1 %v298_v12  ;;  %v56_v23 = vld [vmem:[%s1350_s1 + $0xf8] sm:$0xff]  ;;  %354 = vmatprep.subr.bf16.mxu0 %v248_v16  ;;  %v295_v25 = vpack.c.bf16 %v160_v22, %v157_v20  ;;  %v55_v29 = vld [vmem:[%s1350_s1 + $0xf0] sm:$0xff]  ;;  %v58_v31 = vld [vmem:[%s1350_s1 + $0x108] sm:$0xff] }
   0x8   :  { %395 = vmatprep.subr.bf16.mxu1 %v296_v17  ;;  %v245_v26 = vpack.c.bf16 %v59_v24, %v56_v23  ;;  %v152_v27 = vld [vmem:[%s1350_s1 + $0x3f8] sm:$0xff]  ;;  %v151_v32 = vld [vmem:[%s1350_s1 + $0x3f0] sm:$0xff]  ;;  %v154_v33 = vld [vmem:[%s1350_s1 + $0x408] sm:$0xff]  ;;  %v244_v34 = vpack.c.bf16 %v58_v31, %v55_v29 }
   0x9   :  { %v293_v30 = vpack.c.bf16 %v155_v28, %v152_v27  ;;  %v50_v35 = vld [vmem:[%s1350_s1 + $0xc8] sm:$0xff]  ;;  %v53_v36 = vld [vmem:[%s1350_s1 + $0xe0] sm:$0xff]  ;;  %v292_v38 = vpack.c.bf16 %v154_v33, %v151_v32  ;;  %v52_v42 = vld [vmem:[%s1350_s1 + $0xd8] sm:$0xff] }
   0xa   :  { %355 = vmatpush1.bf16.msra.mxu0 %v247_v21  ;;  %v146_v37 = vld [vmem:[%s1350_s1 + $0x3c8] sm:$0xff]  ;;  %v242_v39 = vpack.c.bf16 %v53_v36, %v50_v35  ;;  %v149_v40 = vld [vmem:[%s1350_s1 + $0x3e0] sm:$0xff]  ;;  %v148_v45 = vld [vmem:[%s1350_s1 + $0x3d8] sm:$0xff] }
   0xb   :  { %396 = vmatpush1.bf16.msra.mxu1 %v295_v25  ;;  %356 = vmatprep.subr.bf16.mxu0 %v245_v26  ;;  %v49_v41 = vld [vmem:[%s1350_s1 + $0xc0] sm:$0xff]  ;;  %v290_v43 = vpack.c.bf16 %v149_v40, %v146_v37  ;;  %v44_v46 = vld [vmem:[%s1350_s1 + $0x98] sm:$0xff]  ;;  %v47_v47 = vld [vmem:[%s1350_s1 + $0xb0] sm:$0xff] }
   0xc   :  { %397 = vmatprep.subr.bf16.mxu1 %v293_v30  ;;  %v145_v44 = vld [vmem:[%s1350_s1 + $0x3c0] sm:$0xff]  ;;  %v140_v48 = vld [vmem:[%s1350_s1 + $0x398] sm:$0xff]  ;;  %v143_v49 = vld [vmem:[%s1350_s1 + $0x3b0] sm:$0xff]  ;;  %v241_v50 = vpack.c.bf16 %v52_v42, %v49_v41  ;;  %v239_v52 = vpack.c.bf16 %v47_v47, %v44_v46 }
   0xd   :  { %v289_v51 = vpack.c.bf16 %v148_v45, %v145_v44  ;;  %v43_v53 = vld [vmem:[%s1350_s1 + $0x90] sm:$0xff]  ;;  %v46_v54 = vld [vmem:[%s1350_s1 + $0xa8] sm:$0xff]  ;;  %v287_v56 = vpack.c.bf16 %v143_v49, %v140_v48  ;;  %v41_v59 = vld [vmem:[%s1350_s1 + $0x80] sm:$0xff] }
   0xe   :  { %357 = vmatpush1.bf16.msra.mxu0 %v244_v34  ;;  %v139_v55 = vld [vmem:[%s1350_s1 + $0x390] sm:$0xff]  ;;  %v142_v57 = vld [vmem:[%s1350_s1 + $0x3a8] sm:$0xff]  ;;  %v137_v61 = vld [vmem:[%s1350_s1 + $0x380] sm:$0xff]  ;;  %v238_v62 = vpack.c.bf16 %v46_v54, %v43_v53 }
   0xf   :  { %398 = vmatpush1.bf16.msra.mxu1 %v292_v38  ;;  %358 = vmatprep.subr.bf16.mxu0 %v242_v39  ;;  %v38_v58 = vld [vmem:[%s1350_s1 + $0x68] sm:$0xff]  ;;  %v286_v63 = vpack.c.bf16 %v142_v57, %v139_v55  ;;  %v37_v1 = vld [vmem:[%s1350_s1 + $0x60] sm:$0xff]  ;;  %v40_v2 = vld [vmem:[%s1350_s1 + $0x78] sm:$0xff] }
  0x10   :  { %399 = vmatprep.subr.bf16.mxu1 %v290_v43  ;;  %v134_v60 = vld [vmem:[%s1350_s1 + $0x368] sm:$0xff]  ;;  %v236_v0 = vpack.c.bf16 %v41_v59, %v38_v58  ;;  %v133_v3 = vld [vmem:[%s1350_s1 + $0x360] sm:$0xff]  ;;  %v136_v5 = vld [vmem:[%s1350_s1 + $0x378] sm:$0xff]  ;;  %v235_v10 = vpack.c.bf16 %v40_v2, %v37_v1 }
  0x11   :  { %v284_v4 = vpack.c.bf16 %v137_v61, %v134_v60  ;;  %v32_v6 = vld [vmem:[%s1350_s1 + $0x38] sm:$0xff]  ;;  %v35_v7 = vld [vmem:[%s1350_s1 + $0x50] sm:$0xff]  ;;  %v283_v11 = vpack.c.bf16 %v136_v5, %v133_v3  ;;  %v34_v14 = vld [vmem:[%s1350_s1 + $0x48] sm:$0xff] }
  0x12   :  { %359 = vmatpush1.bf16.msra.mxu0 %v241_v50  ;;  %v128_v8 = vld [vmem:[%s1350_s1 + $0x338] sm:$0xff]  ;;  %v131_v9 = vld [vmem:[%s1350_s1 + $0x350] sm:$0xff]  ;;  %v233_v12 = vpack.c.bf16 %v35_v7, %v32_v6  ;;  %v130_v17 = vld [vmem:[%s1350_s1 + $0x348] sm:$0xff] }
  0x13   :  { %400 = vmatpush1.bf16.msra.mxu1 %v289_v51  ;;  %360 = vmatprep.subr.bf16.mxu0 %v239_v52  ;;  %v31_v13 = vld [vmem:[%s1350_s1 + $0x30] sm:$0xff]  ;;  %v281_v16 = vpack.c.bf16 %v131_v9, %v128_v8  ;;  %v26_v18 = vld [vmem:[%s1350_s1 + $0x8] sm:$0xff]  ;;  %v29_v19 = vld [vmem:[%s1350_s1 + $0x20] sm:$0xff] }
  0x14   :  { %401 = vmatprep.subr.bf16.mxu1 %v287_v56  ;;  %v127_v15 = vld [vmem:[%s1350_s1 + $0x330] sm:$0xff]  ;;  %v122_v20 = vld [vmem:[%s1350_s1 + $0x308] sm:$0xff]  ;;  %v125_v21 = vld [vmem:[%s1350_s1 + $0x320] sm:$0xff]  ;;  %v232_v22 = vpack.c.bf16 %v34_v14, %v31_v13  ;;  %v230_v24 = vpack.c.bf16 %v29_v19, %v26_v18 }
  0x15   :  { %v280_v23 = vpack.c.bf16 %v130_v17, %v127_v15  ;;  %v25_v25 = vld [vmem:[%s1350_s1] sm:$0xff]  ;;  %v28_v26 = vld [vmem:[%s1350_s1 + $0x18] sm:$0xff]  ;;  %v278_v28 = vpack.c.bf16 %v125_v21, %v122_v20  ;;  %v119_v31 = vld [vmem:[%s1350_s1 + $0x2f0] sm:$0xff] }
  0x16   :  { %361 = vmatpush1.bf16.msra.mxu0 %v238_v62  ;;  %v121_v27 = vld [vmem:[%s1350_s1 + $0x300] sm:$0xff]  ;;  %v124_v29 = vld [vmem:[%s1350_s1 + $0x318] sm:$0xff]  ;;  %v215_v33 = vld [vmem:[%s1350_s1 + $0x5f0] sm:$0xff]  ;;  %v229_v34 = vpack.c.bf16 %v28_v26, %v25_v25 }
  0x17   :  { %402 = vmatpush1.bf16.msra.mxu1 %v286_v63  ;;  %362 = vmatprep.subr.bf16.mxu0 %v236_v0  ;;  %v116_v30 = vld [vmem:[%s1350_s1 + $0x2d8] sm:$0xff]  ;;  %v277_v35 = vpack.c.bf16 %v124_v29, %v121_v27  ;;  %v115_v37 = vld [vmem:[%s1350_s1 + $0x2d0] sm:$0xff]  ;;  %v118_v38 = vld [vmem:[%s1350_s1 + $0x2e8] sm:$0xff] }
  0x18   :  { %403 = vmatprep.subr.bf16.mxu1 %v284_v4  ;;  %v212_v32 = vld [vmem:[%s1350_s1 + $0x5d8] sm:$0xff]  ;;  %v275_v36 = vpack.c.bf16 %v119_v31, %v116_v30  ;;  %v211_v39 = vld [vmem:[%s1350_s1 + $0x5d0] sm:$0xff]  ;;  %v214_v41 = vld [vmem:[%s1350_s1 + $0x5e8] sm:$0xff]  ;;  %v274_v46 = vpack.c.bf16 %v118_v38, %v115_v37 }
  0x19   :  { %v323_v40 = vpack.c.bf16 %v215_v33, %v212_v32  ;;  %v110_v42 = vld [vmem:[%s1350_s1 + $0x2a8] sm:$0xff]  ;;  %v113_v43 = vld [vmem:[%s1350_s1 + $0x2c0] sm:$0xff]  ;;  %v322_v47 = vpack.c.bf16 %v214_v41, %v211_v39  ;;  %v112_v50 = vld [vmem:[%s1350_s1 + $0x2b8] sm:$0xff] }
  0x1a   :  { %363 = vmatpush1.bf16.msra.mxu0 %v235_v10  ;;  %v206_v44 = vld [vmem:[%s1350_s1 + $0x5a8] sm:$0xff]  ;;  %v209_v45 = vld [vmem:[%s1350_s1 + $0x5c0] sm:$0xff]  ;;  %v272_v48 = vpack.c.bf16 %v113_v43, %v110_v42  ;;  %v208_v53 = vld [vmem:[%s1350_s1 + $0x5b8] sm:$0xff] }
  0x1b   :  { %404 = vmatpush1.bf16.msra.mxu1 %v283_v11  ;;  %364 = vmatprep.subr.bf16.mxu0 %v233_v12  ;;  %v109_v49 = vld [vmem:[%s1350_s1 + $0x2a0] sm:$0xff]  ;;  %v320_v52 = vpack.c.bf16 %v209_v45, %v206_v44  ;;  %v104_v54 = vld [vmem:[%s1350_s1 + $0x278] sm:$0xff]  ;;  %v107_v55 = vld [vmem:[%s1350_s1 + $0x290] sm:$0xff] }
  0x1c   :  { %405 = vmatprep.subr.bf16.mxu1 %v281_v16  ;;  %v205_v51 = vld [vmem:[%s1350_s1 + $0x5a0] sm:$0xff]  ;;  %v200_v56 = vld [vmem:[%s1350_s1 + $0x578] sm:$0xff]  ;;  %v203_v57 = vld [vmem:[%s1350_s1 + $0x590] sm:$0xff]  ;;  %v271_v58 = vpack.c.bf16 %v112_v50, %v109_v49  ;;  %v269_v60 = vpack.c.bf16 %v107_v55, %v104_v54 }
  0x1d   :  { %v319_v59 = vpack.c.bf16 %v208_v53, %v205_v51  ;;  %v103_v61 = vld [vmem:[%s1350_s1 + $0x270] sm:$0xff]  ;;  %v106_v62 = vld [vmem:[%s1350_s1 + $0x288] sm:$0xff]  ;;  %v317_v0 = vpack.c.bf16 %v203_v57, %v200_v56  ;;  %v101_v3 = vld [vmem:[%s1350_s1 + $0x260] sm:$0xff] }
  0x1e   :  { %365 = vmatpush1.bf16.msra.mxu0 %v232_v22  ;;  %v199_v63 = vld [vmem:[%s1350_s1 + $0x570] sm:$0xff]  ;;  %v202_v1 = vld [vmem:[%s1350_s1 + $0x588] sm:$0xff]  ;;  %v197_v5 = vld [vmem:[%s1350_s1 + $0x560] sm:$0xff]  ;;  %v268_v6 = vpack.c.bf16 %v106_v62, %v103_v61 }
  0x1f   :  { %406 = vmatpush1.bf16.msra.mxu1 %v280_v23  ;;  %366 = vmatprep.subr.bf16.mxu0 %v230_v24  ;;  %v98_v2 = vld [vmem:[%s1350_s1 + $0x248] sm:$0xff]  ;;  %v97_v7 = vld [vmem:[%s1350_s1 + $0x240] sm:$0xff]  ;;  %v316_v8 = vpack.c.bf16 %v202_v1, %v199_v63  ;;  %v100_v10 = vld [vmem:[%s1350_s1 + $0x258] sm:$0xff] }
  0x20   :  { %407 = vmatprep.subr.bf16.mxu1 %v278_v28  ;;  %v194_v4 = vld [vmem:[%s1350_s1 + $0x548] sm:$0xff]  ;;  %v266_v9 = vpack.c.bf16 %v101_v3, %v98_v2  ;;  %v193_v11 = vld [vmem:[%s1350_s1 + $0x540] sm:$0xff]  ;;  %v196_v12 = vld [vmem:[%s1350_s1 + $0x558] sm:$0xff]  ;;  %v265_v21 = vpack.c.bf16 %v100_v10, %v97_v7 }
  0x21   :  { %v314_v13 = vpack.c.bf16 %v197_v5, %v194_v4  ;;  %v92_v14 = vld [vmem:[%s1350_s1 + $0x218] sm:$0xff]  ;;  %v95_v15 = vld [vmem:[%s1350_s1 + $0x230] sm:$0xff]  ;;  %v16_v16 = vld [vmem:[%s1351_s0 + $0x8] sm:$0xff]  ;;  %v313_v23 = vpack.c.bf16 %v196_v12, %v193_v11 }
  0x22   :  { %367 = vmatpush1.bf16.msra.mxu0 %v229_v34  ;;  %v188_v17 = vld [vmem:[%s1350_s1 + $0x518] sm:$0xff]  ;;  %v191_v18 = vld [vmem:[%s1350_s1 + $0x530] sm:$0xff]  ;;  %v992_v19 = vpack.c.bf16 %v16_v16, %v16_v16  ;;  %v263_v24 = vpack.c.bf16 %v95_v15, %v92_v14  ;;  %v94_v26 = vld [vmem:[%s1350_s1 + $0x228] sm:$0xff] }
  0x23   :  { %408 = vmatpush1.bf16.msra.mxu1 %v277_v35  ;;  %368 = vmatprep.subr.bf16.mxu0 %v275_v36  ;;  %v18_v20 = vld [vmem:[%s1351_s0 + $0x18] sm:$0xff]  ;;  %v91_v25 = vld [vmem:[%s1350_s1 + $0x210] sm:$0xff]  ;;  %v311_v28 = vpack.c.bf16 %v191_v18, %v188_v17  ;;  %v190_v29 = vld [vmem:[%s1350_s1 + $0x528] sm:$0xff] }
  0x24   :  { %409 = vmatprep.subr.bf16.mxu1 %v323_v40  ;;  %v997_v22 = vpack.c.bf16 %v18_v20, %v18_v20  ;;  %v187_v27 = vld [vmem:[%s1350_s1 + $0x510] sm:$0xff]  ;;  %v86_v30 = vld [vmem:[%s1350_s1 + $0x1e8] sm:$0xff]  ;;  %v89_v31 = vld [vmem:[%s1350_s1 + $0x200] sm:$0xff]  ;;  %384 = vmatprep.mubr.bf16.mxu0 %v992_v19  ;;  %v262_v34 = vpack.c.bf16 %v94_v26, %v91_v25 }
  0x25   :  { %v182_v32 = vld [vmem:[%s1350_s1 + $0x4e8] sm:$0xff]  ;;  %v185_v33 = vld [vmem:[%s1350_s1 + $0x500] sm:$0xff]  ;;  %v310_v35 = vpack.c.bf16 %v190_v29, %v187_v27  ;;  %v260_v36 = vpack.c.bf16 %v89_v31, %v86_v30  ;;  %v88_v38 = vld [vmem:[%s1350_s1 + $0x1f8] sm:$0xff] }
  0x26   :  { %369 = vmatpush2.bf16.msra.mxu0 %v274_v46  ;;  %425 = vmatprep.mubr.bf16.mxu1 %v997_v22  ;;  %v85_v37 = vld [vmem:[%s1350_s1 + $0x1e0] sm:$0xff]  ;;  %v308_v40 = vpack.c.bf16 %v185_v33, %v182_v32  ;;  %v184_v41 = vld [vmem:[%s1350_s1 + $0x4f8] sm:$0xff]  ;;  %v83_v43 = vld [vmem:[%s1350_s1 + $0x1d0] sm:$0xff] }
  0x27   :  { %410 = vmatpush2.bf16.msra.mxu1 %v322_v47  ;;  %370 = vmatprep.subr.bf16.mxu0 %v272_v48  ;;  %v181_v39 = vld [vmem:[%s1350_s1 + $0x4e0] sm:$0xff]  ;;  %v80_v42 = vld [vmem:[%s1350_s1 + $0x1b8] sm:$0xff]  ;;  %v179_v45 = vld [vmem:[%s1350_s1 + $0x4d0] sm:$0xff]  ;;  %v259_v46 = vpack.c.bf16 %v88_v38, %v85_v37 }
  0x28   :  { %411 = vmatprep.subr.bf16.mxu1 %v320_v52  ;;  %v176_v44 = vld [vmem:[%s1350_s1 + $0x4b8] sm:$0xff]  ;;  %v307_v47 = vpack.c.bf16 %v184_v41, %v181_v39  ;;  %v257_v48 = vpack.c.bf16 %v83_v43, %v80_v42  ;;  %v79_v49 = vld [vmem:[%s1350_s1 + $0x1b0] sm:$0xff]  ;;  %v82_v50 = vld [vmem:[%s1350_s1 + $0x1c8] sm:$0xff]  ;;  %v666_v43 = vmov 0  }
  0x29   :  { %v175_v51 = vld [vmem:[%s1350_s1 + $0x4b0] sm:$0xff]  ;;  %v305_v52 = vpack.c.bf16 %v179_v45, %v176_v44  ;;  %v178_v53 = vld [vmem:[%s1350_s1 + $0x4c8] sm:$0xff]  ;;  %v77_v55 = vld [vmem:[%s1350_s1 + $0x1a0] sm:$0xff] }
  0x2a   :  { %371 = vmatpush2.bf16.msra.mxu0 %v271_v58  ;;  %v74_v54 = vld [vmem:[%s1350_s1 + $0x188] sm:$0xff]  ;;  %v173_v57 = vld [vmem:[%s1350_s1 + $0x4a0] sm:$0xff]  ;;  %v256_v58 = vpack.c.bf16 %v82_v50, %v79_v49  ;;  %v76_v62 = vld [vmem:[%s1350_s1 + $0x198] sm:$0xff] }
  0x2b   :  { %412 = vmatpush2.bf16.msra.mxu1 %v319_v59  ;;  %372 = vmatprep.subr.bf16.mxu0 %v269_v60  ;;  %v170_v56 = vld [vmem:[%s1350_s1 + $0x488] sm:$0xff]  ;;  %v304_v59 = vpack.c.bf16 %v178_v53, %v175_v51  ;;  %v254_v60 = vpack.c.bf16 %v77_v55, %v74_v54  ;;  %v73_v61 = vld [vmem:[%s1350_s1 + $0x180] sm:$0xff]  ;;  %v172_v1 = vld [vmem:[%s1350_s1 + $0x498] sm:$0xff] }
  0x2c   :  { %413 = vmatprep.subr.bf16.mxu1 %v317_v0  ;;  %v169_v63 = vld [vmem:[%s1350_s1 + $0x480] sm:$0xff]  ;;  %v302_v0 = vpack.c.bf16 %v173_v57, %v170_v56  ;;  %v224_v2 = vld [vmem:[%s1350_s1 + $0x638] sm:$0xff]  ;;  %v227_v3 = vld [vmem:[%s1350_s1 + $0x650] sm:$0xff] }
  0x2d   :  { %v117_v4 = vld [vmem:[%s1350_s1 + $0x2e0] sm:$0xff]  ;;  %v120_v5 = vld [vmem:[%s1350_s1 + $0x2f8] sm:$0xff]  ;;  %v329_v10 = vpack.c.bf16 %v227_v3, %v224_v2  ;;  %v223_v11 = vld [vmem:[%s1350_s1 + $0x630] sm:$0xff] }
  0x2e   :  { %373 = vmatpush2.bf16.msra.mxu0 %v268_v6  ;;  %v253_v6 = vpack.c.bf16 %v76_v62, %v73_v61  ;;  %v15_v7 = vld [vmem:[%s1351_s0] sm:$0xff]  ;;  %v226_v12 = vld [vmem:[%s1350_s1 + $0x648] sm:$0xff]  ;;  %v276_v14 = vpack.c.bf16 %v120_v5, %v117_v4  ;;  %v72_v15 = vld [vmem:[%s1350_s1 + $0x178] sm:$0xff] }
  0x2f   :  { %414 = vmatpush2.bf16.msra.mxu1 %v316_v8  ;;  %374 = vmatprep.subr.bf16.mxu0 %v266_v9  ;;  %v17_v8 = vld [vmem:[%s1351_s0 + $0x10] sm:$0xff]  ;;  %v301_v9 = vpack.c.bf16 %v172_v1, %v169_v63  ;;  %v218_v16 = vld [vmem:[%s1350_s1 + $0x608] sm:$0xff]  ;;  %v221_v17 = vld [vmem:[%s1350_s1 + $0x620] sm:$0xff]  ;;  %v1121_v18 = vpack.c.bf16 %v15_v7, %v15_v7 }
  0x30   :  { %415 = vmatprep.subr.bf16.mxu1 %v314_v13  ;;  %v69_v13 = vld [vmem:[%s1350_s1 + $0x160] sm:$0xff]  ;;  %v111_v20 = vld [vmem:[%s1350_s1 + $0x2b0] sm:$0xff]  ;;  %v326_v26 = vpack.c.bf16 %v221_v17, %v218_v16  ;;  %v66_v31 = vld [vmem:[%s1350_s1 + $0x148] sm:$0xff] }
  0x31   :  { %v252_v25 = vpack.c.bf16 %v72_v15, %v69_v13  ;;  %v217_v27 = vld [vmem:[%s1350_s1 + $0x600] sm:$0xff]  ;;  %v63_v29 = vld [vmem:[%s1350_s1 + $0x130] sm:$0xff]  ;;  %v216_v33 = vld [vmem:[%s1350_s1 + $0x5f8] sm:$0xff] }
  0x32   :  { %375 = vmatpush2.bf16.msra.mxu0 %v265_v21  ;;  %v114_v21 = vld [vmem:[%s1350_s1 + $0x2c8] sm:$0xff]  ;;  %v213_v32 = vld [vmem:[%s1350_s1 + $0x5e0] sm:$0xff]  ;;  %v249_v38 = vpack.c.bf16 %v66_v31, %v63_v29  ;;  %v168_v42 = vld [vmem:[%s1350_s1 + $0x478] sm:$0xff] }
  0x33   :  { %416 = vmatpush2.bf16.msra.mxu1 %v313_v23  ;;  %376 = vmatprep.subr.bf16.mxu0 %v263_v24  ;;  %v1129_v23 = vpack.c.bf16 %v17_v8, %v17_v8  ;;  %v328_v24 = vpack.c.bf16 %v226_v12, %v223_v11  ;;  %v273_v30 = vpack.c.bf16 %v114_v21, %v111_v20  ;;  %v19_v37 = vld [vmem:[%s1351_s0 + $0x20] sm:$0xff]  ;;  %v60_v45 = vld [vmem:[%s1350_s1 + $0x118] sm:$0xff]  ;;  %v99_v49 = vld [vmem:[%s1350_s1 + $0x250] sm:$0xff] }
  0x34   :  { %417 = vmatprep.subr.bf16.mxu1 %v311_v28  ;;  %v220_v28 = vld [vmem:[%s1350_s1 + $0x618] sm:$0xff]  ;;  %v324_v39 = vpack.c.bf16 %v216_v33, %v213_v32  ;;  %v165_v41 = vld [vmem:[%s1350_s1 + $0x460] sm:$0xff]  ;;  %v102_v50 = vld [vmem:[%s1350_s1 + $0x268] sm:$0xff] }
  0x35   :  { %v300_v51 = vpack.c.bf16 %v168_v42, %v165_v41  ;;  %v51_v54 = vld [vmem:[%s1350_s1 + $0xd0] sm:$0xff]  ;;  %v162_v56 = vld [vmem:[%s1350_s1 + $0x448] sm:$0xff]  ;;  %v96_v61 = vld [vmem:[%s1350_s1 + $0x238] sm:$0xff] }
  0x36   :  { %377 = vmatpush2.bf16.msra.mxu0 %v262_v34  ;;  %v105_v34 = vld [vmem:[%s1350_s1 + $0x280] sm:$0xff]  ;;  %v159_v55 = vld [vmem:[%s1350_s1 + $0x430] sm:$0xff]  ;;  %v54_v57 = vld [vmem:[%s1350_s1 + $0xe8] sm:$0xff] }
  0x37   :  { %418 = vmatpush2.bf16.msra.mxu1 %v310_v35  ;;  %378 = vmatprep.subr.bf16.mxu0 %v260_v36  ;;  %v108_v35 = vld [vmem:[%s1350_s1 + $0x298] sm:$0xff]  ;;  %v325_v36 = vpack.c.bf16 %v220_v28, %v217_v27  ;;  %v297_v62 = vpack.c.bf16 %v162_v56, %v159_v55  ;;  %v243_v63 = vpack.c.bf16 %v54_v57, %v51_v54  ;;  %v45_v1 = vld [vmem:[%s1350_s1 + $0xa0] sm:$0xff]  ;;  %v195_v5 = vld [vmem:[%s1350_s1 + $0x550] sm:$0xff] }
  0x38   :  { %419 = vmatprep.subr.bf16.mxu1 %v308_v40  ;;  %v57_v40 = vld [vmem:[%s1350_s1 + $0x100] sm:$0xff]  ;;  %v270_v44 = vpack.c.bf16 %v108_v35, %v105_v34  ;;  %v156_v3 = vld [vmem:[%s1350_s1 + $0x418] sm:$0xff]  ;;  %v87_v7 = vld [vmem:[%s1350_s1 + $0x1f0] sm:$0xff] }
  0x39   :  { %v153_v2 = vld [vmem:[%s1350_s1 + $0x400] sm:$0xff]  ;;  %v90_v8 = vld [vmem:[%s1350_s1 + $0x208] sm:$0xff]  ;;  %v39_v12 = vld [vmem:[%s1350_s1 + $0x70] sm:$0xff] }
  0x3a   :  { %379 = vmatpush2.bf16.msra.mxu0 %v259_v46  ;;  %v207_v46 = vld [vmem:[%s1350_s1 + $0x5b0] sm:$0xff]  ;;  %v261_v15 = vpack.c.bf16 %v90_v8, %v87_v7  ;;  %v42_v16 = vld [vmem:[%s1350_s1 + $0x88] sm:$0xff]  ;;  %v189_v17 = vld [vmem:[%s1350_s1 + $0x520] sm:$0xff] }
  0x3b   :  { %420 = vmatpush2.bf16.msra.mxu1 %v307_v47  ;;  %380 = vmatprep.subr.bf16.mxu0 %v257_v48  ;;  %v210_v47 = vld [vmem:[%s1350_s1 + $0x5c8] sm:$0xff]  ;;  %v1178_v48 = vpack.c.bf16 %v19_v37, %v19_v37  ;;  %v147_v13 = vld [vmem:[%s1350_s1 + $0x3d0] sm:$0xff]  ;;  %v192_v20 = vld [vmem:[%s1350_s1 + $0x538] sm:$0xff] }
  0x3c   :  { %421 = vmatprep.subr.bf16.mxu1 %v305_v52  ;;  %v246_v52 = vpack.c.bf16 %v60_v45, %v57_v40  ;;  %v321_v53 = vpack.c.bf16 %v210_v47, %v207_v46  ;;  %v81_v21 = vld [vmem:[%s1350_s1 + $0x1c0] sm:$0xff]  ;;  %v312_v27 = vpack.c.bf16 %v192_v20, %v189_v17  ;;  %v36_v32 = vld [vmem:[%s1350_s1 + $0x58] sm:$0xff]  ;;  %v183_v33 = vld [vmem:[%s1350_s1 + $0x4f0] sm:$0xff] }
  0x3d   :  { %v33_v28 = vld [vmem:[%s1350_s1 + $0x40] sm:$0xff]  ;;  %v186_v34 = vld [vmem:[%s1350_s1 + $0x508] sm:$0xff]  ;;  %v75_v35 = vld [vmem:[%s1350_s1 + $0x190] sm:$0xff] }
  0x3e   :  { %381 = vmatpush2.bf16.msra.mxu0 %v256_v58  ;;  %v201_v58 = vld [vmem:[%s1350_s1 + $0x580] sm:$0xff]  ;;  %v27_v40 = vld [vmem:[%s1350_s1 + $0x10] sm:$0xff]  ;;  %v138_v42 = vld [vmem:[%s1350_s1 + $0x388] sm:$0xff] }
  0x3f   :  { %422 = vmatpush2.bf16.msra.mxu1 %v304_v59  ;;  %382 = vmatprep.subr.bf16.mxu0 %v254_v60  ;;  %v204_v59 = vld [vmem:[%s1350_s1 + $0x598] sm:$0xff]  ;;  %v93_v60 = vld [vmem:[%s1350_s1 + $0x220] sm:$0xff]  ;;  %v135_v41 = vld [vmem:[%s1350_s1 + $0x370] sm:$0xff] }
  0x40   :  { %423 = vmatprep.subr.bf16.mxu1 %v302_v0  ;;  %v318_v0 = vpack.c.bf16 %v204_v59, %v201_v58  ;;  %v264_v4 = vpack.c.bf16 %v96_v61, %v93_v60  ;;  %v141_v29 = vld [vmem:[%s1350_s1 + $0x3a0] sm:$0xff]  ;;  %v180_v46 = vld [vmem:[%s1350_s1 + $0x4d8] sm:$0xff]  ;;  %v285_v47 = vpack.c.bf16 %v138_v42, %v135_v41  ;;  %v171_v55 = vld [vmem:[%s1350_s1 + $0x490] sm:$0xff]  ;;  %v667_v61 = vmov 0.0  }
  0x41   :  { %v177_v45 = vld [vmem:[%s1350_s1 + $0x4c0] sm:$0xff]  ;;  %v228_v54 = vld [vmem:[%s1350_s1 + $0x658] sm:$0xff]  ;;  %v174_v56 = vld [vmem:[%s1350_s1 + $0x4a8] sm:$0xff] }
  0x42   :  { %383 = vmatpush2.bf16.msra.mxu0 %v253_v6  ;;  %v198_v6 = vld [vmem:[%s1350_s1 + $0x568] sm:$0xff]  ;;  %v303_v58 = vpack.c.bf16 %v174_v56, %v171_v55  ;;  %v123_v59 = vld [vmem:[%s1350_s1 + $0x310] sm:$0xff] }
  0x43   :  { %424 = vmatpush2.bf16.msra.mxu1 %v301_v9  ;;  %446 = vmatprep.subr.bf16.mxu0 %v329_v10  ;;  %v294_v9 = vpack.c.bf16 %v156_v3, %v153_v2  ;;  %v315_v11 = vpack.c.bf16 %v198_v6, %v195_v5  ;;  %v126_v60 = vld [vmem:[%s1350_s1 + $0x328] sm:$0xff]  ;;  %v333_v2 = vlaneseq }
  0x44   :  { %608 = vmatprep.subr.bf16.mxu1 %v276_v14  ;;  %v150_v14 = vld [vmem:[%s1350_s1 + $0x3e8] sm:$0xff] }
  0x45   :  { %385 = vmatmul.mubr.bf16.vlgmr.msra.gmra.mxu0 %v1121_v18  ;;  %v334_v3 = vshrl.u32 %v333_v2, 7 }
  0x46   :  { %426 = vmatmul.mubr.bf16.vlgmr.msra.gmra.mxu1 %v1129_v23  ;;  %447 = vmatpush1.bf16.msra.mxu0 %v328_v24  ;;  %v84_v24 = vld [vmem:[%s1350_s1 + $0x1d8] sm:$0xff] }
  0x47   :  { %609 = vmatpush3.bf16.msra.mxu1 %v252_v25  ;;  %448 = vmatprep.subr.bf16.mxu0 %v326_v26  ;;  %v291_v25 = vpack.c.bf16 %v150_v14, %v147_v13  ;;  %v237_v26 = vpack.c.bf16 %v42_v16, %v39_v12  ;;  %v258_v31 = vpack.c.bf16 %v84_v24, %v81_v21 }
  0x48   :  { %610 = vmatprep.subr.bf16.mxu1 %v273_v30  ;;  %466 = vmatprep.mubr.bf16.mxu0 %v666_v43  ;;  %v144_v30 = vld [vmem:[%s1350_s1 + $0x3b8] sm:$0xff] }
  0x49   :  { %507 = vmatprep.mubr.bf16.mxu1 %v992_v19  ;;  %v267_v19 = vpack.c.bf16 %v102_v50, %v99_v49  ;;  %v288_v37 = vpack.c.bf16 %v144_v30, %v141_v29  ;;  %v306_v50 = vpack.c.bf16 %v180_v46, %v177_v45  ;;  %v343_v30 = vsub.s32 2, %v334_v3 }
  0x4a   :  { %449 = vmatpush1.bf16.msra.mxu0 %v325_v36  ;;  %v78_v36 = vld [vmem:[%s1350_s1 + $0x1a8] sm:$0xff] }
  0x4b   :  { %611 = vmatpush3.bf16.msra.mxu1 %v249_v38  ;;  %630 = vmatprep.subr.bf16.mxu0 %v324_v39  ;;  %v234_v38 = vpack.c.bf16 %v36_v32, %v33_v28  ;;  %v309_v39 = vpack.c.bf16 %v186_v34, %v183_v33  ;;  %v255_v43 = vpack.c.bf16 %v78_v36, %v75_v35 }
  0x4c   :  { %612 = vmatprep.subr.bf16.mxu1 %v270_v44  ;;  %v30_v44 = vld [vmem:[%s1350_s1 + $0x28] sm:$0xff] }
  0x4d   :  { %606 = vmatmul.mubr.msk.bf16.vlgmr.msra.gmra.mxu0 %vm348_vm0, %v1178_v48  ;;  %v231_v49 = vpack.c.bf16 %v30_v44, %v27_v40 }
  0x4e   :  { %631 = vmatpush3.bf16.msra.mxu0 %v300_v51  ;;  %547 = vmatprep.mubr.bf16.mxu0 %v997_v22  ;;  %v48_v22 = vld [vmem:[%s1350_s1 + $0xb8] sm:$0xff]  ;;  %v129_v51 = vld [vmem:[%s1350_s1 + $0x340] sm:$0xff] }
  0x4f   :  { %613 = vmatpush3.bf16.msra.mxu1 %v246_v52  ;;  %632 = vmatprep.subr.bf16.mxu0 %v321_v53  ;;  %v240_v10 = vpack.c.bf16 %v48_v22, %v45_v1  ;;  %v132_v52 = vld [vmem:[%s1350_s1 + $0x358] sm:$0xff]  ;;  %v225_v53 = vld [vmem:[%s1350_s1 + $0x640] sm:$0xff]  ;;  %v339_v22 = vsub.s32 1, %v334_v3 }
  0x50   :  { %614 = vmatprep.subr.bf16.mxu1 %v267_v19  ;;  %v282_v19 = vpack.c.bf16 %v132_v52, %v129_v51  ;;  %v330_v57 = vpack.c.bf16 %v228_v54, %v225_v53 }
  0x52   :  { %633 = vmatpush3.bf16.msra.mxu0 %v297_v62  ;;  %v219_v62 = vld [vmem:[%s1350_s1 + $0x610] sm:$0xff] }
  0x53   :  { %615 = vmatpush3.bf16.msra.mxu1 %v243_v63  ;;  %634 = vmatprep.subr.bf16.mxu0 %v318_v0  ;;  %v222_v63 = vld [vmem:[%s1350_s1 + $0x628] sm:$0xff]  ;;  %v279_v0 = vpack.c.bf16 %v126_v60, %v123_v59 }
  0x54   :  { %616 = vmatprep.subr.bf16.mxu1 %v264_v4  ;;  %v327_v1 = vpack.c.bf16 %v222_v63, %v219_v62  ;;  %v335_v4 = vsub.s32 0, %v334_v3 }
  0x56   :  { %635 = vmatpush3.bf16.msra.mxu0 %v294_v9 }
  0x57   :  { %617 = vmatpush3.bf16.msra.mxu1 %v240_v10  ;;  %636 = vmatprep.subr.bf16.mxu0 %v315_v11 }
  0x58   :  { %618 = vmatprep.subr.bf16.mxu1 %v261_v15 }
  0x5a   :  { %637 = vmatpush3.bf16.msra.mxu0 %v291_v25 }
  0x5b   :  { %619 = vmatpush3.bf16.msra.mxu1 %v237_v26  ;;  %638 = vmatprep.subr.bf16.mxu0 %v312_v27 }
  0x5c   :  { %620 = vmatprep.subr.bf16.mxu1 %v258_v31 }
  0x5e   :  { %639 = vmatpush3.bf16.msra.mxu0 %v288_v37 }
  0x5f   :  { %621 = vmatpush3.bf16.msra.mxu1 %v234_v38  ;;  %640 = vmatprep.subr.bf16.mxu0 %v309_v39 }
  0x60   :  { %622 = vmatprep.subr.bf16.mxu1 %v255_v43 }
  0x62   :  { %641 = vmatpush3.bf16.msra.mxu0 %v285_v47 }
  0x63   :  { %623 = vmatpush3.bf16.msra.mxu1 %v231_v49  ;;  %642 = vmatprep.subr.bf16.mxu0 %v306_v50 }
  0x64   :  { %655 = vmatprep.subr.bf16.mxu1 %v667_v61 }
  0x66   :  { %508 = vmatmul.mubr.bf16.vlgmr.msra.gmra.mxu1 %v1121_v18  ;;  %643 = vmatpush3.bf16.msra.mxu0 %v282_v19  ;;  %v331_v18 = vld [vmem:[%s1352_s2] sm:$0x7] }
  0x67   :  { %656 = vmatpush3.bf16.msra.mxu1 %v330_v57  ;;  %644 = vmatprep.subr.bf16.mxu0 %v303_v58  ;;  %v336_v5 = vrot.slane %v331_v18, %v335_v4  ;;  %v340_v8 = vrot.slane %v331_v18, %v339_v22  ;;  %v344_v33 = vrot.slane %v331_v18, %v343_v30 }
  0x68   :  { %657 = vmatprep.subr.bf16.mxu1 %v667_v61  ;;  %659 = vmatprep.mubr.msk.bf16.mxu1 %vm668_vm1, %v667_v61 }
  0x6a   :  { %645 = vmatpush3.bf16.msra.mxu0 %v279_v0 }
  0x6b   :  { %658 = vmatpush3.bf16.msra.mxu1 %v327_v1 }
  0x6d   :  { %548 = vmatmul.mubr.bf16.vlgmr.msra.gmra.mxu0 %v1129_v23 }
  0x6e   :  { %660 = vmatmul.mubr.msk.bf16.vlgmr.msra.gmra.mxu1 %vm348_vm0, %v1178_v48 }
 0x105   :  { %v386_v6 = vpop.f32.mrf.mxu0 }
 0x106   :  { %v427_v7 = vpop.f32.mrf.mxu1  ;;  %v387_v10 = vadd.f32 %v386_v6, %v336_v5 }
 0x107   :  { %v388_v9 = vpop.f32.mrf.mxu0 }
 0x108   :  { %v429_v11 = vpop.f32.mrf.mxu1  ;;  %v389_v23 = vadd.f32 %v388_v9, %v340_v8  ;;  %v428_v48 = vadd.f32 %v427_v7, %v387_v10 }
 0x109   :  { %v390_v12 = vpop.f32.mrf.mxu0 }
 0x10a   :  { %v431_v13 = vpop.f32.mrf.mxu1  ;;  %v430_v17 = vadd.f32 %v429_v11, %v389_v23 }
 0x10b   :  { %v391_v14 = vpop.f32.mrf.mxu0 }
 0x10c   :  { %v432_v15 = vpop.f32.mrf.mxu1 }
 0x10d   :  { %v468_v16 = vpop.f32.mrf.mxu0 }
 0x10e   :  { %v469_v20 = vadd.f32 %v468_v16, %v428_v48 }
 0x10f   :  { %v470_v21 = vpop.f32.mrf.mxu0 }
 0x110   :  { %v595_v24 = vmax.f32 %v469_v20, 0.0  ;;  %v471_v25 = vadd.f32 %v470_v21, %v430_v17 }
 0x111   :  { %v472_v26 = vpop.f32.mrf.mxu0 }
 0x112   :  { %598 = vst [vmem:[%s1353_s3] sm:$0xff] %v595_v24  ;;  %v596_v27 = vmax.f32 %v471_v25, 0.0 }
 0x113   :  { %v473_v28 = vpop.f32.mrf.mxu0 }
 0x114   :  { %599 = vst [vmem:[%s1353_s3 + $0x8] sm:$0xff] %v596_v27 }
 0x126   :  { %v624_v29 = vpop.f32.mrf.mxu1 }
 0x128   :  { %v625_v31 = vpop.f32.mrf.mxu1 }
 0x129   :  { %v626_v34 = vadd.f32 %v625_v31, %v624_v29 }
 0x12a   :  { %v627_v32 = vpop.f32.mrf.mxu1 }
 0x12b   :  { %v510_v39 = vadd.f32 %v626_v34, %v344_v33 }
 0x12c   :  { %v628_v35 = vpop.f32.mrf.mxu1 }
 0x12d   :  { %v646_v36 = vpop.f32.mrf.mxu0 }
 0x12e   :  { %v589_v37 = vpop.f32.mrf.mxu1 }
 0x12f   :  { %v647_v38 = vpop.f32.mrf.mxu0 }
 0x130   :  { %v648_v40 = vadd.f32 %v647_v38, %v646_v36  ;;  %v661_v41 = vpop.f32.mrf.mxu1 }
 0x131   :  { %v649_v42 = vpop.f32.mrf.mxu0 }
 0x132   :  { %v550_v43 = vadd.f32 %v648_v40, %v510_v39  ;;  %v592_v44 = vpop.f32.mrf.mxu1 }
 0x133   :  { %v650_v45 = vpop.f32.mrf.mxu0 }
 0x134   :  { %v590_v46 = vadd.f32 %v589_v37, %v550_v43  ;;  %v662_v47 = vpop.f32.mrf.mxu1 }
 0x136   :  { %v597_v49 = vmax.f32 %v590_v46, 0.0 }
 0x138   :  { %601 = vst.msk [vmem:[%s1353_s3 + $0x10] sm:$0xff] %vm600_vm2, %v597_v49 }

// kernel: _lambda_.33
= control target key start
LH: loop header
LB: loop body
LE: loop exit
PB: predicated region body
PF: predicated region fallthrough
CT: control target
= control target key end

     0   :  { %vm321_vm0 = vcmask 130048   ;;  %vm653_vm1 = vmmov 0   ;;  %vm606_vm2 = vcmask 254976   ;;  %s1235_s1 = inlined_call_operand.vmem [shape: f32[272,544], index: 1, kind: input, shape index: {}]   ;;  %s1236_s0 = inlined_call_operand.vmem [shape: f32[2,272], index: 0, kind: input, shape index: {}]   ;;  %s1237_s2 = inlined_call_operand.vmem [shape: f32[1,544], index: 2, kind: input, shape index: {}]   ;;  %s1238_s3 = inlined_call_operand.vmem [shape: f32[2,544], index: 3, kind: output, shape index: {}]  }
   0x1   :  { %v110_v0 = vld [vmem:[%s1235_s1 + $0x238] sm:$0xff]  ;;  %v115_v1 = vld [vmem:[%s1235_s1 + $0x260] sm:$0xff]  ;;  %v112_v2 = vld [vmem:[%s1235_s1 + $0x248] sm:$0xff] }
   0x2   :  { %v245_v3 = vpack.c.bf16 %v115_v1, %v110_v0  ;;  %v117_v4 = vld [vmem:[%s1235_s1 + $0x270] sm:$0xff]  ;;  %v114_v6 = vld [vmem:[%s1235_s1 + $0x258] sm:$0xff]  ;;  %v111_v9 = vld [vmem:[%s1235_s1 + $0x240] sm:$0xff] }
   0x3   :  { %v109_v5 = vld [vmem:[%s1235_s1 + $0x230] sm:$0xff]  ;;  %v247_v7 = vpack.c.bf16 %v117_v4, %v112_v2  ;;  %v116_v10 = vld [vmem:[%s1235_s1 + $0x268] sm:$0xff]  ;;  %v102_v14 = vld [vmem:[%s1235_s1 + $0x1f8] sm:$0xff] }
   0x4   :  { %v244_v8 = vpack.c.bf16 %v114_v6, %v109_v5  ;;  %v100_v11 = vld [vmem:[%s1235_s1 + $0x1e8] sm:$0xff]  ;;  %325 = vmatprep.subr.bf16.mxu0 %v245_v3  ;;  %v246_v12 = vpack.c.bf16 %v116_v10, %v111_v9  ;;  %v105_v13 = vld [vmem:[%s1235_s1 + $0x210] sm:$0xff]  ;;  %v107_v15 = vld [vmem:[%s1235_s1 + $0x220] sm:$0xff] }
   0x5   :  { %407 = vmatprep.subr.bf16.mxu1 %v247_v7  ;;  %v240_v16 = vpack.c.bf16 %v105_v13, %v100_v11  ;;  %v242_v17 = vpack.c.bf16 %v107_v15, %v102_v14  ;;  %v99_v18 = vld [vmem:[%s1235_s1 + $0x1e0] sm:$0xff]  ;;  %v104_v19 = vld [vmem:[%s1235_s1 + $0x208] sm:$0xff]  ;;  %v101_v20 = vld [vmem:[%s1235_s1 + $0x1f0] sm:$0xff] }
   0x6   :  { %326 = vmatpush1.bf16.msra.mxu0 %v244_v8  ;;  %408 = vmatpush1.bf16.msra.mxu1 %v246_v12  ;;  %v239_v21 = vpack.c.bf16 %v104_v19, %v99_v18  ;;  %v106_v22 = vld [vmem:[%s1235_s1 + $0x218] sm:$0xff]  ;;  %v95_v24 = vld [vmem:[%s1235_s1 + $0x1c0] sm:$0xff]  ;;  %v92_v27 = vld [vmem:[%s1235_s1 + $0x1a8] sm:$0xff] }
   0x7   :  { %v90_v23 = vld [vmem:[%s1235_s1 + $0x198] sm:$0xff]  ;;  %327 = vmatprep.subr.bf16.mxu0 %v240_v16  ;;  %409 = vmatprep.subr.bf16.mxu1 %v242_v17  ;;  %v241_v25 = vpack.c.bf16 %v106_v22, %v101_v20  ;;  %v97_v28 = vld [vmem:[%s1235_s1 + $0x1d0] sm:$0xff]  ;;  %v91_v32 = vld [vmem:[%s1235_s1 + $0x1a0] sm:$0xff] }
   0x8   :  { %v235_v26 = vpack.c.bf16 %v95_v24, %v90_v23  ;;  %v89_v29 = vld [vmem:[%s1235_s1 + $0x190] sm:$0xff]  ;;  %v237_v30 = vpack.c.bf16 %v97_v28, %v92_v27  ;;  %v94_v31 = vld [vmem:[%s1235_s1 + $0x1b8] sm:$0xff]  ;;  %v96_v33 = vld [vmem:[%s1235_s1 + $0x1c8] sm:$0xff] }
   0x9   :  { %v234_v34 = vpack.c.bf16 %v94_v31, %v89_v29  ;;  %v80_v35 = vld [vmem:[%s1235_s1 + $0x148] sm:$0xff]  ;;  %v85_v36 = vld [vmem:[%s1235_s1 + $0x170] sm:$0xff]  ;;  %v82_v37 = vld [vmem:[%s1235_s1 + $0x158] sm:$0xff]  ;;  %v236_v38 = vpack.c.bf16 %v96_v33, %v91_v32 }
   0xa   :  { %328 = vmatpush1.bf16.msra.mxu0 %v239_v21  ;;  %410 = vmatpush1.bf16.msra.mxu1 %v241_v25  ;;  %v230_v39 = vpack.c.bf16 %v85_v36, %v80_v35  ;;  %v87_v40 = vld [vmem:[%s1235_s1 + $0x180] sm:$0xff]  ;;  %v84_v42 = vld [vmem:[%s1235_s1 + $0x168] sm:$0xff]  ;;  %v81_v44 = vld [vmem:[%s1235_s1 + $0x150] sm:$0xff] }
   0xb   :  { %329 = vmatprep.subr.bf16.mxu0 %v235_v26  ;;  %v79_v41 = vld [vmem:[%s1235_s1 + $0x140] sm:$0xff]  ;;  %411 = vmatprep.subr.bf16.mxu1 %v237_v30  ;;  %v232_v43 = vpack.c.bf16 %v87_v40, %v82_v37  ;;  %v86_v45 = vld [vmem:[%s1235_s1 + $0x178] sm:$0xff]  ;;  %v72_v48 = vld [vmem:[%s1235_s1 + $0x108] sm:$0xff] }
   0xc   :  { %v70_v46 = vld [vmem:[%s1235_s1 + $0xf8] sm:$0xff]  ;;  %v75_v47 = vld [vmem:[%s1235_s1 + $0x120] sm:$0xff]  ;;  %v77_v49 = vld [vmem:[%s1235_s1 + $0x130] sm:$0xff]  ;;  %v229_v50 = vpack.c.bf16 %v84_v42, %v79_v41  ;;  %v231_v51 = vpack.c.bf16 %v86_v45, %v81_v44 }
   0xd   :  { %v225_v52 = vpack.c.bf16 %v75_v47, %v70_v46  ;;  %v69_v53 = vld [vmem:[%s1235_s1 + $0xf0] sm:$0xff]  ;;  %v74_v54 = vld [vmem:[%s1235_s1 + $0x118] sm:$0xff]  ;;  %v71_v55 = vld [vmem:[%s1235_s1 + $0x100] sm:$0xff]  ;;  %v227_v56 = vpack.c.bf16 %v77_v49, %v72_v48  ;;  %v650_v46 = vmov 1983009808   ;;  %v21_v48 = vlaneseq }
   0xe   :  { %330 = vmatpush1.bf16.msra.mxu0 %v234_v34  ;;  %412 = vmatpush1.bf16.msra.mxu1 %v236_v38  ;;  %v76_v57 = vld [vmem:[%s1235_s1 + $0x128] sm:$0xff]  ;;  %v65_v59 = vld [vmem:[%s1235_s1 + $0xd0] sm:$0xff]  ;;  %v62_v60 = vld [vmem:[%s1235_s1 + $0xb8] sm:$0xff]  ;;  %v224_v62 = vpack.c.bf16 %v74_v54, %v69_v53  ;;  %v19_v47 = vunpack.c.l.s4 %v650_v46 }
   0xf   :  { %331 = vmatprep.subr.bf16.mxu0 %v230_v39  ;;  %413 = vmatprep.subr.bf16.mxu1 %v232_v43  ;;  %v60_v58 = vld [vmem:[%s1235_s1 + $0xa8] sm:$0xff]  ;;  %v67_v61 = vld [vmem:[%s1235_s1 + $0xe0] sm:$0xff]  ;;  %v226_v63 = vpack.c.bf16 %v76_v57, %v71_v55  ;;  %v61_v3 = vld [vmem:[%s1235_s1 + $0xb0] sm:$0xff] }
  0x10   :  { %v220_v0 = vpack.c.bf16 %v65_v59, %v60_v58  ;;  %v59_v1 = vld [vmem:[%s1235_s1 + $0xa0] sm:$0xff]  ;;  %v64_v2 = vld [vmem:[%s1235_s1 + $0xc8] sm:$0xff]  ;;  %v222_v4 = vpack.c.bf16 %v67_v61, %v62_v60  ;;  %v66_v5 = vld [vmem:[%s1235_s1 + $0xd8] sm:$0xff]  ;;  %v20_v61 = vunpack.c.0.s8 %v19_v47 }
  0x11   :  { %v50_v6 = vld [vmem:[%s1235_s1 + $0x58] sm:$0xff]  ;;  %v55_v7 = vld [vmem:[%s1235_s1 + $0x80] sm:$0xff]  ;;  %v52_v8 = vld [vmem:[%s1235_s1 + $0x68] sm:$0xff]  ;;  %v219_v10 = vpack.c.bf16 %v64_v2, %v59_v1  ;;  %v221_v11 = vpack.c.bf16 %v66_v5, %v61_v3 }
  0x12   :  { %332 = vmatpush1.bf16.msra.mxu0 %v229_v50  ;;  %414 = vmatpush1.bf16.msra.mxu1 %v231_v51  ;;  %v57_v9 = vld [vmem:[%s1235_s1 + $0x90] sm:$0xff]  ;;  %v215_v12 = vpack.c.bf16 %v55_v7, %v50_v6  ;;  %v54_v14 = vld [vmem:[%s1235_s1 + $0x78] sm:$0xff]  ;;  %v51_v15 = vld [vmem:[%s1235_s1 + $0x60] sm:$0xff] }
  0x13   :  { %333 = vmatprep.subr.bf16.mxu0 %v225_v52  ;;  %415 = vmatprep.subr.bf16.mxu1 %v227_v56  ;;  %v49_v13 = vld [vmem:[%s1235_s1 + $0x50] sm:$0xff]  ;;  %v217_v16 = vpack.c.bf16 %v57_v9, %v52_v8  ;;  %v56_v17 = vld [vmem:[%s1235_s1 + $0x88] sm:$0xff]  ;;  %v42_v20 = vld [vmem:[%s1235_s1 + $0x18] sm:$0xff] }
  0x14   :  { %v40_v18 = vld [vmem:[%s1235_s1 + $0x8] sm:$0xff]  ;;  %v45_v19 = vld [vmem:[%s1235_s1 + $0x30] sm:$0xff]  ;;  %v47_v21 = vld [vmem:[%s1235_s1 + $0x40] sm:$0xff]  ;;  %v214_v22 = vpack.c.bf16 %v54_v14, %v49_v13  ;;  %v216_v23 = vpack.c.bf16 %v56_v17, %v51_v15 }
  0x15   :  { %v210_v24 = vpack.c.bf16 %v45_v19, %v40_v18  ;;  %v39_v25 = vld [vmem:[%s1235_s1] sm:$0xff]  ;;  %v44_v26 = vld [vmem:[%s1235_s1 + $0x28] sm:$0xff]  ;;  %v41_v27 = vld [vmem:[%s1235_s1 + $0x10] sm:$0xff]  ;;  %v212_v28 = vpack.c.bf16 %v47_v21, %v42_v20 }
  0x16   :  { %334 = vmatpush1.bf16.msra.mxu0 %v224_v62  ;;  %416 = vmatpush1.bf16.msra.mxu1 %v226_v63  ;;  %v46_v29 = vld [vmem:[%s1235_s1 + $0x38] sm:$0xff]  ;;  %v195_v31 = vld [vmem:[%s1235_s1 + $0x4e0] sm:$0xff]  ;;  %v192_v32 = vld [vmem:[%s1235_s1 + $0x4c8] sm:$0xff]  ;;  %v209_v34 = vpack.c.bf16 %v44_v26, %v39_v25  ;;  %v926_v62 = vshrl.u32 %v21_v48, 7 }
  0x17   :  { %335 = vmatprep.subr.bf16.mxu0 %v220_v0  ;;  %417 = vmatprep.subr.bf16.mxu1 %v222_v4  ;;  %v190_v30 = vld [vmem:[%s1235_s1 + $0x4b8] sm:$0xff]  ;;  %v197_v33 = vld [vmem:[%s1235_s1 + $0x4f0] sm:$0xff]  ;;  %v211_v35 = vpack.c.bf16 %v46_v29, %v41_v27  ;;  %v191_v39 = vld [vmem:[%s1235_s1 + $0x4c0] sm:$0xff] }
  0x18   :  { %v285_v36 = vpack.c.bf16 %v195_v31, %v190_v30  ;;  %v189_v37 = vld [vmem:[%s1235_s1 + $0x4b0] sm:$0xff]  ;;  %v194_v38 = vld [vmem:[%s1235_s1 + $0x4d8] sm:$0xff]  ;;  %v287_v40 = vpack.c.bf16 %v197_v33, %v192_v32  ;;  %v196_v41 = vld [vmem:[%s1235_s1 + $0x4e8] sm:$0xff] }
  0x19   :  { %v180_v42 = vld [vmem:[%s1235_s1 + $0x468] sm:$0xff]  ;;  %v185_v43 = vld [vmem:[%s1235_s1 + $0x490] sm:$0xff]  ;;  %v182_v44 = vld [vmem:[%s1235_s1 + $0x478] sm:$0xff]  ;;  %v284_v49 = vpack.c.bf16 %v194_v38, %v189_v37  ;;  %v286_v50 = vpack.c.bf16 %v196_v41, %v191_v39 }
  0x1a   :  { %336 = vmatpush1.bf16.msra.mxu0 %v219_v10  ;;  %418 = vmatpush1.bf16.msra.mxu1 %v221_v11  ;;  %v187_v45 = vld [vmem:[%s1235_s1 + $0x4a0] sm:$0xff]  ;;  %v280_v51 = vpack.c.bf16 %v185_v43, %v180_v42  ;;  %v184_v53 = vld [vmem:[%s1235_s1 + $0x488] sm:$0xff]  ;;  %v181_v54 = vld [vmem:[%s1235_s1 + $0x470] sm:$0xff]  ;;  %v953_v11 = vsub.s32 %v20_v61, %v926_v62 }
  0x1b   :  { %337 = vmatprep.subr.bf16.mxu0 %v215_v12  ;;  %419 = vmatprep.subr.bf16.mxu1 %v217_v16  ;;  %v179_v52 = vld [vmem:[%s1235_s1 + $0x460] sm:$0xff]  ;;  %v282_v55 = vpack.c.bf16 %v187_v45, %v182_v44  ;;  %v186_v56 = vld [vmem:[%s1235_s1 + $0x498] sm:$0xff]  ;;  %v172_v59 = vld [vmem:[%s1235_s1 + $0x428] sm:$0xff] }
  0x1c   :  { %v170_v57 = vld [vmem:[%s1235_s1 + $0x418] sm:$0xff]  ;;  %v175_v58 = vld [vmem:[%s1235_s1 + $0x440] sm:$0xff]  ;;  %v177_v60 = vld [vmem:[%s1235_s1 + $0x450] sm:$0xff]  ;;  %v279_v63 = vpack.c.bf16 %v184_v53, %v179_v52  ;;  %v281_v0 = vpack.c.bf16 %v186_v56, %v181_v54 }
  0x1d   :  { %v275_v1 = vpack.c.bf16 %v175_v58, %v170_v57  ;;  %v169_v2 = vld [vmem:[%s1235_s1 + $0x410] sm:$0xff]  ;;  %v174_v3 = vld [vmem:[%s1235_s1 + $0x438] sm:$0xff]  ;;  %v171_v4 = vld [vmem:[%s1235_s1 + $0x420] sm:$0xff]  ;;  %v277_v5 = vpack.c.bf16 %v177_v60, %v172_v59 }
  0x1e   :  { %338 = vmatpush1.bf16.msra.mxu0 %v214_v22  ;;  %420 = vmatpush1.bf16.msra.mxu1 %v216_v23  ;;  %v176_v6 = vld [vmem:[%s1235_s1 + $0x448] sm:$0xff]  ;;  %v165_v8 = vld [vmem:[%s1235_s1 + $0x3f0] sm:$0xff]  ;;  %v162_v9 = vld [vmem:[%s1235_s1 + $0x3d8] sm:$0xff]  ;;  %v274_v12 = vpack.c.bf16 %v174_v3, %v169_v2 }
  0x1f   :  { %339 = vmatprep.subr.bf16.mxu0 %v210_v24  ;;  %421 = vmatprep.subr.bf16.mxu1 %v212_v28  ;;  %v160_v7 = vld [vmem:[%s1235_s1 + $0x3c8] sm:$0xff]  ;;  %v167_v10 = vld [vmem:[%s1235_s1 + $0x400] sm:$0xff]  ;;  %v276_v14 = vpack.c.bf16 %v176_v6, %v171_v4  ;;  %v161_v17 = vld [vmem:[%s1235_s1 + $0x3d0] sm:$0xff] }
  0x20   :  { %v159_v13 = vld [vmem:[%s1235_s1 + $0x3c0] sm:$0xff]  ;;  %v270_v15 = vpack.c.bf16 %v165_v8, %v160_v7  ;;  %v164_v16 = vld [vmem:[%s1235_s1 + $0x3e8] sm:$0xff]  ;;  %v166_v18 = vld [vmem:[%s1235_s1 + $0x3f8] sm:$0xff]  ;;  %v272_v19 = vpack.c.bf16 %v167_v10, %v162_v9 }
  0x21   :  { %v150_v20 = vld [vmem:[%s1235_s1 + $0x378] sm:$0xff]  ;;  %v155_v21 = vld [vmem:[%s1235_s1 + $0x3a0] sm:$0xff]  ;;  %v152_v23 = vld [vmem:[%s1235_s1 + $0x388] sm:$0xff]  ;;  %v269_v26 = vpack.c.bf16 %v164_v16, %v159_v13  ;;  %v271_v27 = vpack.c.bf16 %v166_v18, %v161_v17 }
  0x22   :  { %340 = vmatpush1.bf16.msra.mxu0 %v209_v34  ;;  %422 = vmatpush1.bf16.msra.mxu1 %v211_v35  ;;  %v976_v22 = vld [vmem:[%s1236_s0] sm:$0x3f]  ;;  %v157_v24 = vld [vmem:[%s1235_s1 + $0x3b0] sm:$0xff]  ;;  %v265_v28 = vpack.c.bf16 %v155_v21, %v150_v20  ;;  %v154_v30 = vld [vmem:[%s1235_s1 + $0x398] sm:$0xff] }
  0x23   :  { %341 = vmatprep.subr.bf16.mxu0 %v285_v36  ;;  %423 = vmatprep.subr.bf16.mxu1 %v287_v40  ;;  %v986_v25 = vrot.slane %v976_v22, %v953_v11  ;;  %v149_v29 = vld [vmem:[%s1235_s1 + $0x370] sm:$0xff]  ;;  %v151_v31 = vld [vmem:[%s1235_s1 + $0x380] sm:$0xff]  ;;  %v267_v33 = vpack.c.bf16 %v157_v24, %v152_v23  ;;  %v156_v34 = vld [vmem:[%s1235_s1 + $0x3a8] sm:$0xff]  ;;  %v17_v24 = vcombine.high %v976_v22, %v976_v22 }
  0x24   :  { %v140_v35 = vld [vmem:[%s1235_s1 + $0x328] sm:$0xff]  ;;  %v145_v36 = vld [vmem:[%s1235_s1 + $0x350] sm:$0xff]  ;;  %v142_v37 = vld [vmem:[%s1235_s1 + $0x338] sm:$0xff]  ;;  %v264_v40 = vpack.c.bf16 %v154_v30, %v149_v29  ;;  %v266_v41 = vpack.c.bf16 %v156_v34, %v151_v31 }
  0x25   :  { %v32_v32 = vcombine.high %v986_v25, %v986_v25  ;;  %v147_v38 = vld [vmem:[%s1235_s1 + $0x360] sm:$0xff]  ;;  %v260_v42 = vpack.c.bf16 %v145_v36, %v140_v35  ;;  %v144_v44 = vld [vmem:[%s1235_s1 + $0x348] sm:$0xff]  ;;  %v141_v45 = vld [vmem:[%s1235_s1 + $0x330] sm:$0xff]  ;;  %v31_v34 = vrot.slane %v17_v24, %v953_v11 }
  0x26   :  { %342 = vmatpush2.bf16.msra.mxu0 %v284_v49  ;;  %424 = vmatpush2.bf16.msra.mxu1 %v286_v50  ;;  %v139_v43 = vld [vmem:[%s1235_s1 + $0x320] sm:$0xff]  ;;  %v262_v46 = vpack.c.bf16 %v147_v38, %v142_v37  ;;  %v146_v47 = vld [vmem:[%s1235_s1 + $0x358] sm:$0xff]  ;;  %v132_v50 = vld [vmem:[%s1235_s1 + $0x2e8] sm:$0xff]  ;;  %v651_v38 = vmov 0  }
  0x27   :  { %343 = vmatprep.subr.bf16.mxu0 %v280_v51  ;;  %425 = vmatprep.subr.bf16.mxu1 %v282_v55  ;;  %v1014_v39 = vpack.c.bf16 %v32_v32, %v32_v32  ;;  %v130_v48 = vld [vmem:[%s1235_s1 + $0x2d8] sm:$0xff]  ;;  %v135_v49 = vld [vmem:[%s1235_s1 + $0x300] sm:$0xff]  ;;  %v137_v51 = vld [vmem:[%s1235_s1 + $0x310] sm:$0xff]  ;;  %v259_v52 = vpack.c.bf16 %v144_v44, %v139_v43  ;;  %v261_v53 = vpack.c.bf16 %v146_v47, %v141_v45 }
  0x28   :  { %v255_v54 = vpack.c.bf16 %v135_v49, %v130_v48  ;;  %v129_v55 = vld [vmem:[%s1235_s1 + $0x2d0] sm:$0xff]  ;;  %v134_v56 = vld [vmem:[%s1235_s1 + $0x2f8] sm:$0xff]  ;;  %v131_v57 = vld [vmem:[%s1235_s1 + $0x2e0] sm:$0xff]  ;;  %v257_v58 = vpack.c.bf16 %v137_v51, %v132_v50  ;;  %v38_v45 = vpack.c.bf16 %v31_v34, %v31_v34 }
  0x29   :  { %357 = vmatprep.mubr.bf16.mxu0 %v1014_v39  ;;  %439 = vmatprep.mubr.bf16.mxu1 %v1014_v39  ;;  %v136_v59 = vld [vmem:[%s1235_s1 + $0x308] sm:$0xff]  ;;  %v125_v61 = vld [vmem:[%s1235_s1 + $0x2b0] sm:$0xff]  ;;  %v119_v4 = vld [vmem:[%s1235_s1 + $0x280] sm:$0xff] }
  0x2a   :  { %344 = vmatpush2.bf16.msra.mxu0 %v279_v63  ;;  %426 = vmatpush2.bf16.msra.mxu1 %v281_v0  ;;  %v120_v60 = vld [vmem:[%s1235_s1 + $0x288] sm:$0xff]  ;;  %v122_v63 = vld [vmem:[%s1235_s1 + $0x298] sm:$0xff]  ;;  %v127_v0 = vld [vmem:[%s1235_s1 + $0x2c0] sm:$0xff]  ;;  %v256_v2 = vpack.c.bf16 %v136_v59, %v131_v57 }
  0x2b   :  { %345 = vmatprep.subr.bf16.mxu0 %v275_v1  ;;  %427 = vmatprep.subr.bf16.mxu1 %v277_v5  ;;  %v254_v1 = vpack.c.bf16 %v134_v56, %v129_v55  ;;  %v250_v3 = vpack.c.bf16 %v125_v61, %v120_v60  ;;  %v124_v5 = vld [vmem:[%s1235_s1 + $0x2a8] sm:$0xff]  ;;  %v121_v6 = vld [vmem:[%s1235_s1 + $0x290] sm:$0xff]  ;;  %v252_v7 = vpack.c.bf16 %v127_v0, %v122_v63  ;;  %v126_v8 = vld [vmem:[%s1235_s1 + $0x2b8] sm:$0xff]  ;;  %v652_v55 = vmov 0.0  }
  0x2c   :  { %v200_v9 = vld [vmem:[%s1235_s1 + $0x508] sm:$0xff]  ;;  %v205_v10 = vld [vmem:[%s1235_s1 + $0x530] sm:$0xff]  ;;  %v198_v13 = vld [vmem:[%s1235_s1 + $0x4f8] sm:$0xff] }
  0x2d   :  { %v290_v16 = vpack.c.bf16 %v205_v10, %v200_v9  ;;  %v199_v17 = vld [vmem:[%s1235_s1 + $0x500] sm:$0xff]  ;;  %v204_v18 = vld [vmem:[%s1235_s1 + $0x528] sm:$0xff]  ;;  %v113_v20 = vld [vmem:[%s1235_s1 + $0x250] sm:$0xff] }
  0x2e   :  { %346 = vmatpush2.bf16.msra.mxu0 %v274_v12  ;;  %428 = vmatpush2.bf16.msra.mxu1 %v276_v14  ;;  %v193_v12 = vld [vmem:[%s1235_s1 + $0x4d0] sm:$0xff]  ;;  %v249_v14 = vpack.c.bf16 %v124_v5, %v119_v4  ;;  %v118_v21 = vld [vmem:[%s1235_s1 + $0x278] sm:$0xff]  ;;  %v183_v23 = vld [vmem:[%s1235_s1 + $0x480] sm:$0xff]  ;;  %v289_v30 = vpack.c.bf16 %v204_v18, %v199_v17 }
  0x2f   :  { %347 = vmatprep.subr.bf16.mxu0 %v270_v15  ;;  %429 = vmatprep.subr.bf16.mxu1 %v272_v19  ;;  %v251_v15 = vpack.c.bf16 %v126_v8, %v121_v6  ;;  %v288_v19 = vpack.c.bf16 %v198_v13, %v193_v12  ;;  %v207_v29 = vld [vmem:[%s1235_s1 + $0x540] sm:$0xff]  ;;  %v248_v22 = vpack.c.bf16 %v118_v21, %v113_v20  ;;  %v108_v32 = vld [vmem:[%s1235_s1 + $0x228] sm:$0xff]  ;;  %v173_v35 = vld [vmem:[%s1235_s1 + $0x430] sm:$0xff]  ;;  %v298_v20 = vsub.s32 0, %v926_v62 }
  0x30   :  { %v103_v31 = vld [vmem:[%s1235_s1 + $0x200] sm:$0xff]  ;;  %v178_v36 = vld [vmem:[%s1235_s1 + $0x458] sm:$0xff]  ;;  %v93_v43 = vld [vmem:[%s1235_s1 + $0x1b0] sm:$0xff] }
  0x31   :  { %v243_v37 = vpack.c.bf16 %v108_v32, %v103_v31  ;;  %v98_v44 = vld [vmem:[%s1235_s1 + $0x1d8] sm:$0xff]  ;;  %v168_v47 = vld [vmem:[%s1235_s1 + $0x408] sm:$0xff]  ;;  %v83_v51 = vld [vmem:[%s1235_s1 + $0x160] sm:$0xff]  ;;  %v306_v32 = vsub.s32 2, %v926_v62 }
  0x32   :  { %348 = vmatpush2.bf16.msra.mxu0 %v269_v26  ;;  %430 = vmatpush2.bf16.msra.mxu1 %v271_v27  ;;  %v1109_v26 = vpack.c.bf16 %v986_v25, %v986_v25  ;;  %v188_v27 = vld [vmem:[%s1235_s1 + $0x4a8] sm:$0xff]  ;;  %v238_v49 = vpack.c.bf16 %v98_v44, %v93_v43  ;;  %v203_v56 = vld [vmem:[%s1235_s1 + $0x520] sm:$0xff]  ;;  %v73_v59 = vld [vmem:[%s1235_s1 + $0x110] sm:$0xff] }
  0x33   :  { %349 = vmatprep.subr.bf16.mxu0 %v265_v28  ;;  %431 = vmatprep.subr.bf16.mxu1 %v267_v33  ;;  %v202_v28 = vld [vmem:[%s1235_s1 + $0x518] sm:$0xff]  ;;  %v283_v25 = vpack.c.bf16 %v188_v27, %v183_v23  ;;  %v208_v57 = vld [vmem:[%s1235_s1 + $0x548] sm:$0xff]  ;;  %v143_v61 = vld [vmem:[%s1235_s1 + $0x340] sm:$0xff]  ;;  %v302_v23 = vsub.s32 1, %v926_v62 }
  0x34   :  { %v292_v33 = vpack.c.bf16 %v207_v29, %v202_v28  ;;  %v78_v60 = vld [vmem:[%s1235_s1 + $0x138] sm:$0xff]  ;;  %v148_v63 = vld [vmem:[%s1235_s1 + $0x368] sm:$0xff]  ;;  %v293_v0 = vpack.c.bf16 %v208_v57, %v203_v56  ;;  %v133_v5 = vld [vmem:[%s1235_s1 + $0x2f0] sm:$0xff] }
  0x35   :  { %v68_v4 = vld [vmem:[%s1235_s1 + $0xe8] sm:$0xff]  ;;  %v138_v6 = vld [vmem:[%s1235_s1 + $0x318] sm:$0xff]  ;;  %v53_v9 = vld [vmem:[%s1235_s1 + $0x70] sm:$0xff] }
  0x36   :  { %350 = vmatpush2.bf16.msra.mxu0 %v264_v40  ;;  %432 = vmatpush2.bf16.msra.mxu1 %v266_v41  ;;  %v201_v40 = vld [vmem:[%s1235_s1 + $0x510] sm:$0xff]  ;;  %v206_v41 = vld [vmem:[%s1235_s1 + $0x538] sm:$0xff]  ;;  %v258_v8 = vpack.c.bf16 %v138_v6, %v133_v5  ;;  %v123_v12 = vld [vmem:[%s1235_s1 + $0x2a0] sm:$0xff] }
  0x37   :  { %351 = vmatprep.subr.bf16.mxu0 %v260_v42  ;;  %433 = vmatprep.subr.bf16.mxu1 %v262_v46  ;;  %v278_v42 = vpack.c.bf16 %v178_v36, %v173_v35  ;;  %v163_v46 = vld [vmem:[%s1235_s1 + $0x3e0] sm:$0xff]  ;;  %v291_v48 = vpack.c.bf16 %v206_v41, %v201_v40  ;;  %v58_v10 = vld [vmem:[%s1235_s1 + $0x98] sm:$0xff]  ;;  %v128_v13 = vld [vmem:[%s1235_s1 + $0x2c8] sm:$0xff]  ;;  %v310_v36 = vsub.s32 3, %v926_v62 }
  0x38   :  { %v273_v50 = vpack.c.bf16 %v168_v47, %v163_v46  ;;  %v48_v17 = vld [vmem:[%s1235_s1 + $0x48] sm:$0xff]  ;;  %v294_v28 = vld [vmem:[%s1237_s2] sm:$0x1f] }
  0x39   :  { %v311_v41 = vrot.slane %v294_v28, %v310_v36 }
  0x3a   :  { %352 = vmatpush2.bf16.msra.mxu0 %v259_v52  ;;  %434 = vmatpush2.bf16.msra.mxu1 %v261_v53  ;;  %v88_v52 = vld [vmem:[%s1235_s1 + $0x188] sm:$0xff]  ;;  %v158_v53 = vld [vmem:[%s1235_s1 + $0x3b8] sm:$0xff] }
  0x3b   :  { %353 = vmatprep.subr.bf16.mxu0 %v255_v54  ;;  %435 = vmatprep.subr.bf16.mxu1 %v257_v58  ;;  %v233_v54 = vpack.c.bf16 %v88_v52, %v83_v51 }
  0x3e   :  { %354 = vmatpush2.bf16.msra.mxu0 %v254_v1  ;;  %436 = vmatpush2.bf16.msra.mxu1 %v256_v2  ;;  %v228_v1 = vpack.c.bf16 %v78_v60, %v73_v59  ;;  %v263_v2 = vpack.c.bf16 %v148_v63, %v143_v61 }
  0x3f   :  { %355 = vmatprep.subr.bf16.mxu0 %v250_v3  ;;  %437 = vmatprep.subr.bf16.mxu1 %v252_v7  ;;  %v63_v3 = vld [vmem:[%s1235_s1 + $0xc0] sm:$0xff] }
  0x40   :  { %v223_v7 = vpack.c.bf16 %v68_v4, %v63_v3 }
  0x42   :  { %356 = vmatpush2.bf16.msra.mxu0 %v249_v14  ;;  %438 = vmatpush2.bf16.msra.mxu1 %v251_v15  ;;  %v218_v14 = vpack.c.bf16 %v58_v10, %v53_v9  ;;  %v253_v15 = vpack.c.bf16 %v128_v13, %v123_v12 }
  0x43   :  { %380 = vmatprep.subr.bf16.mxu0 %v290_v16  ;;  %615 = vmatprep.subr.bf16.mxu1 %v288_v19  ;;  %v43_v16 = vld [vmem:[%s1235_s1 + $0x20] sm:$0xff] }
  0x44   :  { %v213_v18 = vpack.c.bf16 %v48_v17, %v43_v16 }
  0x45   :  { %358 = vmatmul.mubr.bf16.vlgmr.msra.gmra.mxu0 %v1109_v26  ;;  %440 = vmatmul.mubr.bf16.vlgmr.msra.gmra.mxu1 %v1109_v26 }
  0x46   :  { %381 = vmatpush1.bf16.msra.mxu0 %v289_v30  ;;  %616 = vmatpush3.bf16.msra.mxu1 %v248_v22  ;;  %v299_v30 = vrot.slane %v294_v28, %v298_v20  ;;  %v303_v22 = vrot.slane %v294_v28, %v302_v23 }
  0x47   :  { %398 = vmatprep.mubr.bf16.mxu0 %v651_v38  ;;  %617 = vmatprep.subr.bf16.mxu1 %v283_v25 }
  0x48   :  { %462 = vmatprep.subr.bf16.mxu0 %v292_v33  ;;  %521 = vmatprep.mubr.bf16.mxu1 %v1014_v39  ;;  %v153_v39 = vld [vmem:[%s1235_s1 + $0x390] sm:$0xff] }
  0x49   :  { %v268_v58 = vpack.c.bf16 %v158_v53, %v153_v39 }
  0x4a   :  { %618 = vmatpush3.bf16.msra.mxu1 %v243_v37 }
  0x4b   :  { %619 = vmatprep.subr.bf16.mxu1 %v278_v42 }
  0x4d   :  { %612 = vmatmul.mubr.msk.bf16.vlgmr.msra.gmra.mxu0 %vm321_vm0, %v38_v45 }
  0x4e   :  { %463 = vmatpush1.bf16.msra.mxu0 %v291_v48  ;;  %480 = vmatprep.mubr.bf16.mxu0 %v651_v38  ;;  %v307_v38 = vrot.slane %v294_v28, %v306_v32 }
  0x4f   :  { %620 = vmatpush3.bf16.msra.mxu1 %v238_v49  ;;  %639 = vmatprep.subr.bf16.mxu0 %v652_v55 }
  0x50   :  { %621 = vmatprep.subr.bf16.mxu1 %v273_v50 }
  0x53   :  { %622 = vmatpush3.bf16.msra.mxu1 %v233_v54 }
  0x54   :  { %623 = vmatprep.subr.bf16.mxu1 %v268_v58 }
  0x55   :  { %613 = vmatmul.mubr.msk.bf16.vlgmr.msra.gmra.mxu0 %vm321_vm0, %v38_v45 }
  0x56   :  { %640 = vmatpush3.bf16.msra.mxu0 %v293_v0  ;;  %641 = vmatprep.mubr.msk.bf16.mxu0 %vm653_vm1, %v652_v55 }
  0x57   :  { %624 = vmatpush3.bf16.msra.mxu1 %v228_v1  ;;  %v314_v1 = vsub.s32 4, %v926_v62 }
  0x58   :  { %625 = vmatprep.subr.bf16.mxu1 %v263_v2 }
  0x59   :  { %v315_v4 = vrot.slane %v294_v28, %v314_v1 }
  0x5b   :  { %626 = vmatpush3.bf16.msra.mxu1 %v223_v7 }
  0x5c   :  { %627 = vmatprep.subr.bf16.mxu1 %v258_v8 }
  0x5d   :  { %642 = vmatmul.mubr.msk.bf16.vlgmr.msra.gmra.mxu0 %vm321_vm0, %v38_v45 }
  0x5f   :  { %628 = vmatpush3.bf16.msra.mxu1 %v218_v14 }
  0x60   :  { %629 = vmatprep.subr.bf16.mxu1 %v253_v15 }
  0x63   :  { %630 = vmatpush3.bf16.msra.mxu1 %v213_v18 }
  0x66   :  { %522 = vmatmul.mubr.bf16.vlgmr.msra.gmra.mxu1 %v1109_v26 }
 0x105   :  { %v359_v19 = vpop.f32.mrf.mxu0  ;;  %v441_v21 = vpop.f32.mrf.mxu1 }
 0x106   :  { %v360_v34 = vadd.f32 %v359_v19, %v299_v30  ;;  %v442_v45 = vadd.f32 %v441_v21, %v307_v38 }
 0x107   :  { %v361_v24 = vpop.f32.mrf.mxu0  ;;  %v443_v27 = vpop.f32.mrf.mxu1 }
 0x108   :  { %v362_v35 = vadd.f32 %v361_v24, %v303_v22  ;;  %v444_v47 = vadd.f32 %v443_v27, %v311_v41 }
 0x109   :  { %v363_v29 = vpop.f32.mrf.mxu0  ;;  %v445_v25 = vpop.f32.mrf.mxu1 }
 0x10b   :  { %v364_v31 = vpop.f32.mrf.mxu0  ;;  %v446_v26 = vpop.f32.mrf.mxu1 }
 0x10d   :  { %v400_v33 = vpop.f32.mrf.mxu0 }
 0x10e   :  { %v401_v42 = vadd.f32 %v400_v33, %v360_v34 }
 0x10f   :  { %v402_v37 = vpop.f32.mrf.mxu0 }
 0x110   :  { %v403_v43 = vadd.f32 %v402_v37, %v362_v35  ;;  %v569_v48 = vmax.f32 %v401_v42, 0.0 }
 0x111   :  { %v404_v40 = vpop.f32.mrf.mxu0 }
 0x112   :  { %v570_v49 = vmax.f32 %v403_v43, 0.0 }
 0x113   :  { %v405_v44 = vpop.f32.mrf.mxu0 }
 0x114   :  { %v579_v53 = vcombine.low %v569_v48, %v570_v49 }
 0x115   :  { %v482_v46 = vpop.f32.mrf.mxu0 }
 0x116   :  { %v483_v50 = vadd.f32 %v482_v46, %v442_v45  ;;  %v587_v59 = vrot.slane %v579_v53, %v953_v11 }
 0x117   :  { %v484_v51 = vpop.f32.mrf.mxu0 }
 0x118   :  { %v485_v52 = vadd.f32 %v484_v51, %v444_v47  ;;  %v571_v54 = vmax.f32 %v483_v50, 0.0 }
 0x119   :  { %v486_v39 = vpop.f32.mrf.mxu0 }
 0x11a   :  { %v572_v55 = vmax.f32 %v485_v52, 0.0 }
 0x11b   :  { %v487_v56 = vpop.f32.mrf.mxu0 }
 0x11c   :  { %v580_v57 = vcombine.low %v571_v54, %v572_v55 }
 0x11d   :  { %v563_v58 = vpop.f32.mrf.mxu0 }
 0x11e   :  { %v594_v60 = vrot.slane %v580_v57, %v953_v11 }
 0x11f   :  { %v643_v61 = vpop.f32.mrf.mxu0 }
 0x120   :  { %v595_v63 = vcombine.low %v587_v59, %v594_v60 }
 0x121   :  { %v566_v0 = vpop.f32.mrf.mxu0 }
 0x122   :  { %605 = vst [vmem:[%s1238_s3] sm:$0xff] %v595_v63 }
 0x123   :  { %v644_v2 = vpop.f32.mrf.mxu0 }
 0x126   :  { %v631_v3 = vpop.f32.mrf.mxu1 }
 0x128   :  { %v632_v5 = vpop.f32.mrf.mxu1 }
 0x129   :  { %v633_v6 = vadd.f32 %v632_v5, %v631_v3 }
 0x12a   :  { %v634_v7 = vpop.f32.mrf.mxu1 }
 0x12b   :  { %v524_v8 = vadd.f32 %v633_v6, %v315_v4 }
 0x12c   :  { %v635_v9 = vpop.f32.mrf.mxu1 }
 0x12d   :  { %v564_v10 = vadd.f32 %v563_v58, %v524_v8 }
 0x12f   :  { %v573_v12 = vmax.f32 %v564_v10, 0.0 }
 0x131   :  { %v602_v13 = vrot.slane %v573_v12, %v953_v11 }
 0x133   :  { %607 = vst.msk [vmem:[%s1238_s3 + $0x8] sm:$0x3] %vm606_vm2, %v602_v13 }

</bundles_post_ra>
